<compile_context>
chip_gen: v7x
topology: tpu7x:2x2x1
jax: 0.10.0
libtpu: 0.0.40
codegen_flags: <defaults>
</compile_context>

<pallas_src>
import functools

import jax
import jax.numpy as jnp
from jax import lax
from jax.experimental import pallas as pl
from jax.experimental.pallas import tpu as pltpu


def _pad128(n):
    return ((n + 127) // 128) * 128


def _conv3(x_flat, L, w_ref, b):
    """Conv1d(kernel=3, stride=1, padding=1) as ONE fused-tap matmul.

    x_flat: (rows, Cin) f32, rows ordered (b, l) with b major (L rows per batch).
    w_ref : (3*Cin, Cout) bf16 ref; row block k multiplies x[l-1+k].
    b     : (1, Cout) f32.
    Returns (rows, Cout) f32.
    """
    N, Cin = x_flat.shape
    # Position within each example; masks kill the rows that would read across a
    # batch boundary (they are the conv's zero padding).
    l_idx = lax.broadcasted_iota(jnp.int32, (N, 1), 0) % L
    zrow = jnp.zeros((1, Cin), x_flat.dtype)
    x_prev = jnp.where(l_idx == 0, 0.0,
                       jnp.concatenate([zrow, x_flat[:N - 1]], axis=0))   # x[l-1]
    x_next = jnp.where(l_idx == L - 1, 0.0,
                       jnp.concatenate([x_flat[1:], zrow], axis=0))       # x[l+1]
    taps = jnp.concatenate([x_prev, x_flat, x_next], axis=1).astype(jnp.bfloat16)
    return jnp.dot(taps, w_ref[...], preferred_element_type=jnp.float32) + b


def _maxpool2(y_flat):
    """MaxPool1d(k=2, s=2) along L on the flat (rows, C) form (L even, so pairs
    never straddle a batch boundary)."""
    N, C = y_flat.shape
    return jnp.max(y_flat.reshape(N // 2, 2, C), axis=1)


def _gru_cell(h, g_i, w_hh, b_hh, R):
    """One GRU step (PyTorch gate order [r | z | n], biases already in g_i/b_hh)."""
    g_h = jnp.dot(h.astype(jnp.bfloat16), w_hh,
                  preferred_element_type=jnp.float32) + b_hh
    r = jax.nn.sigmoid(g_i[:, 0:R] + g_h[:, 0:R])
    u = jax.nn.sigmoid(g_i[:, R:2 * R] + g_h[:, R:2 * R])
    n = jnp.tanh(g_i[:, 2 * R:] + r * g_h[:, 2 * R:])
    return (1.0 - u) * n + u * h


def _net_kernel(tok_ref, emb_ref, w1_ref, b1_ref, w2_ref, b2_ref,
                wih_ref, bih_ref, whh_ref, bhh_ref, wout_ref, outb_ref,
                out_ref, *, B, L):
    Vp = emb_ref.shape[0]
    G2 = wih_ref.shape[-1]          # 6*R: [fwd r|z|n , bwd r|z|n]
    G = G2 // 2
    R = whh_ref.shape[1]
    T = L // 4                      # sequence length after two MaxPool2
    BL = B * L

    # ---- Embedding lookup as an exact one-hot matmul (f32 -> exact gather) ----
    onehot = (tok_ref[...] ==
              lax.broadcasted_iota(jnp.int32, (BL, Vp), 1)).astype(jnp.float32)
    x = jnp.dot(onehot, emb_ref[...], preferred_element_type=jnp.float32)  # (BL, Hp)

    # ---- Conv1d(H -> 2H) + ReLU + MaxPool2 ----
    y = _conv3(x, L, w1_ref, b1_ref[...])
    y = jnp.maximum(y, 0.0)
    y = _maxpool2(y)                                                       # (BL/2, 2Hp)

    # ---- Conv1d(2H -> H) + ELU + MaxPool2 ----
    z = _conv3(y, L // 2, w2_ref, b2_ref[...])
    z = jnp.where(z > 0.0, z, jnp.exp(z) - 1.0)                            # ELU(alpha=1)
    z = _maxpool2(z)                                                       # (B*T, Hp)

    # ---- Input gates for BOTH directions, all timesteps, one wide matmul ----
    gi = jnp.dot(z.astype(jnp.bfloat16), wih_ref[...],
                 preferred_element_type=jnp.float32) + bih_ref[...]        # (B*T, 6R)
    gi = gi.reshape(B, T, G2)

    # ---- Recurrence: both directions per step -> two independent MXU dots ----
    whh_f = whh_ref[0]
    whh_b = whh_ref[1]
    bhh_f = jnp.broadcast_to(bhh_ref[0], (B, G))        # hoisted bias broadcasts
    bhh_b = jnp.broadcast_to(bhh_ref[1], (B, G))
    h_f = jnp.zeros((B, R), jnp.float32)
    h_b = jnp.zeros((B, R), jnp.float32)
    for t in range(T):              # static full unroll (T is small and static)
        h_f = _gru_cell(h_f, gi[:, t, 0:G], whh_f, bhh_f, R)
        h_b = _gru_cell(h_b, gi[:, T - 1 - t, G:], whh_b, bhh_b, R)

    # ---- Output Linear: both direction contributions + bias, lane-dense store ----
    out = (jnp.dot(h_f.astype(jnp.bfloat16), wout_ref[0],
                   preferred_element_type=jnp.float32)
           + jnp.dot(h_b.astype(jnp.bfloat16), wout_ref[1],
                     preferred_element_type=jnp.float32)
           + outb_ref[...])
    out_ref[...] = out


@functools.partial(jax.jit, static_argnames=("num_classes",))
def net_forward(params, tokens, *, num_classes=4):
    B, L = tokens.shape
    assert L % 4 == 0, "two MaxPool2 stages + GRU require L % 4 == 0"
    Cp = params["out_b"].shape[-1]

    tok2 = tokens.reshape(B * L, 1).astype(jnp.int32)    # metadata-only reshape

    # One batch block at this size.  Scaling plan: batch block bb (multiple of 8),
    # grid=(B//bb,), dimension_semantics=(pltpu.CORE_PARALLEL,) on v7x.
    bb = B
    grid = (pl.cdiv(B, bb),)

    out = pl.pallas_call(
        functools.partial(_net_kernel, B=bb, L=L),
        out_shape=jax.ShapeDtypeStruct((B, Cp), jnp.float32),
        grid_spec=pltpu.PrefetchScalarGridSpec(
            num_scalar_prefetch=0,
            grid=grid,
            in_specs=[
                pl.BlockSpec((bb * L, 1), lambda i: (i, 0)),                  # tokens
                pl.BlockSpec(params["emb"].shape, lambda i: (0, 0)),          # emb table
                pl.BlockSpec(params["conv1_w"].shape, lambda i: (0, 0)),      # conv1 W
                pl.BlockSpec(params["conv1_b"].shape, lambda i: (0, 0)),      # conv1 b
                pl.BlockSpec(params["conv2_w"].shape, lambda i: (0, 0)),      # conv2 W
                pl.BlockSpec(params["conv2_b"].shape, lambda i: (0, 0)),      # conv2 b
                pl.BlockSpec(params["gru_wih"].shape, lambda i: (0, 0)),      # W_ih both dirs
                pl.BlockSpec(params["gru_bih"].shape, lambda i: (0, 0)),      # b_ih both dirs
                pl.BlockSpec(params["gru_whh"].shape, lambda i: (0, 0, 0)),   # W_hh per dir
                pl.BlockSpec(params["gru_bhh"].shape, lambda i: (0, 0, 0)),   # b_hh per dir
                pl.BlockSpec(params["out_w"].shape, lambda i: (0, 0, 0)),     # Linear W^T per dir
                pl.BlockSpec(params["out_b"].shape, lambda i: (0, 0)),        # Linear bias
            ],
            out_specs=pl.BlockSpec((bb, Cp), lambda i: (i, 0)),
        ),
        compiler_params=pltpu.CompilerParams(
            dimension_semantics=("parallel",)),          # batch blocks are independent
    )(tok2, params["emb"], params["conv1_w"], params["conv1_b"],
      params["conv2_w"], params["conv2_b"],
      params["gru_wih"], params["gru_bih"], params["gru_whh"], params["gru_bhh"],
      params["out_w"], params["out_b"])

    return out[:, :num_classes]


def init_params(key, vocab_size, hidden_size, num_classes=4):
    """Deterministic synthetic parameters in kernel-friendly, lane-padded layouts."""
    H = hidden_size
    R = 8 * H                       # GRU hidden size (hidden_size * 8)
    G = 3 * R
    C2 = 2 * H
    Hp, C2p = _pad128(H), _pad128(C2)
    Vp, Cp = _pad128(vocab_size), _pad128(num_classes)
    ks = jax.random.split(key, 12)
    s = 0.1
    p = {}

    emb = jnp.zeros((Vp, Hp), jnp.float32)
    p["emb"] = emb.at[:vocab_size, :H].set(
        jax.random.normal(ks[0], (vocab_size, H), jnp.float32) * s)

    # conv weights stored as (3*Cin_p, Cout_p): row block k multiplies x[l-1+k]
    w1 = jnp.zeros((3, Hp, C2p), jnp.float32)
    w1 = w1.at[:, :H, :C2].set(jax.random.normal(ks[1], (3, H, C2), jnp.float32) * s)
    p["conv1_w"] = w1.reshape(3 * Hp, C2p).astype(jnp.bfloat16)
    p["conv1_b"] = jnp.zeros((1, C2p), jnp.float32).at[0, :C2].set(
        jax.random.normal(ks[2], (C2,), jnp.float32) * s)

    w2 = jnp.zeros((3, C2p, Hp), jnp.float32)
    w2 = w2.at[:, :C2, :H].set(jax.random.normal(ks[3], (3, C2, H), jnp.float32) * s)
    p["conv2_w"] = w2.reshape(3 * C2p, Hp).astype(jnp.bfloat16)
    p["conv2_b"] = jnp.zeros((1, Hp), jnp.float32).at[0, :H].set(
        jax.random.normal(ks[4], (H,), jnp.float32) * s)

    # W_ih of both directions concatenated along the gate axis: cols [0:G]=fwd, [G:2G]=bwd
    wih = jnp.zeros((Hp, 2 * G), jnp.float32)
    p["gru_wih"] = wih.at[:H, :].set(
        jax.random.normal(ks[5], (H, 2 * G), jnp.float32) * s).astype(jnp.bfloat16)
    p["gru_bih"] = jax.random.normal(ks[6], (1, 2 * G), jnp.float32) * s
    # per-direction hidden weights (dir 0 = fwd, 1 = bwd), transposed, gate order [r|z|n]
    p["gru_whh"] = (jax.random.normal(ks[7], (2, R, G), jnp.float32) * s).astype(jnp.bfloat16)
    p["gru_bhh"] = jax.random.normal(ks[8], (2, 1, G), jnp.float32) * s

    # output Linear weight^T split by direction, classes zero-padded to 128 lanes
    wout = jnp.zeros((2, R, Cp), jnp.float32)
    p["out_w"] = wout.at[:, :, :num_classes].set(
        jax.random.normal(ks[9], (2, R, num_classes), jnp.float32) * s).astype(jnp.bfloat16)
    p["out_b"] = jnp.zeros((1, Cp), jnp.float32).at[0, :num_classes].set(
        jax.random.normal(ks[10], (num_classes,), jnp.float32) * s)
    return p


if __name__ == "__main__":
    VOCAB, HIDDEN, NUM_CLASSES = 50, 32, 4   # torch module hard-codes Linear(out=4)
    B, L = 2, 16

    key = jax.random.PRNGKey(0)
    k_param, k_tok = jax.random.split(key)
    params = init_params(k_param, VOCAB, HIDDEN, NUM_CLASSES)
    tokens = jax.random.randint(k_tok, (B, L), 0, VOCAB, dtype=jnp.int32)

    out = jax.block_until_ready(net_forward(params, tokens, num_classes=NUM_CLASSES))
    assert out.shape == (B, NUM_CLASSES) and out.dtype == jnp.float32
    assert bool(jnp.all(jnp.isfinite(out)))
    print("KERNEL_OK")
</pallas_src>

<mosaic_0001>
module attributes {stable_mosaic.version = 11 : i64} {
  func.func @_net_kernel(%arg0: i32, %arg1: memref<32x1xi32, #tpu.memory_space<vmem>>, %arg2: memref<128x128xf32, #tpu.memory_space<vmem>>, %arg3: memref<384x128xbf16, #tpu.memory_space<vmem>>, %arg4: memref<1x128xf32, #tpu.memory_space<vmem>>, %arg5: memref<384x128xbf16, #tpu.memory_space<vmem>>, %arg6: memref<1x128xf32, #tpu.memory_space<vmem>>, %arg7: memref<128x1536xbf16, #tpu.memory_space<vmem>>, %arg8: memref<1x1536xf32, #tpu.memory_space<vmem>>, %arg9: memref<2x256x768xbf16, #tpu.memory_space<vmem>>, %arg10: memref<2x1x768xf32, #tpu.memory_space<vmem>>, %arg11: memref<2x256x128xbf16, #tpu.memory_space<vmem>>, %arg12: memref<1x128xf32, #tpu.memory_space<vmem>>, %arg13: memref<2x128xf32, #tpu.memory_space<vmem>>) attributes {dimension_semantics = [#tpu.dimension_semantics<parallel>], iteration_bounds = array<i64: 1>, scalar_prefetch = 0 : i64, scratch_operands = 0 : i64, tpu.core_type = #tpu.core_type<tc>, window_params = [{transform_indices = @transform_0, window_bounds = array<i64: 32, 1>}, {pipeline_mode = #tpu.pipeline_mode<synchronous>, transform_indices = @transform_1, window_bounds = array<i64: 128, 128>}, {pipeline_mode = #tpu.pipeline_mode<synchronous>, transform_indices = @transform_2, window_bounds = array<i64: 384, 128>}, {pipeline_mode = #tpu.pipeline_mode<synchronous>, transform_indices = @transform_3, window_bounds = array<i64: 1, 128>}, {pipeline_mode = #tpu.pipeline_mode<synchronous>, transform_indices = @transform_4, window_bounds = array<i64: 384, 128>}, {pipeline_mode = #tpu.pipeline_mode<synchronous>, transform_indices = @transform_5, window_bounds = array<i64: 1, 128>}, {pipeline_mode = #tpu.pipeline_mode<synchronous>, transform_indices = @transform_6, window_bounds = array<i64: 128, 1536>}, {pipeline_mode = #tpu.pipeline_mode<synchronous>, transform_indices = @transform_7, window_bounds = array<i64: 1, 1536>}, {pipeline_mode = #tpu.pipeline_mode<synchronous>, transform_indices = @transform_8, window_bounds = array<i64: 2, 256, 768>}, {pipeline_mode = #tpu.pipeline_mode<synchronous>, transform_indices = @transform_9, window_bounds = array<i64: 2, 1, 768>}, {pipeline_mode = #tpu.pipeline_mode<synchronous>, transform_indices = @transform_10, window_bounds = array<i64: 2, 256, 128>}, {pipeline_mode = #tpu.pipeline_mode<synchronous>, transform_indices = @transform_11, window_bounds = array<i64: 1, 128>}, {transform_indices = @transform_12, window_bounds = array<i64: 2, 128>}]} {
    %c0 = arith.constant 0 : index
    %c0_0 = arith.constant 0 : index
    %0 = vector.load %arg1[%c0, %c0_0] : memref<32x1xi32, #tpu.memory_space<vmem>>, vector<32x1xi32>
    %1 = tpu.iota {dimensions = array<i32: 1>} : vector<32x128xi32>
    %2 = vector.broadcast %0 : vector<32x1xi32> to vector<32x128xi32>
    %3 = arith.cmpi eq, %2, %1 : vector<32x128xi32>
    %4 = arith.extui %3 : vector<32x128xi1> to vector<32x128xi32>
    %5 = arith.sitofp %4 : vector<32x128xi32> to vector<32x128xf32>
    %c0_1 = arith.constant 0 : index
    %c0_2 = arith.constant 0 : index
    %6 = vector.load %arg2[%c0_1, %c0_2] : memref<128x128xf32, #tpu.memory_space<vmem>>, vector<128x128xf32>
    %cst = arith.constant dense<0.000000e+00> : vector<32x128xf32>
    %7 = tpu.matmul %5, %6, %cst {dimension_numbers = #tpu.dot_dimension_numbers<[1], [0], [0], [1], [0, 0, 1, 1], [], []>} : vector<32x128xf32>, vector<128x128xf32>, vector<32x128xf32> -> vector<32x128xf32>
    %c0_3 = arith.constant 0 : index
    %c0_4 = arith.constant 0 : index
    %8 = vector.load %arg4[%c0_3, %c0_4] : memref<1x128xf32, #tpu.memory_space<vmem>>, vector<1x128xf32>
    %9 = tpu.iota {dimensions = array<i32: 0>} : vector<32x1xi32>
    %c16_i32 = arith.constant 16 : i32
    %c0_i32 = arith.constant 0 : i32
    %10 = arith.cmpi eq, %c16_i32, %c0_i32 : i32
    %c1_i32 = arith.constant 1 : i32
    %11 = arith.select %10, %c1_i32, %c16_i32 : i32
    %12 = vector.broadcast %11 : i32 to vector<32x1xi32>
    %13 = arith.remsi %9, %12 : vector<32x1xi32>
    %c0_i32_5 = arith.constant 0 : i32
    %14 = vector.broadcast %c0_i32_5 : i32 to vector<32x1xi32>
    %15 = arith.cmpi ne, %13, %14 : vector<32x1xi32>
    %c0_i32_6 = arith.constant 0 : i32
    %16 = vector.broadcast %c0_i32_6 : i32 to vector<32x1xi32>
    %17 = arith.cmpi slt, %13, %16 : vector<32x1xi32>
    %c0_i32_7 = arith.constant 0 : i32
    %18 = arith.cmpi slt, %11, %c0_i32_7 : i32
    %19 = vector.broadcast %18 : i1 to vector<32x1xi1>
    %20 = vector.broadcast %19 : vector<32x1xi1> to vector<32x1xi1>
    %21 = arith.xori %17, %20 : vector<32x1xi1>
    %22 = arith.andi %21, %15 : vector<32x1xi1>
    %23 = vector.broadcast %11 : i32 to vector<32x1xi32>
    %24 = arith.addi %13, %23 : vector<32x1xi32>
    %25 = arith.select %22, %24, %13 : vector<32x1xi1>, vector<32x1xi32>
    %cst_8 = arith.constant 0.000000e+00 : f32
    %26 = vector.broadcast %cst_8 : f32 to vector<1x128xf32>
    %c0_i32_9 = arith.constant 0 : i32
    %27 = vector.broadcast %c0_i32_9 : i32 to vector<32x1xi32>
    %28 = arith.cmpi eq, %25, %27 : vector<32x1xi32>
    %29 = vector.extract_strided_slice %7 {offsets = [0, 0], sizes = [31, 128], strides = [1, 1]} : vector<32x128xf32> to vector<31x128xf32>
    %30 = tpu.concatenate %26, %29 in 0 : vector<1x128xf32>, vector<31x128xf32> -> vector<32x128xf32>
    %cst_10 = arith.constant 0.000000e+00 : f32
    %31 = vector.shape_cast %28 : vector<32x1xi1> to vector<32x1xi1>
    %32 = vector.broadcast %31 : vector<32x1xi1> to vector<32x128xi1>
    %33 = vector.broadcast %cst_10 : f32 to vector<32x128xf32>
    %34 = arith.select %32, %33, %30 : vector<32x128xi1>, vector<32x128xf32>
    %c15_i32 = arith.constant 15 : i32
    %35 = vector.broadcast %c15_i32 : i32 to vector<32x1xi32>
    %36 = arith.cmpi eq, %25, %35 : vector<32x1xi32>
    %37 = vector.extract_strided_slice %7 {offsets = [1, 0], sizes = [31, 128], strides = [1, 1]} : vector<32x128xf32> to vector<31x128xf32>
    %38 = tpu.concatenate %37, %26 in 0 : vector<31x128xf32>, vector<1x128xf32> -> vector<32x128xf32>
    %cst_11 = arith.constant 0.000000e+00 : f32
    %39 = vector.shape_cast %36 : vector<32x1xi1> to vector<32x1xi1>
    %40 = vector.broadcast %39 : vector<32x1xi1> to vector<32x128xi1>
    %41 = vector.broadcast %cst_11 : f32 to vector<32x128xf32>
    %42 = arith.select %40, %41, %38 : vector<32x128xi1>, vector<32x128xf32>
    %43 = tpu.concatenate %34, %7, %42 in 1 : vector<32x128xf32>, vector<32x128xf32>, vector<32x128xf32> -> vector<32x384xf32>
    %44 = arith.truncf %43 : vector<32x384xf32> to vector<32x384xbf16>
    %c0_12 = arith.constant 0 : index
    %c0_13 = arith.constant 0 : index
    %45 = vector.load %arg3[%c0_12, %c0_13] : memref<384x128xbf16, #tpu.memory_space<vmem>>, vector<384x128xbf16>
    %cst_14 = arith.constant dense<0.000000e+00> : vector<32x128xf32>
    %46 = tpu.matmul %44, %45, %cst_14 {dimension_numbers = #tpu.dot_dimension_numbers<[1], [0], [0], [1], [0, 0, 1, 1], [], []>} : vector<32x384xbf16>, vector<384x128xbf16>, vector<32x128xf32> -> vector<32x128xf32>
    %47 = vector.broadcast %8 : vector<1x128xf32> to vector<32x128xf32>
    %48 = arith.addf %46, %47 : vector<32x128xf32>
    %cst_15 = arith.constant 0.000000e+00 : f32
    %49 = vector.broadcast %cst_15 : f32 to vector<32x128xf32>
    %50 = arith.maximumf %48, %49 : vector<32x128xf32>
    %51 = vector.shape_cast %50 : vector<32x128xf32> to vector<16x2x128xf32>
    %cst_16 = arith.constant dense<0xFF800000> : vector<16x128xf32>
    %52 = vector.multi_reduction <maximumf>, %51, %cst_16 [1] : vector<16x2x128xf32> to vector<16x128xf32>
    %c0_17 = arith.constant 0 : index
    %c0_18 = arith.constant 0 : index
    %53 = vector.load %arg6[%c0_17, %c0_18] : memref<1x128xf32, #tpu.memory_space<vmem>>, vector<1x128xf32>
    %54 = tpu.iota {dimensions = array<i32: 0>} : vector<16x1xi32>
    %c8_i32 = arith.constant 8 : i32
    %c0_i32_19 = arith.constant 0 : i32
    %55 = arith.cmpi eq, %c8_i32, %c0_i32_19 : i32
    %c1_i32_20 = arith.constant 1 : i32
    %56 = arith.select %55, %c1_i32_20, %c8_i32 : i32
    %57 = vector.broadcast %56 : i32 to vector<16x1xi32>
    %58 = arith.remsi %54, %57 : vector<16x1xi32>
    %c0_i32_21 = arith.constant 0 : i32
    %59 = vector.broadcast %c0_i32_21 : i32 to vector<16x1xi32>
    %60 = arith.cmpi ne, %58, %59 : vector<16x1xi32>
    %c0_i32_22 = arith.constant 0 : i32
    %61 = vector.broadcast %c0_i32_22 : i32 to vector<16x1xi32>
    %62 = arith.cmpi slt, %58, %61 : vector<16x1xi32>
    %c0_i32_23 = arith.constant 0 : i32
    %63 = arith.cmpi slt, %56, %c0_i32_23 : i32
    %64 = vector.broadcast %63 : i1 to vector<16x1xi1>
    %65 = vector.broadcast %64 : vector<16x1xi1> to vector<16x1xi1>
    %66 = arith.xori %62, %65 : vector<16x1xi1>
    %67 = arith.andi %66, %60 : vector<16x1xi1>
    %68 = vector.broadcast %56 : i32 to vector<16x1xi32>
    %69 = arith.addi %58, %68 : vector<16x1xi32>
    %70 = arith.select %67, %69, %58 : vector<16x1xi1>, vector<16x1xi32>
    %cst_24 = arith.constant 0.000000e+00 : f32
    %71 = vector.broadcast %cst_24 : f32 to vector<1x128xf32>
    %c0_i32_25 = arith.constant 0 : i32
    %72 = vector.broadcast %c0_i32_25 : i32 to vector<16x1xi32>
    %73 = arith.cmpi eq, %70, %72 : vector<16x1xi32>
    %74 = vector.extract_strided_slice %52 {offsets = [0, 0], sizes = [15, 128], strides = [1, 1]} : vector<16x128xf32> to vector<15x128xf32>
    %75 = tpu.concatenate %71, %74 in 0 : vector<1x128xf32>, vector<15x128xf32> -> vector<16x128xf32>
    %cst_26 = arith.constant 0.000000e+00 : f32
    %76 = vector.shape_cast %73 : vector<16x1xi1> to vector<16x1xi1>
    %77 = vector.broadcast %76 : vector<16x1xi1> to vector<16x128xi1>
    %78 = vector.broadcast %cst_26 : f32 to vector<16x128xf32>
    %79 = arith.select %77, %78, %75 : vector<16x128xi1>, vector<16x128xf32>
    %c7_i32 = arith.constant 7 : i32
    %80 = vector.broadcast %c7_i32 : i32 to vector<16x1xi32>
    %81 = arith.cmpi eq, %70, %80 : vector<16x1xi32>
    %82 = vector.extract_strided_slice %52 {offsets = [1, 0], sizes = [15, 128], strides = [1, 1]} : vector<16x128xf32> to vector<15x128xf32>
    %83 = tpu.concatenate %82, %71 in 0 : vector<15x128xf32>, vector<1x128xf32> -> vector<16x128xf32>
    %cst_27 = arith.constant 0.000000e+00 : f32
    %84 = vector.shape_cast %81 : vector<16x1xi1> to vector<16x1xi1>
    %85 = vector.broadcast %84 : vector<16x1xi1> to vector<16x128xi1>
    %86 = vector.broadcast %cst_27 : f32 to vector<16x128xf32>
    %87 = arith.select %85, %86, %83 : vector<16x128xi1>, vector<16x128xf32>
    %88 = tpu.concatenate %79, %52, %87 in 1 : vector<16x128xf32>, vector<16x128xf32>, vector<16x128xf32> -> vector<16x384xf32>
    %89 = arith.truncf %88 : vector<16x384xf32> to vector<16x384xbf16>
    %c0_28 = arith.constant 0 : index
    %c0_29 = arith.constant 0 : index
    %90 = vector.load %arg5[%c0_28, %c0_29] : memref<384x128xbf16, #tpu.memory_space<vmem>>, vector<384x128xbf16>
    %cst_30 = arith.constant dense<0.000000e+00> : vector<16x128xf32>
    %91 = tpu.matmul %89, %90, %cst_30 {dimension_numbers = #tpu.dot_dimension_numbers<[1], [0], [0], [1], [0, 0, 1, 1], [], []>} : vector<16x384xbf16>, vector<384x128xbf16>, vector<16x128xf32> -> vector<16x128xf32>
    %92 = vector.broadcast %53 : vector<1x128xf32> to vector<16x128xf32>
    %93 = arith.addf %91, %92 : vector<16x128xf32>
    %cst_31 = arith.constant 0.000000e+00 : f32
    %94 = vector.broadcast %cst_31 : f32 to vector<16x128xf32>
    %95 = arith.cmpf ogt, %93, %94 : vector<16x128xf32>
    %96 = math.exp %93 : vector<16x128xf32>
    %cst_32 = arith.constant 1.000000e+00 : f32
    %97 = vector.broadcast %cst_32 : f32 to vector<16x128xf32>
    %98 = arith.subf %96, %97 : vector<16x128xf32>
    %99 = arith.select %95, %93, %98 : vector<16x128xi1>, vector<16x128xf32>
    %100 = vector.shape_cast %99 : vector<16x128xf32> to vector<8x2x128xf32>
    %cst_33 = arith.constant dense<0xFF800000> : vector<8x128xf32>
    %101 = vector.multi_reduction <maximumf>, %100, %cst_33 [1] : vector<8x2x128xf32> to vector<8x128xf32>
    %102 = arith.truncf %101 : vector<8x128xf32> to vector<8x128xbf16>
    %c0_34 = arith.constant 0 : index
    %c0_35 = arith.constant 0 : index
    %103 = vector.load %arg7[%c0_34, %c0_35] : memref<128x1536xbf16, #tpu.memory_space<vmem>>, vector<128x1536xbf16>
    %cst_36 = arith.constant dense<0.000000e+00> : vector<8x1536xf32>
    %104 = tpu.matmul %102, %103, %cst_36 {dimension_numbers = #tpu.dot_dimension_numbers<[1], [0], [0], [1], [0, 0, 1, 1], [], []>} : vector<8x128xbf16>, vector<128x1536xbf16>, vector<8x1536xf32> -> vector<8x1536xf32>
    %c0_37 = arith.constant 0 : index
    %c0_38 = arith.constant 0 : index
    %105 = vector.load %arg8[%c0_37, %c0_38] : memref<1x1536xf32, #tpu.memory_space<vmem>>, vector<1x1536xf32>
    %106 = vector.broadcast %105 : vector<1x1536xf32> to vector<8x1536xf32>
    %107 = arith.addf %104, %106 : vector<8x1536xf32>
    %108 = vector.shape_cast %107 : vector<8x1536xf32> to vector<2x4x1536xf32>
    %c0_39 = arith.constant 0 : index
    %c0_40 = arith.constant 0 : index
    %c0_41 = arith.constant 0 : index
    %109 = vector.load %arg9[%c0_39, %c0_40, %c0_41] : memref<2x256x768xbf16, #tpu.memory_space<vmem>>, vector<1x256x768xbf16>
    %110 = vector.shape_cast %109 : vector<1x256x768xbf16> to vector<256x768xbf16>
    %c1 = arith.constant 1 : index
    %c0_42 = arith.constant 0 : index
    %c0_43 = arith.constant 0 : index
    %111 = vector.load %arg9[%c1, %c0_42, %c0_43] : memref<2x256x768xbf16, #tpu.memory_space<vmem>>, vector<1x256x768xbf16>
    %112 = vector.shape_cast %111 : vector<1x256x768xbf16> to vector<256x768xbf16>
    %c0_44 = arith.constant 0 : index
    %c0_45 = arith.constant 0 : index
    %c0_46 = arith.constant 0 : index
    %113 = vector.load %arg10[%c0_44, %c0_45, %c0_46] : memref<2x1x768xf32, #tpu.memory_space<vmem>>, vector<1x1x768xf32>
    %114 = vector.shape_cast %113 : vector<1x1x768xf32> to vector<1x768xf32>
    %115 = vector.shape_cast %114 : vector<1x768xf32> to vector<1x768xf32>
    %116 = vector.broadcast %115 : vector<1x768xf32> to vector<2x768xf32>
    %c1_47 = arith.constant 1 : index
    %c0_48 = arith.constant 0 : index
    %c0_49 = arith.constant 0 : index
    %117 = vector.load %arg10[%c1_47, %c0_48, %c0_49] : memref<2x1x768xf32, #tpu.memory_space<vmem>>, vector<1x1x768xf32>
    %118 = vector.shape_cast %117 : vector<1x1x768xf32> to vector<1x768xf32>
    %119 = vector.shape_cast %118 : vector<1x768xf32> to vector<1x768xf32>
    %120 = vector.broadcast %119 : vector<1x768xf32> to vector<2x768xf32>
    %cst_50 = arith.constant 0.000000e+00 : f32
    %121 = vector.broadcast %cst_50 : f32 to vector<2x256xf32>
    %cst_51 = arith.constant 0.000000e+00 : f32
    %122 = vector.broadcast %cst_51 : f32 to vector<2x256xf32>
    %123 = vector.extract_strided_slice %108 {offsets = [0, 0, 0], sizes = [2, 1, 768], strides = [1, 1, 1]} : vector<2x4x1536xf32> to vector<2x1x768xf32>
    %124 = vector.shape_cast %123 : vector<2x1x768xf32> to vector<2x768xf32>
    %125 = arith.truncf %121 : vector<2x256xf32> to vector<2x256xbf16>
    %cst_52 = arith.constant dense<0.000000e+00> : vector<2x768xf32>
    %126 = tpu.matmul %125, %110, %cst_52 {dimension_numbers = #tpu.dot_dimension_numbers<[1], [0], [0], [1], [0, 0, 1, 1], [], []>} : vector<2x256xbf16>, vector<256x768xbf16>, vector<2x768xf32> -> vector<2x768xf32>
    %127 = arith.addf %126, %116 : vector<2x768xf32>
    %128 = vector.extract_strided_slice %124 {offsets = [0, 0], sizes = [2, 256], strides = [1, 1]} : vector<2x768xf32> to vector<2x256xf32>
    %129 = vector.extract_strided_slice %127 {offsets = [0, 0], sizes = [2, 256], strides = [1, 1]} : vector<2x768xf32> to vector<2x256xf32>
    %130 = arith.addf %128, %129 : vector<2x256xf32>
    %131 = arith.negf %130 : vector<2x256xf32>
    %132 = math.exp %131 : vector<2x256xf32>
    %cst_53 = arith.constant 1.000000e+00 : f32
    %133 = vector.broadcast %cst_53 : f32 to vector<2x256xf32>
    %134 = arith.addf %133, %132 : vector<2x256xf32>
    %135 = arith.divf %133, %134 : vector<2x256xf32>
    %136 = vector.extract_strided_slice %124 {offsets = [0, 256], sizes = [2, 256], strides = [1, 1]} : vector<2x768xf32> to vector<2x256xf32>
    %137 = vector.extract_strided_slice %127 {offsets = [0, 256], sizes = [2, 256], strides = [1, 1]} : vector<2x768xf32> to vector<2x256xf32>
    %138 = arith.addf %136, %137 : vector<2x256xf32>
    %139 = arith.negf %138 : vector<2x256xf32>
    %140 = math.exp %139 : vector<2x256xf32>
    %cst_54 = arith.constant 1.000000e+00 : f32
    %141 = vector.broadcast %cst_54 : f32 to vector<2x256xf32>
    %142 = arith.addf %141, %140 : vector<2x256xf32>
    %143 = arith.divf %141, %142 : vector<2x256xf32>
    %144 = vector.extract_strided_slice %124 {offsets = [0, 512], sizes = [2, 256], strides = [1, 1]} : vector<2x768xf32> to vector<2x256xf32>
    %145 = vector.extract_strided_slice %127 {offsets = [0, 512], sizes = [2, 256], strides = [1, 1]} : vector<2x768xf32> to vector<2x256xf32>
    %146 = arith.mulf %135, %145 : vector<2x256xf32>
    %147 = arith.addf %144, %146 : vector<2x256xf32>
    %148 = math.tanh %147 : vector<2x256xf32>
    %cst_55 = arith.constant 1.000000e+00 : f32
    %149 = vector.broadcast %cst_55 : f32 to vector<2x256xf32>
    %150 = arith.subf %149, %143 : vector<2x256xf32>
    %151 = arith.mulf %150, %148 : vector<2x256xf32>
    %152 = arith.mulf %143, %121 : vector<2x256xf32>
    %153 = arith.addf %151, %152 : vector<2x256xf32>
    %154 = vector.extract_strided_slice %108 {offsets = [0, 3, 768], sizes = [2, 1, 768], strides = [1, 1, 1]} : vector<2x4x1536xf32> to vector<2x1x768xf32>
    %155 = vector.shape_cast %154 : vector<2x1x768xf32> to vector<2x768xf32>
    %156 = arith.truncf %122 : vector<2x256xf32> to vector<2x256xbf16>
    %cst_56 = arith.constant dense<0.000000e+00> : vector<2x768xf32>
    %157 = tpu.matmul %156, %112, %cst_56 {dimension_numbers = #tpu.dot_dimension_numbers<[1], [0], [0], [1], [0, 0, 1, 1], [], []>} : vector<2x256xbf16>, vector<256x768xbf16>, vector<2x768xf32> -> vector<2x768xf32>
    %158 = arith.addf %157, %120 : vector<2x768xf32>
    %159 = vector.extract_strided_slice %155 {offsets = [0, 0], sizes = [2, 256], strides = [1, 1]} : vector<2x768xf32> to vector<2x256xf32>
    %160 = vector.extract_strided_slice %158 {offsets = [0, 0], sizes = [2, 256], strides = [1, 1]} : vector<2x768xf32> to vector<2x256xf32>
    %161 = arith.addf %159, %160 : vector<2x256xf32>
    %162 = arith.negf %161 : vector<2x256xf32>
    %163 = math.exp %162 : vector<2x256xf32>
    %cst_57 = arith.constant 1.000000e+00 : f32
    %164 = vector.broadcast %cst_57 : f32 to vector<2x256xf32>
    %165 = arith.addf %164, %163 : vector<2x256xf32>
    %166 = arith.divf %164, %165 : vector<2x256xf32>
    %167 = vector.extract_strided_slice %155 {offsets = [0, 256], sizes = [2, 256], strides = [1, 1]} : vector<2x768xf32> to vector<2x256xf32>
    %168 = vector.extract_strided_slice %158 {offsets = [0, 256], sizes = [2, 256], strides = [1, 1]} : vector<2x768xf32> to vector<2x256xf32>
    %169 = arith.addf %167, %168 : vector<2x256xf32>
    %170 = arith.negf %169 : vector<2x256xf32>
    %171 = math.exp %170 : vector<2x256xf32>
    %cst_58 = arith.constant 1.000000e+00 : f32
    %172 = vector.broadcast %cst_58 : f32 to vector<2x256xf32>
    %173 = arith.addf %172, %171 : vector<2x256xf32>
    %174 = arith.divf %172, %173 : vector<2x256xf32>
    %175 = vector.extract_strided_slice %155 {offsets = [0, 512], sizes = [2, 256], strides = [1, 1]} : vector<2x768xf32> to vector<2x256xf32>
    %176 = vector.extract_strided_slice %158 {offsets = [0, 512], sizes = [2, 256], strides = [1, 1]} : vector<2x768xf32> to vector<2x256xf32>
    %177 = arith.mulf %166, %176 : vector<2x256xf32>
    %178 = arith.addf %175, %177 : vector<2x256xf32>
    %179 = math.tanh %178 : vector<2x256xf32>
    %cst_59 = arith.constant 1.000000e+00 : f32
    %180 = vector.broadcast %cst_59 : f32 to vector<2x256xf32>
    %181 = arith.subf %180, %174 : vector<2x256xf32>
    %182 = arith.mulf %181, %179 : vector<2x256xf32>
    %183 = arith.mulf %174, %122 : vector<2x256xf32>
    %184 = arith.addf %182, %183 : vector<2x256xf32>
    %185 = vector.extract_strided_slice %108 {offsets = [0, 1, 0], sizes = [2, 1, 768], strides = [1, 1, 1]} : vector<2x4x1536xf32> to vector<2x1x768xf32>
    %186 = vector.shape_cast %185 : vector<2x1x768xf32> to vector<2x768xf32>
    %187 = arith.truncf %153 : vector<2x256xf32> to vector<2x256xbf16>
    %cst_60 = arith.constant dense<0.000000e+00> : vector<2x768xf32>
    %188 = tpu.matmul %187, %110, %cst_60 {dimension_numbers = #tpu.dot_dimension_numbers<[1], [0], [0], [1], [0, 0, 1, 1], [], []>} : vector<2x256xbf16>, vector<256x768xbf16>, vector<2x768xf32> -> vector<2x768xf32>
    %189 = arith.addf %188, %116 : vector<2x768xf32>
    %190 = vector.extract_strided_slice %186 {offsets = [0, 0], sizes = [2, 256], strides = [1, 1]} : vector<2x768xf32> to vector<2x256xf32>
    %191 = vector.extract_strided_slice %189 {offsets = [0, 0], sizes = [2, 256], strides = [1, 1]} : vector<2x768xf32> to vector<2x256xf32>
    %192 = arith.addf %190, %191 : vector<2x256xf32>
    %193 = arith.negf %192 : vector<2x256xf32>
    %194 = math.exp %193 : vector<2x256xf32>
    %cst_61 = arith.constant 1.000000e+00 : f32
    %195 = vector.broadcast %cst_61 : f32 to vector<2x256xf32>
    %196 = arith.addf %195, %194 : vector<2x256xf32>
    %197 = arith.divf %195, %196 : vector<2x256xf32>
    %198 = vector.extract_strided_slice %186 {offsets = [0, 256], sizes = [2, 256], strides = [1, 1]} : vector<2x768xf32> to vector<2x256xf32>
    %199 = vector.extract_strided_slice %189 {offsets = [0, 256], sizes = [2, 256], strides = [1, 1]} : vector<2x768xf32> to vector<2x256xf32>
    %200 = arith.addf %198, %199 : vector<2x256xf32>
    %201 = arith.negf %200 : vector<2x256xf32>
    %202 = math.exp %201 : vector<2x256xf32>
    %cst_62 = arith.constant 1.000000e+00 : f32
    %203 = vector.broadcast %cst_62 : f32 to vector<2x256xf32>
    %204 = arith.addf %203, %202 : vector<2x256xf32>
    %205 = arith.divf %203, %204 : vector<2x256xf32>
    %206 = vector.extract_strided_slice %186 {offsets = [0, 512], sizes = [2, 256], strides = [1, 1]} : vector<2x768xf32> to vector<2x256xf32>
    %207 = vector.extract_strided_slice %189 {offsets = [0, 512], sizes = [2, 256], strides = [1, 1]} : vector<2x768xf32> to vector<2x256xf32>
    %208 = arith.mulf %197, %207 : vector<2x256xf32>
    %209 = arith.addf %206, %208 : vector<2x256xf32>
    %210 = math.tanh %209 : vector<2x256xf32>
    %cst_63 = arith.constant 1.000000e+00 : f32
    %211 = vector.broadcast %cst_63 : f32 to vector<2x256xf32>
    %212 = arith.subf %211, %205 : vector<2x256xf32>
    %213 = arith.mulf %212, %210 : vector<2x256xf32>
    %214 = arith.mulf %205, %153 : vector<2x256xf32>
    %215 = arith.addf %213, %214 : vector<2x256xf32>
    %216 = vector.extract_strided_slice %108 {offsets = [0, 2, 768], sizes = [2, 1, 768], strides = [1, 1, 1]} : vector<2x4x1536xf32> to vector<2x1x768xf32>
    %217 = vector.shape_cast %216 : vector<2x1x768xf32> to vector<2x768xf32>
    %218 = arith.truncf %184 : vector<2x256xf32> to vector<2x256xbf16>
    %cst_64 = arith.constant dense<0.000000e+00> : vector<2x768xf32>
    %219 = tpu.matmul %218, %112, %cst_64 {dimension_numbers = #tpu.dot_dimension_numbers<[1], [0], [0], [1], [0, 0, 1, 1], [], []>} : vector<2x256xbf16>, vector<256x768xbf16>, vector<2x768xf32> -> vector<2x768xf32>
    %220 = arith.addf %219, %120 : vector<2x768xf32>
    %221 = vector.extract_strided_slice %217 {offsets = [0, 0], sizes = [2, 256], strides = [1, 1]} : vector<2x768xf32> to vector<2x256xf32>
    %222 = vector.extract_strided_slice %220 {offsets = [0, 0], sizes = [2, 256], strides = [1, 1]} : vector<2x768xf32> to vector<2x256xf32>
    %223 = arith.addf %221, %222 : vector<2x256xf32>
    %224 = arith.negf %223 : vector<2x256xf32>
    %225 = math.exp %224 : vector<2x256xf32>
    %cst_65 = arith.constant 1.000000e+00 : f32
    %226 = vector.broadcast %cst_65 : f32 to vector<2x256xf32>
    %227 = arith.addf %226, %225 : vector<2x256xf32>
    %228 = arith.divf %226, %227 : vector<2x256xf32>
    %229 = vector.extract_strided_slice %217 {offsets = [0, 256], sizes = [2, 256], strides = [1, 1]} : vector<2x768xf32> to vector<2x256xf32>
    %230 = vector.extract_strided_slice %220 {offsets = [0, 256], sizes = [2, 256], strides = [1, 1]} : vector<2x768xf32> to vector<2x256xf32>
    %231 = arith.addf %229, %230 : vector<2x256xf32>
    %232 = arith.negf %231 : vector<2x256xf32>
    %233 = math.exp %232 : vector<2x256xf32>
    %cst_66 = arith.constant 1.000000e+00 : f32
    %234 = vector.broadcast %cst_66 : f32 to vector<2x256xf32>
    %235 = arith.addf %234, %233 : vector<2x256xf32>
    %236 = arith.divf %234, %235 : vector<2x256xf32>
    %237 = vector.extract_strided_slice %217 {offsets = [0, 512], sizes = [2, 256], strides = [1, 1]} : vector<2x768xf32> to vector<2x256xf32>
    %238 = vector.extract_strided_slice %220 {offsets = [0, 512], sizes = [2, 256], strides = [1, 1]} : vector<2x768xf32> to vector<2x256xf32>
    %239 = arith.mulf %228, %238 : vector<2x256xf32>
    %240 = arith.addf %237, %239 : vector<2x256xf32>
    %241 = math.tanh %240 : vector<2x256xf32>
    %cst_67 = arith.constant 1.000000e+00 : f32
    %242 = vector.broadcast %cst_67 : f32 to vector<2x256xf32>
    %243 = arith.subf %242, %236 : vector<2x256xf32>
    %244 = arith.mulf %243, %241 : vector<2x256xf32>
    %245 = arith.mulf %236, %184 : vector<2x256xf32>
    %246 = arith.addf %244, %245 : vector<2x256xf32>
    %247 = vector.extract_strided_slice %108 {offsets = [0, 2, 0], sizes = [2, 1, 768], strides = [1, 1, 1]} : vector<2x4x1536xf32> to vector<2x1x768xf32>
    %248 = vector.shape_cast %247 : vector<2x1x768xf32> to vector<2x768xf32>
    %249 = arith.truncf %215 : vector<2x256xf32> to vector<2x256xbf16>
    %cst_68 = arith.constant dense<0.000000e+00> : vector<2x768xf32>
    %250 = tpu.matmul %249, %110, %cst_68 {dimension_numbers = #tpu.dot_dimension_numbers<[1], [0], [0], [1], [0, 0, 1, 1], [], []>} : vector<2x256xbf16>, vector<256x768xbf16>, vector<2x768xf32> -> vector<2x768xf32>
    %251 = arith.addf %250, %116 : vector<2x768xf32>
    %252 = vector.extract_strided_slice %248 {offsets = [0, 0], sizes = [2, 256], strides = [1, 1]} : vector<2x768xf32> to vector<2x256xf32>
    %253 = vector.extract_strided_slice %251 {offsets = [0, 0], sizes = [2, 256], strides = [1, 1]} : vector<2x768xf32> to vector<2x256xf32>
    %254 = arith.addf %252, %253 : vector<2x256xf32>
    %255 = arith.negf %254 : vector<2x256xf32>
    %256 = math.exp %255 : vector<2x256xf32>
    %cst_69 = arith.constant 1.000000e+00 : f32
    %257 = vector.broadcast %cst_69 : f32 to vector<2x256xf32>
    %258 = arith.addf %257, %256 : vector<2x256xf32>
    %259 = arith.divf %257, %258 : vector<2x256xf32>
    %260 = vector.extract_strided_slice %248 {offsets = [0, 256], sizes = [2, 256], strides = [1, 1]} : vector<2x768xf32> to vector<2x256xf32>
    %261 = vector.extract_strided_slice %251 {offsets = [0, 256], sizes = [2, 256], strides = [1, 1]} : vector<2x768xf32> to vector<2x256xf32>
    %262 = arith.addf %260, %261 : vector<2x256xf32>
    %263 = arith.negf %262 : vector<2x256xf32>
    %264 = math.exp %263 : vector<2x256xf32>
    %cst_70 = arith.constant 1.000000e+00 : f32
    %265 = vector.broadcast %cst_70 : f32 to vector<2x256xf32>
    %266 = arith.addf %265, %264 : vector<2x256xf32>
    %267 = arith.divf %265, %266 : vector<2x256xf32>
    %268 = vector.extract_strided_slice %248 {offsets = [0, 512], sizes = [2, 256], strides = [1, 1]} : vector<2x768xf32> to vector<2x256xf32>
    %269 = vector.extract_strided_slice %251 {offsets = [0, 512], sizes = [2, 256], strides = [1, 1]} : vector<2x768xf32> to vector<2x256xf32>
    %270 = arith.mulf %259, %269 : vector<2x256xf32>
    %271 = arith.addf %268, %270 : vector<2x256xf32>
    %272 = math.tanh %271 : vector<2x256xf32>
    %cst_71 = arith.constant 1.000000e+00 : f32
    %273 = vector.broadcast %cst_71 : f32 to vector<2x256xf32>
    %274 = arith.subf %273, %267 : vector<2x256xf32>
    %275 = arith.mulf %274, %272 : vector<2x256xf32>
    %276 = arith.mulf %267, %215 : vector<2x256xf32>
    %277 = arith.addf %275, %276 : vector<2x256xf32>
    %278 = vector.extract_strided_slice %108 {offsets = [0, 1, 768], sizes = [2, 1, 768], strides = [1, 1, 1]} : vector<2x4x1536xf32> to vector<2x1x768xf32>
    %279 = vector.shape_cast %278 : vector<2x1x768xf32> to vector<2x768xf32>
    %280 = arith.truncf %246 : vector<2x256xf32> to vector<2x256xbf16>
    %cst_72 = arith.constant dense<0.000000e+00> : vector<2x768xf32>
    %281 = tpu.matmul %280, %112, %cst_72 {dimension_numbers = #tpu.dot_dimension_numbers<[1], [0], [0], [1], [0, 0, 1, 1], [], []>} : vector<2x256xbf16>, vector<256x768xbf16>, vector<2x768xf32> -> vector<2x768xf32>
    %282 = arith.addf %281, %120 : vector<2x768xf32>
    %283 = vector.extract_strided_slice %279 {offsets = [0, 0], sizes = [2, 256], strides = [1, 1]} : vector<2x768xf32> to vector<2x256xf32>
    %284 = vector.extract_strided_slice %282 {offsets = [0, 0], sizes = [2, 256], strides = [1, 1]} : vector<2x768xf32> to vector<2x256xf32>
    %285 = arith.addf %283, %284 : vector<2x256xf32>
    %286 = arith.negf %285 : vector<2x256xf32>
    %287 = math.exp %286 : vector<2x256xf32>
    %cst_73 = arith.constant 1.000000e+00 : f32
    %288 = vector.broadcast %cst_73 : f32 to vector<2x256xf32>
    %289 = arith.addf %288, %287 : vector<2x256xf32>
    %290 = arith.divf %288, %289 : vector<2x256xf32>
    %291 = vector.extract_strided_slice %279 {offsets = [0, 256], sizes = [2, 256], strides = [1, 1]} : vector<2x768xf32> to vector<2x256xf32>
    %292 = vector.extract_strided_slice %282 {offsets = [0, 256], sizes = [2, 256], strides = [1, 1]} : vector<2x768xf32> to vector<2x256xf32>
    %293 = arith.addf %291, %292 : vector<2x256xf32>
    %294 = arith.negf %293 : vector<2x256xf32>
    %295 = math.exp %294 : vector<2x256xf32>
    %cst_74 = arith.constant 1.000000e+00 : f32
    %296 = vector.broadcast %cst_74 : f32 to vector<2x256xf32>
    %297 = arith.addf %296, %295 : vector<2x256xf32>
    %298 = arith.divf %296, %297 : vector<2x256xf32>
    %299 = vector.extract_strided_slice %279 {offsets = [0, 512], sizes = [2, 256], strides = [1, 1]} : vector<2x768xf32> to vector<2x256xf32>
    %300 = vector.extract_strided_slice %282 {offsets = [0, 512], sizes = [2, 256], strides = [1, 1]} : vector<2x768xf32> to vector<2x256xf32>
    %301 = arith.mulf %290, %300 : vector<2x256xf32>
    %302 = arith.addf %299, %301 : vector<2x256xf32>
    %303 = math.tanh %302 : vector<2x256xf32>
    %cst_75 = arith.constant 1.000000e+00 : f32
    %304 = vector.broadcast %cst_75 : f32 to vector<2x256xf32>
    %305 = arith.subf %304, %298 : vector<2x256xf32>
    %306 = arith.mulf %305, %303 : vector<2x256xf32>
    %307 = arith.mulf %298, %246 : vector<2x256xf32>
    %308 = arith.addf %306, %307 : vector<2x256xf32>
    %309 = vector.extract_strided_slice %108 {offsets = [0, 3, 0], sizes = [2, 1, 768], strides = [1, 1, 1]} : vector<2x4x1536xf32> to vector<2x1x768xf32>
    %310 = vector.shape_cast %309 : vector<2x1x768xf32> to vector<2x768xf32>
    %311 = arith.truncf %277 : vector<2x256xf32> to vector<2x256xbf16>
    %cst_76 = arith.constant dense<0.000000e+00> : vector<2x768xf32>
    %312 = tpu.matmul %311, %110, %cst_76 {dimension_numbers = #tpu.dot_dimension_numbers<[1], [0], [0], [1], [0, 0, 1, 1], [], []>} : vector<2x256xbf16>, vector<256x768xbf16>, vector<2x768xf32> -> vector<2x768xf32>
    %313 = arith.addf %312, %116 : vector<2x768xf32>
    %314 = vector.extract_strided_slice %310 {offsets = [0, 0], sizes = [2, 256], strides = [1, 1]} : vector<2x768xf32> to vector<2x256xf32>
    %315 = vector.extract_strided_slice %313 {offsets = [0, 0], sizes = [2, 256], strides = [1, 1]} : vector<2x768xf32> to vector<2x256xf32>
    %316 = arith.addf %314, %315 : vector<2x256xf32>
    %317 = arith.negf %316 : vector<2x256xf32>
    %318 = math.exp %317 : vector<2x256xf32>
    %cst_77 = arith.constant 1.000000e+00 : f32
    %319 = vector.broadcast %cst_77 : f32 to vector<2x256xf32>
    %320 = arith.addf %319, %318 : vector<2x256xf32>
    %321 = arith.divf %319, %320 : vector<2x256xf32>
    %322 = vector.extract_strided_slice %310 {offsets = [0, 256], sizes = [2, 256], strides = [1, 1]} : vector<2x768xf32> to vector<2x256xf32>
    %323 = vector.extract_strided_slice %313 {offsets = [0, 256], sizes = [2, 256], strides = [1, 1]} : vector<2x768xf32> to vector<2x256xf32>
    %324 = arith.addf %322, %323 : vector<2x256xf32>
    %325 = arith.negf %324 : vector<2x256xf32>
    %326 = math.exp %325 : vector<2x256xf32>
    %cst_78 = arith.constant 1.000000e+00 : f32
    %327 = vector.broadcast %cst_78 : f32 to vector<2x256xf32>
    %328 = arith.addf %327, %326 : vector<2x256xf32>
    %329 = arith.divf %327, %328 : vector<2x256xf32>
    %330 = vector.extract_strided_slice %310 {offsets = [0, 512], sizes = [2, 256], strides = [1, 1]} : vector<2x768xf32> to vector<2x256xf32>
    %331 = vector.extract_strided_slice %313 {offsets = [0, 512], sizes = [2, 256], strides = [1, 1]} : vector<2x768xf32> to vector<2x256xf32>
    %332 = arith.mulf %321, %331 : vector<2x256xf32>
    %333 = arith.addf %330, %332 : vector<2x256xf32>
    %334 = math.tanh %333 : vector<2x256xf32>
    %cst_79 = arith.constant 1.000000e+00 : f32
    %335 = vector.broadcast %cst_79 : f32 to vector<2x256xf32>
    %336 = arith.subf %335, %329 : vector<2x256xf32>
    %337 = arith.mulf %336, %334 : vector<2x256xf32>
    %338 = arith.mulf %329, %277 : vector<2x256xf32>
    %339 = arith.addf %337, %338 : vector<2x256xf32>
    %340 = vector.extract_strided_slice %108 {offsets = [0, 0, 768], sizes = [2, 1, 768], strides = [1, 1, 1]} : vector<2x4x1536xf32> to vector<2x1x768xf32>
    %341 = vector.shape_cast %340 : vector<2x1x768xf32> to vector<2x768xf32>
    %342 = arith.truncf %308 : vector<2x256xf32> to vector<2x256xbf16>
    %cst_80 = arith.constant dense<0.000000e+00> : vector<2x768xf32>
    %343 = tpu.matmul %342, %112, %cst_80 {dimension_numbers = #tpu.dot_dimension_numbers<[1], [0], [0], [1], [0, 0, 1, 1], [], []>} : vector<2x256xbf16>, vector<256x768xbf16>, vector<2x768xf32> -> vector<2x768xf32>
    %344 = arith.addf %343, %120 : vector<2x768xf32>
    %345 = vector.extract_strided_slice %341 {offsets = [0, 0], sizes = [2, 256], strides = [1, 1]} : vector<2x768xf32> to vector<2x256xf32>
    %346 = vector.extract_strided_slice %344 {offsets = [0, 0], sizes = [2, 256], strides = [1, 1]} : vector<2x768xf32> to vector<2x256xf32>
    %347 = arith.addf %345, %346 : vector<2x256xf32>
    %348 = arith.negf %347 : vector<2x256xf32>
    %349 = math.exp %348 : vector<2x256xf32>
    %cst_81 = arith.constant 1.000000e+00 : f32
    %350 = vector.broadcast %cst_81 : f32 to vector<2x256xf32>
    %351 = arith.addf %350, %349 : vector<2x256xf32>
    %352 = arith.divf %350, %351 : vector<2x256xf32>
    %353 = vector.extract_strided_slice %341 {offsets = [0, 256], sizes = [2, 256], strides = [1, 1]} : vector<2x768xf32> to vector<2x256xf32>
    %354 = vector.extract_strided_slice %344 {offsets = [0, 256], sizes = [2, 256], strides = [1, 1]} : vector<2x768xf32> to vector<2x256xf32>
    %355 = arith.addf %353, %354 : vector<2x256xf32>
    %356 = arith.negf %355 : vector<2x256xf32>
    %357 = math.exp %356 : vector<2x256xf32>
    %cst_82 = arith.constant 1.000000e+00 : f32
    %358 = vector.broadcast %cst_82 : f32 to vector<2x256xf32>
    %359 = arith.addf %358, %357 : vector<2x256xf32>
    %360 = arith.divf %358, %359 : vector<2x256xf32>
    %361 = vector.extract_strided_slice %341 {offsets = [0, 512], sizes = [2, 256], strides = [1, 1]} : vector<2x768xf32> to vector<2x256xf32>
    %362 = vector.extract_strided_slice %344 {offsets = [0, 512], sizes = [2, 256], strides = [1, 1]} : vector<2x768xf32> to vector<2x256xf32>
    %363 = arith.mulf %352, %362 : vector<2x256xf32>
    %364 = arith.addf %361, %363 : vector<2x256xf32>
    %365 = math.tanh %364 : vector<2x256xf32>
    %cst_83 = arith.constant 1.000000e+00 : f32
    %366 = vector.broadcast %cst_83 : f32 to vector<2x256xf32>
    %367 = arith.subf %366, %360 : vector<2x256xf32>
    %368 = arith.mulf %367, %365 : vector<2x256xf32>
    %369 = arith.mulf %360, %308 : vector<2x256xf32>
    %370 = arith.addf %368, %369 : vector<2x256xf32>
    %371 = arith.truncf %339 : vector<2x256xf32> to vector<2x256xbf16>
    %c0_84 = arith.constant 0 : index
    %c0_85 = arith.constant 0 : index
    %c0_86 = arith.constant 0 : index
    %372 = vector.load %arg11[%c0_84, %c0_85, %c0_86] : memref<2x256x128xbf16, #tpu.memory_space<vmem>>, vector<1x256x128xbf16>
    %373 = vector.shape_cast %372 : vector<1x256x128xbf16> to vector<256x128xbf16>
    %cst_87 = arith.constant dense<0.000000e+00> : vector<2x128xf32>
    %374 = tpu.matmul %371, %373, %cst_87 {dimension_numbers = #tpu.dot_dimension_numbers<[1], [0], [0], [1], [0, 0, 1, 1], [], []>} : vector<2x256xbf16>, vector<256x128xbf16>, vector<2x128xf32> -> vector<2x128xf32>
    %375 = arith.truncf %370 : vector<2x256xf32> to vector<2x256xbf16>
    %c1_88 = arith.constant 1 : index
    %c0_89 = arith.constant 0 : index
    %c0_90 = arith.constant 0 : index
    %376 = vector.load %arg11[%c1_88, %c0_89, %c0_90] : memref<2x256x128xbf16, #tpu.memory_space<vmem>>, vector<1x256x128xbf16>
    %377 = vector.shape_cast %376 : vector<1x256x128xbf16> to vector<256x128xbf16>
    %cst_91 = arith.constant dense<0.000000e+00> : vector<2x128xf32>
    %378 = tpu.matmul %375, %377, %cst_91 {dimension_numbers = #tpu.dot_dimension_numbers<[1], [0], [0], [1], [0, 0, 1, 1], [], []>} : vector<2x256xbf16>, vector<256x128xbf16>, vector<2x128xf32> -> vector<2x128xf32>
    %379 = arith.addf %374, %378 : vector<2x128xf32>
    %c0_92 = arith.constant 0 : index
    %c0_93 = arith.constant 0 : index
    %380 = vector.load %arg12[%c0_92, %c0_93] : memref<1x128xf32, #tpu.memory_space<vmem>>, vector<1x128xf32>
    %381 = vector.broadcast %380 : vector<1x128xf32> to vector<2x128xf32>
    %382 = arith.addf %379, %381 : vector<2x128xf32>
    %c0_94 = arith.constant 0 : index
    %c0_95 = arith.constant 0 : index
    %383 = vector.load %arg13[%c0_94, %c0_95] : memref<2x128xf32, #tpu.memory_space<vmem>>, vector<2x128xf32>
    tpu.vector_store %arg13[%c0_94, %c0_95], %382 {strides = array<i32>} : memref<2x128xf32, #tpu.memory_space<vmem>>, vector<2x128xf32>,
    return
  }
  func.func @transform_0(%arg0: i32) -> (i32, i32) {
    %c0_i32 = arith.constant 0 : i32
    %c0_i32_0 = arith.constant 0 : i32
    return %arg0, %c0_i32 : i32, i32
  }
  func.func @transform_1(%arg0: i32) -> (i32, i32) {
    %c0_i32 = arith.constant 0 : i32
    %c0_i32_0 = arith.constant 0 : i32
    %c0_i32_1 = arith.constant 0 : i32
    return %c0_i32, %c0_i32_0 : i32, i32
  }
  func.func @transform_2(%arg0: i32) -> (i32, i32) {
    %c0_i32 = arith.constant 0 : i32
    %c0_i32_0 = arith.constant 0 : i32
    %c0_i32_1 = arith.constant 0 : i32
    return %c0_i32, %c0_i32_0 : i32, i32
  }
  func.func @transform_3(%arg0: i32) -> (i32, i32) {
    %c0_i32 = arith.constant 0 : i32
    %c0_i32_0 = arith.constant 0 : i32
    %c0_i32_1 = arith.constant 0 : i32
    return %c0_i32, %c0_i32_0 : i32, i32
  }
  func.func @transform_4(%arg0: i32) -> (i32, i32) {
    %c0_i32 = arith.constant 0 : i32
    %c0_i32_0 = arith.constant 0 : i32
    %c0_i32_1 = arith.constant 0 : i32
    return %c0_i32, %c0_i32_0 : i32, i32
  }
  func.func @transform_5(%arg0: i32) -> (i32, i32) {
    %c0_i32 = arith.constant 0 : i32
    %c0_i32_0 = arith.constant 0 : i32
    %c0_i32_1 = arith.constant 0 : i32
    return %c0_i32, %c0_i32_0 : i32, i32
  }
  func.func @transform_6(%arg0: i32) -> (i32, i32) {
    %c0_i32 = arith.constant 0 : i32
    %c0_i32_0 = arith.constant 0 : i32
    %c0_i32_1 = arith.constant 0 : i32
    return %c0_i32, %c0_i32_0 : i32, i32
  }
  func.func @transform_7(%arg0: i32) -> (i32, i32) {
    %c0_i32 = arith.constant 0 : i32
    %c0_i32_0 = arith.constant 0 : i32
    %c0_i32_1 = arith.constant 0 : i32
    return %c0_i32, %c0_i32_0 : i32, i32
  }
  func.func @transform_8(%arg0: i32) -> (i32, i32, i32) {
    %c0_i32 = arith.constant 0 : i32
    %c0_i32_0 = arith.constant 0 : i32
    %c0_i32_1 = arith.constant 0 : i32
    %c0_i32_2 = arith.constant 0 : i32
    return %c0_i32, %c0_i32_0, %c0_i32_1 : i32, i32, i32
  }
  func.func @transform_9(%arg0: i32) -> (i32, i32, i32) {
    %c0_i32 = arith.constant 0 : i32
    %c0_i32_0 = arith.constant 0 : i32
    %c0_i32_1 = arith.constant 0 : i32
    %c0_i32_2 = arith.constant 0 : i32
    return %c0_i32, %c0_i32_0, %c0_i32_1 : i32, i32, i32
  }
  func.func @transform_10(%arg0: i32) -> (i32, i32, i32) {
    %c0_i32 = arith.constant 0 : i32
    %c0_i32_0 = arith.constant 0 : i32
    %c0_i32_1 = arith.constant 0 : i32
    %c0_i32_2 = arith.constant 0 : i32
    return %c0_i32, %c0_i32_0, %c0_i32_1 : i32, i32, i32
  }
  func.func @transform_11(%arg0: i32) -> (i32, i32) {
    %c0_i32 = arith.constant 0 : i32
    %c0_i32_0 = arith.constant 0 : i32
    %c0_i32_1 = arith.constant 0 : i32
    return %c0_i32, %c0_i32_0 : i32, i32
  }
  func.func @transform_12(%arg0: i32) -> (i32, i32) {
    %c0_i32 = arith.constant 0 : i32
    %c0_i32_0 = arith.constant 0 : i32
    return %arg0, %c0_i32 : i32, i32
  }
}

</mosaic_0001>

<bundles_post_ra>
// kernel: net_forward.1
= control target key start
LH: loop header
LB: loop body
LE: loop exit
PB: predicated region body
PF: predicated region fallthrough
CT: control target
= control target key end

     0   :  { %17 = vsyncpa [#allocation3], 0  ;;  %s9784_s0 = inlined_call_operand.vmem [shape: s32[32,1], index: 0, kind: input, shape index: {}]   ;;  %s9785_s1 = inlined_call_operand.hbm [shape: f32[128,128], index: 1, kind: input, shape index: {}]   ;;  %s9786_s2 = inlined_call_operand.hbm [shape: bf16[384,128], index: 2, kind: input, shape index: {}]   ;;  %s9787_s3 = inlined_call_operand.vmem [shape: f32[1,128], index: 3, kind: input, shape index: {}]   ;;  %s9788_s4 = inlined_call_operand.hbm [shape: bf16[384,128], index: 4, kind: input, shape index: {}]   ;;  %s9789_s5 = inlined_call_operand.vmem [shape: f32[1,128], index: 5, kind: input, shape index: {}]   ;;  %s9790_s6 = inlined_call_operand.hbm [shape: bf16[128,1536], index: 6, kind: input, shape index: {}]   ;;  %s9791_s7 = inlined_call_operand.vmem [shape: f32[1,1536], index: 7, kind: input, shape index: {}]   ;;  %s9792_s8 = inlined_call_operand.hbm [shape: bf16[2,256,768], index: 8, kind: input, shape index: {}]   ;;  %s9793_s9 = inlined_call_operand.vmem [shape: f32[2,1,768], index: 9, kind: input, shape index: {}]   ;;  %s9794_s10 = inlined_call_operand.hbm [shape: bf16[2,256,128], index: 10, kind: input, shape index: {}]   ;;  %s9795_s11 = inlined_call_operand.vmem [shape: f32[1,128], index: 11, kind: input, shape index: {}]   ;;  %s9796_s12 = inlined_call_operand.hbm [shape: f32[2,128], index: 12, kind: output, shape index: {}]  }
   0x1   :  { %18 = vsyncpa [#allocation6], 0 }
   0x2   :  { %19 = vsyncpa [#allocation9], 0 }
   0x3   :  { %20 = vsyncpa [#allocation12], 0 }
   0x4   :  { %21 = vsyncpa [#allocation4], 0  ;;  %s7542_s21 = smov [#allocation5]   ;;  %s7378_s25 = scalar_lea.hbm %s9786_s2, 3072 }
   0x5   :  { %s41_s22 = sshll.u32 %s7542_s21, 4  ;;  %p7379_p0 = scmp.ne.s32.totalorder %s9786_s2, %s7378_s25  ;;  %s42_s22 = int_to_ptr.vmem [resolvable:$true] %s41_s22 }
   0x6   :  { %p7382_p1 = scmp.lt.u32.totalorder %s7378_s25, %s9786_s2 }
   0x8   :  { %p7384_p2 = pnand %p7382_p1, %p7379_p0 }
   0xa   :  { %7387 = shalt.err (!%p7384_p2)
}
   0xb   :  { %s7388_s30 = scalar_lea.vmem %s42_s22, 3072  ;;  %p7393_p4 = scmp.lt.s32.totalorder %s42_s22, %s42_s22 }
   0xc   :  { %p7389_p3 = scmp.ne.s32.totalorder %s42_s22, %s7388_s30  ;;  %p7394_p5 = scmp.lt.s32.totalorder %s7388_s30, %s7388_s30 }
   0xe   :  { %p7395_p6 = por %p7394_p5, %p7393_p4 }
  0x10   :  { %p7396_p7 = pnand %p7395_p6, %p7389_p3 }
  0x12   :  { %7399 = shalt.err (!%p7396_p7)
}
  0x13   :  { %s7543_s13 = smov 64   ;;  %s7544_s14 = smov 4  }
  0x14   :  { %47 = dma.hbm_to_vmem [thread:$0]  %s9786_s2, 3072, %s42_s22, [#allocation6], %s7543_s13, %s7543_s13, %s7544_s14  }
  0x15   :  { %s7545_s17 = smov [#allocation8]   ;;  %s7400_s21 = scalar_lea.hbm %s9790_s6, 12288 }
  0x16   :  { %s69_s18 = sshll.u32 %s7545_s17, 4  ;;  %p7401_p8 = scmp.ne.s32.totalorder %s9790_s6, %s7400_s21  ;;  %s70_s18 = int_to_ptr.vmem [resolvable:$true] %s69_s18 }
  0x17   :  { %p7404_p9 = scmp.lt.u32.totalorder %s7400_s21, %s9790_s6 }
  0x19   :  { %p7406_p10 = pnand %p7404_p9, %p7401_p8 }
  0x1b   :  { %7409 = shalt.err (!%p7406_p10)
}
  0x1c   :  { %s7410_s27 = scalar_lea.vmem %s70_s18, 12288  ;;  %p7415_p12 = scmp.lt.s32.totalorder %s70_s18, %s70_s18 }
  0x1d   :  { %p7411_p11 = scmp.ne.s32.totalorder %s70_s18, %s7410_s27  ;;  %p7416_p13 = scmp.lt.s32.totalorder %s7410_s27, %s7410_s27 }
  0x1f   :  { %p7417_p0 = por %p7416_p13, %p7415_p12 }
  0x21   :  { %p7418_p1 = pnand %p7417_p0, %p7411_p11 }
  0x23   :  { %7421 = shalt.err (!%p7418_p1)
}
  0x24   :  { %s7546_s2 = smov 768   ;;  %s7547_s22 = smov 48  }
  0x25   :  { %75 = dma.hbm_to_vmem [thread:$0]  %s9790_s6, 12288, %s70_s18, [#allocation9], %s7546_s2, %s7546_s2, %s7547_s22  }
  0x26   :  { %s7548_s30 = smov [#allocation2]   ;;  %s7422_s19 = scalar_lea.hbm %s9785_s1, 2048 }
  0x27   :  { %s29_s15 = sshll.u32 %s7548_s30, 4  ;;  %p7423_p2 = scmp.ne.s32.totalorder %s9785_s1, %s7422_s19  ;;  %s30_s15 = int_to_ptr.vmem [resolvable:$true] %s29_s15 }
  0x28   :  { %p7426_p3 = scmp.lt.u32.totalorder %s7422_s19, %s9785_s1 }
  0x2a   :  { %p7428_p4 = pnand %p7426_p3, %p7423_p2 }
  0x2c   :  { %7431 = shalt.err (!%p7428_p4)
}
  0x2d   :  { %s7432_s25 = scalar_lea.vmem %s30_s15, 2048  ;;  %p7437_p6 = scmp.lt.s32.totalorder %s30_s15, %s30_s15 }
  0x2e   :  { %p7433_p5 = scmp.ne.s32.totalorder %s30_s15, %s7432_s25  ;;  %p7438_p7 = scmp.lt.s32.totalorder %s7432_s25, %s7432_s25 }
  0x30   :  { %p7439_p8 = por %p7438_p7, %p7437_p6 }
  0x32   :  { %p7440_p9 = pnand %p7439_p8, %p7433_p5 }
  0x34   :  { %7443 = shalt.err (!%p7440_p9)
}
  0x35   :  { %s7549_s6 = smov 128   ;;  %s7550_s18 = smov 8  }
  0x36   :  { %35 = dma.hbm_to_vmem [thread:$0]  %s9785_s1, 2048, %s30_s15, [#allocation3], %s7549_s6, %s7549_s6, %s7550_s18  }
  0x37   :  { %s7551_s2 = smov [#allocation7]   ;;  %s7552_s28 = smov [#allocation10]  }
  0x38   :  { %s55_s22 = sshll.u32 %s7551_s2, 4  ;;  %s83_s29 = sshll.u32 %s7552_s28, 4  ;;  %s56_s22 = int_to_ptr.vmem [resolvable:$true] %s55_s22  ;;  %s84_s29 = int_to_ptr.vmem [resolvable:$true] %s83_s29 }
  0x39   :  { %s7444_s17 = scalar_lea.hbm %s9788_s4, 3072 }
  0x3a   :  { %p7445_p10 = scmp.ne.s32.totalorder %s9788_s4, %s7444_s17  ;;  %p7448_p11 = scmp.lt.u32.totalorder %s7444_s17, %s9788_s4 }
  0x3c   :  { %p7450_p12 = pnand %p7448_p11, %p7445_p10 }
  0x3e   :  { %7453 = shalt.err (!%p7450_p12)
}
  0x3f   :  { %s7454_s1 = scalar_lea.vmem %s56_s22, 3072  ;;  %p7459_p0 = scmp.lt.s32.totalorder %s56_s22, %s56_s22 }
  0x40   :  { %p7455_p13 = scmp.ne.s32.totalorder %s56_s22, %s7454_s1  ;;  %p7460_p1 = scmp.lt.s32.totalorder %s7454_s1, %s7454_s1 }
  0x42   :  { %p7461_p2 = por %p7460_p1, %p7459_p0 }
  0x44   :  { %p7462_p3 = pnand %p7461_p2, %p7455_p13 }
  0x46   :  { %7465 = shalt.err (!%p7462_p3)
}
  0x47   :  { %61 = dma.hbm_to_vmem [thread:$0]  %s9788_s4, 3072, %s56_s22, [#allocation6], %s7543_s13, %s7543_s13, %s7544_s14  }
  0x48   :  { %s7466_s18 = scalar_lea.hbm %s9792_s8, 24576 }
  0x49   :  { %p7467_p4 = scmp.ne.s32.totalorder %s9792_s8, %s7466_s18  ;;  %p7470_p5 = scmp.lt.u32.totalorder %s7466_s18, %s9792_s8 }
  0x4b   :  { %p7472_p6 = pnand %p7470_p5, %p7467_p4 }
  0x4d   :  { %7475 = shalt.err (!%p7472_p6)
}
  0x4e   :  { %s7476_s30 = scalar_lea.vmem %s84_s29, 24576  ;;  %p7481_p8 = scmp.lt.s32.totalorder %s84_s29, %s84_s29 }
  0x4f   :  { %p7477_p7 = scmp.ne.s32.totalorder %s84_s29, %s7476_s30  ;;  %p7482_p9 = scmp.lt.s32.totalorder %s7476_s30, %s7476_s30 }
  0x51   :  { %p7483_p10 = por %p7482_p9, %p7481_p8 }
  0x53   :  { %p7484_p11 = pnand %p7483_p10, %p7477_p7 }
  0x55   :  { %7487 = shalt.err (!%p7484_p11)
}
  0x56   :  { %s7553_s4 = smov 384   ;;  %s7554_s22 = smov 24  }
  0x57   :  { %89 = dma.hbm_to_vmem [thread:$0]  %s9792_s8, 24576, %s84_s29, [#allocation9], %s7553_s4, %s7553_s4, %s7554_s22  }
  0x58   :  { %s7555_s19 = smov [#allocation11]   ;;  %s7488_s1 = scalar_lea.hbm %s9794_s10, 4096 }
  0x59   :  { %s97_s20 = sshll.u32 %s7555_s19, 4  ;;  %p7489_p12 = scmp.ne.s32.totalorder %s9794_s10, %s7488_s1  ;;  %s98_s20 = int_to_ptr.vmem [resolvable:$true] %s97_s20 }
  0x5a   :  { %p7492_p13 = scmp.lt.u32.totalorder %s7488_s1, %s9794_s10 }
  0x5c   :  { %p7494_p0 = pnand %p7492_p13, %p7489_p12 }
  0x5e   :  { %7497 = shalt.err (!%p7494_p0)
}
  0x5f   :  { %s7498_s18 = scalar_lea.vmem %s98_s20, 4096  ;;  %p7503_p2 = scmp.lt.s32.totalorder %s98_s20, %s98_s20 }
  0x60   :  { %p7499_p1 = scmp.ne.s32.totalorder %s98_s20, %s7498_s18  ;;  %p7504_p3 = scmp.lt.s32.totalorder %s7498_s18, %s7498_s18 }
  0x62   :  { %p7505_p4 = por %p7504_p3, %p7503_p2 }
  0x64   :  { %p7506_p5 = pnand %p7505_p4, %p7499_p1 }
  0x66   :  { %7509 = shalt.err (!%p7506_p5)
}
  0x67   :  { %103 = dma.hbm_to_vmem [thread:$0]  %s9794_s10, 4096, %s98_s20, [#allocation12], %s7543_s13, %s7543_s13, %s7544_s14  }
  0x68   :  { %7532 = dma.done.wait [#allocation3], 2048  }
  0x69   :  { %7533 = vsyncadd [#allocation3], 4294965248 }
  0x6a   :  { %7534 = dma.done.wait [#allocation6], 6144  }
  0x6b   :  { %7535 = vsyncadd [#allocation6], 4294961152 }
  0x6c   :  { %7536 = dma.done.wait [#allocation9], 36864  }
  0x6d   :  { %7537 = vsyncadd [#allocation9], 4294930432 }
  0x6e   :  { %7538 = dma.done.wait [#allocation12], 4096  }
  0x6f   :  { %7539 = vsyncadd [#allocation12], 4294963200  ;;  %v9797_v0 = vmov 0   ;;  %v125_v1 = vld [vmem:[%s9784_s0] sm:$0xff]  ;;  %v127_v2 = vld [vmem:[%s9784_s0 + $0x10] sm:$0xff]  ;;  %v129_v43 = vlaneseq  ;;  %v7557_v47 = vmov 1.0  }
  0x70   :  { %6489 = vset.pattern.permute.xlu0 %v9797_v0  ;;  %6490 = vset.pattern.permute.xlu1 %v9797_v0  ;;  %v126_v3 = vld [vmem:[%s9784_s0 + $0x8] sm:$0xff]  ;;  %v155_v4 = vld [vmem:[#allocation2] sm:$0xff]  ;;  %v128_v6 = vld [vmem:[%s9784_s0 + $0x18] sm:$0xff]  ;;  %vm318_vm4 = vcmask 1040384   ;;  %vm347_vm5 = vcmask 1046528   ;;  %vm7558_vm7 = vmmov 1  }
  0x71   :  { %132 = vperm.xlu0 %6489, %v125_v1   ;;  %138 = vperm.xlu1 %6490, %v127_v2   ;;  %v156_v5 = vld [vmem:[#allocation2 + $0x8] sm:$0xff]  ;;  %v157_v8 = vld [vmem:[#allocation2 + $0x10] sm:$0xff]  ;;  %v158_v9 = vld [vmem:[#allocation2 + $0x18] sm:$0xff]  ;;  %v130_v44 = vand.u32 127, %v129_v43  ;;  %v7723_v60 = vshrl.u32 %v129_v43, 7  ;;  %vm7560_vm15 = vmmov 0  }
  0x72   :  { %v6436_v7 = vpack.c.bf16 %v156_v5, %v155_v4  ;;  %v6440_v10 = vpack.c.bf16 %v158_v9, %v157_v8  ;;  %v159_v11 = vld [vmem:[#allocation2 + $0x20] sm:$0xff]  ;;  %v160_v12 = vld [vmem:[#allocation2 + $0x28] sm:$0xff]  ;;  %v161_v13 = vld [vmem:[#allocation2 + $0x30] sm:$0xff]  ;;  %s7562_s15 = smov [#allocation13]  }
  0x73   :  { %v162_v14 = vld [vmem:[#allocation2 + $0x38] sm:$0xff]  ;;  %v6444_v15 = vpack.c.bf16 %v160_v12, %v159_v11  ;;  %v6491_v16 = vld [vmem:[#allocation5 + $0x40] sm:$0xff]   ;;  %v6493_v18 = vld [vmem:[#allocation5 + $0x48] sm:$0xff]   ;;  %v266_v61 = vand.u32 15, %v7723_v60  ;;  %v7727_v62 = vadd.s32 8, %v7723_v60  ;;  %v261_v63 = vadd.s32 24, %v7723_v60 }
  0x74   :  { %6437 = vmatprep.subr.bf16.mxu0 %v6436_v7  ;;  %v6492_v17 = vld [vmem:[#allocation5] sm:$0xff]   ;;  %v6448_v19 = vpack.c.bf16 %v162_v14, %v161_v13  ;;  %v164_v21 = vld [vmem:[#allocation2 + $0x48] sm:$0xff]  ;;  %6245 = vmatprep.subr.bf16.mxu1 %v6491_v16  ;;  %v6496_v23 = vld [vmem:[#allocation5 + $0x50] sm:$0xff]   ;;  %s5759_s24 = sshll.u32 %s7562_s15, 4  ;;  %s5760_s24 = int_to_ptr.vmem [resolvable:$true] %s5759_s24 }
  0x75   :  { %135 = vperm.xlu0 %6489, %v126_v3   ;;  %141 = vperm.xlu1 %6490, %v128_v6   ;;  %v163_v20 = vld [vmem:[#allocation2 + $0x40] sm:$0xff]  ;;  %v6494_v22 = vld [vmem:[#allocation5 + $0x8] sm:$0xff]   ;;  %v165_v25 = vld [vmem:[#allocation2 + $0x50] sm:$0xff]  ;;  %vm7730_vm6 = vcmp.ne.s32.totalorder %v266_v61, 0  ;;  %v273_v3 = vand.u32 15, %v7727_v62  ;;  %v287_v11 = vand.u32 15, %v261_v63  ;;  %p7515_p7 = scmp.lt.s32.totalorder %s5760_s24, %s5760_s24 }
  0x76   :  { %6439 = vmatpush3.bf16.msra.mxu0 %v6436_v7  ;;  %6246 = vmatpush3.bf16.msra.mxu1 %v6492_v17  ;;  %v6452_v24 = vpack.c.bf16 %v164_v21, %v163_v20  ;;  %v166_v26 = vld [vmem:[#allocation2 + $0x58] sm:$0xff]  ;;  %v6497_v27 = vld [vmem:[#allocation5 + $0x10] sm:$0xff]   ;;  %v167_v30 = vld [vmem:[#allocation2 + $0x60] sm:$0xff]  ;;  %v260_v7 = vadd.s32 16, %v7723_v60  ;;  %s7510_s25 = scalar_lea.vmem %s5760_s24, 32 }
  0x77   :  { %6441 = vmatprep.subr.bf16.mxu0 %v6440_v10  ;;  %6247 = vmatprep.subr.bf16.mxu1 %v6493_v18  ;;  %v6499_v28 = vld [vmem:[#allocation5 + $0x58] sm:$0xff]   ;;  %v6456_v29 = vpack.c.bf16 %v166_v26, %v165_v25  ;;  %v168_v31 = vld [vmem:[#allocation2 + $0x68] sm:$0xff]  ;;  %v169_v33 = vld [vmem:[#allocation2 + $0x70] sm:$0xff]  ;;  %vm7742_vm9 = vcmp.ne.s32.totalorder %v273_v3, 15  ;;  %vm6220_vm10 = vcmp.ne.s32.totalorder %v287_v11, 15  ;;  %p7511_p6 = scmp.ne.s32.totalorder %s5760_s24, %s7510_s25  ;;  %p7516_p8 = scmp.lt.s32.totalorder %s7510_s25, %s7510_s25 }
  0x78   :  { %v6500_v32 = vld [vmem:[#allocation5 + $0x18] sm:$0xff]   ;;  %v6502_v35 = vld [vmem:[#allocation5 + $0x60] sm:$0xff]   ;;  %v6460_v36 = vpack.c.bf16 %v168_v31, %v167_v30  ;;  %v6505_v38 = vld [vmem:[#allocation5 + $0x68] sm:$0xff]   ;;  %v280_v21 = vand.u32 15, %v260_v7 }
  0x79   :  { %v170_v34 = vld [vmem:[#allocation2 + $0x78] sm:$0xff]  ;;  %v6503_v37 = vld [vmem:[#allocation5 + $0x20] sm:$0xff]   ;;  %v6506_v40 = vld [vmem:[#allocation5 + $0x28] sm:$0xff]   ;;  %p7517_p9 = por %p7516_p8, %p7515_p7 }
  0x7a   :  { %6443 = vmatpush3.bf16.msra.mxu0 %v6440_v10  ;;  %6248 = vmatpush3.bf16.msra.mxu1 %v6494_v22  ;;  %v6464_v39 = vpack.c.bf16 %v170_v34, %v169_v33  ;;  %v6508_v41 = vld [vmem:[#allocation5 + $0x70] sm:$0xff]   ;;  %v6495_v42 = vld [vmem:[#allocation5 + $0x80] sm:$0xff]   ;;  %v6498_v48 = vld [vmem:[#allocation5 + $0x88] sm:$0xff]   ;;  %vm6218_vm13 = vcmp.ne.s32.totalorder %v280_v21, 0 }
  0x7b   :  { %6445 = vmatprep.subr.bf16.mxu0 %v6444_v15  ;;  %6249 = vmatprep.subr.bf16.mxu1 %v6496_v23  ;;  %v6501_v51 = vld [vmem:[#allocation5 + $0x90] sm:$0xff]   ;;  %v6504_v52 = vld [vmem:[#allocation5 + $0x98] sm:$0xff]   ;;  %v6507_v53 = vld [vmem:[#allocation5 + $0xa0] sm:$0xff]   ;;  %p7518_p10 = pnand %p7517_p9, %p7511_p6 }
  0x7c   :  { %v6509_v54 = vld [vmem:[#allocation5 + $0x30] sm:$0xff]   ;;  %v6510_v55 = vld [vmem:[#allocation5 + $0xa8] sm:$0xff]   ;;  %v6511_v56 = vld [vmem:[#allocation5 + $0x78] sm:$0xff]  }
  0x7d   :  { %v6512_v57 = vld [vmem:[#allocation5 + $0x38] sm:$0xff]   ;;  %v6513_v58 = vld [vmem:[#allocation5 + $0xb0] sm:$0xff]   ;;  %vm5805_vm8 = vmpackc.low %vm7558_vm7, %vm7730_vm6  ;;  %vm925_vm6 = vcmask 1044484  }
  0x7e   :  { %6447 = vmatpush3.bf16.msra.mxu0 %v6444_v15  ;;  %6250 = vmatpush3.bf16.msra.mxu1 %v6497_v27  ;;  %v6514_v59 = vld [vmem:[#allocation5 + $0xb8] sm:$0xff]   ;;  %vm5813_vm11 = vmpackc.low %vm7742_vm9, %vm7558_vm7  ;;  %v6515_v33 = vld [vmem:[#allocation7 + $0x40] sm:$0xff]   ;;  %vm931_vm9 = vcmask 1047559  }
  0x7f   :  { %6449 = vmatprep.subr.bf16.mxu0 %v6448_v19  ;;  %6251 = vmatprep.subr.bf16.mxu1 %v6499_v28  ;;  %vm5817_vm12 = vmpackc.low %vm6220_vm10, %vm7558_vm7  ;;  %v6516_v34 = vld [vmem:[#allocation7] sm:$0xff]   ;;  %v6524_v43 = vld [vmem:[#allocation7 + $0x58] sm:$0xff]  }
  0x80   :  { %vm5809_vm14 = vmpackc.low %vm7558_vm7, %vm6218_vm13  ;;  %vm927_vm7 = vcmask 1045509  }
  0x82   :  { %6451 = vmatpush3.bf16.msra.mxu0 %v6448_v19  ;;  %6252 = vmatpush3.bf16.msra.mxu1 %v6500_v32 }
  0x83   :  { %6453 = vmatprep.subr.bf16.mxu0 %v6452_v24  ;;  %6253 = vmatprep.subr.bf16.mxu1 %v6502_v35  ;;  %v6517_v35 = vld [vmem:[#allocation7 + $0x80] sm:$0xff]  }
  0x86   :  { %6455 = vmatpush3.bf16.msra.mxu0 %v6452_v24  ;;  %6254 = vmatpush3.bf16.msra.mxu1 %v6503_v37  ;;  %v6518_v37 = vld [vmem:[#allocation7 + $0x48] sm:$0xff]  }
  0x87   :  { %6457 = vmatprep.subr.bf16.mxu0 %v6456_v29  ;;  %6255 = vmatprep.subr.bf16.mxu1 %v6505_v38  ;;  %v6519_v38 = vld [vmem:[#allocation7 + $0x8] sm:$0xff]  }
  0x8a   :  { %6459 = vmatpush3.bf16.msra.mxu0 %v6456_v29  ;;  %6256 = vmatpush3.bf16.msra.mxu1 %v6506_v40  ;;  %v6521_v40 = vld [vmem:[#allocation7 + $0x50] sm:$0xff]  }
  0x8b   :  { %6461 = vmatprep.subr.bf16.mxu0 %v6460_v36  ;;  %6257 = vmatprep.subr.bf16.mxu1 %v6508_v41  ;;  %v6522_v41 = vld [vmem:[#allocation7 + $0x10] sm:$0xff]  }
  0x8e   :  { %6463 = vmatpush3.bf16.msra.mxu0 %v6460_v36  ;;  %6258 = vmatpush3.bf16.msra.mxu1 %v6509_v54  ;;  %v7559_v36 = vmov 0.0   ;;  %v6535_v54 = vld [vmem:[#allocation7 + $0xb0] sm:$0xff]  }
  0x8f   :  { %6465 = vmatprep.subr.bf16.mxu0 %v6464_v39  ;;  %6259 = vmatprep.subr.bf16.mxu1 %v6511_v56  ;;  %v6537_v56 = vld [vmem:[#allocation7 + $0x38] sm:$0xff]  }
  0x92   :  { %6467 = vmatpush3.bf16.msra.mxu0 %v6464_v39  ;;  %6260 = vmatpush3.bf16.msra.mxu1 %v6512_v57  ;;  %v6520_v39 = vld [vmem:[#allocation7 + $0x88] sm:$0xff]   ;;  %v6538_v57 = vld [vmem:[#allocation7 + $0xb8] sm:$0xff]  }
  0x93   :  { %6396 = vmatprep.subr.bf16.mxu0 %v6495_v42  ;;  %6283 = vmatprep.subr.bf16.mxu1 %v6515_v33 }
  0xf0   :  { %v133_v45 = vpop.permute.xlu0 %132  ;;  %v139_v46 = vpop.permute.xlu1 %138 }
  0xf1   :  { %vm143_vm0 = vcmp.eq.s32.totalorder %v133_v45, %v130_v44  ;;  %vm145_vm1 = vcmp.eq.s32.totalorder %v139_v46, %v130_v44  ;;  %v6526_v45 = vld [vmem:[#allocation7 + $0x98] sm:$0xff]   ;;  %v6527_v46 = vld [vmem:[#allocation7 + $0x60] sm:$0xff]  }
  0xf2   :  { %6390 = vmatprep.mubr.msk.f32.mxu0 %vm143_vm0, %v7557_v47  ;;  %vm766_vm0 = vcmask 1041408  }
  0xf4   :  { %v136_v49 = vpop.permute.xlu0 %135  ;;  %v142_v50 = vpop.permute.xlu1 %141 }
  0xf5   :  { %vm144_vm2 = vcmp.eq.s32.totalorder %v136_v49, %v130_v44  ;;  %vm146_vm3 = vcmp.eq.s32.totalorder %v142_v50, %v130_v44  ;;  %v6525_v44 = vld [vmem:[#allocation7 + $0x18] sm:$0xff]   ;;  %v6530_v49 = vld [vmem:[#allocation7 + $0x68] sm:$0xff]  }
  0xf6   :  { %6391 = vmatmul.mubr.msk.f32.vlgmr.msra.gmra.mrb[0].mxu0 %vm144_vm2, %v7557_v47  ;;  %v6531_v50 = vld [vmem:[#allocation7 + $0x28] sm:$0xff]   ;;  %vm933_vm2 = vcmask 1041409  }
  0xf7   :  { %6393 = vmatprep.mubr.msk.f32.mxu0 %vm145_vm1, %v7557_v47  ;;  %6397 = vmatpush3.bf16.msra.mxu0 %v6495_v42  ;;  %v6523_v42 = vld [vmem:[#allocation7 + $0x90] sm:$0xff]   ;;  %vm921_vm1 = vcmask 1042434  }
  0xf8   :  { %6398 = vmatprep.subr.bf16.mxu0 %v6498_v48 }
  0xfa   :  { %6394 = vmatmul.mubr.msk.f32.gmra.mrb[2].mxu0 %vm146_vm3, %v7557_v47  ;;  %v6528_v47 = vld [vmem:[#allocation7 + $0x20] sm:$0xff]   ;;  %vm923_vm3 = vcmask 1043459  }
  0xfb   :  { %6399 = vmatpush3.bf16.msra.mxu0 %v6498_v48  ;;  %v6529_v48 = vld [vmem:[#allocation7 + $0xa0] sm:$0xff]  }
  0xfc   :  { %6400 = vmatprep.subr.bf16.mxu0 %v6501_v51 }
  0xff   :  { %6401 = vmatpush3.bf16.msra.mxu0 %v6501_v51  ;;  %v6532_v51 = vld [vmem:[#allocation7 + $0xa8] sm:$0xff]  }
 0x100   :  { %6402 = vmatprep.subr.bf16.mxu0 %v6504_v52 }
 0x103   :  { %6403 = vmatpush3.bf16.msra.mxu0 %v6504_v52  ;;  %v6533_v52 = vld [vmem:[#allocation7 + $0x70] sm:$0xff]  }
 0x104   :  { %6404 = vmatprep.subr.bf16.mxu0 %v6507_v53 }
 0x107   :  { %6405 = vmatpush3.bf16.msra.mxu0 %v6507_v53  ;;  %v6534_v53 = vld [vmem:[#allocation7 + $0x30] sm:$0xff]  }
 0x108   :  { %6406 = vmatprep.subr.bf16.mxu0 %v6510_v55 }
 0x10b   :  { %6407 = vmatpush3.bf16.msra.mxu0 %v6510_v55  ;;  %v6536_v55 = vld [vmem:[#allocation7 + $0x78] sm:$0xff]  }
 0x10c   :  { %6408 = vmatprep.subr.bf16.mxu0 %v6513_v58 }
 0x10f   :  { %6409 = vmatpush3.bf16.msra.mxu0 %v6513_v58  ;;  %v7561_v58 = vmov 1983009808  }
 0x110   :  { %6410 = vmatprep.subr.bf16.mxu0 %v6514_v59 }
 0x113   :  { %6411 = vmatpush3.bf16.msra.mxu0 %v6514_v59  ;;  %v684_v59 = vunpack.c.l.s4 %v7561_v58 }
 0x114   :  { %6416 = vmatprep.subr.bf16.mxu0 %v7559_v36 }
 0x1c9   :  { %v6392_v1 = vpop.f32.mrb[0].mxu0 }
 0x1ca   :  { %v320_v4 = vrot.slane %v6392_v1, 7  ;;  %v349_v5 = vrot.slane %v6392_v1, 1  ;;  %v237_v6 = vpop.f32.mrb[1].mxu0 }
 0x1cb   :  { %v319_v8 = vrot.slane %v237_v6, 7  ;;  %v348_v9 = vrot.slane %v237_v6, 1  ;;  %v373_v10 = vpack.c.bf16 %v6392_v1, %v237_v6  ;;  %v5779_v1 = vld [vmem:[%s9787_s3] ss:$0 sm:$0xff] }
 0x1cd   :  { %v321_v12 = vsel %vm318_vm4, %v319_v8, %v320_v4  ;;  %v330_v13 = vsel %vm318_vm4, 0.0, %v319_v8  ;;  %v350_v14 = vsel %vm347_vm5, %v348_v9, %v349_v5  ;;  %v6395_v15 = vpop.f32.mrb[2].mxu0  ;;  %608 = vmatprep.mubr.bf16.mxu1 %v373_v10 }
 0x1ce   :  { %v5806_v17 = vpack.c.bf16 %v321_v12, %v330_v13  ;;  %v324_v18 = vrot.slane %v6395_v15, 7  ;;  %v353_v19 = vrot.slane %v6395_v15, 1  ;;  %v247_v20 = vpop.f32.mrb[3].mxu0 }
 0x1cf   :  { %v322_v22 = vrot.slane %v247_v20, 7  ;;  %v351_v23 = vrot.slane %v247_v20, 1  ;;  %v376_v24 = vpack.c.bf16 %v6395_v15, %v247_v20 }
 0x1d0   :  { %v359_v25 = vsel %vm347_vm5, %v353_v19, 0.0  ;;  %5807 = vmatmul.mubr.msk.bf16.vlgmr.msra.gmra.mrb[0].mxu1 %vm5805_vm8, %v5806_v17  ;;  %vm929_vm8 = vcmask 1046534  }
 0x1d1   :  { %v323_v26 = vsel %vm318_vm4, %v320_v4, %v322_v22  ;;  %v325_v27 = vsel %vm318_vm4, %v322_v22, %v324_v18  ;;  %v352_v28 = vsel %vm347_vm5, %v349_v5, %v351_v23  ;;  %v354_v29 = vsel %vm347_vm5, %v351_v23, %v353_v19  ;;  %616 = vmatprep.mubr.bf16.mxu1 %v376_v24 }
 0x1d2   :  { %v5818_v30 = vpack.c.bf16 %v359_v25, %v354_v29  ;;  %v5814_v31 = vpack.c.bf16 %v352_v28, %v350_v14  ;;  %v5810_v32 = vpack.c.bf16 %v325_v27, %v323_v26  ;;  %6284 = vmatpush3.bf16.msra.mxu1 %v6516_v34  ;;  %v685_v5 = vunpack.c.0.s8 %v684_v59 }
 0x1d3   :  { %6285 = vmatprep.subr.bf16.mxu1 %v6518_v37  ;;  %v891_v25 = vand.u32 7, %v7727_v62  ;;  %v884_v28 = vand.u32 7, %v7723_v60 }
 0x1d4   :  { %6412 = vmatprep.mubr.msk.bf16.mxu0 %vm5813_vm11, %v5814_v31  ;;  %v7760_v12 = vsub.s32 %v685_v5, %v7723_v60 }
 0x1d5   :  { %6413 = vmatmul.mubr.msk.bf16.vlgmr.msra.gmra.mrb[4].mxu0 %vm5817_vm12, %v5818_v30  ;;  %vm7833_vm10 = vcmp.ne.s32.totalorder %v891_v25, 7  ;;  %vm7841_vm11 = vcmp.ne.s32.totalorder %v891_v25, 0  ;;  %vm7847_vm12 = vcmp.ne.s32.totalorder %v884_v28, 0  ;;  %vm7854_vm13 = vcmp.ne.s32.totalorder %v884_v28, 7 }
 0x1d6   :  { %6417 = vmatpush3.bf16.msra.mxu0 %v6517_v35  ;;  %6286 = vmatpush3.bf16.msra.mxu1 %v6519_v38 }
 0x1d7   :  { %6418 = vmatprep.subr.bf16.mxu0 %v7559_v36  ;;  %6287 = vmatprep.subr.bf16.mxu1 %v6521_v40 }
 0x1d8   :  { %5811 = vmatmul.mubr.msk.bf16.gmra.mrb[4].mxu1 %vm5809_vm14, %v5810_v32  ;;  %6432 = vmatprep.mubr.msk.bf16.mxu0 %vm7560_vm15, %v7559_v36  ;;  %vm5852_vm14 = vmpackc.low %vm7833_vm10, %vm7854_vm13 }
 0x1da   :  { %6419 = vmatpush3.bf16.msra.mxu0 %v6520_v39  ;;  %6288 = vmatpush3.bf16.msra.mxu1 %v6522_v41 }
 0x1db   :  { %6420 = vmatprep.subr.bf16.mxu0 %v7559_v36  ;;  %6289 = vmatprep.subr.bf16.mxu1 %v6524_v43 }
 0x1de   :  { %6421 = vmatpush3.bf16.msra.mxu0 %v6523_v42  ;;  %6290 = vmatpush3.bf16.msra.mxu1 %v6525_v44 }
 0x1df   :  { %6422 = vmatprep.subr.bf16.mxu0 %v7559_v36  ;;  %6291 = vmatprep.subr.bf16.mxu1 %v6527_v46 }
 0x1e2   :  { %6423 = vmatpush3.bf16.msra.mxu0 %v6526_v45  ;;  %6292 = vmatpush3.bf16.msra.mxu1 %v6528_v47 }
 0x1e3   :  { %6424 = vmatprep.subr.bf16.mxu0 %v7559_v36  ;;  %6293 = vmatprep.subr.bf16.mxu1 %v6530_v49 }
 0x1e6   :  { %6425 = vmatpush3.bf16.msra.mxu0 %v6529_v48  ;;  %6294 = vmatpush3.bf16.msra.mxu1 %v6531_v50 }
 0x1e7   :  { %6426 = vmatprep.subr.bf16.mxu0 %v7559_v36  ;;  %6295 = vmatprep.subr.bf16.mxu1 %v6533_v52 }
 0x1ea   :  { %6427 = vmatpush3.bf16.msra.mxu0 %v6532_v51  ;;  %6296 = vmatpush3.bf16.msra.mxu1 %v6534_v53 }
 0x1eb   :  { %6428 = vmatprep.subr.bf16.mxu0 %v7559_v36  ;;  %6297 = vmatprep.subr.bf16.mxu1 %v6536_v55 }
 0x1ee   :  { %6429 = vmatpush3.bf16.msra.mxu0 %v6535_v54  ;;  %6298 = vmatpush3.bf16.msra.mxu1 %v6537_v56 }
 0x1ef   :  { %6430 = vmatprep.subr.bf16.mxu0 %v7559_v36 }
 0x1f2   :  { %6431 = vmatpush3.bf16.msra.mxu0 %v6538_v57 }
 0x2a3   :  { %v6261_v61 = vpop.f32.mrb[0].mxu1 }
 0x2a4   :  { %v6262_v63 = vpop.f32.mrb[1].mxu1 }
 0x2a5   :  { %v6263_v2 = vadd.f32 %v6262_v63, %v6261_v61  ;;  %v6264_v3 = vpop.f32.mrb[2].mxu1 }
 0x2a6   :  { %v6265_v4 = vpop.f32.mrb[3].mxu1 }
 0x2a7   :  { %v6266_v6 = vadd.f32 %v6265_v4, %v6264_v3  ;;  %v611_v7 = vadd.f32 %v6263_v2, %v5779_v1 }
 0x2a8   :  { %v6414_v8 = vpop.f32.mrb[4].mxu0 }
 0x2a9   :  { %v659_v9 = vpop.f32.mrb[5].mxu0  ;;  %v614_v10 = vadd.f32 %v6266_v6, %v5779_v1 }
 0x2aa   :  { %v660_v11 = vadd.f32 %v659_v9, %v611_v7  ;;  %v7762_v13 = vpop.f32.mrb[6].mxu0 }
 0x2ab   :  { %v6267_v14 = vpop.f32.mrb[4].mxu1  ;;  %v662_v15 = vpop.f32.mrb[7].mxu0 }
 0x2ac   :  { %v674_v16 = vmax.f32 %v660_v11, 0.0  ;;  %v663_v17 = vadd.f32 %v662_v15, %v614_v10  ;;  %v6268_v18 = vpop.f32.mrb[5].mxu1 }
 0x2ad   :  { %v6269_v19 = vadd.f32 %v6268_v18, %v6267_v14  ;;  %v6270_v20 = vpop.f32.mrb[6].mxu1 }
 0x2ae   :  { %v682_v21 = vcombine.high %v674_v16, %v674_v16  ;;  %v689_v22 = vrot.slane %v674_v16, %v7760_v12  ;;  %v675_v23 = vmax.f32 %v663_v17, 0.0  ;;  %v6271_v24 = vpop.f32.mrb[7].mxu1 }
 0x2af   :  { %v619_v26 = vadd.f32 %v6269_v19, %v5779_v1  ;;  %v6272_v27 = vadd.f32 %v6271_v24, %v6270_v20 }
 0x2b0   :  { %v696_v29 = vrot.slane %v682_v21, %v7760_v12  ;;  %v697_v30 = vcombine.high %v689_v22, %v689_v22  ;;  %v767_v31 = vsel %vm766_vm0, %v689_v22, -inf  ;;  %v699_v32 = vcombine.high %v675_v23, %v675_v23 }
 0x2b1   :  { %v768_v33 = vrot.slane %v767_v31, 4  ;;  %v706_v34 = vrot.slane %v675_v23, %v7760_v12  ;;  %v668_v35 = vadd.f32 %v6414_v8, %v619_v26  ;;  %v622_v36 = vadd.f32 %v6272_v27, %v5779_v1 }
 0x2b2   :  { %v698_v37 = vcombine.high %v696_v29, %v696_v29  ;;  %v774_v38 = vsel %vm766_vm0, %v697_v30, -inf  ;;  %v781_v39 = vsel %vm766_vm0, %v696_v29, -inf  ;;  %v713_v40 = vrot.slane %v699_v32, %v7760_v12 }
 0x2b3   :  { %v769_v41 = vmax.f32 %v767_v31, %v768_v33  ;;  %v775_v42 = vrot.slane %v774_v38, 4  ;;  %v782_v43 = vrot.slane %v781_v39, 4  ;;  %v714_v44 = vcombine.high %v706_v34, %v706_v34 }
 0x2b4   :  { %v788_v45 = vsel %vm766_vm0, %v698_v37, -inf  ;;  %v715_v46 = vcombine.high %v713_v40, %v713_v40  ;;  %v795_v47 = vsel %vm766_vm0, %v706_v34, -inf  ;;  %v809_v48 = vsel %vm766_vm0, %v713_v40, -inf }
 0x2b5   :  { %v770_v49 = vrot.slane %v769_v41, 2  ;;  %v776_v50 = vmax.f32 %v774_v38, %v775_v42  ;;  %v783_v51 = vmax.f32 %v781_v39, %v782_v43  ;;  %v789_v52 = vrot.slane %v788_v45, 4 }
 0x2b6   :  { %v796_v53 = vrot.slane %v795_v47, 4  ;;  %v802_v54 = vsel %vm766_vm0, %v714_v44, -inf  ;;  %v810_v55 = vrot.slane %v809_v48, 4  ;;  %v816_v56 = vsel %vm766_vm0, %v715_v46, -inf }
 0x2b7   :  { %v771_v57 = vmax.f32 %v769_v41, %v770_v49  ;;  %v777_v58 = vrot.slane %v776_v50, 2  ;;  %v784_v59 = vrot.slane %v783_v51, 2  ;;  %v790_v61 = vmax.f32 %v788_v45, %v789_v52 }
 0x2b8   :  { %v797_v63 = vmax.f32 %v795_v47, %v796_v53  ;;  %v803_v1 = vrot.slane %v802_v54, 4  ;;  %v811_v2 = vmax.f32 %v809_v48, %v810_v55  ;;  %v817_v3 = vrot.slane %v816_v56, 4 }
 0x2b9   :  { %v772_v4 = vrot.slane %v771_v57, 1  ;;  %v778_v5 = vmax.f32 %v776_v50, %v777_v58  ;;  %v785_v6 = vmax.f32 %v783_v51, %v784_v59  ;;  %v791_v7 = vrot.slane %v790_v61, 2 }
 0x2ba   :  { %v798_v8 = vrot.slane %v797_v63, 2  ;;  %v804_v9 = vmax.f32 %v802_v54, %v803_v1  ;;  %v812_v10 = vrot.slane %v811_v2, 2  ;;  %v7778_v11 = vmax.f32 %v816_v56, %v817_v3 }
 0x2bb   :  { %v773_v14 = vmax.f32 %v771_v57, %v772_v4  ;;  %v779_v15 = vrot.slane %v778_v5, 1  ;;  %v786_v16 = vrot.slane %v785_v6, 1  ;;  %v792_v17 = vmax.f32 %v790_v61, %v791_v7 }
 0x2bc   :  { %v799_v18 = vmax.f32 %v797_v63, %v798_v8  ;;  %v805_v19 = vrot.slane %v804_v9, 2  ;;  %v7780_v20 = vmax.f32 %v811_v2, %v812_v10  ;;  %v819_v21 = vrot.slane %v7778_v11, 2 }
 0x2bd   :  { %v780_v22 = vmax.f32 %v778_v5, %v779_v15  ;;  %v7783_v23 = vmax.f32 %v785_v6, %v786_v16  ;;  %v793_v24 = vrot.slane %v792_v17, 1  ;;  %v676_v26 = vmax.f32 %v668_v35, 0.0 }
 0x2be   :  { %v800_v27 = vrot.slane %v799_v18, 1  ;;  %v806_v29 = vmax.f32 %v804_v9, %v805_v19  ;;  %v814_v30 = vrot.slane %v7780_v20, 1  ;;  %v671_v31 = vadd.f32 %v7762_v13, %v622_v36 }
 0x2bf   :  { %v7787_v32 = vmax.f32 %v792_v17, %v793_v24  ;;  %v922_v33 = vsel %vm921_vm1, %v780_v22, %v773_v14  ;;  %v953_v34 = vsel %vm933_vm2, %v7783_v23, %v780_v22  ;;  %v7793_v37 = vsel %vm933_vm2, %v780_v22, %v773_v14 }
 0x2c0   :  { %v924_v38 = vsel %vm923_vm3, %v7783_v23, %v922_v33  ;;  %v7797_v35 = vmax.f32 %v799_v18, %v800_v27  ;;  %v807_v39 = vrot.slane %v806_v29, 1  ;;  %v716_v40 = vcombine.high %v676_v26, %v676_v26 }
 0x2c1   :  { %v926_v13 = vsel %vm925_vm6, %v7787_v32, %v924_v38  ;;  %v954_v36 = vsel %vm921_vm1, %v7787_v32, %v953_v34  ;;  %v723_v41 = vrot.slane %v676_v26, %v7760_v12  ;;  %v677_v42 = vmax.f32 %v671_v31, 0.0 }
 0x2c2   :  { %v7804_v43 = vmax.f32 %v806_v29, %v807_v39  ;;  %v928_v44 = vsel %vm927_vm7, %v7797_v35, %v926_v13  ;;  %v955_v45 = vsel %vm923_vm3, %v7797_v35, %v954_v36  ;;  %v730_v46 = vrot.slane %v716_v40, %v7760_v12 }
 0x2c3   :  { %v731_v47 = vcombine.high %v723_v41, %v723_v41  ;;  %v823_v48 = vsel %vm766_vm0, %v723_v41, -inf  ;;  %v733_v49 = vcombine.high %v677_v42, %v677_v42  ;;  %v740_v50 = vrot.slane %v677_v42, %v7760_v12 }
 0x2c4   :  { %v930_v51 = vsel %vm929_vm8, %v7804_v43, %v928_v44  ;;  %v7817_v52 = vsel %vm925_vm6, %v7804_v43, %v955_v45  ;;  %v732_v53 = vcombine.high %v730_v46, %v730_v46  ;;  %v824_v54 = vrot.slane %v823_v48, 4 }
 0x2c5   :  { %v830_v55 = vsel %vm766_vm0, %v731_v47, -inf  ;;  %v837_v56 = vsel %vm766_vm0, %v730_v46, -inf  ;;  %v747_v57 = vrot.slane %v733_v49, %v7760_v12  ;;  %v748_v58 = vcombine.high %v740_v50, %v740_v50 }
 0x2c6   :  { %v825_v59 = vmax.f32 %v823_v48, %v824_v54  ;;  %v831_v61 = vrot.slane %v830_v55, 4  ;;  %v838_v63 = vrot.slane %v837_v56, 4  ;;  %v844_v1 = vsel %vm766_vm0, %v732_v53, -inf }
 0x2c7   :  { %v845_v2 = vrot.slane %v844_v1, 4  ;;  %v749_v3 = vcombine.high %v747_v57, %v747_v57  ;;  %v851_v4 = vsel %vm766_vm0, %v740_v50, -inf  ;;  %v858_v5 = vsel %vm766_vm0, %v748_v58, -inf }
 0x2c8   :  { %v826_v6 = vrot.slane %v825_v59, 2  ;;  %v832_v7 = vmax.f32 %v830_v55, %v831_v61  ;;  %v839_v8 = vmax.f32 %v837_v56, %v838_v63  ;;  %v852_v9 = vrot.slane %v851_v4, 4 }
 0x2c9   :  { %v846_v10 = vmax.f32 %v844_v1, %v845_v2  ;;  %v859_v14 = vrot.slane %v858_v5, 4  ;;  %v865_v15 = vsel %vm766_vm0, %v747_v57, -inf  ;;  %v872_v16 = vsel %vm766_vm0, %v749_v3, -inf  ;;  %v6566_v1 = vld [vmem:[#allocation8 + $0x188] ss:$48 sps:$4 sm:$0xff]  }
 0x2ca   :  { %v827_v17 = vmax.f32 %v825_v59, %v826_v6  ;;  %v833_v18 = vrot.slane %v832_v7, 2  ;;  %v840_v19 = vrot.slane %v839_v8, 2  ;;  %v853_v22 = vmax.f32 %v851_v4, %v852_v9 }
 0x2cb   :  { %v847_v24 = vrot.slane %v846_v10, 2  ;;  %v860_v26 = vmax.f32 %v858_v5, %v859_v14  ;;  %v866_v27 = vrot.slane %v865_v15, 4  ;;  %v873_v29 = vrot.slane %v872_v16, 4 }
 0x2cc   :  { %v828_v31 = vrot.slane %v827_v17, 1  ;;  %v834_v33 = vmax.f32 %v832_v7, %v833_v18  ;;  %v841_v34 = vmax.f32 %v839_v8, %v840_v19  ;;  %v854_v38 = vrot.slane %v853_v22, 2 }
 0x2cd   :  { %v848_v39 = vmax.f32 %v846_v10, %v847_v24  ;;  %v861_v40 = vrot.slane %v860_v26, 2  ;;  %v867_v13 = vmax.f32 %v865_v15, %v866_v27  ;;  %v815_v36 = vmax.f32 %v7780_v20, %v814_v30  ;;  %v6562_v20 = vld [vmem:[#allocation8 + $0x12c] ss:$48 sps:$4 sm:$0xff]  }
 0x2ce   :  { %v829_v41 = vmax.f32 %v827_v17, %v828_v31  ;;  %v835_v42 = vrot.slane %v834_v33, 1  ;;  %v842_v44 = vrot.slane %v841_v34, 1  ;;  %v855_v45 = vmax.f32 %v853_v22, %v854_v38 }
 0x2cf   :  { %v849_v46 = vrot.slane %v848_v39, 1  ;;  %v862_v47 = vmax.f32 %v860_v26, %v861_v40  ;;  %v868_v48 = vrot.slane %v867_v13, 2  ;;  %v820_v49 = vmax.f32 %v7778_v11, %v819_v21  ;;  %v6563_v21 = vld [vmem:[#allocation8 + $0x180] ss:$48 sps:$4 sm:$0xff]  }
 0x2d0   :  { %v836_v50 = vmax.f32 %v834_v33, %v835_v42  ;;  %v843_v53 = vmax.f32 %v841_v34, %v842_v44  ;;  %v856_v54 = vrot.slane %v855_v45, 1  ;;  %v874_v55 = vmax.f32 %v872_v16, %v873_v29 }
 0x2d1   :  { %v850_v56 = vmax.f32 %v848_v39, %v849_v46  ;;  %v821_v57 = vrot.slane %v820_v49, 1  ;;  %v863_v58 = vrot.slane %v862_v47, 1  ;;  %v869_v59 = vmax.f32 %v867_v13, %v868_v48  ;;  %v6544_v46 = vld [vmem:[#allocation8 + $0xc] ss:$48 sps:$4 sm:$0xff]   ;;  %v6542_v48 = vld [vmem:[#allocation8 + $0x8] ss:$48 sps:$4 sm:$0xff]  }
 0x2d2   :  { %v960_v30 = vsel %vm933_vm2, %v843_v53, %v836_v50  ;;  %v857_v61 = vmax.f32 %v855_v45, %v856_v54  ;;  %v875_v63 = vrot.slane %v874_v55, 2  ;;  %v932_v11 = vsel %vm931_vm9, %v815_v36, %v930_v51  ;;  %v6541_v45 = vld [vmem:[#allocation8 + $0x4] ss:$48 sps:$4 sm:$0xff]   ;;  %2098 = vmatprep.subr.bf16.mxu0 %v6544_v46  ;;  %v6548_v54 = vld [vmem:[#allocation8 + $0x68] ss:$48 sps:$4 sm:$0xff]  }
 0x2d3   :  { %v961_v2 = vsel %vm921_vm1, %v850_v56, %v960_v30  ;;  %v822_v3 = vmax.f32 %v820_v49, %v821_v57  ;;  %v870_v4 = vrot.slane %v869_v59, 1  ;;  %v864_v25 = vmax.f32 %v862_v47, %v863_v58  ;;  %v6539_v47 = vld [vmem:[#allocation8] ss:$48 sps:$4 sm:$0xff]   ;;  %2057 = vmatprep.subr.bf16.mxu1 %v6541_v45  ;;  %v6547_v49 = vld [vmem:[#allocation8 + $0x64] ss:$48 sps:$4 sm:$0xff]  }
 0x2d4   :  { %v962_v62 = vsel %vm923_vm3, %v857_v61, %v961_v2  ;;  %v876_v5 = vmax.f32 %v874_v55, %v875_v63  ;;  %v957_v6 = vsel %vm927_vm7, %v815_v36, %v7817_v52  ;;  %v976_v10 = vsel %vm921_vm1, %v7783_v23, %v7793_v37  ;;  %v6553_v55 = vld [vmem:[#allocation8 + $0xc4] ss:$48 sps:$4 sm:$0xff]   ;;  %v6551_v57 = vld [vmem:[#allocation8 + $0xc0] ss:$48 sps:$4 sm:$0xff]   ;;  %v6554_v58 = vld [vmem:[#allocation8 + $0xc8] ss:$48 sps:$4 sm:$0xff]  }
 0x2d5   :  { %v871_v7 = vmax.f32 %v869_v59, %v870_v4  ;;  %v934_v8 = vsel %vm933_vm2, %v829_v41, %v822_v3  ;;  %v958_v9 = vsel %vm929_vm8, %v822_v3, %v957_v6  ;;  %v977_v15 = vsel %vm923_vm3, %v7787_v32, %v976_v10  ;;  %v6559_v59 = vld [vmem:[#allocation8 + $0x124] ss:$48 sps:$4 sm:$0xff]   ;;  %v6557_v30 = vld [vmem:[#allocation8 + $0x120] ss:$48 sps:$4 sm:$0xff]   ;;  %v6572_v51 = vld [vmem:[#allocation8 + $0x1e8] ss:$48 sps:$4 sm:$0xff]  }
 0x2d6   :  { %v877_v28 = vrot.slane %v876_v5, 1  ;;  %v935_v14 = vsel %vm921_vm1, %v836_v50, %v934_v8  ;;  %v982_v16 = vsel %vm933_vm2, %v836_v50, %v829_v41  ;;  %v978_v52 = vsel %vm925_vm6, %v7797_v35, %v977_v15  ;;  %v6550_v50 = vld [vmem:[#allocation8 + $0x6c] ss:$48 sps:$4 sm:$0xff]   ;;  %v6565_v63 = vld [vmem:[#allocation8 + $0x184] ss:$48 sps:$4 sm:$0xff]  }
 0x2d7   :  { %v936_v17 = vsel %vm923_vm3, %v843_v53, %v935_v14  ;;  %v983_v18 = vsel %vm921_vm1, %v843_v53, %v982_v16  ;;  %v959_v19 = vsel %vm931_vm9, %v829_v41, %v958_v9  ;;  %v979_v37 = vsel %vm927_vm7, %v7804_v43, %v978_v52  ;;  %v6545_v53 = vld [vmem:[#allocation8 + $0x60] ss:$48 sps:$4 sm:$0xff]   ;;  %v6571_v2 = vld [vmem:[#allocation8 + $0x1e4] ss:$48 sps:$4 sm:$0xff]   ;;  %v6580_v6 = vld [vmem:[#allocation8 + $0x24c] ss:$48 sps:$4 sm:$0xff]  }
 0x2d8   :  { %v878_v22 = vmax.f32 %v876_v5, %v877_v28  ;;  %v937_v23 = vsel %vm925_vm6, %v850_v56, %v936_v17  ;;  %v984_v24 = vsel %vm923_vm3, %v850_v56, %v983_v18  ;;  %v980_v26 = vsel %vm929_vm8, %v815_v36, %v979_v37  ;;  %v6556_v56 = vld [vmem:[#allocation8 + $0xcc] ss:$48 sps:$4 sm:$0xff]   ;;  %v6569_v4 = vld [vmem:[#allocation8 + $0x1e0] ss:$48 sps:$4 sm:$0xff]   ;;  %v6578_v5 = vld [vmem:[#allocation8 + $0x248] ss:$48 sps:$4 sm:$0xff]  }
 0x2d9   :  { %v938_v32 = vsel %vm927_vm7, %v857_v61, %v937_v23  ;;  %v985_v27 = vsel %vm925_vm6, %v857_v61, %v984_v24  ;;  %v963_v35 = vsel %vm925_vm6, %v864_v25, %v962_v62  ;;  %v981_v31 = vsel %vm931_vm9, %v822_v3, %v980_v26  ;;  %v6560_v61 = vld [vmem:[#allocation8 + $0x128] ss:$48 sps:$4 sm:$0xff]   ;;  %v6574_v3 = vld [vmem:[#allocation8 + $0x1ec] ss:$48 sps:$4 sm:$0xff]   ;;  %v6575_v62 = vld [vmem:[#allocation8 + $0x240] ss:$48 sps:$4 sm:$0xff]  }
 0x2da   :  { %v939_v29 = vsel %vm929_vm8, %v864_v25, %v938_v32  ;;  %v986_v33 = vsel %vm927_vm7, %v864_v25, %v985_v27  ;;  %v964_v34 = vsel %vm927_vm7, %v871_v7, %v963_v35  ;;  %v943_v38 = vsel %vm318_vm4, 0.0, %v932_v11  ;;  %vm5847_vm4 = vmpackc.low %vm7841_vm11, %vm7847_vm12  ;;  %v6568_v11 = vld [vmem:[#allocation8 + $0x18c] ss:$48 sps:$4 sm:$0xff]   ;;  %v6577_v25 = vld [vmem:[#allocation8 + $0x244] ss:$48 sps:$4 sm:$0xff]  }
 0x2db   :  { %v940_v43 = vsel %vm931_vm9, %v871_v7, %v939_v29  ;;  %v987_v39 = vsel %vm929_vm8, %v871_v7, %v986_v33  ;;  %v965_v40 = vsel %vm929_vm8, %v878_v22, %v964_v34  ;;  %v6583_v7 = vld [vmem:[#allocation8 + $0x2a4] ss:$48 sps:$4 sm:$0xff]   ;;  %v6586_v8 = vld [vmem:[#allocation8 + $0x2ac] ss:$48 sps:$4 sm:$0xff]   ;;  %v6581_v9 = vld [vmem:[#allocation8 + $0x2a0] ss:$48 sps:$4 sm:$0xff]  }
 0x2dc   :  { %v988_v13 = vsel %vm931_vm9, %v878_v22, %v987_v39  ;;  %v5848_v36 = vpack.c.bf16 %v940_v43, %v943_v38  ;;  %v968_v41 = vsel %vm347_vm5, %v965_v40, 0.0  ;;  %v6584_v10 = vld [vmem:[#allocation8 + $0x2a8] ss:$48 sps:$4 sm:$0xff]   ;;  %v6589_v28 = vld [vmem:[#allocation8 + $0x14] ss:$48 sps:$4 sm:$0xff]  }
 0x2dd   :  { %v992_v42 = vpack.c.bf16 %v988_v13, %v981_v31  ;;  %v5853_v44 = vpack.c.bf16 %v968_v41, %v959_v19  ;;  %v6592_v14 = vld [vmem:[#allocation8 + $0x1c] ss:$48 sps:$4 sm:$0xff]   ;;  %v5820_v52 = vld [vmem:[%s9789_s5] ss:$0 sm:$0xff] }
 0x2df   :  { %1224 = vmatprep.mubr.bf16.mxu1 %v992_v42  ;;  %6433 = vmatmul.mubr.msk.bf16.vlgmr.msra.gmra.mrb[8].mxu0 %vm5852_vm14, %v5853_v44 }
 0x2e0   :  { %5849 = vmatmul.mubr.msk.bf16.vlgmr.msra.gmra.mrb[8].mxu1 %vm5847_vm4, %v5848_v36  ;;  %2130 = vmatprep.mubr.bf16.mxu0 %v9797_v0 }
 0x2e1   :  { %2089 = vmatprep.mubr.bf16.mxu1 %v9797_v0  ;;  %2058 = vmatpush1.bf16.msra.mxu1 %v6539_v47 }
 0x2e2   :  { %2099 = vmatpush1.bf16.msra.mxu0 %v6542_v48  ;;  %2059 = vmatprep.subr.bf16.mxu1 %v6547_v49 }
 0x2e3   :  { %2100 = vmatprep.subr.bf16.mxu0 %v6550_v50 }
 0x2e5   :  { %2060 = vmatpush1.bf16.msra.mxu1 %v6545_v53 }
 0x2e6   :  { %2101 = vmatpush1.bf16.msra.mxu0 %v6548_v54  ;;  %2061 = vmatprep.subr.bf16.mxu1 %v6553_v55 }
 0x2e7   :  { %2102 = vmatprep.subr.bf16.mxu0 %v6556_v56 }
 0x2e9   :  { %2062 = vmatpush1.bf16.msra.mxu1 %v6551_v57 }
 0x2ea   :  { %2103 = vmatpush1.bf16.msra.mxu0 %v6554_v58  ;;  %2063 = vmatprep.subr.bf16.mxu1 %v6559_v59 }
 0x2eb   :  { %2104 = vmatprep.subr.bf16.mxu0 %v6562_v20 }
 0x2ed   :  { %2064 = vmatpush1.bf16.msra.mxu1 %v6557_v30 }
 0x2ee   :  { %2105 = vmatpush1.bf16.msra.mxu0 %v6560_v61  ;;  %2065 = vmatprep.subr.bf16.mxu1 %v6565_v63 }
 0x2ef   :  { %2106 = vmatprep.subr.bf16.mxu0 %v6568_v11 }
 0x2f1   :  { %2066 = vmatpush1.bf16.msra.mxu1 %v6563_v21 }
 0x2f2   :  { %2107 = vmatpush1.bf16.msra.mxu0 %v6566_v1  ;;  %2067 = vmatprep.subr.bf16.mxu1 %v6571_v2 }
 0x2f3   :  { %2108 = vmatprep.subr.bf16.mxu0 %v6574_v3 }
 0x2f5   :  { %2068 = vmatpush1.bf16.msra.mxu1 %v6569_v4 }
 0x2f6   :  { %2109 = vmatpush1.bf16.msra.mxu0 %v6572_v51  ;;  %2069 = vmatprep.subr.bf16.mxu1 %v6577_v25 }
 0x2f7   :  { %2110 = vmatprep.subr.bf16.mxu0 %v6580_v6 }
 0x2f9   :  { %2070 = vmatpush1.bf16.msra.mxu1 %v6575_v62 }
 0x2fa   :  { %2111 = vmatpush1.bf16.msra.mxu0 %v6578_v5  ;;  %2071 = vmatprep.subr.bf16.mxu1 %v6583_v7 }
 0x2fb   :  { %2112 = vmatprep.subr.bf16.mxu0 %v6586_v8 }
 0x2fd   :  { %2072 = vmatpush1.bf16.msra.mxu1 %v6581_v9 }
 0x2fe   :  { %2113 = vmatpush1.bf16.msra.mxu0 %v6584_v10  ;;  %2139 = vmatprep.subr.bf16.mxu1 %v6589_v28 }
 0x2ff   :  { %2180 = vmatprep.subr.bf16.mxu0 %v6592_v14 }
 0x3b2   :  { %v1267_v15 = vpop.f32.mrb[8].mxu0 }
 0x3b3   :  { %v6299_v16 = vpop.f32.mrb[8].mxu1  ;;  %v6434_v17 = vpop.f32.mrb[9].mxu0 }
 0x3b4   :  { %v6300_v18 = vpop.f32.mrb[9].mxu1  ;;  %v1270_v19 = vpop.f32.mrb[10].mxu0 }
 0x3b5   :  { %v6301_v22 = vadd.f32 %v6300_v18, %v6299_v16  ;;  %v6302_v23 = vpop.f32.mrb[10].mxu1  ;;  %v6435_v37 = vpop.f32.mrb[11].mxu0 }
 0x3b6   :  { %v6303_v24 = vpop.f32.mrb[11].mxu1 }
 0x3b7   :  { %v1227_v32 = vadd.f32 %v6301_v22, %v5820_v52  ;;  %v6304_v26 = vadd.f32 %v6303_v24, %v6302_v23 }
 0x3b9   :  { %v1268_v27 = vadd.f32 %v1267_v15, %v1227_v32  ;;  %v1230_v35 = vadd.f32 %v6304_v26, %v5820_v52 }
 0x3bb   :  { %v1276_v29 = vmul.f32 1.442695, %v1268_v27  ;;  %v1271_v31 = vadd.f32 %v1270_v19, %v1230_v35  ;;  %vm1274_vm5 = vcmp.gt.f32.partialorder %v1268_v27, 0.0 }
 0x3bd   :  { %7003 = vpow2.f32 %v1276_v29  ;;  %v1278_v33 = vmul.f32 1.442695, %v1271_v31  ;;  %vm1275_vm15 = vcmp.gt.f32.partialorder %v1271_v31, 0.0 }
 0x3bf   :  { %7005 = vpow2.f32 %v1278_v33 }
 0x3c7   :  { %v7004_v34 = vpop.eup %7003 }
 0x3c8   :  { %v5855_v43 = vadd.f32 -1.0, %v7004_v34 }
 0x3c9   :  { %v7006_v38 = vpop.eup %7005 }
 0x3ca   :  { %v1282_v39 = vsel %vm1274_vm5, %v1268_v27, %v5855_v43  ;;  %v5856_v40 = vadd.f32 -1.0, %v7006_v38 }
 0x3cb   :  { %v1286_v13 = vcombine.high %v1282_v39, %v1282_v39  ;;  %v1293_v36 = vrot.slane %v1282_v39, %v7760_v12 }
 0x3cc   :  { %v1283_v41 = vsel %vm1275_vm15, %v1271_v31, %v5856_v40 }
 0x3cd   :  { %v1300_v42 = vrot.slane %v1286_v13, %v7760_v12  ;;  %v1301_v44 = vcombine.high %v1293_v36, %v1293_v36  ;;  %v1328_v45 = vsel %vm766_vm0, %v1293_v36, -inf  ;;  %v1303_v46 = vcombine.high %v1283_v41, %v1283_v41 }
 0x3ce   :  { %v1329_v47 = vrot.slane %v1328_v45, 4  ;;  %v1310_v48 = vrot.slane %v1283_v41, %v7760_v12 }
 0x3cf   :  { %v1302_v49 = vcombine.high %v1300_v42, %v1300_v42  ;;  %v1335_v50 = vsel %vm766_vm0, %v1301_v44, -inf  ;;  %v1342_v53 = vsel %vm766_vm0, %v1300_v42, -inf  ;;  %v1317_v54 = vrot.slane %v1303_v46, %v7760_v12 }
 0x3d0   :  { %v1330_v55 = vmax.f32 %v1328_v45, %v1329_v47  ;;  %v1336_v56 = vrot.slane %v1335_v50, 4  ;;  %v1343_v57 = vrot.slane %v1342_v53, 4  ;;  %v1318_v58 = vcombine.high %v1310_v48, %v1310_v48 }
 0x3d1   :  { %v1349_v59 = vsel %vm766_vm0, %v1302_v49, -inf  ;;  %v1319_v20 = vcombine.high %v1317_v54, %v1317_v54  ;;  %v1356_v30 = vsel %vm766_vm0, %v1310_v48, -inf  ;;  %v1370_v61 = vsel %vm766_vm0, %v1317_v54, -inf }
 0x3d2   :  { %v1331_v63 = vrot.slane %v1330_v55, 2  ;;  %v1337_v11 = vmax.f32 %v1335_v50, %v1336_v56  ;;  %v1344_v21 = vmax.f32 %v1342_v53, %v1343_v57  ;;  %v1350_v1 = vrot.slane %v1349_v59, 4 }
 0x3d3   :  { %v1357_v2 = vrot.slane %v1356_v30, 4  ;;  %v1363_v3 = vsel %vm766_vm0, %v1318_v58, -inf  ;;  %v1371_v4 = vrot.slane %v1370_v61, 4  ;;  %v1377_v12 = vsel %vm766_vm0, %v1319_v20, -inf }
 0x3d4   :  { %v1332_v51 = vmax.f32 %v1330_v55, %v1331_v63  ;;  %v1338_v62 = vrot.slane %v1337_v11, 2  ;;  %v1345_v25 = vrot.slane %v1344_v21, 2  ;;  %v1351_v5 = vmax.f32 %v1349_v59, %v1350_v1 }
 0x3d5   :  { %v1358_v6 = vmax.f32 %v1356_v30, %v1357_v2  ;;  %v1364_v7 = vrot.slane %v1363_v3, 4  ;;  %v1372_v8 = vmax.f32 %v1370_v61, %v1371_v4  ;;  %v1378_v9 = vrot.slane %v1377_v12, 4  ;;  %v6587_v4 = vld [vmem:[#allocation8 + $0x10] ss:$48 sps:$4 sm:$0xff]  }
 0x3d6   :  { %v1333_v10 = vrot.slane %v1332_v51, 1  ;;  %v1339_v28 = vmax.f32 %v1337_v11, %v1338_v62  ;;  %v1346_v14 = vmax.f32 %v1344_v21, %v1345_v25  ;;  %v1352_v15 = vrot.slane %v1351_v5, 2  ;;  %v6595_v25 = vld [vmem:[#allocation8 + $0x74] ss:$48 sps:$4 sm:$0xff]  }
 0x3d7   :  { %v1359_v16 = vrot.slane %v1358_v6, 2  ;;  %v1365_v17 = vmax.f32 %v1363_v3, %v1364_v7  ;;  %v1373_v52 = vrot.slane %v1372_v8, 2  ;;  %v1379_v18 = vmax.f32 %v1377_v12, %v1378_v9  ;;  %v6590_v12 = vld [vmem:[#allocation8 + $0x18] ss:$48 sps:$4 sm:$0xff]   ;;  %v6604_v9 = vld [vmem:[#allocation8 + $0xdc] ss:$48 sps:$4 sm:$0xff]  }
 0x3d8   :  { %v1334_v19 = vmax.f32 %v1332_v51, %v1333_v10  ;;  %v1340_v22 = vrot.slane %v1339_v28, 1  ;;  %v1347_v23 = vrot.slane %v1346_v14, 1  ;;  %v1353_v37 = vmax.f32 %v1351_v5, %v1352_v15  ;;  %v6598_v5 = vld [vmem:[#allocation8 + $0x7c] ss:$48 sps:$4 sm:$0xff]   ;;  %v6596_v7 = vld [vmem:[#allocation8 + $0x78] ss:$48 sps:$4 sm:$0xff]  }
 0x3d9   :  { %v1360_v24 = vmax.f32 %v1358_v6, %v1359_v16  ;;  %v1366_v32 = vrot.slane %v1365_v17, 2  ;;  %v1374_v26 = vmax.f32 %v1372_v8, %v1373_v52  ;;  %v1380_v27 = vrot.slane %v1379_v18, 2  ;;  %v6593_v6 = vld [vmem:[#allocation8 + $0x70] ss:$48 sps:$4 sm:$0xff]   ;;  %v6601_v8 = vld [vmem:[#allocation8 + $0xd4] ss:$48 sps:$4 sm:$0xff]  }
 0x3da   :  { %v1341_v35 = vmax.f32 %v1339_v28, %v1340_v22  ;;  %v1348_v29 = vmax.f32 %v1346_v14, %v1347_v23  ;;  %v1354_v31 = vrot.slane %v1353_v37, 1  ;;  %v1384_v33 = vpack.c.bf16 %v1334_v19, %v1334_v19  ;;  %v6599_v10 = vld [vmem:[#allocation8 + $0xd0] ss:$48 sps:$4 sm:$0xff]   ;;  %v6602_v28 = vld [vmem:[#allocation8 + $0xd8] ss:$48 sps:$4 sm:$0xff]  }
 0x3db   :  { %v1361_v34 = vrot.slane %v1360_v24, 1  ;;  %v1367_v43 = vmax.f32 %v1365_v17, %v1366_v32  ;;  %v1375_v38 = vrot.slane %v1374_v26, 1  ;;  %v1381_v39 = vmax.f32 %v1379_v18, %v1380_v27  ;;  %v6607_v14 = vld [vmem:[#allocation8 + $0x134] ss:$48 sps:$4 sm:$0xff]   ;;  %v6610_v15 = vld [vmem:[#allocation8 + $0x13c] ss:$48 sps:$4 sm:$0xff]  }
 0x3dc   :  { %v1355_v40 = vmax.f32 %v1353_v37, %v1354_v31  ;;  %v1385_v13 = vpack.c.bf16 %v1341_v35, %v1341_v35  ;;  %v1386_v36 = vpack.c.bf16 %v1348_v29, %v1348_v29  ;;  %v1560_v47 = vunpack.c.l.b16 %v1384_v33  ;;  %v6605_v16 = vld [vmem:[#allocation8 + $0x130] ss:$48 sps:$4 sm:$0xff]   ;;  %v6608_v17 = vld [vmem:[#allocation8 + $0x138] ss:$48 sps:$4 sm:$0xff]   ;;  %v6613_v52 = vld [vmem:[#allocation8 + $0x194] ss:$48 sps:$4 sm:$0xff]  }
 0x3dd   :  { %v1362_v41 = vmax.f32 %v1360_v24, %v1361_v34  ;;  %v1368_v42 = vrot.slane %v1367_v43, 1  ;;  %v1376_v44 = vmax.f32 %v1374_v26, %v1375_v38  ;;  %v1382_v45 = vrot.slane %v1381_v39, 1  ;;  %v6616_v18 = vld [vmem:[#allocation8 + $0x19c] ss:$48 sps:$4 sm:$0xff]   ;;  %v6611_v19 = vld [vmem:[#allocation8 + $0x190] ss:$48 sps:$4 sm:$0xff]  }
 0x3de   :  { %v1387_v46 = vpack.c.bf16 %v1355_v40, %v1355_v40  ;;  %v1561_v48 = vunpack.c.l.b16 %v1385_v13  ;;  %v1562_v49 = vunpack.c.l.b16 %v1386_v36  ;;  %v6614_v22 = vld [vmem:[#allocation8 + $0x198] ss:$48 sps:$4 sm:$0xff]   ;;  %v6619_v23 = vld [vmem:[#allocation8 + $0x1f4] ss:$48 sps:$4 sm:$0xff]   ;;  %v6622_v37 = vld [vmem:[#allocation8 + $0x1fc] ss:$48 sps:$4 sm:$0xff]  }
 0x3df   :  { %v1369_v50 = vmax.f32 %v1367_v43, %v1368_v42  ;;  %v1383_v53 = vmax.f32 %v1381_v39, %v1382_v45  ;;  %v1388_v54 = vpack.c.bf16 %v1362_v41, %v1362_v41  ;;  %v1390_v57 = vpack.c.bf16 %v1376_v44, %v1376_v44  ;;  %v6617_v24 = vld [vmem:[#allocation8 + $0x1f0] ss:$48 sps:$4 sm:$0xff]   ;;  %v6620_v32 = vld [vmem:[#allocation8 + $0x1f8] ss:$48 sps:$4 sm:$0xff]   ;;  %v6625_v26 = vld [vmem:[#allocation8 + $0x254] ss:$48 sps:$4 sm:$0xff]  }
 0x3e0   :  { %v1563_v55 = vunpack.c.l.b16 %v1387_v46  ;;  %v1568_v56 = vsel %vm933_vm2, %v1561_v48, %v1560_v47  ;;  %v6628_v27 = vld [vmem:[#allocation8 + $0x25c] ss:$48 sps:$4 sm:$0xff]   ;;  %v6623_v35 = vld [vmem:[#allocation8 + $0x250] ss:$48 sps:$4 sm:$0xff]   ;;  %v6626_v29 = vld [vmem:[#allocation8 + $0x258] ss:$48 sps:$4 sm:$0xff]  }
 0x3e1   :  { %v1569_v58 = vsel %vm921_vm1, %v1562_v49, %v1568_v56  ;;  %v1389_v59 = vpack.c.bf16 %v1369_v50, %v1369_v50  ;;  %v1391_v20 = vpack.c.bf16 %v1383_v53, %v1383_v53  ;;  %v1564_v30 = vunpack.c.l.b16 %v1388_v54  ;;  %v6631_v31 = vld [vmem:[#allocation8 + $0x2b4] ss:$48 sps:$4 sm:$0xff]   ;;  %v6634_v33 = vld [vmem:[#allocation8 + $0x2bc] ss:$48 sps:$4 sm:$0xff]   ;;  %v6629_v34 = vld [vmem:[#allocation8 + $0x2b0] ss:$48 sps:$4 sm:$0xff]  }
 0x3e2   :  { %v1570_v61 = vsel %vm923_vm3, %v1563_v55, %v1569_v58  ;;  %v1566_v21 = vunpack.c.l.b16 %v1390_v57  ;;  %v6632_v43 = vld [vmem:[#allocation8 + $0x2b8] ss:$48 sps:$4 sm:$0xff]   ;;  %v6637_v38 = vld [vmem:[#allocation8 + $0x24] ss:$48 sps:$4 sm:$0xff]   ;;  %v6640_v39 = vld [vmem:[#allocation8 + $0x2c] ss:$48 sps:$4 sm:$0xff]  }
 0x3e3   :  { %v1565_v63 = vunpack.c.l.b16 %v1389_v59  ;;  %v1571_v11 = vsel %vm925_vm6, %v1564_v30, %v1570_v61  ;;  %v1567_v1 = vunpack.c.l.b16 %v1391_v20  ;;  %v6635_v40 = vld [vmem:[#allocation8 + $0x20] ss:$48 sps:$4 sm:$0xff]   ;;  %v6638_v13 = vld [vmem:[#allocation8 + $0x28] ss:$48 sps:$4 sm:$0xff]   ;;  %v6643_v36 = vld [vmem:[#allocation8 + $0x84] ss:$48 sps:$4 sm:$0xff]  }
 0x3e4   :  { %v6646_v41 = vld [vmem:[#allocation8 + $0x8c] ss:$48 sps:$4 sm:$0xff]   ;;  %v6641_v42 = vld [vmem:[#allocation8 + $0x80] ss:$48 sps:$4 sm:$0xff]   ;;  %v6644_v44 = vld [vmem:[#allocation8 + $0x88] ss:$48 sps:$4 sm:$0xff]  }
 0x3e5   :  { %v1572_v2 = vsel %vm927_vm7, %v1565_v63, %v1571_v11  ;;  %v6649_v45 = vld [vmem:[#allocation8 + $0xe4] ss:$48 sps:$4 sm:$0xff]   ;;  %v6652_v46 = vld [vmem:[#allocation8 + $0xec] ss:$48 sps:$4 sm:$0xff]   ;;  %v6647_v47 = vld [vmem:[#allocation8 + $0xe0] ss:$48 sps:$4 sm:$0xff]  }
 0x3e6   :  { %v1573_v3 = vsel %vm929_vm8, %v1566_v21, %v1572_v2  ;;  %v6650_v48 = vld [vmem:[#allocation8 + $0xe8] ss:$48 sps:$4 sm:$0xff]   ;;  %v6655_v49 = vld [vmem:[#allocation8 + $0x144] ss:$48 sps:$4 sm:$0xff]   ;;  %v6658_v50 = vld [vmem:[#allocation8 + $0x14c] ss:$48 sps:$4 sm:$0xff]  }
 0x3e7   :  { %v1574_v51 = vsel %vm931_vm9, %v1567_v1, %v1573_v3  ;;  %v6653_v53 = vld [vmem:[#allocation8 + $0x140] ss:$48 sps:$4 sm:$0xff]   ;;  %v6656_v54 = vld [vmem:[#allocation8 + $0x148] ss:$48 sps:$4 sm:$0xff]   ;;  %v6661_v55 = vld [vmem:[#allocation8 + $0x1a4] ss:$48 sps:$4 sm:$0xff]  }
 0x3e8   :  { %v7925_v62 = vpack.c.b16 %v1574_v51, %v1574_v51  ;;  %v6664_v56 = vld [vmem:[#allocation8 + $0x1ac] ss:$48 sps:$4 sm:$0xff]   ;;  %v6659_v57 = vld [vmem:[#allocation8 + $0x1a0] ss:$48 sps:$4 sm:$0xff]   ;;  %v6662_v58 = vld [vmem:[#allocation8 + $0x1a8] ss:$48 sps:$4 sm:$0xff]  }
 0x3e9   :  { %v6667_v59 = vld [vmem:[#allocation8 + $0x204] ss:$48 sps:$4 sm:$0xff]   ;;  %v6670_v20 = vld [vmem:[#allocation8 + $0x20c] ss:$48 sps:$4 sm:$0xff]   ;;  %v6665_v30 = vld [vmem:[#allocation8 + $0x200] ss:$48 sps:$4 sm:$0xff]  }
 0x3ea   :  { %2090 = vmatmul.mubr.bf16.vlgmr.msra.gmra.mrb[12].mxu1 %v7925_v62  ;;  %2131 = vmatmul.mubr.bf16.vlgmr.msra.gmra.mrb[12].mxu0 %v7925_v62  ;;  %v6668_v61 = vld [vmem:[#allocation8 + $0x208] ss:$48 sps:$4 sm:$0xff]   ;;  %v6673_v63 = vld [vmem:[#allocation8 + $0x264] ss:$48 sps:$4 sm:$0xff]   ;;  %v6676_v11 = vld [vmem:[#allocation8 + $0x26c] ss:$48 sps:$4 sm:$0xff]  }
 0x3eb   :  { %2140 = vmatpush1.bf16.msra.mxu1 %v6587_v4  ;;  %2181 = vmatpush1.bf16.msra.mxu0 %v6590_v12  ;;  %v6671_v21 = vld [vmem:[#allocation8 + $0x260] ss:$48 sps:$4 sm:$0xff]   ;;  %v6674_v1 = vld [vmem:[#allocation8 + $0x268] ss:$48 sps:$4 sm:$0xff]   ;;  %v6679_v2 = vld [vmem:[#allocation8 + $0x2c4] ss:$48 sps:$4 sm:$0xff]  }
 0x3ec   :  { %2141 = vmatprep.subr.bf16.mxu1 %v6595_v25  ;;  %2182 = vmatprep.subr.bf16.mxu0 %v6598_v5  ;;  %v6682_v3 = vld [vmem:[#allocation8 + $0x2cc] ss:$48 sps:$4 sm:$0xff]   ;;  %v6677_v4 = vld [vmem:[#allocation8 + $0x2c0] ss:$48 sps:$4 sm:$0xff]   ;;  %v6680_v12 = vld [vmem:[#allocation8 + $0x2c8] ss:$48 sps:$4 sm:$0xff]  }
 0x3ed   :  { %2171 = vmatprep.mubr.bf16.mxu1 %v9797_v0  ;;  %2212 = vmatprep.mubr.bf16.mxu0 %v9797_v0  ;;  %v7935_v51 = vld [vmem:[#allocation10 + $0x4] ss:$24 sps:$4 sm:$0xff]   ;;  %v7939_v5 = vld [vmem:[#allocation10] ss:$24 sps:$4 sm:$0xff]  }
 0x3ee   :  { %v7937_v25 = vld [vmem:[#allocation10 + $0xc] ss:$24 sps:$4 sm:$0xff]  }
 0x3ef   :  { %2142 = vmatpush1.bf16.msra.mxu1 %v6593_v6  ;;  %2183 = vmatpush1.bf16.msra.mxu0 %v6596_v7  ;;  %v7941_v6 = vld [vmem:[#allocation10 + $0x8] ss:$24 sps:$4 sm:$0xff]   ;;  %v7945_v7 = vld [vmem:[#allocation10 + $0x34] ss:$24 sps:$4 sm:$0xff]  }
 0x3f0   :  { %2143 = vmatprep.subr.bf16.mxu1 %v6601_v8  ;;  %2184 = vmatprep.subr.bf16.mxu0 %v6604_v9  ;;  %v7947_v8 = vld [vmem:[#allocation10 + $0x3c] ss:$24 sps:$4 sm:$0xff]   ;;  %v7953_v9 = vld [vmem:[#allocation10 + $0x30] ss:$24 sps:$4 sm:$0xff]  }
 0x3f3   :  { %2144 = vmatpush1.bf16.msra.mxu1 %v6599_v10  ;;  %2185 = vmatpush1.bf16.msra.mxu0 %v6602_v28  ;;  %v7955_v10 = vld [vmem:[#allocation10 + $0x38] ss:$24 sps:$4 sm:$0xff]   ;;  %v7959_v28 = vld [vmem:[#allocation10 + $0x64] ss:$24 sps:$4 sm:$0xff]  }
 0x3f4   :  { %2145 = vmatprep.subr.bf16.mxu1 %v6607_v14  ;;  %2186 = vmatprep.subr.bf16.mxu0 %v6610_v15  ;;  %v7961_v14 = vld [vmem:[#allocation10 + $0x6c] ss:$24 sps:$4 sm:$0xff]   ;;  %v7969_v15 = vld [vmem:[#allocation10 + $0x68] ss:$24 sps:$4 sm:$0xff]  }
 0x3f7   :  { %2146 = vmatpush1.bf16.msra.mxu1 %v6605_v16  ;;  %2187 = vmatpush1.bf16.msra.mxu0 %v6608_v17  ;;  %v7973_v16 = vld [vmem:[#allocation10 + $0x94] ss:$24 sps:$4 sm:$0xff]  }
 0x3f8   :  { %2147 = vmatprep.subr.bf16.mxu1 %v6613_v52  ;;  %2188 = vmatprep.subr.bf16.mxu0 %v6616_v18  ;;  %v7975_v17 = vld [vmem:[#allocation10 + $0x9c] ss:$24 sps:$4 sm:$0xff]   ;;  %v7979_v52 = vld [vmem:[#allocation10 + $0x90] ss:$24 sps:$4 sm:$0xff]  }
 0x3f9   :  { %v7981_v18 = vld [vmem:[#allocation10 + $0x98] ss:$24 sps:$4 sm:$0xff]  }
 0x3fb   :  { %2148 = vmatpush1.bf16.msra.mxu1 %v6611_v19  ;;  %2189 = vmatpush1.bf16.msra.mxu0 %v6614_v22  ;;  %v7985_v19 = vld [vmem:[#allocation10 + $0xc4] ss:$24 sps:$4 sm:$0xff]  }
 0x3fc   :  { %2149 = vmatprep.subr.bf16.mxu1 %v6619_v23  ;;  %2190 = vmatprep.subr.bf16.mxu0 %v6622_v37  ;;  %v7987_v22 = vld [vmem:[#allocation10 + $0xcc] ss:$24 sps:$4 sm:$0xff]   ;;  %v7991_v23 = vld [vmem:[#allocation10 + $0xc0] ss:$24 sps:$4 sm:$0xff]  }
 0x3fd   :  { %v7993_v37 = vld [vmem:[#allocation10 + $0xc8] ss:$24 sps:$4 sm:$0xff]  }
 0x3ff   :  { %2150 = vmatpush1.bf16.msra.mxu1 %v6617_v24  ;;  %2191 = vmatpush1.bf16.msra.mxu0 %v6620_v32  ;;  %v7997_v24 = vld [vmem:[#allocation10 + $0xf4] ss:$24 sps:$4 sm:$0xff]  }
 0x400   :  { %2151 = vmatprep.subr.bf16.mxu1 %v6625_v26  ;;  %2192 = vmatprep.subr.bf16.mxu0 %v6628_v27  ;;  %v7999_v32 = vld [vmem:[#allocation10 + $0xfc] ss:$24 sps:$4 sm:$0xff]   ;;  %v8003_v26 = vld [vmem:[#allocation10 + $0xf0] ss:$24 sps:$4 sm:$0xff]  }
 0x401   :  { %v8005_v27 = vld [vmem:[#allocation10 + $0xf8] ss:$24 sps:$4 sm:$0xff]  }
 0x403   :  { %2152 = vmatpush1.bf16.msra.mxu1 %v6623_v35  ;;  %2193 = vmatpush1.bf16.msra.mxu0 %v6626_v29  ;;  %v8009_v35 = vld [vmem:[#allocation10 + $0x124] ss:$24 sps:$4 sm:$0xff]  }
 0x404   :  { %2153 = vmatprep.subr.bf16.mxu1 %v6631_v31  ;;  %2194 = vmatprep.subr.bf16.mxu0 %v6634_v33  ;;  %v8011_v29 = vld [vmem:[#allocation10 + $0x12c] ss:$24 sps:$4 sm:$0xff]   ;;  %v8015_v31 = vld [vmem:[#allocation10 + $0x120] ss:$24 sps:$4 sm:$0xff]  }
 0x405   :  { %v8017_v33 = vld [vmem:[#allocation10 + $0x128] ss:$24 sps:$4 sm:$0xff]  }
 0x407   :  { %2154 = vmatpush1.bf16.msra.mxu1 %v6629_v34  ;;  %2195 = vmatpush1.bf16.msra.mxu0 %v6632_v43  ;;  %v8021_v34 = vld [vmem:[#allocation10 + $0x154] ss:$24 sps:$4 sm:$0xff]  }
 0x408   :  { %2221 = vmatprep.subr.bf16.mxu1 %v6637_v38  ;;  %2262 = vmatprep.subr.bf16.mxu0 %v6640_v39  ;;  %v8023_v43 = vld [vmem:[#allocation10 + $0x15c] ss:$24 sps:$4 sm:$0xff]   ;;  %v8027_v38 = vld [vmem:[#allocation10 + $0x150] ss:$24 sps:$4 sm:$0xff]  }
 0x409   :  { %v8029_v39 = vld [vmem:[#allocation10 + $0x158] ss:$24 sps:$4 sm:$0xff]  }
 0x40a   :  { %2172 = vmatmul.mubr.bf16.vlgmr.msra.gmra.mrb[16].mxu1 %v7925_v62  ;;  %2213 = vmatmul.mubr.bf16.vlgmr.msra.gmra.mrb[16].mxu0 %v7925_v62 }
 0x40b   :  { %2222 = vmatpush1.bf16.msra.mxu1 %v6635_v40  ;;  %2263 = vmatpush1.bf16.msra.mxu0 %v6638_v13  ;;  %v8033_v40 = vld [vmem:[#allocation10 + $0x184] ss:$24 sps:$4 sm:$0xff]  }
 0x40c   :  { %2223 = vmatprep.subr.bf16.mxu1 %v6643_v36  ;;  %2264 = vmatprep.subr.bf16.mxu0 %v6646_v41  ;;  %v8035_v13 = vld [vmem:[#allocation10 + $0x18c] ss:$24 sps:$4 sm:$0xff]   ;;  %v8039_v36 = vld [vmem:[#allocation10 + $0x180] ss:$24 sps:$4 sm:$0xff]  }
 0x40d   :  { %2253 = vmatprep.mubr.bf16.mxu1 %v9797_v0  ;;  %2294 = vmatprep.mubr.bf16.mxu0 %v9797_v0  ;;  %v8041_v41 = vld [vmem:[#allocation10 + $0x188] ss:$24 sps:$4 sm:$0xff]  }
 0x40e   :  { %10127 = vst [vmem:[#allocation19_spill] sm:$0xff] %v8041_v41 }
 0x40f   :  { %2224 = vmatpush1.bf16.msra.mxu1 %v6641_v42  ;;  %2265 = vmatpush1.bf16.msra.mxu0 %v6644_v44  ;;  %v8045_v42 = vld [vmem:[#allocation10 + $0x1b4] ss:$24 sps:$4 sm:$0xff]  }
 0x410   :  { %2225 = vmatprep.subr.bf16.mxu1 %v6649_v45  ;;  %2266 = vmatprep.subr.bf16.mxu0 %v6652_v46  ;;  %10128 = vst [vmem:[#allocation20_spill] sm:$0xff] %v8045_v42  ;;  %v8047_v44 = vld [vmem:[#allocation10 + $0x1bc] ss:$24 sps:$4 sm:$0xff]   ;;  %v8051_v45 = vld [vmem:[#allocation10 + $0x1b0] ss:$24 sps:$4 sm:$0xff]  }
 0x411   :  { %10129 = vst [vmem:[#allocation21_spill] sm:$0xff] %v8047_v44  ;;  %10130 = vst [vmem:[#allocation22_spill] sm:$0xff] %v8051_v45  ;;  %v8053_v46 = vld [vmem:[#allocation10 + $0x1b8] ss:$24 sps:$4 sm:$0xff]  }
 0x412   :  { %10131 = vst [vmem:[#allocation23_spill] sm:$0xff] %v8053_v46 }
 0x413   :  { %2226 = vmatpush1.bf16.msra.mxu1 %v6647_v47  ;;  %2267 = vmatpush1.bf16.msra.mxu0 %v6650_v48  ;;  %v8057_v47 = vld [vmem:[#allocation10 + $0x1e4] ss:$24 sps:$4 sm:$0xff]  }
 0x414   :  { %2227 = vmatprep.subr.bf16.mxu1 %v6655_v49  ;;  %2268 = vmatprep.subr.bf16.mxu0 %v6658_v50  ;;  %10132 = vst [vmem:[#allocation24_spill] sm:$0xff] %v8057_v47  ;;  %v8059_v48 = vld [vmem:[#allocation10 + $0x1ec] ss:$24 sps:$4 sm:$0xff]   ;;  %v8063_v49 = vld [vmem:[#allocation10 + $0x1e0] ss:$24 sps:$4 sm:$0xff]  }
 0x415   :  { %10133 = vst [vmem:[#allocation25_spill] sm:$0xff] %v8059_v48  ;;  %10134 = vst [vmem:[#allocation26_spill] sm:$0xff] %v8063_v49  ;;  %v8065_v50 = vld [vmem:[#allocation10 + $0x1e8] ss:$24 sps:$4 sm:$0xff]  }
 0x416   :  { %10135 = vst [vmem:[#allocation27_spill] sm:$0xff] %v8065_v50 }
 0x417   :  { %2228 = vmatpush1.bf16.msra.mxu1 %v6653_v53  ;;  %2269 = vmatpush1.bf16.msra.mxu0 %v6656_v54  ;;  %v8069_v53 = vld [vmem:[#allocation10 + $0x214] ss:$24 sps:$4 sm:$0xff]  }
 0x418   :  { %2229 = vmatprep.subr.bf16.mxu1 %v6661_v55  ;;  %2270 = vmatprep.subr.bf16.mxu0 %v6664_v56  ;;  %10136 = vst [vmem:[#allocation28_spill] sm:$0xff] %v8069_v53  ;;  %v8071_v54 = vld [vmem:[#allocation10 + $0x21c] ss:$24 sps:$4 sm:$0xff]   ;;  %v8075_v55 = vld [vmem:[#allocation10 + $0x210] ss:$24 sps:$4 sm:$0xff]  }
 0x419   :  { %10137 = vst [vmem:[#allocation29_spill] sm:$0xff] %v8071_v54  ;;  %10138 = vst [vmem:[#allocation30_spill] sm:$0xff] %v8075_v55  ;;  %v8077_v56 = vld [vmem:[#allocation10 + $0x218] ss:$24 sps:$4 sm:$0xff]  }
 0x41a   :  { %10139 = vst [vmem:[#allocation31_spill] sm:$0xff] %v8077_v56 }
 0x41b   :  { %2230 = vmatpush1.bf16.msra.mxu1 %v6659_v57  ;;  %2271 = vmatpush1.bf16.msra.mxu0 %v6662_v58  ;;  %v8081_v57 = vld [vmem:[#allocation10 + $0x244] ss:$24 sps:$4 sm:$0xff]  }
 0x41c   :  { %2231 = vmatprep.subr.bf16.mxu1 %v6667_v59  ;;  %2272 = vmatprep.subr.bf16.mxu0 %v6670_v20  ;;  %10140 = vst [vmem:[#allocation32_spill] sm:$0xff] %v8081_v57  ;;  %v8083_v58 = vld [vmem:[#allocation10 + $0x24c] ss:$24 sps:$4 sm:$0xff]   ;;  %v8087_v59 = vld [vmem:[#allocation10 + $0x240] ss:$24 sps:$4 sm:$0xff]  }
 0x41d   :  { %10141 = vst [vmem:[#allocation33_spill] sm:$0xff] %v8083_v58  ;;  %10142 = vst [vmem:[#allocation34_spill] sm:$0xff] %v8087_v59  ;;  %v8089_v20 = vld [vmem:[#allocation10 + $0x248] ss:$24 sps:$4 sm:$0xff]  }
 0x41e   :  { %10143 = vst [vmem:[#allocation35_spill] sm:$0xff] %v8089_v20 }
 0x41f   :  { %2232 = vmatpush1.bf16.msra.mxu1 %v6665_v30  ;;  %2273 = vmatpush1.bf16.msra.mxu0 %v6668_v61  ;;  %v8093_v30 = vld [vmem:[#allocation10 + $0x274] ss:$24 sps:$4 sm:$0xff]  }
 0x420   :  { %2233 = vmatprep.subr.bf16.mxu1 %v6673_v63  ;;  %2274 = vmatprep.subr.bf16.mxu0 %v6676_v11  ;;  %10144 = vst [vmem:[#allocation36_spill] sm:$0xff] %v8093_v30  ;;  %v8095_v61 = vld [vmem:[#allocation10 + $0x27c] ss:$24 sps:$4 sm:$0xff]   ;;  %v8099_v63 = vld [vmem:[#allocation10 + $0x270] ss:$24 sps:$4 sm:$0xff]  }
 0x421   :  { %10145 = vst [vmem:[#allocation37_spill] sm:$0xff] %v8095_v61  ;;  %10146 = vst [vmem:[#allocation38_spill] sm:$0xff] %v8099_v63  ;;  %v8101_v11 = vld [vmem:[#allocation10 + $0x278] ss:$24 sps:$4 sm:$0xff]  }
 0x422   :  { %10147 = vst [vmem:[#allocation39_spill] sm:$0xff] %v8101_v11 }
 0x423   :  { %2234 = vmatpush1.bf16.msra.mxu1 %v6671_v21  ;;  %2275 = vmatpush1.bf16.msra.mxu0 %v6674_v1  ;;  %v8105_v21 = vld [vmem:[#allocation10 + $0x2a4] ss:$24 sps:$4 sm:$0xff]  }
 0x424   :  { %2235 = vmatprep.subr.bf16.mxu1 %v6679_v2  ;;  %2276 = vmatprep.subr.bf16.mxu0 %v6682_v3  ;;  %10148 = vst [vmem:[#allocation40_spill] sm:$0xff] %v8105_v21  ;;  %v8107_v1 = vld [vmem:[#allocation10 + $0x2ac] ss:$24 sps:$4 sm:$0xff]   ;;  %v8111_v2 = vld [vmem:[#allocation10 + $0x2a0] ss:$24 sps:$4 sm:$0xff]  }
 0x425   :  { %10149 = vst [vmem:[#allocation41_spill] sm:$0xff] %v8107_v1  ;;  %10150 = vst [vmem:[#allocation42_spill] sm:$0xff] %v8111_v2  ;;  %v8113_v3 = vld [vmem:[#allocation10 + $0x2a8] ss:$24 sps:$4 sm:$0xff]  }
 0x426   :  { %10151 = vst [vmem:[#allocation43_spill] sm:$0xff] %v8113_v3 }
 0x427   :  { %2236 = vmatpush1.bf16.msra.mxu1 %v6677_v4  ;;  %2277 = vmatpush1.bf16.msra.mxu0 %v6680_v12  ;;  %v8117_v4 = vld [vmem:[#allocation10 + $0x2d4] ss:$24 sps:$4 sm:$0xff]  }
 0x428   :  { %3077 = vmatprep.subr.bf16.mxu1 %v7935_v51  ;;  %3118 = vmatprep.subr.bf16.mxu0 %v7937_v25  ;;  %10152 = vst [vmem:[#allocation44_spill] sm:$0xff] %v8117_v4  ;;  %v8119_v12 = vld [vmem:[#allocation10 + $0x2dc] ss:$24 sps:$4 sm:$0xff]  }
 0x429   :  { %10153 = vst [vmem:[#allocation45_spill] sm:$0xff] %v8119_v12 }
 0x42a   :  { %2254 = vmatmul.mubr.bf16.vlgmr.msra.gmra.mrb[20].mxu1 %v7925_v62  ;;  %2295 = vmatmul.mubr.bf16.vlgmr.msra.gmra.mrb[20].mxu0 %v7925_v62  ;;  %v7967_v62 = vld [vmem:[#allocation10 + $0x60] ss:$24 sps:$4 sm:$0xff]  }
 0x42b   :  { %3078 = vmatpush1.bf16.msra.mxu1 %v7939_v5  ;;  %3119 = vmatpush1.bf16.msra.mxu0 %v7941_v6 }
 0x42c   :  { %3079 = vmatprep.subr.bf16.mxu1 %v7945_v7  ;;  %3120 = vmatprep.subr.bf16.mxu0 %v7947_v8 }
 0x42d   :  { %3109 = vmatprep.mubr.bf16.mxu1 %v9797_v0  ;;  %3150 = vmatprep.mubr.bf16.mxu0 %v9797_v0  ;;  %v8123_v0 = vld [vmem:[#allocation10 + $0x2d0] ss:$24 sps:$4 sm:$0xff]  }
 0x42e   :  { %10154 = vst [vmem:[#allocation46_spill] sm:$0xff] %v8123_v0 }
 0x42f   :  { %3080 = vmatpush1.bf16.msra.mxu1 %v7953_v9  ;;  %3121 = vmatpush1.bf16.msra.mxu0 %v7955_v10 }
 0x430   :  { %3081 = vmatprep.subr.bf16.mxu1 %v7959_v28  ;;  %3122 = vmatprep.subr.bf16.mxu0 %v7961_v14 }
 0x433   :  { %3082 = vmatpush1.bf16.msra.mxu1 %v7967_v62  ;;  %3123 = vmatpush1.bf16.msra.mxu0 %v7969_v15 }
 0x434   :  { %3083 = vmatprep.subr.bf16.mxu1 %v7973_v16  ;;  %3124 = vmatprep.subr.bf16.mxu0 %v7975_v17 }
 0x437   :  { %3084 = vmatpush1.bf16.msra.mxu1 %v7979_v52  ;;  %3125 = vmatpush1.bf16.msra.mxu0 %v7981_v18 }
 0x438   :  { %3085 = vmatprep.subr.bf16.mxu1 %v7985_v19  ;;  %3126 = vmatprep.subr.bf16.mxu0 %v7987_v22 }
 0x43b   :  { %3086 = vmatpush1.bf16.msra.mxu1 %v7991_v23  ;;  %3127 = vmatpush1.bf16.msra.mxu0 %v7993_v37 }
 0x43c   :  { %3087 = vmatprep.subr.bf16.mxu1 %v7997_v24  ;;  %3128 = vmatprep.subr.bf16.mxu0 %v7999_v32 }
 0x43f   :  { %3088 = vmatpush1.bf16.msra.mxu1 %v8003_v26  ;;  %3129 = vmatpush1.bf16.msra.mxu0 %v8005_v27 }
 0x440   :  { %3089 = vmatprep.subr.bf16.mxu1 %v8009_v35  ;;  %3130 = vmatprep.subr.bf16.mxu0 %v8011_v29 }
 0x443   :  { %3090 = vmatpush1.bf16.msra.mxu1 %v8015_v31  ;;  %3131 = vmatpush1.bf16.msra.mxu0 %v8017_v33 }
 0x444   :  { %3091 = vmatprep.subr.bf16.mxu1 %v8021_v34  ;;  %3132 = vmatprep.subr.bf16.mxu0 %v8023_v43 }
 0x447   :  { %3092 = vmatpush1.bf16.msra.mxu1 %v8027_v38  ;;  %3133 = vmatpush1.bf16.msra.mxu0 %v8029_v39 }
 0x448   :  { %3093 = vmatprep.subr.bf16.mxu1 %v8033_v40  ;;  %3134 = vmatprep.subr.bf16.mxu0 %v8035_v13 }
 0x44b   :  { %3094 = vmatpush1.bf16.msra.mxu1 %v8039_v36  ;;  %3135 = vmatpush1.bf16.msra.mxu0 %v8041_v41 }
 0x44c   :  { %3095 = vmatprep.subr.bf16.mxu1 %v8045_v42  ;;  %3136 = vmatprep.subr.bf16.mxu0 %v8047_v44 }
 0x44f   :  { %3096 = vmatpush1.bf16.msra.mxu1 %v8051_v45  ;;  %3137 = vmatpush1.bf16.msra.mxu0 %v8053_v46 }
 0x450   :  { %3097 = vmatprep.subr.bf16.mxu1 %v8057_v47  ;;  %3138 = vmatprep.subr.bf16.mxu0 %v8059_v48 }
 0x453   :  { %3098 = vmatpush1.bf16.msra.mxu1 %v8063_v49  ;;  %3139 = vmatpush1.bf16.msra.mxu0 %v8065_v50 }
 0x454   :  { %3099 = vmatprep.subr.bf16.mxu1 %v8069_v53  ;;  %3140 = vmatprep.subr.bf16.mxu0 %v8071_v54  ;;  %v8371_v54 = vld [vmem:[#allocation10 + $0x434] ss:$24 sps:$4 sm:$0xff]  }
 0x455   :  { %10231 = vst [vmem:[#allocation122_spill] sm:$0xff] %v8371_v54 }
 0x457   :  { %3100 = vmatpush1.bf16.msra.mxu1 %v8075_v55  ;;  %3141 = vmatpush1.bf16.msra.mxu0 %v8077_v56  ;;  %v8369_v55 = vld [vmem:[#allocation10 + $0x42c] ss:$24 sps:$4 sm:$0xff]  }
 0x458   :  { %3101 = vmatprep.subr.bf16.mxu1 %v8081_v57  ;;  %3142 = vmatprep.subr.bf16.mxu0 %v8083_v58  ;;  %v6907_v58 = vld [vmem:[#allocation10 + $0x404] ss:$24 sps:$4 sm:$0xff]   ;;  %10230 = vst [vmem:[#allocation121_spill] sm:$0xff] %v8369_v55 }
 0x45b   :  { %3102 = vmatpush1.bf16.msra.mxu1 %v8087_v59  ;;  %3143 = vmatpush1.bf16.msra.mxu0 %v8089_v20  ;;  %v8231_v20 = vld [vmem:[#allocation10 + $0x1f4] ss:$24 sps:$4 sm:$0xff]  }
 0x45c   :  { %3103 = vmatprep.subr.bf16.mxu1 %v8093_v30  ;;  %3144 = vmatprep.subr.bf16.mxu0 %v8095_v61  ;;  %v6787_v61 = vld [vmem:[#allocation10 + $0x334] ss:$24 sps:$4 sm:$0xff]   ;;  %10189 = vst [vmem:[#allocation80_spill] sm:$0xff] %v8231_v20 }
 0x45d   :  { %v6835_v30 = vld [vmem:[#allocation10 + $0x4b4] ss:$24 sps:$4 sm:$0xff]  }
 0x45e   :  { %v8353_v59 = vld [vmem:[#allocation10 + $0x3fc] ss:$24 sps:$4 sm:$0xff]  }
 0x45f   :  { %3104 = vmatpush1.bf16.msra.mxu1 %v8099_v63  ;;  %3145 = vmatpush1.bf16.msra.mxu0 %v8101_v11  ;;  %v8125_v63 = vld [vmem:[#allocation10 + $0x2d8] ss:$24 sps:$4 sm:$0xff]   ;;  %v8129_v11 = vld [vmem:[#allocation10 + $0x14] ss:$24 sps:$4 sm:$0xff]   ;;  %10227 = vst [vmem:[#allocation118_spill] sm:$0xff] %v8353_v59 }
 0x460   :  { %3105 = vmatprep.subr.bf16.mxu1 %v8105_v21  ;;  %3146 = vmatprep.subr.bf16.mxu0 %v8107_v1  ;;  %10155 = vst [vmem:[#allocation47_spill] sm:$0xff] %v8125_v63  ;;  %10156 = vst [vmem:[#allocation48_spill] sm:$0xff] %v8129_v11  ;;  %v8131_v21 = vld [vmem:[#allocation10 + $0x304] ss:$24 sps:$4 sm:$0xff]   ;;  %v6783_v1 = vld [vmem:[#allocation10 + $0x10] ss:$24 sps:$4 sm:$0xff]  }
 0x461   :  { %10157 = vst [vmem:[#allocation49_spill] sm:$0xff] %v8131_v21 }
 0x463   :  { %3106 = vmatpush1.bf16.msra.mxu1 %v8111_v2  ;;  %3147 = vmatpush1.bf16.msra.mxu0 %v8113_v3  ;;  %v6784_v2 = vld [vmem:[#allocation10 + $0x300] ss:$24 sps:$4 sm:$0xff]   ;;  %v8137_v3 = vld [vmem:[#allocation10 + $0x44] ss:$24 sps:$4 sm:$0xff]  }
 0x464   :  { %3107 = vmatprep.subr.bf16.mxu1 %v8117_v4  ;;  %3148 = vmatprep.subr.bf16.mxu0 %v8119_v12  ;;  %10158 = vst [vmem:[#allocation50_spill] sm:$0xff] %v8137_v3  ;;  %v10159_v4 = vmov 0   ;;  %v8141_v12 = vld [vmem:[#allocation10 + $0x40] ss:$24 sps:$4 sm:$0xff]  }
 0x465   :  { %10160 = vst [vmem:[#allocation51_spill] sm:$0xff] %v8141_v12 }
 0x467   :  { %3108 = vmatpush1.bf16.msra.mxu1 %v8123_v0  ;;  %3149 = vmatpush1.bf16.msra.mxu0 %v8125_v63  ;;  %v8143_v0 = vld [vmem:[#allocation10 + $0x330] ss:$24 sps:$4 sm:$0xff]   ;;  %v8146_v63 = vld [vmem:[#allocation10 + $0x74] ss:$24 sps:$4 sm:$0xff]  }
 0x468   :  { %3159 = vmatprep.subr.bf16.mxu1 %v8129_v11  ;;  %3740 = vmatprep.subr.bf16.mxu0 %v8131_v21  ;;  %10161 = vst [vmem:[#allocation52_spill] sm:$0xff] %v8143_v0  ;;  %10162 = vst [vmem:[#allocation53_spill] sm:$0xff] %v8146_v63  ;;  %v8148_v11 = vld [vmem:[#allocation10 + $0x364] ss:$24 sps:$4 sm:$0xff]   ;;  %v8166_v21 = vld [vmem:[#allocation10 + $0xa0] ss:$24 sps:$4 sm:$0xff]  }
 0x469   :  { %10163 = vst [vmem:[#allocation54_spill] sm:$0xff] %v8148_v11  ;;  %10168 = vst [vmem:[#allocation59_spill] sm:$0xff] %v8166_v21 }
 0x46a   :  { %3110 = vmatmul.mubr.bf16.vlgmr.msra.gmra.mrb[24].mxu1 %v10159_v4  ;;  %3151 = vmatmul.mubr.bf16.vlgmr.msra.gmra.mrb[24].mxu0 %v10159_v4 }
 0x46b   :  { %3160 = vmatpush1.bf16.msra.mxu1 %v6783_v1  ;;  %3741 = vmatpush1.bf16.msra.mxu0 %v6784_v2  ;;  %v8154_v1 = vld [vmem:[#allocation10 + $0x70] ss:$24 sps:$4 sm:$0xff]   ;;  %v8156_v2 = vld [vmem:[#allocation10 + $0x360] ss:$24 sps:$4 sm:$0xff]  }
 0x46c   :  { %3161 = vmatprep.subr.bf16.mxu1 %v8137_v3  ;;  %3742 = vmatprep.subr.bf16.mxu0 %v6787_v61  ;;  %10164 = vst [vmem:[#allocation55_spill] sm:$0xff] %v8154_v1  ;;  %10165 = vst [vmem:[#allocation56_spill] sm:$0xff] %v8156_v2  ;;  %v8160_v61 = vld [vmem:[#allocation10 + $0xa4] ss:$24 sps:$4 sm:$0xff]   ;;  %v8162_v3 = vld [vmem:[#allocation10 + $0x394] ss:$24 sps:$4 sm:$0xff]  }
 0x46d   :  { %3191 = vmatprep.mubr.bf16.mxu1 %v10159_v4  ;;  %3772 = vmatprep.mubr.bf16.mxu0 %v10159_v4  ;;  %10166 = vst [vmem:[#allocation57_spill] sm:$0xff] %v8160_v61  ;;  %10167 = vst [vmem:[#allocation58_spill] sm:$0xff] %v8162_v3 }
 0x46f   :  { %3162 = vmatpush1.bf16.msra.mxu1 %v8141_v12  ;;  %3743 = vmatpush1.bf16.msra.mxu0 %v8143_v0  ;;  %v8168_v12 = vld [vmem:[#allocation10 + $0x390] ss:$24 sps:$4 sm:$0xff]   ;;  %v8172_v0 = vld [vmem:[#allocation10 + $0xd4] ss:$24 sps:$4 sm:$0xff]  }
 0x470   :  { %3163 = vmatprep.subr.bf16.mxu1 %v8146_v63  ;;  %3744 = vmatprep.subr.bf16.mxu0 %v8148_v11  ;;  %10169 = vst [vmem:[#allocation60_spill] sm:$0xff] %v8168_v12  ;;  %10170 = vst [vmem:[#allocation61_spill] sm:$0xff] %v8172_v0  ;;  %v8174_v63 = vld [vmem:[#allocation10 + $0x3c4] ss:$24 sps:$4 sm:$0xff]   ;;  %v8178_v11 = vld [vmem:[#allocation10 + $0xd0] ss:$24 sps:$4 sm:$0xff]  }
 0x471   :  { %10171 = vst [vmem:[#allocation62_spill] sm:$0xff] %v8174_v63  ;;  %10172 = vst [vmem:[#allocation63_spill] sm:$0xff] %v8178_v11 }
 0x473   :  { %3164 = vmatpush1.bf16.msra.mxu1 %v8154_v1  ;;  %3745 = vmatpush1.bf16.msra.mxu0 %v8156_v2  ;;  %v8180_v1 = vld [vmem:[#allocation10 + $0x3c0] ss:$24 sps:$4 sm:$0xff]   ;;  %v8184_v2 = vld [vmem:[#allocation10 + $0x104] ss:$24 sps:$4 sm:$0xff]  }
 0x474   :  { %3165 = vmatprep.subr.bf16.mxu1 %v8160_v61  ;;  %3746 = vmatprep.subr.bf16.mxu0 %v8162_v3  ;;  %10173 = vst [vmem:[#allocation64_spill] sm:$0xff] %v8180_v1  ;;  %10174 = vst [vmem:[#allocation65_spill] sm:$0xff] %v8184_v2  ;;  %v8186_v61 = vld [vmem:[#allocation10 + $0x3f4] ss:$24 sps:$4 sm:$0xff]   ;;  %v8190_v3 = vld [vmem:[#allocation10 + $0x100] ss:$24 sps:$4 sm:$0xff]  }
 0x475   :  { %10175 = vst [vmem:[#allocation66_spill] sm:$0xff] %v8186_v61  ;;  %10176 = vst [vmem:[#allocation67_spill] sm:$0xff] %v8190_v3 }
 0x477   :  { %3166 = vmatpush1.bf16.msra.mxu1 %v8166_v21  ;;  %3747 = vmatpush1.bf16.msra.mxu0 %v8168_v12  ;;  %v8192_v21 = vld [vmem:[#allocation10 + $0x3f0] ss:$24 sps:$4 sm:$0xff]   ;;  %v8196_v12 = vld [vmem:[#allocation10 + $0x134] ss:$24 sps:$4 sm:$0xff]  }
 0x478   :  { %3167 = vmatprep.subr.bf16.mxu1 %v8172_v0  ;;  %3748 = vmatprep.subr.bf16.mxu0 %v8174_v63  ;;  %10177 = vst [vmem:[#allocation68_spill] sm:$0xff] %v8192_v21  ;;  %10178 = vst [vmem:[#allocation69_spill] sm:$0xff] %v8196_v12  ;;  %v8198_v0 = vld [vmem:[#allocation10 + $0x424] ss:$24 sps:$4 sm:$0xff]   ;;  %v8202_v63 = vld [vmem:[#allocation10 + $0x130] ss:$24 sps:$4 sm:$0xff]  }
 0x479   :  { %10179 = vst [vmem:[#allocation70_spill] sm:$0xff] %v8198_v0  ;;  %10180 = vst [vmem:[#allocation71_spill] sm:$0xff] %v8202_v63 }
 0x47b   :  { %3168 = vmatpush1.bf16.msra.mxu1 %v8178_v11  ;;  %3749 = vmatpush1.bf16.msra.mxu0 %v8180_v1  ;;  %v8204_v11 = vld [vmem:[#allocation10 + $0x420] ss:$24 sps:$4 sm:$0xff]   ;;  %v8208_v1 = vld [vmem:[#allocation10 + $0x164] ss:$24 sps:$4 sm:$0xff]  }
 0x47c   :  { %3169 = vmatprep.subr.bf16.mxu1 %v8184_v2  ;;  %3750 = vmatprep.subr.bf16.mxu0 %v8186_v61  ;;  %10181 = vst [vmem:[#allocation72_spill] sm:$0xff] %v8204_v11  ;;  %10182 = vst [vmem:[#allocation73_spill] sm:$0xff] %v8208_v1  ;;  %v8210_v2 = vld [vmem:[#allocation10 + $0x454] ss:$24 sps:$4 sm:$0xff]   ;;  %v8214_v61 = vld [vmem:[#allocation10 + $0x160] ss:$24 sps:$4 sm:$0xff]  }
 0x47d   :  { %10183 = vst [vmem:[#allocation74_spill] sm:$0xff] %v8210_v2  ;;  %10184 = vst [vmem:[#allocation75_spill] sm:$0xff] %v8214_v61 }
 0x47f   :  { %3170 = vmatpush1.bf16.msra.mxu1 %v8190_v3  ;;  %3751 = vmatpush1.bf16.msra.mxu0 %v8192_v21  ;;  %v8216_v3 = vld [vmem:[#allocation10 + $0x450] ss:$24 sps:$4 sm:$0xff]   ;;  %v8220_v21 = vld [vmem:[#allocation10 + $0x194] ss:$24 sps:$4 sm:$0xff]  }
 0x480   :  { %3171 = vmatprep.subr.bf16.mxu1 %v8196_v12  ;;  %3752 = vmatprep.subr.bf16.mxu0 %v8198_v0  ;;  %10185 = vst [vmem:[#allocation76_spill] sm:$0xff] %v8216_v3  ;;  %10186 = vst [vmem:[#allocation77_spill] sm:$0xff] %v8220_v21  ;;  %v8222_v12 = vld [vmem:[#allocation10 + $0x484] ss:$24 sps:$4 sm:$0xff]   ;;  %v6831_v0 = vld [vmem:[#allocation10 + $0x190] ss:$24 sps:$4 sm:$0xff]  }
 0x481   :  { %10187 = vst [vmem:[#allocation78_spill] sm:$0xff] %v8222_v12 }
 0x483   :  { %3172 = vmatpush1.bf16.msra.mxu1 %v8202_v63  ;;  %3753 = vmatpush1.bf16.msra.mxu0 %v8204_v11  ;;  %v6832_v63 = vld [vmem:[#allocation10 + $0x480] ss:$24 sps:$4 sm:$0xff]   ;;  %v8228_v11 = vld [vmem:[#allocation10 + $0x1c4] ss:$24 sps:$4 sm:$0xff]  }
 0x484   :  { %3173 = vmatprep.subr.bf16.mxu1 %v8208_v1  ;;  %3754 = vmatprep.subr.bf16.mxu0 %v8210_v2  ;;  %10188 = vst [vmem:[#allocation79_spill] sm:$0xff] %v8228_v11  ;;  %v6837_v2 = vld [vmem:[#allocation10 + $0x1c0] ss:$24 sps:$4 sm:$0xff]   ;;  %v6838_v1 = vld [vmem:[#allocation10 + $0x4b0] ss:$24 sps:$4 sm:$0xff]  }
 0x487   :  { %3174 = vmatpush1.bf16.msra.mxu1 %v8214_v61  ;;  %3755 = vmatpush1.bf16.msra.mxu0 %v8216_v3  ;;  %v6841_v61 = vld [vmem:[#allocation10 + $0x4e4] ss:$24 sps:$4 sm:$0xff]   ;;  %v8233_v3 = vld [vmem:[#allocation10 + $0x1f0] ss:$24 sps:$4 sm:$0xff]  }
 0x488   :  { %3175 = vmatprep.subr.bf16.mxu1 %v8220_v21  ;;  %3756 = vmatprep.subr.bf16.mxu0 %v8222_v12  ;;  %10190 = vst [vmem:[#allocation81_spill] sm:$0xff] %v8233_v3  ;;  %v8235_v21 = vld [vmem:[#allocation10 + $0x4e0] ss:$24 sps:$4 sm:$0xff]   ;;  %v8238_v12 = vld [vmem:[#allocation10 + $0x224] ss:$24 sps:$4 sm:$0xff]  }
 0x489   :  { %10191 = vst [vmem:[#allocation82_spill] sm:$0xff] %v8235_v21  ;;  %10192 = vst [vmem:[#allocation83_spill] sm:$0xff] %v8238_v12 }
 0x48b   :  { %3176 = vmatpush1.bf16.msra.mxu1 %v6831_v0  ;;  %3757 = vmatpush1.bf16.msra.mxu0 %v6832_v63  ;;  %v8240_v0 = vld [vmem:[#allocation10 + $0x514] ss:$24 sps:$4 sm:$0xff]   ;;  %v8246_v63 = vld [vmem:[#allocation10 + $0x510] ss:$24 sps:$4 sm:$0xff]  }
 0x48c   :  { %3177 = vmatprep.subr.bf16.mxu1 %v8228_v11  ;;  %3758 = vmatprep.subr.bf16.mxu0 %v6835_v30  ;;  %10193 = vst [vmem:[#allocation84_spill] sm:$0xff] %v8240_v0  ;;  %v8244_v30 = vld [vmem:[#allocation10 + $0x220] ss:$24 sps:$4 sm:$0xff]   ;;  %10195 = vst [vmem:[#allocation86_spill] sm:$0xff] %v8246_v63 }
 0x48d   :  { %10194 = vst [vmem:[#allocation85_spill] sm:$0xff] %v8244_v30  ;;  %v8332_v11 = vld [vmem:[#allocation10 + $0x3c8] ss:$24 sps:$4 sm:$0xff]  }
 0x48e   :  { %10222 = vst [vmem:[#allocation113_spill] sm:$0xff] %v8332_v11 }
 0x48f   :  { %3178 = vmatpush1.bf16.msra.mxu1 %v6837_v2  ;;  %3759 = vmatpush1.bf16.msra.mxu0 %v6838_v1  ;;  %v8250_v1 = vld [vmem:[#allocation10 + $0x254] ss:$24 sps:$4 sm:$0xff]   ;;  %v8252_v2 = vld [vmem:[#allocation10 + $0x544] ss:$24 sps:$4 sm:$0xff]  }
 0x490   :  { %3179 = vmatprep.subr.bf16.mxu1 %v8231_v20  ;;  %3760 = vmatprep.subr.bf16.mxu0 %v6841_v61  ;;  %10196 = vst [vmem:[#allocation87_spill] sm:$0xff] %v8250_v1  ;;  %10197 = vst [vmem:[#allocation88_spill] sm:$0xff] %v8252_v2  ;;  %v8256_v61 = vld [vmem:[#allocation10 + $0x250] ss:$24 sps:$4 sm:$0xff]   ;;  %v6898_v20 = vld [vmem:[#allocation10 + $0x3a0] ss:$24 sps:$4 sm:$0xff]  }
 0x491   :  { %10198 = vst [vmem:[#allocation89_spill] sm:$0xff] %v8256_v61 }
 0x493   :  { %3180 = vmatpush1.bf16.msra.mxu1 %v8233_v3  ;;  %3761 = vmatpush1.bf16.msra.mxu0 %v8235_v21  ;;  %v8258_v3 = vld [vmem:[#allocation10 + $0x540] ss:$24 sps:$4 sm:$0xff]   ;;  %v8262_v21 = vld [vmem:[#allocation10 + $0x284] ss:$24 sps:$4 sm:$0xff]  }
 0x494   :  { %3181 = vmatprep.subr.bf16.mxu1 %v8238_v12  ;;  %3762 = vmatprep.subr.bf16.mxu0 %v8240_v0  ;;  %10199 = vst [vmem:[#allocation90_spill] sm:$0xff] %v8258_v3  ;;  %10200 = vst [vmem:[#allocation91_spill] sm:$0xff] %v8262_v21  ;;  %v8264_v12 = vld [vmem:[#allocation10 + $0x574] ss:$24 sps:$4 sm:$0xff]   ;;  %v8268_v0 = vld [vmem:[#allocation10 + $0x280] ss:$24 sps:$4 sm:$0xff]  }
 0x495   :  { %10201 = vst [vmem:[#allocation92_spill] sm:$0xff] %v8264_v12  ;;  %10202 = vst [vmem:[#allocation93_spill] sm:$0xff] %v8268_v0 }
 0x497   :  { %3182 = vmatpush1.bf16.msra.mxu1 %v8244_v30  ;;  %3763 = vmatpush1.bf16.msra.mxu0 %v8246_v63  ;;  %v8270_v30 = vld [vmem:[#allocation10 + $0x570] ss:$24 sps:$4 sm:$0xff]   ;;  %v8274_v63 = vld [vmem:[#allocation10 + $0x2b4] ss:$24 sps:$4 sm:$0xff]  }
 0x498   :  { %3183 = vmatprep.subr.bf16.mxu1 %v8250_v1  ;;  %3764 = vmatprep.subr.bf16.mxu0 %v8252_v2  ;;  %10203 = vst [vmem:[#allocation94_spill] sm:$0xff] %v8270_v30  ;;  %10204 = vst [vmem:[#allocation95_spill] sm:$0xff] %v8274_v63  ;;  %v8276_v1 = vld [vmem:[#allocation10 + $0x5a4] ss:$24 sps:$4 sm:$0xff]   ;;  %v8280_v2 = vld [vmem:[#allocation10 + $0x2b0] ss:$24 sps:$4 sm:$0xff]  }
 0x499   :  { %10205 = vst [vmem:[#allocation96_spill] sm:$0xff] %v8276_v1  ;;  %10206 = vst [vmem:[#allocation97_spill] sm:$0xff] %v8280_v2 }
 0x49b   :  { %3184 = vmatpush1.bf16.msra.mxu1 %v8256_v61  ;;  %3765 = vmatpush1.bf16.msra.mxu0 %v8258_v3  ;;  %v8282_v61 = vld [vmem:[#allocation10 + $0x5a0] ss:$24 sps:$4 sm:$0xff]   ;;  %v8286_v3 = vld [vmem:[#allocation10 + $0x2e4] ss:$24 sps:$4 sm:$0xff]  }
 0x49c   :  { %3185 = vmatprep.subr.bf16.mxu1 %v8262_v21  ;;  %3766 = vmatprep.subr.bf16.mxu0 %v8264_v12  ;;  %10207 = vst [vmem:[#allocation98_spill] sm:$0xff] %v8282_v61  ;;  %10208 = vst [vmem:[#allocation99_spill] sm:$0xff] %v8286_v3  ;;  %v8288_v21 = vld [vmem:[#allocation10 + $0x5d4] ss:$24 sps:$4 sm:$0xff]   ;;  %v8292_v12 = vld [vmem:[#allocation10 + $0x2e0] ss:$24 sps:$4 sm:$0xff]  }
 0x49d   :  { %10209 = vst [vmem:[#allocation100_spill] sm:$0xff] %v8288_v21  ;;  %10210 = vst [vmem:[#allocation101_spill] sm:$0xff] %v8292_v12 }
 0x49f   :  { %3186 = vmatpush1.bf16.msra.mxu1 %v8268_v0  ;;  %3767 = vmatpush1.bf16.msra.mxu0 %v8270_v30  ;;  %v8294_v0 = vld [vmem:[#allocation10 + $0x5d0] ss:$24 sps:$4 sm:$0xff]   ;;  %v8298_v30 = vld [vmem:[#allocation10 + $0x30c] ss:$24 sps:$4 sm:$0xff]  }
 0x4a0   :  { %3187 = vmatprep.subr.bf16.mxu1 %v8274_v63  ;;  %3768 = vmatprep.subr.bf16.mxu0 %v8276_v1  ;;  %10211 = vst [vmem:[#allocation102_spill] sm:$0xff] %v8294_v0  ;;  %10212 = vst [vmem:[#allocation103_spill] sm:$0xff] %v8298_v30  ;;  %v8300_v63 = vld [vmem:[#allocation10 + $0x314] ss:$24 sps:$4 sm:$0xff]   ;;  %v8304_v1 = vld [vmem:[#allocation10 + $0x308] ss:$24 sps:$4 sm:$0xff]  }
 0x4a1   :  { %10213 = vst [vmem:[#allocation104_spill] sm:$0xff] %v8300_v63  ;;  %10214 = vst [vmem:[#allocation105_spill] sm:$0xff] %v8304_v1 }
 0x4a3   :  { %3188 = vmatpush1.bf16.msra.mxu1 %v8280_v2  ;;  %3769 = vmatpush1.bf16.msra.mxu0 %v8282_v61  ;;  %v6880_v2 = vld [vmem:[#allocation10 + $0x310] ss:$24 sps:$4 sm:$0xff]   ;;  %v8308_v61 = vld [vmem:[#allocation10 + $0x33c] ss:$24 sps:$4 sm:$0xff]  }
 0x4a4   :  { %3189 = vmatprep.subr.bf16.mxu1 %v8286_v3  ;;  %3770 = vmatprep.subr.bf16.mxu0 %v8288_v21  ;;  %10215 = vst [vmem:[#allocation106_spill] sm:$0xff] %v8308_v61  ;;  %v6883_v3 = vld [vmem:[#allocation10 + $0x344] ss:$24 sps:$4 sm:$0xff]  }
 0x4a5   :  { %v8316_v21 = vld [vmem:[#allocation10 + $0x36c] ss:$24 sps:$4 sm:$0xff]  }
 0x4a6   :  { %10217 = vst [vmem:[#allocation108_spill] sm:$0xff] %v8316_v21 }
 0x4a7   :  { %3190 = vmatpush1.bf16.msra.mxu1 %v8292_v12  ;;  %3771 = vmatpush1.bf16.msra.mxu0 %v8294_v0  ;;  %v8313_v12 = vld [vmem:[#allocation10 + $0x338] ss:$24 sps:$4 sm:$0xff]  }
 0x4a8   :  { %3781 = vmatprep.subr.bf16.mxu1 %v8298_v30  ;;  %3822 = vmatprep.subr.bf16.mxu0 %v8300_v63  ;;  %10216 = vst [vmem:[#allocation107_spill] sm:$0xff] %v8313_v12  ;;  %v6886_v0 = vld [vmem:[#allocation10 + $0x340] ss:$24 sps:$4 sm:$0xff]   ;;  %v6889_v30 = vld [vmem:[#allocation10 + $0x374] ss:$24 sps:$4 sm:$0xff]  }
 0x4a9   :  { %v8321_v63 = vld [vmem:[#allocation10 + $0x368] ss:$24 sps:$4 sm:$0xff]  }
 0x4aa   :  { %3192 = vmatmul.mubr.bf16.vlgmr.msra.gmra.mrb[28].mxu1 %v10159_v4  ;;  %3773 = vmatmul.mubr.bf16.vlgmr.msra.gmra.mrb[28].mxu0 %v10159_v4  ;;  %10218 = vst [vmem:[#allocation109_spill] sm:$0xff] %v8321_v63 }
 0x4ab   :  { %3782 = vmatpush1.bf16.msra.mxu1 %v8304_v1  ;;  %3823 = vmatpush1.bf16.msra.mxu0 %v6880_v2  ;;  %v6892_v1 = vld [vmem:[#allocation10 + $0x370] ss:$24 sps:$4 sm:$0xff]   ;;  %v8324_v2 = vld [vmem:[#allocation10 + $0x39c] ss:$24 sps:$4 sm:$0xff]  }
 0x4ac   :  { %3783 = vmatprep.subr.bf16.mxu1 %v8308_v61  ;;  %3824 = vmatprep.subr.bf16.mxu0 %v6883_v3  ;;  %10219 = vst [vmem:[#allocation110_spill] sm:$0xff] %v8324_v2  ;;  %v6895_v61 = vld [vmem:[#allocation10 + $0x3a4] ss:$24 sps:$4 sm:$0xff]   ;;  %v8327_v3 = vld [vmem:[#allocation10 + $0x398] ss:$24 sps:$4 sm:$0xff]  }
 0x4ad   :  { %3813 = vmatprep.mubr.bf16.mxu1 %v10159_v4  ;;  %3854 = vmatprep.mubr.bf16.mxu0 %v10159_v4  ;;  %10220 = vst [vmem:[#allocation111_spill] sm:$0xff] %v8327_v3 }
 0x4af   :  { %3784 = vmatpush1.bf16.msra.mxu1 %v8313_v12  ;;  %3825 = vmatpush1.bf16.msra.mxu0 %v6886_v0  ;;  %v8330_v12 = vld [vmem:[#allocation10 + $0x3cc] ss:$24 sps:$4 sm:$0xff]  }
 0x4b0   :  { %3785 = vmatprep.subr.bf16.mxu1 %v8316_v21  ;;  %3826 = vmatprep.subr.bf16.mxu0 %v6889_v30  ;;  %10221 = vst [vmem:[#allocation112_spill] sm:$0xff] %v8330_v12  ;;  %v6901_v0 = vld [vmem:[#allocation10 + $0x3d4] ss:$24 sps:$4 sm:$0xff]   ;;  %v8335_v21 = vsub.s32 0, %v7723_v60  ;;  %v8338_v30 = vsub.s32 2, %v7723_v60 }
 0x4b2   :  { %10223 = vst [vmem:[#allocation114_spill] sm:$0xff] %v8335_v21  ;;  %10224 = vst [vmem:[#allocation115_spill] sm:$0xff] %v8338_v30 }
 0x4b3   :  { %3786 = vmatpush1.bf16.msra.mxu1 %v8321_v63  ;;  %3827 = vmatpush1.bf16.msra.mxu0 %v6892_v1  ;;  %v6904_v1 = vld [vmem:[#allocation10 + $0x3d0] ss:$24 sps:$4 sm:$0xff]   ;;  %v8350_v63 = vsub.s32 3, %v7723_v60 }
 0x4b4   :  { %3787 = vmatprep.subr.bf16.mxu1 %v8324_v2  ;;  %3828 = vmatprep.subr.bf16.mxu0 %v6895_v61  ;;  %v8344_v2 = vld [vmem:[%s9791_s7] sm:$0xff]  ;;  %v8347_v61 = vsub.s32 1, %v7723_v60 }
 0x4b5   :  { %10226 = vst [vmem:[#allocation117_spill] sm:$0xff] %v8350_v63  ;;  %v1507_v56 = vrot.slane %v8344_v2, %v8350_v63 }
 0x4b6   :  { %10225 = vst [vmem:[#allocation116_spill] sm:$0xff] %v8347_v61  ;;  %v1499_v57 = vrot.slane %v8344_v2, %v8347_v61 }
 0x4b7   :  { %3788 = vmatpush1.bf16.msra.mxu1 %v8327_v3  ;;  %3829 = vmatpush1.bf16.msra.mxu0 %v6898_v20  ;;  %v1495_v20 = vrot.slane %v8344_v2, %v8335_v21  ;;  %v1503_v3 = vrot.slane %v8344_v2, %v8338_v30 }
 0x4b8   :  { %3789 = vmatprep.subr.bf16.mxu1 %v8330_v12  ;;  %3830 = vmatprep.subr.bf16.mxu0 %v6901_v0  ;;  %v8364_v12 = vld [vmem:[#allocation10 + $0x3f8] ss:$24 sps:$4 sm:$0xff]  }
 0x4b9   :  { %10228 = vst [vmem:[#allocation119_spill] sm:$0xff] %v8364_v12  ;;  %v8366_v0 = vld [vmem:[#allocation10 + $0x400] ss:$24 sps:$4 sm:$0xff]  }
 0x4ba   :  { %10229 = vst [vmem:[#allocation120_spill] sm:$0xff] %v8366_v0 }
 0x4bb   :  { %3790 = vmatpush1.bf16.msra.mxu1 %v8332_v11  ;;  %3831 = vmatpush1.bf16.msra.mxu0 %v6904_v1 }
 0x4bc   :  { %3791 = vmatprep.subr.bf16.mxu1 %v8353_v59  ;;  %3832 = vmatprep.subr.bf16.mxu0 %v6907_v58  ;;  %v8375_v59 = vld [vmem:[#allocation10 + $0x428] ss:$24 sps:$4 sm:$0xff]  }
 0x4bd   :  { %v2091_v53 = vpop.f32.mrb[12].mxu1  ;;  %v2132_v11 = vpop.f32.mrb[12].mxu0  ;;  %10232 = vst [vmem:[#allocation123_spill] sm:$0xff] %v8375_v59  ;;  %v8377_v58 = vld [vmem:[#allocation10 + $0x430] ss:$24 sps:$4 sm:$0xff]  }
 0x4be   :  { %v2092_v1 = vadd.f32 %v2091_v53, %v1495_v20  ;;  %v2133_v50 = vadd.f32 %v2132_v11, %v1503_v3  ;;  %v2093_v49 = vpop.f32.mrb[13].mxu1  ;;  %v2134_v48 = vpop.f32.mrb[13].mxu0  ;;  %10233 = vst [vmem:[#allocation124_spill] sm:$0xff] %v8377_v58  ;;  %v8381_v53 = vld [vmem:[#allocation10 + $0x45c] ss:$24 sps:$4 sm:$0xff]  }
 0x4bf   :  { %v2094_v47 = vadd.f32 %v2093_v49, %v1499_v57  ;;  %v2135_v46 = vadd.f32 %v2134_v48, %v1507_v56  ;;  %3792 = vmatpush1.bf16.msra.mxu1 %v8364_v12  ;;  %3833 = vmatpush1.bf16.msra.mxu0 %v8366_v0  ;;  %v2095_v45 = vpop.f32.mrb[14].mxu1  ;;  %v2136_v44 = vpop.f32.mrb[14].mxu0  ;;  %10234 = vst [vmem:[#allocation125_spill] sm:$0xff] %v8381_v53  ;;  %v8383_v49 = vld [vmem:[#allocation10 + $0x464] ss:$24 sps:$4 sm:$0xff]   ;;  %v8457_v0 = vsub.s32 6, %v7723_v60 }
 0x4c0   :  { %v2096_v42 = vpop.f32.mrb[15].mxu1  ;;  %v2137_v41 = vpop.f32.mrb[15].mxu0  ;;  %3793 = vmatprep.subr.bf16.mxu1 %v8369_v55  ;;  %3834 = vmatprep.subr.bf16.mxu0 %v8371_v54  ;;  %10235 = vst [vmem:[#allocation126_spill] sm:$0xff] %v8383_v49  ;;  %v8401_v57 = vld [vmem:[#allocation10 + $0x48c] ss:$24 sps:$4 sm:$0xff]  }
 0x4c1   :  { %v8385_v48 = vcombine.low %v2092_v1, %v2094_v47  ;;  %v8387_v56 = vcombine.high %v2092_v1, %v2094_v47  ;;  %v8389_v45 = vcombine.low %v2133_v50, %v2135_v46  ;;  %v8391_v44 = vcombine.high %v2133_v50, %v2135_v46  ;;  %v8395_v41 = vld [vmem:[#allocation10 + $0x458] ss:$24 sps:$4 sm:$0xff]   ;;  %10240 = vst [vmem:[#allocation131_spill] sm:$0xff] %v8401_v57  ;;  %v8403_v47 = vld [vmem:[#allocation10 + $0x494] ss:$24 sps:$4 sm:$0xff]  }
 0x4c2   :  { %10238 = vst [vmem:[#allocation129_spill] sm:$0xff] %v8395_v41  ;;  %v8397_v42 = vld [vmem:[#allocation10 + $0x460] ss:$24 sps:$4 sm:$0xff]   ;;  %10241 = vst [vmem:[#allocation132_spill] sm:$0xff] %v8403_v47  ;;  %v8409_v50 = vld [vmem:[#allocation10 + $0x490] ss:$24 sps:$4 sm:$0xff]  }
 0x4c3   :  { %10236 = vst [vmem:[#allocation127_spill] sm:$0xff] %v8389_v45  ;;  %10237 = vst [vmem:[#allocation128_spill] sm:$0xff] %v8391_v44  ;;  %3794 = vmatpush1.bf16.msra.mxu1 %v8375_v59  ;;  %3835 = vmatpush1.bf16.msra.mxu0 %v8377_v58  ;;  %v8407_v46 = vld [vmem:[#allocation10 + $0x488] ss:$24 sps:$4 sm:$0xff]   ;;  %v8413_v11 = vld [vmem:[#allocation10 + $0x4bc] ss:$24 sps:$4 sm:$0xff]  }
 0x4c4   :  { %10239 = vst [vmem:[#allocation130_spill] sm:$0xff] %v8397_v42  ;;  %3795 = vmatprep.subr.bf16.mxu1 %v8381_v53  ;;  %3836 = vmatprep.subr.bf16.mxu0 %v8383_v49  ;;  %10242 = vst [vmem:[#allocation133_spill] sm:$0xff] %v8407_v46  ;;  %v8415_v3 = vld [vmem:[#allocation10 + $0x4c4] ss:$24 sps:$4 sm:$0xff]   ;;  %v8419_v20 = vld [vmem:[#allocation10 + $0x4b8] ss:$24 sps:$4 sm:$0xff]  }
 0x4c5   :  { %10243 = vst [vmem:[#allocation134_spill] sm:$0xff] %v8409_v50  ;;  %10244 = vst [vmem:[#allocation135_spill] sm:$0xff] %v8413_v11  ;;  %v8421_v1 = vld [vmem:[#allocation10 + $0x4c0] ss:$24 sps:$4 sm:$0xff]   ;;  %v8427_v49 = vld [vmem:[#allocation10 + $0x4f4] ss:$24 sps:$4 sm:$0xff]  }
 0x4c6   :  { %10245 = vst [vmem:[#allocation136_spill] sm:$0xff] %v8415_v3  ;;  %10246 = vst [vmem:[#allocation137_spill] sm:$0xff] %v8419_v20  ;;  %v8433_v58 = vld [vmem:[#allocation10 + $0x4f0] ss:$24 sps:$4 sm:$0xff]   ;;  %v8439_v54 = vld [vmem:[#allocation10 + $0x524] ss:$24 sps:$4 sm:$0xff]  }
 0x4c7   :  { %3796 = vmatpush1.bf16.msra.mxu1 %v8395_v41  ;;  %3837 = vmatpush1.bf16.msra.mxu0 %v8397_v42  ;;  %10247 = vst [vmem:[#allocation138_spill] sm:$0xff] %v8421_v1  ;;  %v8425_v42 = vld [vmem:[#allocation10 + $0x4ec] ss:$24 sps:$4 sm:$0xff]   ;;  %10249 = vst [vmem:[#allocation140_spill] sm:$0xff] %v8427_v49 }
 0x4c8   :  { %3797 = vmatprep.subr.bf16.mxu1 %v8401_v57  ;;  %3838 = vmatprep.subr.bf16.mxu0 %v8403_v47  ;;  %10248 = vst [vmem:[#allocation139_spill] sm:$0xff] %v8425_v42  ;;  %v8431_v47 = vld [vmem:[#allocation10 + $0x4e8] ss:$24 sps:$4 sm:$0xff]   ;;  %10251 = vst [vmem:[#allocation142_spill] sm:$0xff] %v8433_v58  ;;  %v8493_v41 = vld [vmem:[#allocation10 + $0x5ac] ss:$24 sps:$4 sm:$0xff]  }
 0x4c9   :  { %10250 = vst [vmem:[#allocation141_spill] sm:$0xff] %v8431_v47  ;;  %10253 = vst [vmem:[#allocation144_spill] sm:$0xff] %v8439_v54  ;;  %v8489_v57 = vld [vmem:[#allocation10 + $0x580] ss:$24 sps:$4 sm:$0xff]  }
 0x4ca   :  { %10259 = vst [vmem:[#allocation150_spill] sm:$0xff] %v8457_v0 }
 0x4cb   :  { %3798 = vmatpush1.bf16.msra.mxu1 %v8407_v46  ;;  %3839 = vmatpush1.bf16.msra.mxu0 %v8409_v50  ;;  %v8437_v50 = vld [vmem:[#allocation10 + $0x51c] ss:$24 sps:$4 sm:$0xff]  }
 0x4cc   :  { %3799 = vmatprep.subr.bf16.mxu1 %v8413_v11  ;;  %3840 = vmatprep.subr.bf16.mxu0 %v8415_v3  ;;  %10252 = vst [vmem:[#allocation143_spill] sm:$0xff] %v8437_v50  ;;  %v8443_v3 = vld [vmem:[#allocation10 + $0x518] ss:$24 sps:$4 sm:$0xff]   ;;  %v8473_v11 = vld [vmem:[#allocation10 + $0x57c] ss:$24 sps:$4 sm:$0xff]  }
 0x4cd   :  { %10254 = vst [vmem:[#allocation145_spill] sm:$0xff] %v8443_v3  ;;  %10264 = vst [vmem:[#allocation155_spill] sm:$0xff] %v8473_v11  ;;  %v8475_v46 = vld [vmem:[#allocation10 + $0x584] ss:$24 sps:$4 sm:$0xff]  }
 0x4ce   :  { %10265 = vst [vmem:[#allocation156_spill] sm:$0xff] %v8475_v46 }
 0x4cf   :  { %3800 = vmatpush1.bf16.msra.mxu1 %v8419_v20  ;;  %3841 = vmatpush1.bf16.msra.mxu0 %v8421_v1  ;;  %v8445_v20 = vld [vmem:[#allocation10 + $0x520] ss:$24 sps:$4 sm:$0xff]   ;;  %v8449_v1 = vld [vmem:[#allocation10 + $0x54c] ss:$24 sps:$4 sm:$0xff]  }
 0x4d0   :  { %3801 = vmatprep.subr.bf16.mxu1 %v8425_v42  ;;  %3842 = vmatprep.subr.bf16.mxu0 %v8427_v49  ;;  %10255 = vst [vmem:[#allocation146_spill] sm:$0xff] %v8445_v20  ;;  %10256 = vst [vmem:[#allocation147_spill] sm:$0xff] %v8449_v1  ;;  %v8451_v42 = vld [vmem:[#allocation10 + $0x554] ss:$24 sps:$4 sm:$0xff]   ;;  %v8454_v49 = vsub.s32 4, %v7723_v60 }
 0x4d1   :  { %10257 = vst [vmem:[#allocation148_spill] sm:$0xff] %v8451_v42 }
 0x4d2   :  { %10258 = vst [vmem:[#allocation149_spill] sm:$0xff] %v8454_v49 }
 0x4d3   :  { %3802 = vmatpush1.bf16.msra.mxu1 %v8431_v47  ;;  %3843 = vmatpush1.bf16.msra.mxu0 %v8433_v58  ;;  %v8461_v58 = vld [vmem:[#allocation10 + $0x548] ss:$24 sps:$4 sm:$0xff]  }
 0x4d4   :  { %3803 = vmatprep.subr.bf16.mxu1 %v8437_v50  ;;  %3844 = vmatprep.subr.bf16.mxu0 %v8439_v54  ;;  %10260 = vst [vmem:[#allocation151_spill] sm:$0xff] %v8461_v58  ;;  %v8463_v47 = vld [vmem:[#allocation10 + $0x550] ss:$24 sps:$4 sm:$0xff]   ;;  %v8466_v54 = vsub.s32 5, %v7723_v60  ;;  %v8469_v50 = vsub.s32 7, %v7723_v60 }
 0x4d5   :  { %10261 = vst [vmem:[#allocation152_spill] sm:$0xff] %v8463_v47 }
 0x4d6   :  { %10262 = vst [vmem:[#allocation153_spill] sm:$0xff] %v8466_v54  ;;  %10263 = vst [vmem:[#allocation154_spill] sm:$0xff] %v8469_v50  ;;  %v1515_v60 = vrot.slane %v8344_v2, %v8466_v54 }
 0x4d7   :  { %3804 = vmatpush1.bf16.msra.mxu1 %v8443_v3  ;;  %3845 = vmatpush1.bf16.msra.mxu0 %v8445_v20  ;;  %v1511_v20 = vrot.slane %v8344_v2, %v8454_v49  ;;  %v1519_v3 = vrot.slane %v8344_v2, %v8457_v0  ;;  %v8495_v0 = vld [vmem:[#allocation10 + $0x5b4] ss:$24 sps:$4 sm:$0xff]  }
 0x4d8   :  { %3805 = vmatprep.subr.bf16.mxu1 %v8449_v1  ;;  %3846 = vmatprep.subr.bf16.mxu0 %v8451_v42  ;;  %v1523_v42 = vrot.slane %v8344_v2, %v8469_v50  ;;  %v8487_v1 = vld [vmem:[#allocation10 + $0x578] ss:$24 sps:$4 sm:$0xff]  }
 0x4db   :  { %3806 = vmatpush1.bf16.msra.mxu1 %v8461_v58  ;;  %3847 = vmatpush1.bf16.msra.mxu0 %v8463_v47 }
 0x4dc   :  { %3807 = vmatprep.subr.bf16.mxu1 %v8473_v11  ;;  %3848 = vmatprep.subr.bf16.mxu0 %v8475_v46  ;;  %v8499_v11 = vld [vmem:[#allocation10 + $0x5a8] ss:$24 sps:$4 sm:$0xff]  }
 0x4dd   :  { %v2173_v58 = vpop.f32.mrb[16].mxu1  ;;  %v2214_v47 = vpop.f32.mrb[16].mxu0  ;;  %v8501_v46 = vld [vmem:[#allocation10 + $0x5b0] ss:$24 sps:$4 sm:$0xff]  }
 0x4de   :  { %v2174_v53 = vadd.f32 %v2173_v58, %v1511_v20  ;;  %v2215_v59 = vadd.f32 %v2214_v47, %v1519_v3  ;;  %v2175_v55 = vpop.f32.mrb[17].mxu1  ;;  %v2216_v12 = vpop.f32.mrb[17].mxu0  ;;  %v8505_v58 = vld [vmem:[#allocation10 + $0x5dc] ss:$24 sps:$4 sm:$0xff]   ;;  %v10289_v20 = vld [vmem:[#allocation39_spill] sm:$0xff] }
 0x4df   :  { %v2176_v54 = vadd.f32 %v2175_v55, %v1515_v60  ;;  %v2217_v2 = vadd.f32 %v2216_v12, %v1523_v42  ;;  %v2177_v50 = vpop.f32.mrb[18].mxu1  ;;  %v2218_v49 = vpop.f32.mrb[18].mxu0  ;;  %3808 = vmatpush1.bf16.msra.mxu1 %v8487_v1  ;;  %3849 = vmatpush1.bf16.msra.mxu0 %v8489_v57  ;;  %v8507_v55 = vld [vmem:[#allocation10 + $0x5e4] ss:$24 sps:$4 sm:$0xff]   ;;  %v10290_v60 = vld [vmem:[#allocation40_spill] sm:$0xff] }
 0x4e0   :  { %v2178_v44 = vpop.f32.mrb[19].mxu1  ;;  %v2219_v45 = vpop.f32.mrb[19].mxu0  ;;  %3809 = vmatprep.subr.bf16.mxu1 %v8493_v41  ;;  %3850 = vmatprep.subr.bf16.mxu0 %v8495_v0  ;;  %v10287_v50 = vld [vmem:[#allocation37_spill] sm:$0xff]  ;;  %v10288_v3 = vld [vmem:[#allocation38_spill] sm:$0xff] }
 0x4e1   :  { %v8509_v12 = vcombine.low %v2174_v53, %v2176_v54  ;;  %v8511_v49 = vcombine.high %v2174_v53, %v2176_v54  ;;  %v8513_v42 = vcombine.low %v2215_v59, %v2217_v2  ;;  %v8515_v47 = vcombine.high %v2215_v59, %v2217_v2  ;;  %v8519_v45 = vld [vmem:[#allocation10 + $0x5d8] ss:$24 sps:$4 sm:$0xff]  }
 0x4e2   :  { %v8521_v44 = vld [vmem:[#allocation10 + $0x5e0] ss:$24 sps:$4 sm:$0xff]   ;;  %v10286_v53 = vld [vmem:[#allocation36_spill] sm:$0xff] }
 0x4e3   :  { %3810 = vmatpush1.bf16.msra.mxu1 %v8499_v11  ;;  %3851 = vmatpush1.bf16.msra.mxu0 %v8501_v46  ;;  %v10283_v54 = vld [vmem:[#allocation33_spill] sm:$0xff]  ;;  %v10284_v59 = vld [vmem:[#allocation34_spill] sm:$0xff] }
 0x4e4   :  { %3811 = vmatprep.subr.bf16.mxu1 %v8505_v58  ;;  %3852 = vmatprep.subr.bf16.mxu0 %v8507_v55  ;;  %v10291_v2 = vld [vmem:[#allocation41_spill] sm:$0xff] }
 0x4e7   :  { %3812 = vmatpush1.bf16.msra.mxu1 %v8519_v45  ;;  %3853 = vmatpush1.bf16.msra.mxu0 %v8521_v44 }
 0x4e8   :  { %3968 = vmatprep.subr.bf16.mxu1 %v7935_v51  ;;  %4009 = vmatprep.subr.bf16.mxu0 %v7937_v25  ;;  %v1489_v51 = vld [vmem:[%s9791_s7 + $0x8] sm:$0xf] }
 0x4e9   :  { %v1527_v25 = vrot.slane %v1489_v51, %v8335_v21 }
 0x4ea   :  { %3814 = vmatmul.mubr.bf16.vlgmr.msra.gmra.mrb[32].mxu1 %v10159_v4  ;;  %3855 = vmatmul.mubr.bf16.vlgmr.msra.gmra.mrb[32].mxu0 %v10159_v4  ;;  %v10285_v4 = vld [vmem:[#allocation35_spill] sm:$0xff] }
 0x4eb   :  { %3969 = vmatpush1.bf16.msra.mxu1 %v7939_v5  ;;  %4010 = vmatpush1.bf16.msra.mxu0 %v7941_v6  ;;  %v1535_v5 = vrot.slane %v1489_v51, %v8338_v30  ;;  %v1531_v6 = vrot.slane %v1489_v51, %v8347_v61 }
 0x4ec   :  { %3970 = vmatprep.subr.bf16.mxu1 %v7945_v7  ;;  %4011 = vmatprep.subr.bf16.mxu0 %v7947_v8  ;;  %v1539_v7 = vrot.slane %v1489_v51, %v8350_v63  ;;  %v10292_v51 = vld [vmem:[#allocation42_spill] sm:$0xff] }
 0x4ef   :  { %3971 = vmatpush1.bf16.msra.mxu1 %v7953_v9  ;;  %4012 = vmatpush1.bf16.msra.mxu0 %v7955_v10 }
 0x4f0   :  { %3972 = vmatprep.subr.bf16.mxu1 %v7959_v28  ;;  %4013 = vmatprep.subr.bf16.mxu0 %v7961_v14 }
 0x4f3   :  { %3973 = vmatpush1.bf16.msra.mxu1 %v7967_v62  ;;  %4014 = vmatpush1.bf16.msra.mxu0 %v7969_v15 }
 0x4f4   :  { %3974 = vmatprep.subr.bf16.mxu1 %v7973_v16  ;;  %4015 = vmatprep.subr.bf16.mxu0 %v7975_v17 }
 0x4f7   :  { %3975 = vmatpush1.bf16.msra.mxu1 %v7979_v52  ;;  %4016 = vmatpush1.bf16.msra.mxu0 %v7981_v18 }
 0x4f8   :  { %3976 = vmatprep.subr.bf16.mxu1 %v7985_v19  ;;  %4017 = vmatprep.subr.bf16.mxu0 %v7987_v22 }
 0x4fb   :  { %3977 = vmatpush1.bf16.msra.mxu1 %v7991_v23  ;;  %4018 = vmatpush1.bf16.msra.mxu0 %v7993_v37 }
 0x4fc   :  { %3978 = vmatprep.subr.bf16.mxu1 %v7997_v24  ;;  %4019 = vmatprep.subr.bf16.mxu0 %v7999_v32  ;;  %v10269_v32 = vld [vmem:[#allocation19_spill] sm:$0xff] }
 0x4fd   :  { %v2255_v8 = vpop.f32.mrb[20].mxu1  ;;  %v2296_v9 = vpop.f32.mrb[20].mxu0 }
 0x4fe   :  { %v2256_v10 = vadd.f32 %v2255_v8, %v1527_v25  ;;  %v2297_v28 = vadd.f32 %v2296_v9, %v1535_v5  ;;  %v2257_v14 = vpop.f32.mrb[21].mxu1  ;;  %v2298_v62 = vpop.f32.mrb[21].mxu0  ;;  %v10293_v25 = vld [vmem:[#allocation43_spill] sm:$0xff]  ;;  %v10294_v5 = vld [vmem:[#allocation44_spill] sm:$0xff] }
 0x4ff   :  { %v2258_v15 = vadd.f32 %v2257_v14, %v1531_v6  ;;  %v2299_v16 = vadd.f32 %v2298_v62, %v1539_v7  ;;  %v2259_v17 = vpop.f32.mrb[22].mxu1  ;;  %v2300_v52 = vpop.f32.mrb[22].mxu0  ;;  %3979 = vmatpush1.bf16.msra.mxu1 %v8003_v26  ;;  %4020 = vmatpush1.bf16.msra.mxu0 %v8005_v27  ;;  %v10270_v26 = vld [vmem:[#allocation20_spill] sm:$0xff]  ;;  %v10271_v27 = vld [vmem:[#allocation21_spill] sm:$0xff]  ;;  %v10296_v7 = vld [vmem:[#allocation46_spill] sm:$0xff] }
 0x500   :  { %v2260_v18 = vpop.f32.mrb[23].mxu1  ;;  %v2301_v19 = vpop.f32.mrb[23].mxu0  ;;  %3980 = vmatprep.subr.bf16.mxu1 %v8009_v35  ;;  %4021 = vmatprep.subr.bf16.mxu0 %v8011_v29  ;;  %v10272_v35 = vld [vmem:[#allocation22_spill] sm:$0xff]  ;;  %v10273_v29 = vld [vmem:[#allocation23_spill] sm:$0xff]  ;;  %v10295_v6 = vld [vmem:[#allocation45_spill] sm:$0xff] }
 0x501   :  { %v8562_v22 = vcombine.low %v2256_v10, %v2258_v15  ;;  %v8564_v23 = vcombine.high %v2256_v10, %v2258_v15  ;;  %v8566_v37 = vcombine.low %v2297_v28, %v2299_v16  ;;  %v8568_v24 = vcombine.high %v2297_v28, %v2299_v16  ;;  %v10297_v8 = vld [vmem:[#allocation47_spill] sm:$0xff]  ;;  %v10298_v9 = vld [vmem:[#allocation48_spill] sm:$0xff]  ;;  %v10299_v10 = vld [vmem:[#allocation49_spill] sm:$0xff] }
 0x502   :  { %v2532_v28 = vld [vmem:[%s9793_s9] sm:$0x3f] }
 0x503   :  { %10266 = vst [vmem:[#allocation157_spill] sm:$0xff] %v8562_v22  ;;  %10267 = vst [vmem:[#allocation158_spill] sm:$0xff] %v8566_v37  ;;  %3981 = vmatpush1.bf16.msra.mxu1 %v8015_v31  ;;  %4022 = vmatpush1.bf16.msra.mxu0 %v8017_v33  ;;  %v10274_v31 = vld [vmem:[#allocation24_spill] sm:$0xff]  ;;  %v10275_v33 = vld [vmem:[#allocation25_spill] sm:$0xff]  ;;  %v8614_v14 = vrot.slane %v2532_v28, %v8335_v21  ;;  %v8617_v62 = vrot.slane %v2532_v28, %v8338_v30 }
 0x504   :  { %10268 = vst [vmem:[#allocation159_spill] sm:$0xff] %v8568_v24  ;;  %3982 = vmatprep.subr.bf16.mxu1 %v8021_v34  ;;  %4023 = vmatprep.subr.bf16.mxu0 %v8023_v43  ;;  %v10276_v34 = vld [vmem:[#allocation26_spill] sm:$0xff]  ;;  %v10277_v43 = vld [vmem:[#allocation27_spill] sm:$0xff]  ;;  %v8620_v15 = vrot.slane %v2532_v28, %v8347_v61  ;;  %v8623_v16 = vrot.slane %v2532_v28, %v8350_v63 }
 0x505   :  { %10300 = vst [vmem:[#allocation19_spill] sm:$0xff] %v8614_v14  ;;  %10301 = vst [vmem:[#allocation20_spill] sm:$0xff] %v8617_v62 }
 0x506   :  { %10302 = vst [vmem:[#allocation21_spill] sm:$0xff] %v8620_v15 }
 0x507   :  { %3983 = vmatpush1.bf16.msra.mxu1 %v8027_v38  ;;  %4024 = vmatpush1.bf16.msra.mxu0 %v8029_v39  ;;  %v10278_v38 = vld [vmem:[#allocation28_spill] sm:$0xff]  ;;  %v10279_v39 = vld [vmem:[#allocation29_spill] sm:$0xff] }
 0x508   :  { %3984 = vmatprep.subr.bf16.mxu1 %v8033_v40  ;;  %4025 = vmatprep.subr.bf16.mxu0 %v8035_v13  ;;  %v10280_v40 = vld [vmem:[#allocation30_spill] sm:$0xff]  ;;  %v10281_v13 = vld [vmem:[#allocation31_spill] sm:$0xff] }
 0x50b   :  { %3985 = vmatpush1.bf16.msra.mxu1 %v8039_v36  ;;  %4026 = vmatpush1.bf16.msra.mxu0 %v10269_v32  ;;  %v10282_v36 = vld [vmem:[#allocation32_spill] sm:$0xff] }
 0x50c   :  { %3986 = vmatprep.subr.bf16.mxu1 %v10270_v26  ;;  %4027 = vmatprep.subr.bf16.mxu0 %v10271_v27 }
 0x50f   :  { %3987 = vmatpush1.bf16.msra.mxu1 %v10272_v35  ;;  %4028 = vmatpush1.bf16.msra.mxu0 %v10273_v29 }
 0x510   :  { %3988 = vmatprep.subr.bf16.mxu1 %v10274_v31  ;;  %4029 = vmatprep.subr.bf16.mxu0 %v10275_v33 }
 0x513   :  { %3989 = vmatpush1.bf16.msra.mxu1 %v10276_v34  ;;  %4030 = vmatpush1.bf16.msra.mxu0 %v10277_v43 }
 0x514   :  { %3990 = vmatprep.subr.bf16.mxu1 %v10278_v38  ;;  %4031 = vmatprep.subr.bf16.mxu0 %v10279_v39 }
 0x517   :  { %3991 = vmatpush1.bf16.msra.mxu1 %v10280_v40  ;;  %4032 = vmatpush1.bf16.msra.mxu0 %v10281_v13 }
 0x518   :  { %3992 = vmatprep.subr.bf16.mxu1 %v10282_v36  ;;  %4033 = vmatprep.subr.bf16.mxu0 %v10283_v54 }
 0x51b   :  { %3993 = vmatpush1.bf16.msra.mxu1 %v10284_v59  ;;  %4034 = vmatpush1.bf16.msra.mxu0 %v10285_v4  ;;  %v10303_v4 = vld [vmem:[#allocation127_spill] sm:$0xff] }
 0x51c   :  { %3994 = vmatprep.subr.bf16.mxu1 %v10286_v53  ;;  %4035 = vmatprep.subr.bf16.mxu0 %v10287_v50  ;;  %v10304_v50 = vld [vmem:[#allocation128_spill] sm:$0xff] }
 0x51f   :  { %3995 = vmatpush1.bf16.msra.mxu1 %v10288_v3  ;;  %4036 = vmatpush1.bf16.msra.mxu0 %v10289_v20 }
 0x520   :  { %3996 = vmatprep.subr.bf16.mxu1 %v10290_v60  ;;  %4037 = vmatprep.subr.bf16.mxu0 %v10291_v2 }
 0x523   :  { %3997 = vmatpush1.bf16.msra.mxu1 %v10292_v51  ;;  %4038 = vmatpush1.bf16.msra.mxu0 %v10293_v25 }
 0x524   :  { %3998 = vmatprep.subr.bf16.mxu1 %v10294_v5  ;;  %4039 = vmatprep.subr.bf16.mxu0 %v10295_v6  ;;  %v8636_v6 = vld [vmem:[%s9793_s9 + $0x6] sm:$0x3f] }
 0x527   :  { %3999 = vmatpush1.bf16.msra.mxu1 %v10296_v7  ;;  %4040 = vmatpush1.bf16.msra.mxu0 %v10297_v8  ;;  %v10305_v7 = vld [vmem:[#allocation149_spill] sm:$0xff] }
 0x528   :  { %4050 = vmatprep.subr.bf16.mxu1 %v10298_v9  ;;  %4199 = vmatprep.subr.bf16.mxu0 %v10299_v10  ;;  %v8639_v8 = vrot.slane %v2532_v28, %v10305_v7  ;;  %v8643_v9 = vrot.slane %v8636_v6, %v8335_v21  ;;  %v10306_v10 = vld [vmem:[#allocation153_spill] sm:$0xff] }
 0x53d   :  { %v3111_v17 = vpop.f32.mrb[24].mxu1  ;;  %v3152_v52 = vpop.f32.mrb[24].mxu0 }
 0x53e   :  { %v3112_v18 = vadd.f32 %v3111_v17, %v8614_v14  ;;  %v3153_v19 = vadd.f32 %v3152_v52, %v8617_v62  ;;  %v3113_v32 = vpop.f32.mrb[25].mxu1  ;;  %v3154_v26 = vpop.f32.mrb[25].mxu0  ;;  %v8646_v17 = vrot.slane %v2532_v28, %v10306_v10  ;;  %v8650_v52 = vrot.slane %v8636_v6, %v8347_v61 }
 0x53f   :  { %v3114_v27 = vadd.f32 %v3113_v32, %v8620_v15  ;;  %v3155_v35 = vadd.f32 %v3154_v26, %v8623_v16  ;;  %v3115_v29 = vpop.f32.mrb[26].mxu1  ;;  %v3156_v31 = vpop.f32.mrb[26].mxu0 }
 0x540   :  { %v3116_v33 = vpop.f32.mrb[27].mxu1  ;;  %v3157_v34 = vpop.f32.mrb[27].mxu0 }
 0x541   :  { %v3202_v43 = vcombine.low %v3112_v18, %v3114_v27  ;;  %v3222_v38 = vcombine.low %v3153_v19, %v3155_v35 }
 0x543   :  { %v3203_v39 = vrot.slane %v3202_v43, 1  ;;  %v3206_v40 = vadd.f32 %v3202_v43, %v8385_v48  ;;  %v3223_v59 = vrot.slane %v3222_v38, 1  ;;  %v3226_v53 = vadd.f32 %v3222_v38, %v10303_v4 }
 0x545   :  { %v3207_v13 = vadd.f32 %v3203_v39, %v8387_v56  ;;  %v6050_v36 = vmul.f32 -1.442695, %v3206_v40  ;;  %v3227_v3 = vadd.f32 %v3223_v59, %v10304_v50  ;;  %v6052_v20 = vmul.f32 -1.442695, %v3226_v53 }
 0x547   :  { %v6051_v54 = vmul.f32 -1.442695, %v3207_v13  ;;  %7007 = vpow2.f32 %v6050_v36  ;;  %v6053_v60 = vmul.f32 -1.442695, %v3227_v3 }
 0x549   :  { %7009 = vpow2.f32 %v6051_v54 }
 0x54a   :  { %7011 = vpow2.f32 %v6052_v20 }
 0x54b   :  { %7013 = vpow2.f32 %v6053_v60 }
 0x551   :  { %v7008_v2 = vpop.eup %7007 }
 0x552   :  { %v3214_v25 = vadd.f32 1.0, %v7008_v2 }
 0x553   :  { %v7010_v51 = vpop.eup %7009 }
 0x554   :  { %v3215_v5 = vadd.f32 1.0, %v7010_v51  ;;  %7015 = vrcp.f32 %v3214_v25  ;;  %v7012_v18 = vpop.eup %7011 }
 0x555   :  { %v7014_v26 = vpop.eup %7013  ;;  %v3234_v33 = vadd.f32 1.0, %v7012_v18 }
 0x556   :  { %7017 = vrcp.f32 %v3215_v5  ;;  %v3235_v13 = vadd.f32 1.0, %v7014_v26 }
 0x557   :  { %7019 = vrcp.f32 %v3234_v33 }
 0x558   :  { %7021 = vrcp.f32 %v3235_v13 }
 0x55e   :  { %v7016_v59 = vpop.eup %7015 }
 0x560   :  { %v7018_v20 = vpop.eup %7017 }
 0x561   :  { %v7020_v25 = vpop.eup %7019 }
 0x562   :  { %v7022_v5 = vpop.eup %7021  ;;  %v3252_v18 = vsub.f32 1.0, %v7020_v25 }
 0x57d   :  { %v3193_v19 = vpop.f32.mrb[28].mxu1  ;;  %v3774_v32 = vpop.f32.mrb[28].mxu0 }
 0x57e   :  { %v3194_v27 = vadd.f32 %v3193_v19, %v8639_v8  ;;  %v3775_v35 = vadd.f32 %v3774_v32, %v8643_v9  ;;  %v3195_v29 = vpop.f32.mrb[29].mxu1  ;;  %v3776_v31 = vpop.f32.mrb[29].mxu0  ;;  %v3253_v32 = vsub.f32 1.0, %v7022_v5 }
 0x57f   :  { %v3196_v34 = vadd.f32 %v3195_v29, %v8646_v17  ;;  %v3777_v28 = vadd.f32 %v3776_v31, %v8650_v52  ;;  %v3197_v43 = vpop.f32.mrb[30].mxu1  ;;  %v3778_v38 = vpop.f32.mrb[30].mxu0  ;;  %v3257_v31 = vmul.f32 0.0, %v7022_v5 }
 0x580   :  { %v3198_v39 = vpop.f32.mrb[31].mxu1  ;;  %v3779_v40 = vpop.f32.mrb[31].mxu0 }
 0x581   :  { %v3242_v36 = vcombine.low %v3194_v27, %v3196_v34  ;;  %v3865_v54 = vcombine.low %v3775_v35, %v3777_v28  ;;  %v3256_v27 = vmul.f32 0.0, %v7020_v25 }
 0x583   :  { %v3243_v53 = vrot.slane %v3242_v36, 1  ;;  %v3246_v3 = vmul.f32 %v7016_v59, %v3242_v36 }
 0x585   :  { %v3247_v60 = vmul.f32 %v7018_v20, %v3243_v53  ;;  %v3248_v2 = vadd.f32 %v3246_v3, %v8509_v12  ;;  %v3866_v53 = vrot.slane %v3865_v54, 5 }
 0x587   :  { %v3249_v51 = vadd.f32 %v3247_v60, %v8511_v49  ;;  %7023 = vtanh.f32 %v3248_v2  ;;  %v3867_v60 = vrot.slane %v3865_v54, 6 }
 0x589   :  { %7025 = vtanh.f32 %v3249_v51 }
 0x591   :  { %v7024_v19 = vpop.eup %7023 }
 0x592   :  { %v3254_v26 = vmul.f32 %v7024_v19, %v3252_v18  ;;  %v3870_v18 = vadd.f32 %v3866_v53, %v8513_v42  ;;  %v10313_v53 = vld [vmem:[#allocation57_spill] sm:$0xff] }
 0x593   :  { %v7026_v35 = vpop.eup %7025 }
 0x594   :  { %v3255_v29 = vmul.f32 %v7026_v35, %v3253_v32  ;;  %v8658_v33 = vadd.f32 %v3256_v27, %v3254_v26  ;;  %v3871_v26 = vadd.f32 %v3867_v60, %v8515_v47  ;;  %v10316_v60 = vld [vmem:[#allocation59_spill] sm:$0xff] }
 0x596   :  { %v8660_v34 = vadd.f32 %v3257_v31, %v3255_v29  ;;  %v3935_v28 = vrot.slane %v8658_v33, %v10305_v7  ;;  %v3931_v43 = vrot.slane %v8658_v33, %v8335_v21  ;;  %v6150_v29 = vmul.f32 -1.442695, %v3870_v18  ;;  %v8678_v31 = vld [vmem:[#allocation10 + $0x10] ss:$24 sps:$4 sm:$0xff]   ;;  %v10319_v18 = vld [vmem:[#allocation62_spill] sm:$0xff] }
 0x597   :  { %v6151_v54 = vmul.f32 -1.442695, %v3871_v26 }
 0x598   :  { %v3943_v38 = vrot.slane %v8660_v34, %v10305_v7  ;;  %v3939_v39 = vrot.slane %v8660_v34, %v8335_v21  ;;  %v3949_v40 = vpack.c.bf16 %v3935_v28, %v3935_v28  ;;  %v3948_v36 = vpack.c.bf16 %v3931_v43, %v3931_v43  ;;  %v10307_v28 = vld [vmem:[#allocation50_spill] sm:$0xff] }
 0x599   :  { %v8682_v43 = vld [vmem:[#allocation10 + $0x300] ss:$24 sps:$4 sm:$0xff]   ;;  %7027 = vpow2.f32 %v6150_v29  ;;  %v10322_v29 = vld [vmem:[#allocation64_spill] sm:$0xff] }
 0x59a   :  { %v3951_v13 = vpack.c.bf16 %v3943_v38, %v3943_v38  ;;  %v3950_v59 = vpack.c.bf16 %v3939_v39, %v3939_v39  ;;  %v3957_v2 = vunpack.c.l.b16 %v3949_v40  ;;  %v3956_v25 = vunpack.c.l.b16 %v3948_v36  ;;  %v8685_v38 = vld [vmem:[#allocation10 + $0x334] ss:$24 sps:$4 sm:$0xff]   ;;  %v10308_v39 = vld [vmem:[#allocation51_spill] sm:$0xff]  ;;  %v10311_v36 = vld [vmem:[#allocation54_spill] sm:$0xff] }
 0x59b   :  { %7029 = vpow2.f32 %v6151_v54  ;;  %v10309_v40 = vld [vmem:[#allocation53_spill] sm:$0xff]  ;;  %v10323_v54 = vld [vmem:[#allocation66_spill] sm:$0xff] }
 0x59c   :  { %v3959_v3 = vunpack.c.l.b16 %v3951_v13  ;;  %v3958_v20 = vunpack.c.l.b16 %v3950_v59  ;;  %v10310_v13 = vld [vmem:[#allocation52_spill] sm:$0xff]  ;;  %v10312_v59 = vld [vmem:[#allocation55_spill] sm:$0xff] }
 0x59e   :  { %v3962_v51 = vrot.slane %v3959_v3, 7  ;;  %v3960_v5 = vrot.slane %v3958_v20, 7  ;;  %v10314_v3 = vld [vmem:[#allocation56_spill] sm:$0xff]  ;;  %v10315_v20 = vld [vmem:[#allocation58_spill] sm:$0xff] }
 0x5a0   :  { %v3963_v19 = vsel %vm933_vm2, %v3962_v51, %v3957_v2  ;;  %v3961_v32 = vsel %vm933_vm2, %v3960_v5, %v3956_v25  ;;  %v10317_v51 = vld [vmem:[#allocation61_spill] sm:$0xff]  ;;  %v10318_v25 = vld [vmem:[#allocation60_spill] sm:$0xff] }
 0x5a1   :  { %v3965_v27 = vpack.c.b16 %v3963_v19, %v3963_v19  ;;  %v8674_v35 = vpack.c.b16 %v3961_v32, %v3961_v32  ;;  %v10320_v32 = vld [vmem:[#allocation63_spill] sm:$0xff] }
 0x5a3   :  { %4000 = vmatprep.mubr.bf16.mxu1 %v3965_v27  ;;  %4041 = vmatprep.mubr.bf16.mxu0 %v3965_v27  ;;  %v7028_v2 = vpop.eup %7027 }
 0x5a4   :  { %4001 = vmatmul.mubr.bf16.vlgmr.msra.gmra.mrb[36].mxu1 %v8674_v35  ;;  %4042 = vmatmul.mubr.bf16.vlgmr.msra.gmra.mrb[36].mxu0 %v8674_v35  ;;  %v3878_v19 = vadd.f32 1.0, %v7028_v2 }
 0x5a5   :  { %4051 = vmatpush1.bf16.msra.mxu1 %v8678_v31  ;;  %4082 = vmatprep.mubr.bf16.mxu1 %v3965_v27  ;;  %v7030_v5 = vpop.eup %7029  ;;  %v10321_v27 = vld [vmem:[#allocation65_spill] sm:$0xff] }
 0x5a6   :  { %4052 = vmatprep.subr.bf16.mxu1 %v10307_v28  ;;  %4200 = vmatpush1.bf16.msra.mxu0 %v8682_v43  ;;  %v3879_v26 = vadd.f32 1.0, %v7030_v5  ;;  %7031 = vrcp.f32 %v3878_v19  ;;  %v10324_v28 = vld [vmem:[#allocation67_spill] sm:$0xff]  ;;  %v10333_v19 = vld [vmem:[#allocation73_spill] sm:$0xff] }
 0x5a7   :  { %4201 = vmatprep.subr.bf16.mxu0 %v8685_v38 }
 0x5a8   :  { %7033 = vrcp.f32 %v3879_v26 }
 0x5a9   :  { %4053 = vmatpush1.bf16.msra.mxu1 %v10308_v39  ;;  %v10325_v39 = vld [vmem:[#allocation69_spill] sm:$0xff] }
 0x5aa   :  { %4054 = vmatprep.subr.bf16.mxu1 %v10309_v40  ;;  %4202 = vmatpush1.bf16.msra.mxu0 %v10310_v13  ;;  %v8708_v40 = vrot.slane %v8636_v6, %v8338_v30  ;;  %v8712_v13 = vrot.slane %v8636_v6, %v10305_v7  ;;  %v10350_v30 = vld [vmem:[#allocation89_spill] sm:$0xff] }
 0x5ab   :  { %4203 = vmatprep.subr.bf16.mxu0 %v10311_v36  ;;  %v10328_v36 = vld [vmem:[#allocation68_spill] sm:$0xff] }
 0x5ac   :  { %10326 = vst [vmem:[#allocation22_spill] sm:$0xff] %v8708_v40  ;;  %10327 = vst [vmem:[#allocation23_spill] sm:$0xff] %v8712_v13 }
 0x5ad   :  { %4055 = vmatpush1.bf16.msra.mxu1 %v10312_v59  ;;  %v8717_v59 = vrot.slane %v8636_v6, %v8350_v63 }
 0x5ae   :  { %4056 = vmatprep.subr.bf16.mxu1 %v10313_v53  ;;  %4204 = vmatpush1.bf16.msra.mxu0 %v10314_v3  ;;  %v8721_v53 = vrot.slane %v8636_v6, %v10306_v10  ;;  %v10331_v3 = vld [vmem:[#allocation70_spill] sm:$0xff] }
 0x5af   :  { %4205 = vmatprep.subr.bf16.mxu0 %v10315_v20  ;;  %10329 = vst [vmem:[#allocation24_spill] sm:$0xff] %v8717_v59  ;;  %v10332_v20 = vld [vmem:[#allocation71_spill] sm:$0xff] }
 0x5b0   :  { %10330 = vst [vmem:[#allocation25_spill] sm:$0xff] %v8721_v53 }
 0x5b1   :  { %4057 = vmatpush1.bf16.msra.mxu1 %v10316_v60 }
 0x5b2   :  { %4058 = vmatprep.subr.bf16.mxu1 %v10317_v51  ;;  %4206 = vmatpush1.bf16.msra.mxu0 %v10318_v25 }
 0x5b3   :  { %4207 = vmatprep.subr.bf16.mxu0 %v10319_v18 }
 0x5b5   :  { %4059 = vmatpush1.bf16.msra.mxu1 %v10320_v32  ;;  %v10334_v32 = vld [vmem:[#allocation72_spill] sm:$0xff] }
 0x5b6   :  { %4060 = vmatprep.subr.bf16.mxu1 %v10321_v27  ;;  %4208 = vmatpush1.bf16.msra.mxu0 %v10322_v29 }
 0x5b7   :  { %4209 = vmatprep.subr.bf16.mxu0 %v10323_v54  ;;  %v10335_v54 = vld [vmem:[#allocation74_spill] sm:$0xff] }
 0x5b9   :  { %4061 = vmatpush1.bf16.msra.mxu1 %v10324_v28 }
 0x5ba   :  { %4062 = vmatprep.subr.bf16.mxu1 %v10325_v39  ;;  %4210 = vmatpush1.bf16.msra.mxu0 %v10328_v36 }
 0x5bb   :  { %4211 = vmatprep.subr.bf16.mxu0 %v10331_v3 }
 0x5bd   :  { %4063 = vmatpush1.bf16.msra.mxu1 %v10332_v20  ;;  %v3815_v60 = vpop.f32.mrb[32].mxu1  ;;  %v3856_v2 = vpop.f32.mrb[32].mxu0  ;;  %v10336_v20 = vld [vmem:[#allocation75_spill] sm:$0xff] }
 0x5be   :  { %v3816_v51 = vadd.f32 %v3815_v60, %v8708_v40  ;;  %v3857_v25 = vadd.f32 %v3856_v2, %v8712_v13  ;;  %v3817_v5 = vpop.f32.mrb[33].mxu1  ;;  %v3858_v18 = vpop.f32.mrb[33].mxu0  ;;  %4064 = vmatprep.subr.bf16.mxu1 %v10333_v19  ;;  %4212 = vmatpush1.bf16.msra.mxu0 %v10334_v32  ;;  %v10337_v60 = vld [vmem:[#allocation77_spill] sm:$0xff]  ;;  %v10338_v2 = vld [vmem:[#allocation76_spill] sm:$0xff] }
 0x5bf   :  { %v3818_v26 = vadd.f32 %v3817_v5, %v8717_v59  ;;  %v3859_v6 = vadd.f32 %v3858_v18, %v8721_v53  ;;  %v3819_v27 = vpop.f32.mrb[34].mxu1  ;;  %v3860_v29 = vpop.f32.mrb[34].mxu0  ;;  %4213 = vmatprep.subr.bf16.mxu0 %v10335_v54  ;;  %v10339_v18 = vld [vmem:[#allocation78_spill] sm:$0xff] }
 0x5c0   :  { %v3820_v28 = vpop.f32.mrb[35].mxu1  ;;  %v3861_v39 = vpop.f32.mrb[35].mxu0 }
 0x5c1   :  { %v3886_v36 = vcombine.low %v3816_v51, %v3818_v26  ;;  %v3907_v3 = vcombine.low %v3857_v25, %v3859_v6  ;;  %4065 = vmatpush1.bf16.msra.mxu1 %v10336_v20  ;;  %v7032_v19 = vpop.eup %7031  ;;  %v8738_v26 = vld [vmem:[#allocation10 + $0x190] ss:$24 sps:$4 sm:$0xff]   ;;  %v8742_v28 = vld [vmem:[#allocation10 + $0x480] ss:$24 sps:$4 sm:$0xff]  }
 0x5c2   :  { %4066 = vmatprep.subr.bf16.mxu1 %v10337_v60  ;;  %4214 = vmatpush1.bf16.msra.mxu0 %v10338_v2  ;;  %v7034_v27 = vpop.eup %7033  ;;  %v10340_v6 = vld [vmem:[#allocation79_spill] sm:$0xff]  ;;  %v10342_v2 = vld [vmem:[#allocation81_spill] sm:$0xff] }
 0x5c3   :  { %v3887_v32 = vrot.slane %v3886_v36, 5  ;;  %v3888_v21 = vrot.slane %v3886_v36, 6  ;;  %v3908_v5 = vrot.slane %v3907_v3, 5  ;;  %v3909_v7 = vrot.slane %v3907_v3, 6  ;;  %4215 = vmatprep.subr.bf16.mxu0 %v10339_v18  ;;  %v8745_v3 = vld [vmem:[#allocation10 + $0x4b4] ss:$24 sps:$4 sm:$0xff]  }
 0x5c4   :  { %v8752_v20 = vld [vmem:[#allocation10 + $0x4b0] ss:$24 sps:$4 sm:$0xff]   ;;  %v8755_v60 = vld [vmem:[#allocation10 + $0x4e4] ss:$24 sps:$4 sm:$0xff]  }
 0x5c5   :  { %v3891_v29 = vadd.f32 %v3887_v32, %v8562_v22  ;;  %v3892_v54 = vadd.f32 %v3888_v21, %v8564_v23  ;;  %v3912_v51 = vmul.f32 %v7032_v19, %v3908_v5  ;;  %v3913_v25 = vmul.f32 %v7034_v27, %v3909_v7  ;;  %4067 = vmatpush1.bf16.msra.mxu1 %v8738_v26  ;;  %v8748_v21 = vld [vmem:[#allocation10 + $0x1c0] ss:$24 sps:$4 sm:$0xff]   ;;  %v10341_v7 = vld [vmem:[#allocation80_spill] sm:$0xff] }
 0x5c6   :  { %4068 = vmatprep.subr.bf16.mxu1 %v10340_v6  ;;  %4216 = vmatpush1.bf16.msra.mxu0 %v8742_v28  ;;  %v10343_v19 = vld [vmem:[#allocation83_spill] sm:$0xff]  ;;  %v10344_v32 = vld [vmem:[#allocation82_spill] sm:$0xff]  ;;  %v10345_v5 = vld [vmem:[#allocation84_spill] sm:$0xff] }
 0x5c7   :  { %v6152_v39 = vmul.f32 -1.442695, %v3891_v29  ;;  %v6153_v36 = vmul.f32 -1.442695, %v3892_v54  ;;  %4217 = vmatprep.subr.bf16.mxu0 %v8745_v3  ;;  %v10346_v18 = vld [vmem:[#allocation85_spill] sm:$0xff]  ;;  %v10347_v27 = vld [vmem:[#allocation87_spill] sm:$0xff] }
 0x5c8   :  { %v10348_v29 = vld [vmem:[#allocation86_spill] sm:$0xff]  ;;  %v10349_v6 = vld [vmem:[#allocation88_spill] sm:$0xff] }
 0x5c9   :  { %7035 = vpow2.f32 %v6152_v39  ;;  %4069 = vmatpush1.bf16.msra.mxu1 %v8748_v21 }
 0x5ca   :  { %7037 = vpow2.f32 %v6153_v36  ;;  %4070 = vmatprep.subr.bf16.mxu1 %v10341_v7  ;;  %4218 = vmatpush1.bf16.msra.mxu0 %v8752_v20  ;;  %v3914_v7 = vadd.f32 %v3912_v51, %v8566_v37  ;;  %v10356_v51 = vld [vmem:[#allocation94_spill] sm:$0xff] }
 0x5cb   :  { %4219 = vmatprep.subr.bf16.mxu0 %v8755_v60 }
 0x5cd   :  { %4071 = vmatpush1.bf16.msra.mxu1 %v10342_v2 }
 0x5ce   :  { %4072 = vmatprep.subr.bf16.mxu1 %v10343_v19  ;;  %4220 = vmatpush1.bf16.msra.mxu0 %v10344_v32  ;;  %v3915_v19 = vadd.f32 %v3913_v25, %v8568_v24  ;;  %v10351_v32 = vld [vmem:[#allocation91_spill] sm:$0xff]  ;;  %v10358_v25 = vld [vmem:[#allocation97_spill] sm:$0xff] }
 0x5cf   :  { %4221 = vmatprep.subr.bf16.mxu0 %v10345_v5  ;;  %v10352_v5 = vld [vmem:[#allocation90_spill] sm:$0xff] }
 0x5d1   :  { %4073 = vmatpush1.bf16.msra.mxu1 %v10346_v18  ;;  %v10353_v18 = vld [vmem:[#allocation92_spill] sm:$0xff] }
 0x5d2   :  { %4074 = vmatprep.subr.bf16.mxu1 %v10347_v27  ;;  %4222 = vmatpush1.bf16.msra.mxu0 %v10348_v29  ;;  %v10354_v27 = vld [vmem:[#allocation93_spill] sm:$0xff]  ;;  %v10355_v29 = vld [vmem:[#allocation95_spill] sm:$0xff] }
 0x5d3   :  { %v7036_v54 = vpop.eup %7035  ;;  %4223 = vmatprep.subr.bf16.mxu0 %v10349_v6  ;;  %v10360_v6 = vld [vmem:[#allocation98_spill] sm:$0xff] }
 0x5d4   :  { %v7038_v39 = vpop.eup %7037  ;;  %v3899_v36 = vadd.f32 1.0, %v7036_v54  ;;  %v10357_v54 = vld [vmem:[#allocation96_spill] sm:$0xff] }
 0x5d5   :  { %v3900_v2 = vadd.f32 1.0, %v7038_v39  ;;  %4075 = vmatpush1.bf16.msra.mxu1 %v10350_v30  ;;  %v10359_v30 = vld [vmem:[#allocation99_spill] sm:$0xff]  ;;  %v10361_v39 = vld [vmem:[#allocation100_spill] sm:$0xff] }
 0x5d6   :  { %7039 = vrcp.f32 %v3899_v36  ;;  %4076 = vmatprep.subr.bf16.mxu1 %v10351_v32  ;;  %4224 = vmatpush1.bf16.msra.mxu0 %v10352_v5  ;;  %v10363_v5 = vld [vmem:[#allocation103_spill] sm:$0xff] }
 0x5d7   :  { %7041 = vrcp.f32 %v3900_v2  ;;  %4225 = vmatprep.subr.bf16.mxu0 %v10353_v18  ;;  %v10364_v18 = vld [vmem:[#allocation102_spill] sm:$0xff] }
 0x5d8   :  { %7043 = vtanh.f32 %v3914_v7  ;;  %v10362_v7 = vld [vmem:[#allocation101_spill] sm:$0xff] }
 0x5d9   :  { %7045 = vtanh.f32 %v3915_v19  ;;  %4077 = vmatpush1.bf16.msra.mxu1 %v10354_v27 }
 0x5da   :  { %4078 = vmatprep.subr.bf16.mxu1 %v10355_v29  ;;  %4226 = vmatpush1.bf16.msra.mxu0 %v10356_v51 }
 0x5db   :  { %4227 = vmatprep.subr.bf16.mxu0 %v10357_v54 }
 0x5dd   :  { %4079 = vmatpush1.bf16.msra.mxu1 %v10358_v25  ;;  %v10365_v25 = vld [vmem:[#allocation104_spill] sm:$0xff] }
 0x5de   :  { %4080 = vmatprep.subr.bf16.mxu1 %v10359_v30  ;;  %4228 = vmatpush1.bf16.msra.mxu0 %v10360_v6 }
 0x5df   :  { %4229 = vmatprep.subr.bf16.mxu0 %v10361_v39  ;;  %v10366_v39 = vld [vmem:[#allocation105_spill] sm:$0xff] }
 0x5e0   :  { %v7040_v36 = vpop.eup %7039 }
 0x5e1   :  { %v7042_v2 = vpop.eup %7041  ;;  %4081 = vmatpush1.bf16.msra.mxu1 %v10362_v7  ;;  %v3918_v19 = vsub.f32 1.0, %v7040_v36  ;;  %v3922_v54 = vmul.f32 0.0, %v7040_v36  ;;  %v10368_v7 = vld [vmem:[#allocation106_spill] sm:$0xff] }
 0x5e2   :  { %v7044_v32 = vpop.eup %7043  ;;  %4240 = vmatprep.subr.bf16.mxu1 %v10363_v5  ;;  %4230 = vmatpush1.bf16.msra.mxu0 %v10364_v18  ;;  %v3919_v27 = vsub.f32 1.0, %v7042_v2  ;;  %v3923_v6 = vmul.f32 0.0, %v7042_v2  ;;  %v10369_v5 = vld [vmem:[#allocation154_spill] sm:$0xff]  ;;  %v10370_v2 = vld [vmem:[#allocation107_spill] sm:$0xff] }
 0x5e3   :  { %v7046_v29 = vpop.eup %7045  ;;  %v3920_v51 = vmul.f32 %v7044_v32, %v3918_v19  ;;  %4281 = vmatprep.subr.bf16.mxu0 %v10365_v25 }
 0x5e4   :  { %4083 = vmatmul.mubr.bf16.vlgmr.msra.gmra.mrb[40].mxu1 %v8674_v35  ;;  %v3921_v30 = vmul.f32 %v7046_v29, %v3919_v27  ;;  %v10371_v29 = vld [vmem:[#allocation108_spill] sm:$0xff] }
 0x5e5   :  { %4241 = vmatpush1.bf16.msra.mxu1 %v10366_v39  ;;  %v8786_v24 = vadd.f32 %v3922_v54, %v3920_v51 }
 0x5e6   :  { %4242 = vmatprep.subr.bf16.mxu1 %v10368_v7  ;;  %v8789_v37 = vadd.f32 %v3923_v6, %v3921_v30  ;;  %v10372_v7 = vld [vmem:[#allocation109_spill] sm:$0xff] }
 0x5e7   :  { %10367 = vst [vmem:[#allocation26_spill] sm:$0xff] %v8786_v24  ;;  %v4164_v18 = vrot.slane %v8786_v24, %v10369_v5  ;;  %v4160_v36 = vrot.slane %v8786_v24, %v8350_v63 }
 0x5e8   :  { %v4172_v19 = vrot.slane %v8789_v37, %v10369_v5  ;;  %v4168_v35 = vrot.slane %v8789_v37, %v8350_v63  ;;  %v10373_v5 = vld [vmem:[#allocation110_spill] sm:$0xff] }
 0x5e9   :  { %4243 = vmatpush1.bf16.msra.mxu1 %v10370_v2  ;;  %v4178_v32 = vpack.c.bf16 %v4164_v18, %v4164_v18  ;;  %v4177_v27 = vpack.c.bf16 %v4160_v36, %v4160_v36  ;;  %v10374_v36 = vld [vmem:[#allocation111_spill] sm:$0xff] }
 0x5ea   :  { %4244 = vmatprep.subr.bf16.mxu1 %v10371_v29  ;;  %v4180_v51 = vpack.c.bf16 %v4172_v19, %v4172_v19  ;;  %v4179_v54 = vpack.c.bf16 %v4168_v35, %v4168_v35  ;;  %v8822_v29 = vld [vmem:[#allocation10 + $0x374] ss:$24 sps:$4 sm:$0xff]  }
 0x5eb   :  { %v4186_v25 = vunpack.c.l.b16 %v4178_v32  ;;  %v4185_v30 = vunpack.c.l.b16 %v4177_v27  ;;  %v10375_v32 = vld [vmem:[#allocation112_spill] sm:$0xff] }
 0x5ec   :  { %v4188_v6 = vunpack.c.l.b16 %v4180_v51  ;;  %v4187_v39 = vunpack.c.l.b16 %v4179_v54  ;;  %v8810_v27 = vld [vmem:[#allocation10 + $0x310] ss:$24 sps:$4 sm:$0xff]  }
 0x5ed   :  { %4245 = vmatpush1.bf16.msra.mxu1 %v10372_v7  ;;  %v4192_v24 = vrot.slane %v4186_v25, 3  ;;  %v4189_v53 = vrot.slane %v4185_v30, 3  ;;  %v10379_v51 = vld [vmem:[#allocation121_spill] sm:$0xff]  ;;  %v10380_v25 = vld [vmem:[#allocation123_spill] sm:$0xff] }
 0x5ee   :  { %4246 = vmatprep.subr.bf16.mxu1 %v10373_v5  ;;  %v4193_v13 = vrot.slane %v4188_v6, 2  ;;  %v4190_v63 = vrot.slane %v4187_v39, 2  ;;  %v10376_v5 = vld [vmem:[#allocation113_spill] sm:$0xff]  ;;  %v8830_v30 = vld [vmem:[#allocation10 + $0x3a4] ss:$24 sps:$4 sm:$0xff]  }
 0x5ef   :  { %v8826_v54 = vld [vmem:[#allocation10 + $0x370] ss:$24 sps:$4 sm:$0xff]   ;;  %v8834_v39 = vld [vmem:[#allocation10 + $0x3a0] ss:$24 sps:$4 sm:$0xff]  }
 0x5f0   :  { %v4194_v2 = vsel %vm933_vm2, %v4193_v13, %v4192_v24  ;;  %v4191_v18 = vsel %vm933_vm2, %v4190_v63, %v4189_v53  ;;  %v8814_v24 = vld [vmem:[#allocation10 + $0x344] ss:$24 sps:$4 sm:$0xff]   ;;  %v8818_v13 = vld [vmem:[#allocation10 + $0x340] ss:$24 sps:$4 sm:$0xff]  }
 0x5f1   :  { %4247 = vmatpush1.bf16.msra.mxu1 %v10374_v36  ;;  %v4196_v19 = vpack.c.b16 %v4194_v2, %v4194_v2  ;;  %v8806_v35 = vpack.c.b16 %v4191_v18, %v4191_v18  ;;  %v10377_v63 = vld [vmem:[#allocation118_spill] sm:$0xff]  ;;  %v10378_v53 = vld [vmem:[#allocation119_spill] sm:$0xff]  ;;  %v10381_v6 = vld [vmem:[#allocation125_spill] sm:$0xff] }
 0x5f2   :  { %4248 = vmatprep.subr.bf16.mxu1 %v10375_v32  ;;  %v10382_v7 = vld [vmem:[#allocation129_spill] sm:$0xff]  ;;  %v10383_v18 = vld [vmem:[#allocation131_spill] sm:$0xff] }
 0x5f3   :  { %4231 = vmatprep.mubr.bf16.mxu0 %v4196_v19  ;;  %4272 = vmatprep.mubr.bf16.mxu1 %v4196_v19  ;;  %v8838_v2 = vld [vmem:[#allocation10 + $0x3d4] ss:$24 sps:$4 sm:$0xff]   ;;  %v8842_v36 = vld [vmem:[#allocation10 + $0x3d0] ss:$24 sps:$4 sm:$0xff]   ;;  %v8846_v32 = vld [vmem:[#allocation10 + $0x404] ss:$24 sps:$4 sm:$0xff]  }
 0x5f4   :  { %4232 = vmatmul.mubr.bf16.vlgmr.msra.gmra.mrb[40].mxu0 %v8806_v35  ;;  %10384 = vst [vmem:[#allocation27_spill] sm:$0xff] %v8842_v36  ;;  %10386 = vst [vmem:[#allocation28_spill] sm:$0xff] %v8846_v32 }
 0x5f5   :  { %4282 = vmatpush1.bf16.msra.mxu0 %v8810_v27  ;;  %4249 = vmatpush1.bf16.msra.mxu1 %v10376_v5  ;;  %v10387_v5 = vld [vmem:[#allocation135_spill] sm:$0xff] }
 0x5f6   :  { %4313 = vmatprep.mubr.bf16.mxu0 %v4196_v19  ;;  %4283 = vmatprep.subr.bf16.mxu0 %v8814_v24  ;;  %v10385_v19 = vld [vmem:[#allocation133_spill] sm:$0xff] }
 0x5f7   :  { %4250 = vmatprep.subr.bf16.mxu1 %v10377_v63  ;;  %v10388_v63 = vld [vmem:[#allocation120_spill] sm:$0xff] }
 0x5f9   :  { %4284 = vmatpush1.bf16.msra.mxu0 %v8818_v13  ;;  %4251 = vmatpush1.bf16.msra.mxu1 %v10378_v53  ;;  %v10389_v53 = vld [vmem:[#allocation137_spill] sm:$0xff] }
 0x5fa   :  { %4285 = vmatprep.subr.bf16.mxu0 %v8822_v29  ;;  %4252 = vmatprep.subr.bf16.mxu1 %v10379_v51  ;;  %v10390_v51 = vld [vmem:[#allocation122_spill] sm:$0xff] }
 0x5fd   :  { %4286 = vmatpush1.bf16.msra.mxu0 %v8826_v54  ;;  %4253 = vmatpush1.bf16.msra.mxu1 %v10380_v25  ;;  %v10391_v25 = vld [vmem:[#allocation139_spill] sm:$0xff] }
 0x5fe   :  { %4287 = vmatprep.subr.bf16.mxu0 %v8830_v30  ;;  %4254 = vmatprep.subr.bf16.mxu1 %v10381_v6  ;;  %v10392_v6 = vld [vmem:[#allocation124_spill] sm:$0xff] }
 0x601   :  { %4288 = vmatpush1.bf16.msra.mxu0 %v8834_v39  ;;  %4255 = vmatpush1.bf16.msra.mxu1 %v10382_v7  ;;  %v10393_v7 = vld [vmem:[#allocation141_spill] sm:$0xff] }
 0x602   :  { %4289 = vmatprep.subr.bf16.mxu0 %v8838_v2  ;;  %4256 = vmatprep.subr.bf16.mxu1 %v10383_v18  ;;  %v10394_v18 = vld [vmem:[#allocation126_spill] sm:$0xff] }
 0x605   :  { %4290 = vmatpush1.bf16.msra.mxu0 %v8842_v36  ;;  %4257 = vmatpush1.bf16.msra.mxu1 %v10385_v19  ;;  %v10395_v19 = vld [vmem:[#allocation143_spill] sm:$0xff]  ;;  %v10396_v36 = vld [vmem:[#allocation130_spill] sm:$0xff] }
 0x606   :  { %4291 = vmatprep.subr.bf16.mxu0 %v8846_v32  ;;  %4258 = vmatprep.subr.bf16.mxu1 %v10387_v5  ;;  %v10397_v32 = vld [vmem:[#allocation145_spill] sm:$0xff]  ;;  %v10398_v5 = vld [vmem:[#allocation132_spill] sm:$0xff] }
 0x609   :  { %4292 = vmatpush1.bf16.msra.mxu0 %v10388_v63  ;;  %4259 = vmatpush1.bf16.msra.mxu1 %v10389_v53  ;;  %v10399_v63 = vld [vmem:[#allocation147_spill] sm:$0xff]  ;;  %v10400_v53 = vld [vmem:[#allocation134_spill] sm:$0xff] }
 0x60a   :  { %4293 = vmatprep.subr.bf16.mxu0 %v10390_v51  ;;  %4260 = vmatprep.subr.bf16.mxu1 %v10391_v25  ;;  %v10401_v51 = vld [vmem:[#allocation151_spill] sm:$0xff]  ;;  %v10402_v25 = vld [vmem:[#allocation136_spill] sm:$0xff] }
 0x60d   :  { %4294 = vmatpush1.bf16.msra.mxu0 %v10392_v6  ;;  %4261 = vmatpush1.bf16.msra.mxu1 %v10393_v7  ;;  %v10403_v6 = vld [vmem:[#allocation155_spill] sm:$0xff]  ;;  %v10404_v7 = vld [vmem:[#allocation138_spill] sm:$0xff] }
 0x60e   :  { %4295 = vmatprep.subr.bf16.mxu0 %v10394_v18  ;;  %4262 = vmatprep.subr.bf16.mxu1 %v10395_v19  ;;  %v10405_v18 = vld [vmem:[#allocation140_spill] sm:$0xff]  ;;  %v10408_v19 = vld [vmem:[#allocation146_spill] sm:$0xff] }
 0x611   :  { %4296 = vmatpush1.bf16.msra.mxu0 %v10396_v36  ;;  %4263 = vmatpush1.bf16.msra.mxu1 %v10397_v32  ;;  %v10406_v36 = vld [vmem:[#allocation142_spill] sm:$0xff]  ;;  %v10407_v32 = vld [vmem:[#allocation144_spill] sm:$0xff] }
 0x612   :  { %4297 = vmatprep.subr.bf16.mxu0 %v10398_v5  ;;  %4264 = vmatprep.subr.bf16.mxu1 %v10399_v63  ;;  %v10409_v5 = vld [vmem:[#allocation148_spill] sm:$0xff]  ;;  %v8877_v63 = vld [vmem:[#allocation10 + $0x4] ss:$24 sps:$4 sm:$0xff]  }
 0x615   :  { %4298 = vmatpush1.bf16.msra.mxu0 %v10400_v53  ;;  %4265 = vmatpush1.bf16.msra.mxu1 %v10401_v51  ;;  %v8894_v53 = vld [vmem:[#allocation10 + $0x64] ss:$24 sps:$4 sm:$0xff]   ;;  %v8898_v51 = vld [vmem:[#allocation10 + $0x60] ss:$24 sps:$4 sm:$0xff]  }
 0x616   :  { %4299 = vmatprep.subr.bf16.mxu0 %v10402_v25  ;;  %4266 = vmatprep.subr.bf16.mxu1 %v10403_v6  ;;  %10412 = vst [vmem:[#allocation29_spill] sm:$0xff] %v8898_v51  ;;  %v8902_v25 = vld [vmem:[#allocation10 + $0x94] ss:$24 sps:$4 sm:$0xff]   ;;  %v8919_v6 = vld [vmem:[#allocation10 + $0xc0] ss:$24 sps:$4 sm:$0xff]  }
 0x617   :  { %10413 = vst [vmem:[#allocation30_spill] sm:$0xff] %v8902_v25  ;;  %10418 = vst [vmem:[#allocation35_spill] sm:$0xff] %v8919_v6 }
 0x619   :  { %4300 = vmatpush1.bf16.msra.mxu0 %v10404_v7  ;;  %4267 = vmatpush1.bf16.msra.mxu1 %v8487_v1  ;;  %v8882_v1 = vld [vmem:[#allocation10] ss:$24 sps:$4 sm:$0xff]   ;;  %v8925_v7 = vld [vmem:[#allocation10 + $0xf4] ss:$24 sps:$4 sm:$0xff]  }
 0x61a   :  { %4301 = vmatprep.subr.bf16.mxu0 %v10405_v18  ;;  %4268 = vmatprep.subr.bf16.mxu1 %v8493_v41  ;;  %v10410_v41 = vld [vmem:[#allocation152_spill] sm:$0xff]  ;;  %10420 = vst [vmem:[#allocation37_spill] sm:$0xff] %v8925_v7 }
 0x61b   :  { %v8928_v18 = vld [vmem:[#allocation10 + $0x38] ss:$24 sps:$4 sm:$0xff]  }
 0x61c   :  { %10421 = vst [vmem:[#allocation38_spill] sm:$0xff] %v8928_v18 }
 0x61d   :  { %4302 = vmatpush1.bf16.msra.mxu0 %v10406_v36  ;;  %4269 = vmatpush1.bf16.msra.mxu1 %v8499_v11  ;;  %v10411_v11 = vld [vmem:[#allocation156_spill] sm:$0xff] }
 0x61e   :  { %4303 = vmatprep.subr.bf16.mxu0 %v10407_v32  ;;  %4270 = vmatprep.subr.bf16.mxu1 %v8505_v58  ;;  %v8886_v58 = vld [vmem:[#allocation10 + $0x34] ss:$24 sps:$4 sm:$0xff]   ;;  %v8937_v32 = vld [vmem:[#allocation10 + $0x124] ss:$24 sps:$4 sm:$0xff]  }
 0x61f   :  { %v8934_v36 = vld [vmem:[#allocation10 + $0x6c] ss:$24 sps:$4 sm:$0xff]   ;;  %10424 = vst [vmem:[#allocation41_spill] sm:$0xff] %v8937_v32 }
 0x620   :  { %10423 = vst [vmem:[#allocation40_spill] sm:$0xff] %v8934_v36 }
 0x621   :  { %4304 = vmatpush1.bf16.msra.mxu0 %v10408_v19  ;;  %4271 = vmatpush1.bf16.msra.mxu1 %v8519_v45  ;;  %v8890_v45 = vld [vmem:[#allocation10 + $0x30] ss:$24 sps:$4 sm:$0xff]  }
 0x622   :  { %4305 = vmatprep.subr.bf16.mxu0 %v10409_v5  ;;  %4433 = vmatprep.subr.bf16.mxu1 %v8877_v63  ;;  %v8940_v19 = vld [vmem:[#allocation10 + $0x68] ss:$24 sps:$4 sm:$0xff]  }
 0x623   :  { %10425 = vst [vmem:[#allocation42_spill] sm:$0xff] %v8940_v19  ;;  %v8943_v5 = vld [vmem:[#allocation10 + $0x120] ss:$24 sps:$4 sm:$0xff]  }
 0x624   :  { %4273 = vmatmul.mubr.bf16.vlgmr.msra.gmra.mrb[44].mxu1 %v8806_v35  ;;  %10426 = vst [vmem:[#allocation43_spill] sm:$0xff] %v8943_v5 }
 0x625   :  { %4306 = vmatpush1.bf16.msra.mxu0 %v10410_v41  ;;  %4434 = vmatpush1.bf16.msra.mxu1 %v8882_v1  ;;  %v8946_v41 = vld [vmem:[#allocation10 + $0x9c] ss:$24 sps:$4 sm:$0xff]  }
 0x626   :  { %4307 = vmatprep.subr.bf16.mxu0 %v10411_v11  ;;  %4435 = vmatprep.subr.bf16.mxu1 %v8886_v58  ;;  %10427 = vst [vmem:[#allocation44_spill] sm:$0xff] %v8946_v41  ;;  %v8949_v11 = vld [vmem:[#allocation10 + $0x154] ss:$24 sps:$4 sm:$0xff]  }
 0x627   :  { %10428 = vst [vmem:[#allocation45_spill] sm:$0xff] %v8949_v11 }
 0x629   :  { %4308 = vmatpush1.bf16.msra.mxu0 %v8489_v57  ;;  %4436 = vmatpush1.bf16.msra.mxu1 %v8890_v45  ;;  %v8906_v57 = vld [vmem:[#allocation10 + $0x90] ss:$24 sps:$4 sm:$0xff]  }
 0x62a   :  { %4309 = vmatprep.subr.bf16.mxu0 %v8495_v0  ;;  %4437 = vmatprep.subr.bf16.mxu1 %v8894_v53  ;;  %10414 = vst [vmem:[#allocation31_spill] sm:$0xff] %v8906_v57  ;;  %v8909_v0 = vld [vmem:[#allocation10 + $0xc] ss:$24 sps:$4 sm:$0xff]  }
 0x62b   :  { %10415 = vst [vmem:[#allocation32_spill] sm:$0xff] %v8909_v0 }
 0x62d   :  { %4310 = vmatpush1.bf16.msra.mxu0 %v8501_v46  ;;  %4438 = vmatpush1.bf16.msra.mxu1 %v8898_v51  ;;  %v8912_v46 = vld [vmem:[#allocation10 + $0xc4] ss:$24 sps:$4 sm:$0xff]  }
 0x62e   :  { %4311 = vmatprep.subr.bf16.mxu0 %v8507_v55  ;;  %4439 = vmatprep.subr.bf16.mxu1 %v8902_v25  ;;  %10416 = vst [vmem:[#allocation33_spill] sm:$0xff] %v8912_v46  ;;  %v8916_v55 = vld [vmem:[#allocation10 + $0x8] ss:$24 sps:$4 sm:$0xff]  }
 0x62f   :  { %10417 = vst [vmem:[#allocation34_spill] sm:$0xff] %v8916_v55 }
 0x631   :  { %4312 = vmatpush1.bf16.msra.mxu0 %v8521_v44  ;;  %4440 = vmatpush1.bf16.msra.mxu1 %v8906_v57  ;;  %v8922_v44 = vld [vmem:[#allocation10 + $0x3c] ss:$24 sps:$4 sm:$0xff]  }
 0x632   :  { %4474 = vmatprep.subr.bf16.mxu0 %v8909_v0  ;;  %4441 = vmatprep.subr.bf16.mxu1 %v8912_v46  ;;  %10419 = vst [vmem:[#allocation36_spill] sm:$0xff] %v8922_v44 }
 0x634   :  { %4314 = vmatmul.mubr.bf16.vlgmr.msra.gmra.mrb[44].mxu0 %v8806_v35  ;;  %v8931_v35 = vld [vmem:[#allocation10 + $0xf0] ss:$24 sps:$4 sm:$0xff]  }
 0x635   :  { %4475 = vmatpush1.bf16.msra.mxu0 %v8916_v55  ;;  %4442 = vmatpush1.bf16.msra.mxu1 %v8919_v6  ;;  %10422 = vst [vmem:[#allocation39_spill] sm:$0xff] %v8931_v35 }
 0x636   :  { %4476 = vmatprep.subr.bf16.mxu0 %v8922_v44  ;;  %4443 = vmatprep.subr.bf16.mxu1 %v8925_v7 }
 0x639   :  { %4477 = vmatpush1.bf16.msra.mxu0 %v8928_v18  ;;  %4444 = vmatpush1.bf16.msra.mxu1 %v8931_v35 }
 0x63a   :  { %4478 = vmatprep.subr.bf16.mxu0 %v8934_v36  ;;  %4445 = vmatprep.subr.bf16.mxu1 %v8937_v32  ;;  %v8952_v36 = vld [vmem:[#allocation10 + $0x98] ss:$24 sps:$4 sm:$0xff]  }
 0x63b   :  { %10429 = vst [vmem:[#allocation46_spill] sm:$0xff] %v8952_v36  ;;  %v8955_v32 = vld [vmem:[#allocation10 + $0x150] ss:$24 sps:$4 sm:$0xff]  }
 0x63c   :  { %10430 = vst [vmem:[#allocation47_spill] sm:$0xff] %v8955_v32 }
 0x63d   :  { %4479 = vmatpush1.bf16.msra.mxu0 %v8940_v19  ;;  %4446 = vmatpush1.bf16.msra.mxu1 %v8943_v5  ;;  %v8958_v19 = vld [vmem:[#allocation10 + $0xcc] ss:$24 sps:$4 sm:$0xff]  }
 0x63e   :  { %4480 = vmatprep.subr.bf16.mxu0 %v8946_v41  ;;  %4447 = vmatprep.subr.bf16.mxu1 %v8949_v11  ;;  %10431 = vst [vmem:[#allocation48_spill] sm:$0xff] %v8958_v19  ;;  %v8961_v5 = vld [vmem:[#allocation10 + $0x184] ss:$24 sps:$4 sm:$0xff]   ;;  %v8964_v41 = vld [vmem:[#allocation10 + $0xc8] ss:$24 sps:$4 sm:$0xff]  }
 0x63f   :  { %10432 = vst [vmem:[#allocation49_spill] sm:$0xff] %v8961_v5  ;;  %10433 = vst [vmem:[#allocation127_spill] sm:$0xff] %v8964_v41  ;;  %v8967_v11 = vld [vmem:[#allocation10 + $0x180] ss:$24 sps:$4 sm:$0xff]  }
 0x640   :  { %10434 = vst [vmem:[#allocation128_spill] sm:$0xff] %v8967_v11 }
 0x641   :  { %4481 = vmatpush1.bf16.msra.mxu0 %v8952_v36  ;;  %4448 = vmatpush1.bf16.msra.mxu1 %v8955_v32  ;;  %v8970_v36 = vld [vmem:[#allocation10 + $0xfc] ss:$24 sps:$4 sm:$0xff]  }
 0x642   :  { %4482 = vmatprep.subr.bf16.mxu0 %v8958_v19  ;;  %4449 = vmatprep.subr.bf16.mxu1 %v8961_v5  ;;  %10435 = vst [vmem:[#allocation50_spill] sm:$0xff] %v8970_v36  ;;  %v8973_v32 = vld [vmem:[#allocation10 + $0x1b4] ss:$24 sps:$4 sm:$0xff]   ;;  %v8976_v19 = vld [vmem:[#allocation10 + $0xf8] ss:$24 sps:$4 sm:$0xff]  }
 0x643   :  { %10436 = vst [vmem:[#allocation51_spill] sm:$0xff] %v8973_v32  ;;  %10437 = vst [vmem:[#allocation53_spill] sm:$0xff] %v8976_v19  ;;  %v8979_v5 = vld [vmem:[#allocation10 + $0x1b0] ss:$24 sps:$4 sm:$0xff]  }
 0x644   :  { %10438 = vst [vmem:[#allocation52_spill] sm:$0xff] %v8979_v5 }
 0x645   :  { %4483 = vmatpush1.bf16.msra.mxu0 %v8964_v41  ;;  %4450 = vmatpush1.bf16.msra.mxu1 %v8967_v11  ;;  %v8982_v41 = vld [vmem:[#allocation10 + $0x12c] ss:$24 sps:$4 sm:$0xff]  }
 0x646   :  { %4484 = vmatprep.subr.bf16.mxu0 %v8970_v36  ;;  %4451 = vmatprep.subr.bf16.mxu1 %v8973_v32  ;;  %10439 = vst [vmem:[#allocation54_spill] sm:$0xff] %v8982_v41  ;;  %v8985_v11 = vld [vmem:[#allocation10 + $0x1e4] ss:$24 sps:$4 sm:$0xff]   ;;  %v8988_v36 = vld [vmem:[#allocation10 + $0x128] ss:$24 sps:$4 sm:$0xff]  }
 0x647   :  { %10440 = vst [vmem:[#allocation55_spill] sm:$0xff] %v8985_v11  ;;  %10441 = vst [vmem:[#allocation57_spill] sm:$0xff] %v8988_v36  ;;  %v8991_v32 = vld [vmem:[#allocation10 + $0x1e0] ss:$24 sps:$4 sm:$0xff]  }
 0x648   :  { %10442 = vst [vmem:[#allocation56_spill] sm:$0xff] %v8991_v32 }
 0x649   :  { %4485 = vmatpush1.bf16.msra.mxu0 %v8976_v19  ;;  %4452 = vmatpush1.bf16.msra.mxu1 %v8979_v5  ;;  %v8994_v19 = vld [vmem:[#allocation10 + $0x15c] ss:$24 sps:$4 sm:$0xff]  }
 0x64a   :  { %4486 = vmatprep.subr.bf16.mxu0 %v8982_v41  ;;  %4453 = vmatprep.subr.bf16.mxu1 %v8985_v11  ;;  %10443 = vst [vmem:[#allocation58_spill] sm:$0xff] %v8994_v19  ;;  %v8997_v5 = vld [vmem:[#allocation10 + $0x214] ss:$24 sps:$4 sm:$0xff]   ;;  %v9000_v41 = vld [vmem:[#allocation10 + $0x158] ss:$24 sps:$4 sm:$0xff]  }
 0x64b   :  { %10444 = vst [vmem:[#allocation59_spill] sm:$0xff] %v8997_v5  ;;  %10445 = vst [vmem:[#allocation61_spill] sm:$0xff] %v9000_v41  ;;  %v9003_v11 = vld [vmem:[#allocation10 + $0x210] ss:$24 sps:$4 sm:$0xff]  }
 0x64c   :  { %10446 = vst [vmem:[#allocation60_spill] sm:$0xff] %v9003_v11 }
 0x64d   :  { %4487 = vmatpush1.bf16.msra.mxu0 %v8988_v36  ;;  %4454 = vmatpush1.bf16.msra.mxu1 %v8991_v32  ;;  %v9006_v36 = vld [vmem:[#allocation10 + $0x18c] ss:$24 sps:$4 sm:$0xff]  }
 0x64e   :  { %4488 = vmatprep.subr.bf16.mxu0 %v8994_v19  ;;  %4455 = vmatprep.subr.bf16.mxu1 %v8997_v5  ;;  %10447 = vst [vmem:[#allocation62_spill] sm:$0xff] %v9006_v36  ;;  %v9009_v32 = vld [vmem:[#allocation10 + $0x244] ss:$24 sps:$4 sm:$0xff]   ;;  %v9012_v19 = vld [vmem:[#allocation10 + $0x188] ss:$24 sps:$4 sm:$0xff]  }
 0x64f   :  { %10448 = vst [vmem:[#allocation63_spill] sm:$0xff] %v9009_v32  ;;  %10449 = vst [vmem:[#allocation65_spill] sm:$0xff] %v9012_v19  ;;  %v9015_v5 = vld [vmem:[#allocation10 + $0x240] ss:$24 sps:$4 sm:$0xff]  }
 0x650   :  { %10450 = vst [vmem:[#allocation64_spill] sm:$0xff] %v9015_v5 }
 0x651   :  { %4489 = vmatpush1.bf16.msra.mxu0 %v9000_v41  ;;  %4456 = vmatpush1.bf16.msra.mxu1 %v9003_v11  ;;  %v9018_v41 = vld [vmem:[#allocation10 + $0x1bc] ss:$24 sps:$4 sm:$0xff]  }
 0x652   :  { %4490 = vmatprep.subr.bf16.mxu0 %v9006_v36  ;;  %4457 = vmatprep.subr.bf16.mxu1 %v9009_v32  ;;  %10451 = vst [vmem:[#allocation66_spill] sm:$0xff] %v9018_v41  ;;  %v9021_v11 = vld [vmem:[#allocation10 + $0x274] ss:$24 sps:$4 sm:$0xff]   ;;  %v9024_v36 = vld [vmem:[#allocation10 + $0x1b8] ss:$24 sps:$4 sm:$0xff]  }
 0x653   :  { %10452 = vst [vmem:[#allocation67_spill] sm:$0xff] %v9021_v11  ;;  %10453 = vst [vmem:[#allocation69_spill] sm:$0xff] %v9024_v36  ;;  %v9027_v32 = vld [vmem:[#allocation10 + $0x270] ss:$24 sps:$4 sm:$0xff]  }
 0x654   :  { %10454 = vst [vmem:[#allocation68_spill] sm:$0xff] %v9027_v32 }
 0x655   :  { %4491 = vmatpush1.bf16.msra.mxu0 %v9012_v19  ;;  %4458 = vmatpush1.bf16.msra.mxu1 %v9015_v5  ;;  %v9030_v19 = vld [vmem:[#allocation10 + $0x1ec] ss:$24 sps:$4 sm:$0xff]  }
 0x656   :  { %4492 = vmatprep.subr.bf16.mxu0 %v9018_v41  ;;  %4459 = vmatprep.subr.bf16.mxu1 %v9021_v11  ;;  %10455 = vst [vmem:[#allocation70_spill] sm:$0xff] %v9030_v19  ;;  %v9033_v5 = vld [vmem:[#allocation10 + $0x2a4] ss:$24 sps:$4 sm:$0xff]   ;;  %v9036_v41 = vld [vmem:[#allocation10 + $0x1e8] ss:$24 sps:$4 sm:$0xff]  }
 0x657   :  { %10456 = vst [vmem:[#allocation71_spill] sm:$0xff] %v9033_v5  ;;  %10457 = vst [vmem:[#allocation73_spill] sm:$0xff] %v9036_v41  ;;  %v9039_v11 = vld [vmem:[#allocation10 + $0x2a0] ss:$24 sps:$4 sm:$0xff]  }
 0x658   :  { %10458 = vst [vmem:[#allocation72_spill] sm:$0xff] %v9039_v11 }
 0x659   :  { %4493 = vmatpush1.bf16.msra.mxu0 %v9024_v36  ;;  %4460 = vmatpush1.bf16.msra.mxu1 %v9027_v32  ;;  %v9042_v36 = vld [vmem:[#allocation10 + $0x21c] ss:$24 sps:$4 sm:$0xff]  }
 0x65a   :  { %4494 = vmatprep.subr.bf16.mxu0 %v9030_v19  ;;  %4461 = vmatprep.subr.bf16.mxu1 %v9033_v5  ;;  %10459 = vst [vmem:[#allocation74_spill] sm:$0xff] %v9042_v36  ;;  %v9045_v32 = vld [vmem:[#allocation10 + $0x2d4] ss:$24 sps:$4 sm:$0xff]   ;;  %v9048_v19 = vld [vmem:[#allocation10 + $0x218] ss:$24 sps:$4 sm:$0xff]  }
 0x65b   :  { %10460 = vst [vmem:[#allocation75_spill] sm:$0xff] %v9045_v32  ;;  %10461 = vst [vmem:[#allocation77_spill] sm:$0xff] %v9048_v19  ;;  %v9051_v5 = vld [vmem:[#allocation10 + $0x2d0] ss:$24 sps:$4 sm:$0xff]  }
 0x65c   :  { %10462 = vst [vmem:[#allocation76_spill] sm:$0xff] %v9051_v5 }
 0x65d   :  { %4495 = vmatpush1.bf16.msra.mxu0 %v9036_v41  ;;  %4462 = vmatpush1.bf16.msra.mxu1 %v9039_v11  ;;  %v9054_v41 = vld [vmem:[#allocation10 + $0x24c] ss:$24 sps:$4 sm:$0xff]  }
 0x65e   :  { %4496 = vmatprep.subr.bf16.mxu0 %v9042_v36  ;;  %4463 = vmatprep.subr.bf16.mxu1 %v9045_v32  ;;  %10463 = vst [vmem:[#allocation78_spill] sm:$0xff] %v9054_v41  ;;  %v9057_v11 = vld [vmem:[#allocation10 + $0x14] ss:$24 sps:$4 sm:$0xff]   ;;  %v9060_v36 = vld [vmem:[#allocation10 + $0x248] ss:$24 sps:$4 sm:$0xff]  }
 0x65f   :  { %10464 = vst [vmem:[#allocation79_spill] sm:$0xff] %v9057_v11  ;;  %10465 = vst [vmem:[#allocation80_spill] sm:$0xff] %v9060_v36  ;;  %v9063_v32 = vld [vmem:[#allocation10 + $0x27c] ss:$24 sps:$4 sm:$0xff]  }
 0x660   :  { %10466 = vst [vmem:[#allocation81_spill] sm:$0xff] %v9063_v32 }
 0x661   :  { %4497 = vmatpush1.bf16.msra.mxu0 %v9048_v19  ;;  %4464 = vmatpush1.bf16.msra.mxu1 %v9051_v5  ;;  %v9066_v19 = vld [vmem:[#allocation10 + $0x278] ss:$24 sps:$4 sm:$0xff]   ;;  %v9069_v5 = vld [vmem:[#allocation10 + $0x2ac] ss:$24 sps:$4 sm:$0xff]  }
 0x662   :  { %4498 = vmatprep.subr.bf16.mxu0 %v9054_v41  ;;  %4515 = vmatprep.subr.bf16.mxu1 %v9057_v11  ;;  %10467 = vst [vmem:[#allocation83_spill] sm:$0xff] %v9066_v19  ;;  %10468 = vst [vmem:[#allocation82_spill] sm:$0xff] %v9069_v5  ;;  %v9072_v41 = vld [vmem:[#allocation10 + $0x2a8] ss:$24 sps:$4 sm:$0xff]   ;;  %v9075_v11 = vld [vmem:[#allocation10 + $0x2dc] ss:$24 sps:$4 sm:$0xff]  }
 0x663   :  { %10469 = vst [vmem:[#allocation84_spill] sm:$0xff] %v9072_v41  ;;  %10470 = vst [vmem:[#allocation85_spill] sm:$0xff] %v9075_v11 }
 0x665   :  { %4499 = vmatpush1.bf16.msra.mxu0 %v9060_v36  ;;  %v9078_v36 = vld [vmem:[#allocation10 + $0x2d8] ss:$24 sps:$4 sm:$0xff]  }
 0x666   :  { %4500 = vmatprep.subr.bf16.mxu0 %v9063_v32  ;;  %10471 = vst [vmem:[#allocation87_spill] sm:$0xff] %v9078_v36  ;;  %v9081_v32 = vld [vmem:[#allocation10 + $0x304] ss:$24 sps:$4 sm:$0xff]  }
 0x667   :  { %10472 = vst [vmem:[#allocation86_spill] sm:$0xff] %v9081_v32 }
 0x669   :  { %4501 = vmatpush1.bf16.msra.mxu0 %v9066_v19 }
 0x66a   :  { %4502 = vmatprep.subr.bf16.mxu0 %v9069_v5 }
 0x66d   :  { %4503 = vmatpush1.bf16.msra.mxu0 %v9072_v41 }
 0x66e   :  { %4504 = vmatprep.subr.bf16.mxu0 %v9075_v11 }
 0x671   :  { %4505 = vmatpush1.bf16.msra.mxu0 %v9078_v36 }
 0x672   :  { %4667 = vmatprep.subr.bf16.mxu0 %v9081_v32 }
 0x677   :  { %v4002_v19 = vpop.f32.mrb[36].mxu1  ;;  %v4043_v18 = vpop.f32.mrb[36].mxu0 }
 0x678   :  { %v4003_v5 = vadd.f32 %v4002_v19, %v8614_v14  ;;  %v4044_v35 = vadd.f32 %v4043_v18, %v8617_v62  ;;  %v4004_v44 = vpop.f32.mrb[37].mxu1  ;;  %v4045_v41 = vpop.f32.mrb[37].mxu0 }
 0x679   :  { %v4005_v7 = vadd.f32 %v4004_v44, %v8620_v15  ;;  %v4046_v11 = vadd.f32 %v4045_v41, %v8623_v16  ;;  %v4006_v55 = vpop.f32.mrb[38].mxu1  ;;  %v4047_v6 = vpop.f32.mrb[38].mxu0 }
 0x67a   :  { %v4007_v0 = vpop.f32.mrb[39].mxu1  ;;  %v4048_v36 = vpop.f32.mrb[39].mxu0 }
 0x67b   :  { %v4093_v46 = vcombine.low %v4003_v5, %v4005_v7  ;;  %v4113_v57 = vcombine.low %v4044_v35, %v4046_v11  ;;  %v4148_v0 = vrot.slane %v8660_v34, 7 }
 0x67d   :  { %v4114_v25 = vrot.slane %v4113_v57, 7  ;;  %v4118_v32 = vadd.f32 %v4113_v57, %v10304_v50  ;;  %v4094_v55 = vrot.slane %v4093_v46, 7  ;;  %v4098_v7 = vadd.f32 %v4093_v46, %v8387_v56 }
 0x67e   :  { %v4147_v57 = vrot.slane %v8658_v33, 7 }
 0x67f   :  { %v4117_v51 = vadd.f32 %v4114_v25, %v10303_v4  ;;  %v6157_v19 = vmul.f32 -1.442695, %v4118_v32 }
 0x681   :  { %v6156_v14 = vmul.f32 -1.442695, %v4117_v51  ;;  %7047 = vpow2.f32 %v6157_v19  ;;  %v4097_v51 = vadd.f32 %v4094_v55, %v8385_v48 }
 0x683   :  { %7049 = vpow2.f32 %v6156_v14  ;;  %v6155_v14 = vmul.f32 -1.442695, %v4098_v7  ;;  %v6154_v32 = vmul.f32 -1.442695, %v4097_v51 }
 0x68b   :  { %v7048_v18 = vpop.eup %7047 }
 0x68c   :  { %v4126_v62 = vadd.f32 1.0, %v7048_v18 }
 0x68d   :  { %v7050_v44 = vpop.eup %7049 }
 0x68e   :  { %v4125_v15 = vadd.f32 1.0, %v7050_v44  ;;  %7051 = vrcp.f32 %v4126_v62 }
 0x690   :  { %7053 = vrcp.f32 %v4125_v15 }
 0x691   :  { %7055 = vpow2.f32 %v6155_v14 }
 0x692   :  { %7057 = vpow2.f32 %v6154_v32 }
 0x698   :  { %v7052_v6 = vpop.eup %7051 }
 0x699   :  { %v4152_v35 = vmul.f32 %v7052_v6, %v4148_v0 }
 0x69a   :  { %v7054_v25 = vpop.eup %7053 }
 0x69b   :  { %v4151_v36 = vmul.f32 %v7054_v25, %v4147_v57  ;;  %v7056_v5 = vpop.eup %7055 }
 0x69c   :  { %v7058_v62 = vpop.eup %7057  ;;  %v4106_v15 = vadd.f32 1.0, %v7056_v5 }
 0x69d   :  { %v4105_v41 = vadd.f32 1.0, %v7058_v62 }
 0x69e   :  { %7059 = vrcp.f32 %v4106_v15 }
 0x69f   :  { %7061 = vrcp.f32 %v4105_v41 }
 0x6a8   :  { %v7060_v55 = vpop.eup %7059 }
 0x6a9   :  { %v7062_v57 = vpop.eup %7061 }
 0x6b7   :  { %v4084_v34 = vpop.f32.mrb[40].mxu1 }
 0x6b8   :  { %v4085_v46 = vadd.f32 %v4084_v34, %v8639_v8  ;;  %v4086_v11 = vpop.f32.mrb[41].mxu1 }
 0x6b9   :  { %v4087_v33 = vadd.f32 %v4086_v11, %v8646_v17  ;;  %v4088_v19 = vpop.f32.mrb[42].mxu1 }
 0x6ba   :  { %v4089_v18 = vpop.f32.mrb[43].mxu1 }
 0x6bb   :  { %v4133_v44 = vcombine.low %v4085_v46, %v4087_v33  ;;  %v4144_v46 = vsub.f32 1.0, %v7052_v6  ;;  %v4143_v18 = vsub.f32 1.0, %v7054_v25 }
 0x6bd   :  { %v4134_v0 = vrot.slane %v4133_v44, 7  ;;  %v4138_v7 = vmul.f32 %v7060_v55, %v4133_v44 }
 0x6bf   :  { %v4137_v51 = vmul.f32 %v7062_v57, %v4134_v0  ;;  %v4140_v14 = vadd.f32 %v4138_v7, %v8511_v49 }
 0x6c1   :  { %v4139_v32 = vadd.f32 %v4137_v51, %v8509_v12  ;;  %7063 = vtanh.f32 %v4140_v14 }
 0x6c3   :  { %7065 = vtanh.f32 %v4139_v32 }
 0x6c7   :  { %v4233_v5 = vpop.f32.mrb[40].mxu0 }
 0x6c8   :  { %v4234_v62 = vadd.f32 %v4233_v5, %v8643_v9  ;;  %v4235_v15 = vpop.f32.mrb[41].mxu0 }
 0x6c9   :  { %v4236_v41 = vadd.f32 %v4235_v15, %v8650_v52  ;;  %v4237_v34 = vpop.f32.mrb[42].mxu0 }
 0x6ca   :  { %v4238_v11 = vpop.f32.mrb[43].mxu0 }
 0x6cb   :  { %v7064_v33 = vpop.eup %7063  ;;  %v4324_v19 = vcombine.low %v4234_v62, %v4236_v41 }
 0x6cc   :  { %v4146_v44 = vmul.f32 %v7064_v33, %v4144_v46 }
 0x6cd   :  { %v7066_v55 = vpop.eup %7065 }
 0x6ce   :  { %v4145_v0 = vmul.f32 %v7066_v55, %v4143_v18  ;;  %v9100_v7 = vadd.f32 %v4152_v35, %v4146_v44 }
 0x6d0   :  { %v9102_v57 = vadd.f32 %v4151_v36, %v4145_v0  ;;  %v4408_v51 = vrot.slane %v9100_v7, %v10306_v10  ;;  %v4404_v14 = vrot.slane %v9100_v7, %v8347_v61  ;;  %v9119_v0 = vld [vmem:[#allocation10 + $0x44] ss:$24 sps:$4 sm:$0xff]  }
 0x6d2   :  { %v4400_v32 = vrot.slane %v9102_v57, %v10306_v10  ;;  %v4396_v6 = vrot.slane %v9102_v57, %v8347_v61  ;;  %v4416_v5 = vpack.c.bf16 %v4408_v51, %v4408_v51  ;;  %v4415_v15 = vpack.c.bf16 %v4404_v14, %v4404_v14  ;;  %v9124_v51 = vld [vmem:[#allocation10 + $0x40] ss:$24 sps:$4 sm:$0xff]  }
 0x6d3   :  { %v4325_v14 = vrot.slane %v4324_v19, 6 }
 0x6d4   :  { %v4414_v25 = vpack.c.bf16 %v4400_v32, %v4400_v32  ;;  %v4413_v62 = vpack.c.bf16 %v4396_v6, %v4396_v6  ;;  %v4424_v36 = vunpack.c.l.b16 %v4416_v5  ;;  %v4423_v11 = vunpack.c.l.b16 %v4415_v15  ;;  %v9127_v32 = vld [vmem:[#allocation10 + $0x74] ss:$24 sps:$4 sm:$0xff]   ;;  %v9130_v6 = vld [vmem:[#allocation10 + $0x330] ss:$24 sps:$4 sm:$0xff]   ;;  %v9140_v5 = vld [vmem:[#allocation10 + $0xa4] ss:$24 sps:$4 sm:$0xff]  }
 0x6d5   :  { %v9147_v15 = vld [vmem:[#allocation10 + $0x394] ss:$24 sps:$4 sm:$0xff]  }
 0x6d6   :  { %v4422_v35 = vunpack.c.l.b16 %v4414_v25  ;;  %v4421_v41 = vunpack.c.l.b16 %v4413_v62  ;;  %v9133_v25 = vld [vmem:[#allocation10 + $0x364] ss:$24 sps:$4 sm:$0xff]   ;;  %v9143_v62 = vld [vmem:[#allocation10 + $0x360] ss:$24 sps:$4 sm:$0xff]  }
 0x6d8   :  { %v4427_v34 = vrot.slane %v4422_v35, 1  ;;  %v4425_v46 = vrot.slane %v4421_v41, 1  ;;  %v9150_v35 = vld [vmem:[#allocation10 + $0xa0] ss:$24 sps:$4 sm:$0xff]  }
 0x6da   :  { %v4428_v33 = vsel %vm933_vm2, %v4424_v36, %v4427_v34  ;;  %v4426_v18 = vsel %vm933_vm2, %v4423_v11, %v4425_v46  ;;  %v9153_v36 = vld [vmem:[#allocation10 + $0xd4] ss:$24 sps:$4 sm:$0xff]   ;;  %v9156_v34 = vld [vmem:[#allocation10 + $0x390] ss:$24 sps:$4 sm:$0xff]   ;;  %v9159_v46 = vld [vmem:[#allocation10 + $0x3c4] ss:$24 sps:$4 sm:$0xff]  }
 0x6db   :  { %v4430_v44 = vpack.c.b16 %v4428_v33, %v4428_v33  ;;  %v9114_v55 = vpack.c.b16 %v4426_v18, %v4426_v18  ;;  %v9162_v33 = vld [vmem:[#allocation10 + $0xd0] ss:$24 sps:$4 sm:$0xff]   ;;  %v9165_v18 = vld [vmem:[#allocation10 + $0x104] ss:$24 sps:$4 sm:$0xff]  }
 0x6dc   :  { %10473 = vst [vmem:[#allocation88_spill] sm:$0xff] %v9162_v33  ;;  %10474 = vst [vmem:[#allocation89_spill] sm:$0xff] %v9165_v18 }
 0x6dd   :  { %4465 = vmatprep.mubr.bf16.mxu1 %v4430_v44  ;;  %4506 = vmatprep.mubr.bf16.mxu0 %v4430_v44 }
 0x6de   :  { %4466 = vmatmul.mubr.bf16.vlgmr.msra.gmra.mrb[48].mxu1 %v9114_v55  ;;  %4507 = vmatmul.mubr.bf16.vlgmr.msra.gmra.mrb[48].mxu0 %v9114_v55 }
 0x6df   :  { %4516 = vmatpush1.bf16.msra.mxu1 %v8678_v31  ;;  %4547 = vmatprep.mubr.bf16.mxu1 %v4430_v44  ;;  %v4326_v31 = vrot.slane %v4324_v19, 7  ;;  %v9168_v44 = vld [vmem:[#allocation10 + $0x3c0] ss:$24 sps:$4 sm:$0xff]  }
 0x6e0   :  { %4517 = vmatprep.subr.bf16.mxu1 %v9119_v0  ;;  %4668 = vmatpush1.bf16.msra.mxu0 %v8682_v43  ;;  %v9136_v43 = vld [vmem:[#allocation10 + $0x70] ss:$24 sps:$4 sm:$0xff]   ;;  %10475 = vst [vmem:[#allocation91_spill] sm:$0xff] %v9168_v44 }
 0x6e1   :  { %4669 = vmatprep.subr.bf16.mxu0 %v8685_v38  ;;  %v4329_v38 = vadd.f32 %v4325_v14, %v8513_v42  ;;  %v4330_v19 = vadd.f32 %v4326_v31, %v8515_v47  ;;  %v9171_v14 = vld [vmem:[#allocation10 + $0x3f4] ss:$24 sps:$4 sm:$0xff]   ;;  %v9174_v31 = vld [vmem:[#allocation10 + $0x100] ss:$24 sps:$4 sm:$0xff]  }
 0x6e2   :  { %10476 = vst [vmem:[#allocation90_spill] sm:$0xff] %v9171_v14  ;;  %10477 = vst [vmem:[#allocation92_spill] sm:$0xff] %v9174_v31 }
 0x6e3   :  { %4518 = vmatpush1.bf16.msra.mxu1 %v9124_v51  ;;  %v6158_v41 = vmul.f32 -1.442695, %v4329_v38  ;;  %v6159_v11 = vmul.f32 -1.442695, %v4330_v19  ;;  %v9177_v38 = vld [vmem:[#allocation10 + $0x134] ss:$24 sps:$4 sm:$0xff]  }
 0x6e4   :  { %4519 = vmatprep.subr.bf16.mxu1 %v9127_v32  ;;  %4670 = vmatpush1.bf16.msra.mxu0 %v9130_v6  ;;  %10478 = vst [vmem:[#allocation93_spill] sm:$0xff] %v9177_v38  ;;  %v9180_v19 = vld [vmem:[#allocation10 + $0x3f0] ss:$24 sps:$4 sm:$0xff]  }
 0x6e5   :  { %4671 = vmatprep.subr.bf16.mxu0 %v9133_v25  ;;  %7067 = vpow2.f32 %v6158_v41  ;;  %10479 = vst [vmem:[#allocation95_spill] sm:$0xff] %v9180_v19  ;;  %v9183_v41 = vld [vmem:[#allocation10 + $0x424] ss:$24 sps:$4 sm:$0xff]  }
 0x6e6   :  { %7069 = vpow2.f32 %v6159_v11  ;;  %10480 = vst [vmem:[#allocation94_spill] sm:$0xff] %v9183_v41  ;;  %v9186_v11 = vld [vmem:[#allocation10 + $0x130] ss:$24 sps:$4 sm:$0xff]  }
 0x6e7   :  { %4520 = vmatpush1.bf16.msra.mxu1 %v9136_v43  ;;  %10481 = vst [vmem:[#allocation96_spill] sm:$0xff] %v9186_v11 }
 0x6e8   :  { %4521 = vmatprep.subr.bf16.mxu1 %v9140_v5  ;;  %4672 = vmatpush1.bf16.msra.mxu0 %v9143_v62 }
 0x6e9   :  { %4673 = vmatprep.subr.bf16.mxu0 %v9147_v15 }
 0x6eb   :  { %4522 = vmatpush1.bf16.msra.mxu1 %v9150_v35 }
 0x6ec   :  { %4523 = vmatprep.subr.bf16.mxu1 %v9153_v36  ;;  %4674 = vmatpush1.bf16.msra.mxu0 %v9156_v34 }
 0x6ed   :  { %4675 = vmatprep.subr.bf16.mxu0 %v9159_v46 }
 0x6ef   :  { %4524 = vmatpush1.bf16.msra.mxu1 %v9162_v33 }
 0x6f0   :  { %4525 = vmatprep.subr.bf16.mxu1 %v9165_v18  ;;  %4676 = vmatpush1.bf16.msra.mxu0 %v9168_v44 }
 0x6f1   :  { %4677 = vmatprep.subr.bf16.mxu0 %v9171_v14  ;;  %v9190_v14 = vld [vmem:[#allocation10 + $0x164] ss:$24 sps:$4 sm:$0xff]  }
 0x6f2   :  { %10482 = vst [vmem:[#allocation97_spill] sm:$0xff] %v9190_v14 }
 0x6f3   :  { %4526 = vmatpush1.bf16.msra.mxu1 %v9174_v31 }
 0x6f4   :  { %4527 = vmatprep.subr.bf16.mxu1 %v9177_v38  ;;  %4678 = vmatpush1.bf16.msra.mxu0 %v9180_v19  ;;  %v9193_v38 = vld [vmem:[#allocation10 + $0x420] ss:$24 sps:$4 sm:$0xff]  }
 0x6f5   :  { %4679 = vmatprep.subr.bf16.mxu0 %v9183_v41  ;;  %10483 = vst [vmem:[#allocation99_spill] sm:$0xff] %v9193_v38  ;;  %v9197_v41 = vld [vmem:[#allocation10 + $0x454] ss:$24 sps:$4 sm:$0xff]  }
 0x6f6   :  { %10484 = vst [vmem:[#allocation98_spill] sm:$0xff] %v9197_v41 }
 0x6f7   :  { %4528 = vmatpush1.bf16.msra.mxu1 %v9186_v11  ;;  %v4274_v61 = vpop.f32.mrb[44].mxu1  ;;  %v7068_v11 = vpop.eup %7067 }
 0x6f8   :  { %v4275_v10 = vadd.f32 %v4274_v61, %v8708_v40  ;;  %v4276_v31 = vpop.f32.mrb[45].mxu1  ;;  %4529 = vmatprep.subr.bf16.mxu1 %v9190_v14  ;;  %4680 = vmatpush1.bf16.msra.mxu0 %v9193_v38  ;;  %v7070_v33 = vpop.eup %7069  ;;  %v9200_v40 = vld [vmem:[#allocation10 + $0x160] ss:$24 sps:$4 sm:$0xff]   ;;  %v9203_v14 = vld [vmem:[#allocation10 + $0x194] ss:$24 sps:$4 sm:$0xff]  }
 0x6f9   :  { %v4277_v19 = vadd.f32 %v4276_v31, %v8717_v59  ;;  %v4278_v44 = vpop.f32.mrb[46].mxu1  ;;  %4681 = vmatprep.subr.bf16.mxu0 %v9197_v41  ;;  %10485 = vst [vmem:[#allocation100_spill] sm:$0xff] %v9200_v40  ;;  %v9206_v38 = vld [vmem:[#allocation10 + $0x450] ss:$24 sps:$4 sm:$0xff]   ;;  %v9209_v41 = vld [vmem:[#allocation10 + $0x484] ss:$24 sps:$4 sm:$0xff]  }
 0x6fa   :  { %v4279_v18 = vpop.f32.mrb[47].mxu1  ;;  %v4337_v44 = vadd.f32 1.0, %v7068_v11  ;;  %10486 = vst [vmem:[#allocation101_spill] sm:$0xff] %v9209_v41 }
 0x6fb   :  { %v4345_v61 = vcombine.low %v4275_v10, %v4277_v19  ;;  %4530 = vmatpush1.bf16.msra.mxu1 %v9200_v40  ;;  %v4338_v10 = vadd.f32 1.0, %v7070_v33  ;;  %v9215_v40 = vld [vmem:[#allocation10 + $0x1c4] ss:$24 sps:$4 sm:$0xff]   ;;  %v9221_v33 = vld [vmem:[#allocation10 + $0x1f4] ss:$24 sps:$4 sm:$0xff]  }
 0x6fc   :  { %4531 = vmatprep.subr.bf16.mxu1 %v9203_v14  ;;  %4682 = vmatpush1.bf16.msra.mxu0 %v9206_v38  ;;  %10487 = vst [vmem:[#allocation103_spill] sm:$0xff] %v9215_v40  ;;  %7071 = vrcp.f32 %v4337_v44  ;;  %10488 = vst [vmem:[#allocation102_spill] sm:$0xff] %v9221_v33 }
 0x6fd   :  { %v4346_v31 = vrot.slane %v4345_v61, 6  ;;  %v4347_v59 = vrot.slane %v4345_v61, 7  ;;  %4683 = vmatprep.subr.bf16.mxu0 %v9209_v41  ;;  %7073 = vrcp.f32 %v4338_v10  ;;  %v10493_v10 = vld [vmem:[#allocation25_spill] sm:$0xff] }
 0x6ff   :  { %v4350_v18 = vadd.f32 %v4346_v31, %v8562_v22  ;;  %v4351_v19 = vadd.f32 %v4347_v59, %v8564_v23  ;;  %4532 = vmatpush1.bf16.msra.mxu1 %v8738_v26  ;;  %v9226_v26 = vld [vmem:[#allocation10 + $0x1f0] ss:$24 sps:$4 sm:$0xff]   ;;  %v9230_v31 = vld [vmem:[#allocation10 + $0x224] ss:$24 sps:$4 sm:$0xff]  }
 0x700   :  { %4533 = vmatprep.subr.bf16.mxu1 %v9215_v40  ;;  %4684 = vmatpush1.bf16.msra.mxu0 %v8742_v28  ;;  %10489 = vst [vmem:[#allocation104_spill] sm:$0xff] %v9226_v26  ;;  %v10490_v28 = vld [vmem:[#allocation23_spill] sm:$0xff]  ;;  %10491 = vst [vmem:[#allocation105_spill] sm:$0xff] %v9230_v31  ;;  %v9332_v40 = vld [vmem:[#allocation10 + $0x39c] ss:$24 sps:$4 sm:$0xff]  }
 0x701   :  { %v6160_v11 = vmul.f32 -1.442695, %v4350_v18  ;;  %v6161_v61 = vmul.f32 -1.442695, %v4351_v19  ;;  %4685 = vmatprep.subr.bf16.mxu0 %v8745_v3 }
 0x703   :  { %7075 = vpow2.f32 %v6160_v11  ;;  %4534 = vmatpush1.bf16.msra.mxu1 %v8748_v21  ;;  %v9233_v21 = vld [vmem:[#allocation10 + $0x4e0] ss:$24 sps:$4 sm:$0xff]  }
 0x704   :  { %7077 = vpow2.f32 %v6161_v61  ;;  %4535 = vmatprep.subr.bf16.mxu1 %v9221_v33  ;;  %4686 = vmatpush1.bf16.msra.mxu0 %v8752_v20  ;;  %10492 = vst [vmem:[#allocation106_spill] sm:$0xff] %v9233_v21  ;;  %v9252_v33 = vld [vmem:[#allocation10 + $0x250] ss:$24 sps:$4 sm:$0xff]  }
 0x705   :  { %4687 = vmatprep.subr.bf16.mxu0 %v8755_v60  ;;  %v9237_v60 = vld [vmem:[#allocation10 + $0x514] ss:$24 sps:$4 sm:$0xff]   ;;  %10499 = vst [vmem:[#allocation112_spill] sm:$0xff] %v9252_v33 }
 0x706   :  { %10494 = vst [vmem:[#allocation107_spill] sm:$0xff] %v9237_v60  ;;  %v7072_v11 = vpop.eup %7071 }
 0x707   :  { %v4315_v59 = vpop.f32.mrb[44].mxu0  ;;  %4536 = vmatpush1.bf16.msra.mxu1 %v9226_v26 }
 0x708   :  { %v4316_v3 = vadd.f32 %v4315_v59, %v10490_v28  ;;  %v4317_v44 = vpop.f32.mrb[45].mxu0  ;;  %4537 = vmatprep.subr.bf16.mxu1 %v9230_v31  ;;  %4688 = vmatpush1.bf16.msra.mxu0 %v9233_v21  ;;  %v9240_v59 = vld [vmem:[#allocation10 + $0x220] ss:$24 sps:$4 sm:$0xff]   ;;  %v7074_v28 = vpop.eup %7073  ;;  %v9243_v31 = vld [vmem:[#allocation10 + $0x254] ss:$24 sps:$4 sm:$0xff]  }
 0x709   :  { %v4318_v20 = vadd.f32 %v4317_v44, %v10493_v10  ;;  %v4319_v18 = vpop.f32.mrb[46].mxu0  ;;  %4689 = vmatprep.subr.bf16.mxu0 %v9237_v60  ;;  %10495 = vst [vmem:[#allocation108_spill] sm:$0xff] %v9240_v59  ;;  %10496 = vst [vmem:[#allocation109_spill] sm:$0xff] %v9243_v31  ;;  %v9246_v21 = vld [vmem:[#allocation10 + $0x510] ss:$24 sps:$4 sm:$0xff]  }
 0x70a   :  { %v4320_v19 = vpop.f32.mrb[47].mxu0  ;;  %10497 = vst [vmem:[#allocation110_spill] sm:$0xff] %v9246_v21  ;;  %v9249_v60 = vld [vmem:[#allocation10 + $0x544] ss:$24 sps:$4 sm:$0xff]  }
 0x70b   :  { %v4366_v61 = vcombine.low %v4316_v3, %v4318_v20  ;;  %4538 = vmatpush1.bf16.msra.mxu1 %v9240_v59  ;;  %10498 = vst [vmem:[#allocation111_spill] sm:$0xff] %v9249_v60 }
 0x70c   :  { %4539 = vmatprep.subr.bf16.mxu1 %v9243_v31  ;;  %4690 = vmatpush1.bf16.msra.mxu0 %v9246_v21  ;;  %v9255_v31 = vld [vmem:[#allocation10 + $0x284] ss:$24 sps:$4 sm:$0xff]   ;;  %v9258_v21 = vld [vmem:[#allocation10 + $0x540] ss:$24 sps:$4 sm:$0xff]  }
 0x70d   :  { %v7076_v44 = vpop.eup %7075  ;;  %v4367_v18 = vrot.slane %v4366_v61, 6  ;;  %v4368_v10 = vrot.slane %v4366_v61, 7  ;;  %4691 = vmatprep.subr.bf16.mxu0 %v9249_v60  ;;  %10500 = vst [vmem:[#allocation113_spill] sm:$0xff] %v9255_v31  ;;  %10501 = vst [vmem:[#allocation118_spill] sm:$0xff] %v9258_v21  ;;  %v10502_v61 = vld [vmem:[#allocation158_spill] sm:$0xff] }
 0x70e   :  { %v7078_v3 = vpop.eup %7077  ;;  %v4358_v20 = vadd.f32 1.0, %v7076_v44  ;;  %v10503_v44 = vld [vmem:[#allocation159_spill] sm:$0xff] }
 0x70f   :  { %v4359_v19 = vadd.f32 1.0, %v7078_v3  ;;  %v4371_v59 = vmul.f32 %v7072_v11, %v4367_v18  ;;  %v4372_v26 = vmul.f32 %v7074_v28, %v4368_v10  ;;  %4540 = vmatpush1.bf16.msra.mxu1 %v9252_v33  ;;  %v9263_v11 = vld [vmem:[#allocation10 + $0x574] ss:$24 sps:$4 sm:$0xff]   ;;  %v9266_v28 = vld [vmem:[#allocation10 + $0x280] ss:$24 sps:$4 sm:$0xff]  }
 0x710   :  { %7079 = vrcp.f32 %v4358_v20  ;;  %4541 = vmatprep.subr.bf16.mxu1 %v9255_v31  ;;  %4692 = vmatpush1.bf16.msra.mxu0 %v9258_v21  ;;  %10504 = vst [vmem:[#allocation119_spill] sm:$0xff] %v9263_v11  ;;  %10505 = vst [vmem:[#allocation121_spill] sm:$0xff] %v9266_v28  ;;  %v9269_v10 = vld [vmem:[#allocation10 + $0x2b4] ss:$24 sps:$4 sm:$0xff]   ;;  %v9272_v18 = vld [vmem:[#allocation10 + $0x570] ss:$24 sps:$4 sm:$0xff]  }
 0x711   :  { %7081 = vrcp.f32 %v4359_v19  ;;  %v4373_v60 = vadd.f32 %v4371_v59, %v10502_v61  ;;  %v4374_v3 = vadd.f32 %v4372_v26, %v10503_v44  ;;  %4693 = vmatprep.subr.bf16.mxu0 %v9263_v11  ;;  %10506 = vst [vmem:[#allocation123_spill] sm:$0xff] %v9269_v10  ;;  %10507 = vst [vmem:[#allocation125_spill] sm:$0xff] %v9272_v18  ;;  %v9275_v59 = vld [vmem:[#allocation10 + $0x5a4] ss:$24 sps:$4 sm:$0xff]   ;;  %v9278_v26 = vld [vmem:[#allocation10 + $0x2b0] ss:$24 sps:$4 sm:$0xff]  }
 0x712   :  { %10508 = vst [vmem:[#allocation129_spill] sm:$0xff] %v9275_v59  ;;  %10509 = vst [vmem:[#allocation131_spill] sm:$0xff] %v9278_v26  ;;  %v9284_v20 = vld [vmem:[#allocation10 + $0x5a0] ss:$24 sps:$4 sm:$0xff]   ;;  %v9287_v19 = vld [vmem:[#allocation10 + $0x5d4] ss:$24 sps:$4 sm:$0xff]  }
 0x713   :  { %7083 = vtanh.f32 %v4373_v60  ;;  %4542 = vmatpush1.bf16.msra.mxu1 %v9266_v28  ;;  %v9281_v60 = vld [vmem:[#allocation10 + $0x2e4] ss:$24 sps:$4 sm:$0xff]   ;;  %10511 = vst [vmem:[#allocation135_spill] sm:$0xff] %v9284_v20  ;;  %10512 = vst [vmem:[#allocation120_spill] sm:$0xff] %v9287_v19  ;;  %v9292_v11 = vld [vmem:[#allocation10 + $0x2e0] ss:$24 sps:$4 sm:$0xff]  }
 0x714   :  { %7085 = vtanh.f32 %v4374_v3  ;;  %4543 = vmatprep.subr.bf16.mxu1 %v9269_v10  ;;  %4694 = vmatpush1.bf16.msra.mxu0 %v9272_v18  ;;  %10510 = vst [vmem:[#allocation133_spill] sm:$0xff] %v9281_v60  ;;  %v10513_v3 = vld [vmem:[#allocation26_spill] sm:$0xff]  ;;  %10514 = vst [vmem:[#allocation137_spill] sm:$0xff] %v9292_v11  ;;  %v9295_v61 = vld [vmem:[#allocation10 + $0x30c] ss:$24 sps:$4 sm:$0xff]  }
 0x715   :  { %4695 = vmatprep.subr.bf16.mxu0 %v9275_v59  ;;  %v6162_v18 = vrot.slane %v10513_v3, 9  ;;  %v6163_v59 = vrot.slane %v8789_v37, 9  ;;  %10515 = vst [vmem:[#allocation122_spill] sm:$0xff] %v9295_v61  ;;  %v9301_v31 = vld [vmem:[#allocation10 + $0x314] ss:$24 sps:$4 sm:$0xff]   ;;  %v10523_v33 = vld [vmem:[#allocation115_spill] sm:$0xff] }
 0x716   :  { %10517 = vst [vmem:[#allocation124_spill] sm:$0xff] %v9301_v31 }
 0x717   :  { %4544 = vmatpush1.bf16.msra.mxu1 %v9278_v26 }
 0x718   :  { %4545 = vmatprep.subr.bf16.mxu1 %v9281_v60  ;;  %4696 = vmatpush1.bf16.msra.mxu0 %v9284_v20  ;;  %v9298_v20 = vld [vmem:[#allocation10 + $0x5d0] ss:$24 sps:$4 sm:$0xff]  }
 0x719   :  { %4697 = vmatprep.subr.bf16.mxu0 %v9287_v19  ;;  %10516 = vst [vmem:[#allocation139_spill] sm:$0xff] %v9298_v20 }
 0x71a   :  { %v7080_v10 = vpop.eup %7079 }
 0x71b   :  { %v7082_v28 = vpop.eup %7081  ;;  %4546 = vmatpush1.bf16.msra.mxu1 %v9292_v11  ;;  %v4377_v26 = vsub.f32 1.0, %v7080_v10  ;;  %v4387_v60 = vmul.f32 %v7080_v10, %v6162_v18  ;;  %v9305_v10 = vld [vmem:[#allocation10 + $0x308] ss:$24 sps:$4 sm:$0xff]  }
 0x71c   :  { %4708 = vmatprep.subr.bf16.mxu1 %v9295_v61  ;;  %4698 = vmatpush1.bf16.msra.mxu0 %v9298_v20  ;;  %v4378_v19 = vsub.f32 1.0, %v7082_v28  ;;  %v4388_v3 = vmul.f32 %v7082_v28, %v6163_v59  ;;  %10518 = vst [vmem:[#allocation141_spill] sm:$0xff] %v9305_v10  ;;  %v9308_v61 = vld [vmem:[#allocation10 + $0x33c] ss:$24 sps:$4 sm:$0xff]  }
 0x71d   :  { %v7084_v21 = vpop.eup %7083  ;;  %4749 = vmatprep.subr.bf16.mxu0 %v9301_v31  ;;  %10519 = vst [vmem:[#allocation126_spill] sm:$0xff] %v9308_v61  ;;  %v10522_v59 = vld [vmem:[#allocation150_spill] sm:$0xff] }
 0x71e   :  { %v7086_v37 = vpop.eup %7085  ;;  %4548 = vmatmul.mubr.bf16.vlgmr.msra.gmra.mrb[52].mxu1 %v9114_v55  ;;  %v4379_v11 = vmul.f32 %v7084_v21, %v4377_v26  ;;  %v9319_v21 = vld [vmem:[#allocation10 + $0x338] ss:$24 sps:$4 sm:$0xff]  }
 0x71f   :  { %4709 = vmatpush1.bf16.msra.mxu1 %v9305_v10  ;;  %v4380_v18 = vmul.f32 %v7086_v37, %v4378_v19  ;;  %10524 = vst [vmem:[#allocation145_spill] sm:$0xff] %v9319_v21 }
 0x720   :  { %4710 = vmatprep.subr.bf16.mxu1 %v9308_v61  ;;  %v9311_v20 = vadd.f32 %v4387_v60, %v4379_v11  ;;  %v9326_v11 = vld [vmem:[#allocation10 + $0x36c] ss:$24 sps:$4 sm:$0xff]  }
 0x721   :  { %v9313_v28 = vadd.f32 %v4388_v3, %v4380_v18  ;;  %10525 = vst [vmem:[#allocation132_spill] sm:$0xff] %v9326_v11 }
 0x722   :  { %10520 = vst [vmem:[#allocation143_spill] sm:$0xff] %v9311_v20  ;;  %v4632_v31 = vrot.slane %v9311_v20, %v10522_v59  ;;  %v4628_v55 = vrot.slane %v9311_v20, %v10523_v33  ;;  %v9329_v20 = vld [vmem:[#allocation10 + $0x368] ss:$24 sps:$4 sm:$0xff]  }
 0x723   :  { %10521 = vst [vmem:[#allocation130_spill] sm:$0xff] %v9313_v28  ;;  %4711 = vmatpush1.bf16.msra.mxu1 %v9319_v21  ;;  %v4640_v26 = vrot.slane %v9313_v28, %v10522_v59  ;;  %v4636_v19 = vrot.slane %v9313_v28, %v10523_v33 }
 0x724   :  { %4712 = vmatprep.subr.bf16.mxu1 %v9326_v11  ;;  %v4646_v60 = vpack.c.bf16 %v4632_v31, %v4632_v31  ;;  %v4645_v3 = vpack.c.bf16 %v4628_v55, %v4628_v55  ;;  %v9335_v31 = vld [vmem:[#allocation10 + $0x398] ss:$24 sps:$4 sm:$0xff]  }
 0x725   :  { %v4648_v37 = vpack.c.bf16 %v4640_v26, %v4640_v26  ;;  %v4647_v18 = vpack.c.bf16 %v4636_v19, %v4636_v19 }
 0x726   :  { %v4654_v61 = vunpack.c.l.b16 %v4646_v60  ;;  %v4653_v10 = vunpack.c.l.b16 %v4645_v3  ;;  %v9342_v3 = vld [vmem:[#allocation10 + $0x3cc] ss:$24 sps:$4 sm:$0xff]  }
 0x727   :  { %4713 = vmatpush1.bf16.msra.mxu1 %v9329_v20  ;;  %v4656_v21 = vunpack.c.l.b16 %v4648_v37  ;;  %v4655_v44 = vunpack.c.l.b16 %v4647_v18  ;;  %v9398_v37 = vld [vmem:[#allocation10 + $0x4e8] ss:$24 sps:$4 sm:$0xff]  }
 0x728   :  { %4714 = vmatprep.subr.bf16.mxu1 %v9332_v40  ;;  %v4660_v28 = vrot.slane %v4654_v61, 2  ;;  %v4657_v22 = vrot.slane %v4653_v10, 2  ;;  %v9346_v61 = vld [vmem:[#allocation10 + $0x3c8] ss:$24 sps:$4 sm:$0xff]   ;;  %v9370_v10 = vld [vmem:[#allocation10 + $0x458] ss:$24 sps:$4 sm:$0xff]  }
 0x729   :  { %v4661_v41 = vrot.slane %v4656_v21, 1  ;;  %v4658_v11 = vrot.slane %v4655_v44, 1  ;;  %v9358_v44 = vld [vmem:[#allocation10 + $0x42c] ss:$24 sps:$4 sm:$0xff]   ;;  %v9386_v21 = vld [vmem:[#allocation10 + $0x4b8] ss:$24 sps:$4 sm:$0xff]  }
 0x72a   :  { %10531 = vst [vmem:[#allocation136_spill] sm:$0xff] %v9386_v21  ;;  %10535 = vst [vmem:[#allocation142_spill] sm:$0xff] %v9398_v37  ;;  %v9401_v18 = vld [vmem:[#allocation10 + $0x430] ss:$24 sps:$4 sm:$0xff]  }
 0x72b   :  { %4715 = vmatpush1.bf16.msra.mxu1 %v9335_v31  ;;  %v4662_v55 = vsel %vm933_vm2, %v4661_v41, %v4660_v28  ;;  %v4659_v26 = vsel %vm933_vm2, %v4658_v11, %v4657_v22  ;;  %v9351_v22 = vld [vmem:[#allocation10 + $0x3fc] ss:$24 sps:$4 sm:$0xff]   ;;  %v9354_v41 = vld [vmem:[#allocation10 + $0x3f8] ss:$24 sps:$4 sm:$0xff]   ;;  %10536 = vst [vmem:[#allocation144_spill] sm:$0xff] %v9401_v18 }
 0x72c   :  { %v4664_v19 = vpack.c.b16 %v4662_v55, %v4662_v55  ;;  %v9340_v60 = vpack.c.b16 %v4659_v26, %v4659_v26  ;;  %4716 = vmatprep.subr.bf16.mxu1 %v9342_v3  ;;  %v9382_v28 = vld [vmem:[#allocation10 + $0x4bc] ss:$24 sps:$4 sm:$0xff]  }
 0x72d   :  { %10529 = vst [vmem:[#allocation151_spill] sm:$0xff] %v9382_v28  ;;  %v9395_v11 = vld [vmem:[#allocation10 + $0x434] ss:$24 sps:$4 sm:$0xff]   ;;  %v9407_v26 = vld [vmem:[#allocation10 + $0x464] ss:$24 sps:$4 sm:$0xff]  }
 0x72e   :  { %4699 = vmatprep.mubr.bf16.mxu0 %v4664_v19  ;;  %4740 = vmatprep.mubr.bf16.mxu1 %v4664_v19  ;;  %10534 = vst [vmem:[#allocation140_spill] sm:$0xff] %v9395_v11  ;;  %v9404_v55 = vld [vmem:[#allocation10 + $0x51c] ss:$24 sps:$4 sm:$0xff]   ;;  %10538 = vst [vmem:[#allocation148_spill] sm:$0xff] %v9407_v26 }
 0x72f   :  { %4700 = vmatmul.mubr.bf16.vlgmr.msra.gmra.mrb[52].mxu0 %v9340_v60  ;;  %4717 = vmatpush1.bf16.msra.mxu1 %v9346_v61  ;;  %10537 = vst [vmem:[#allocation146_spill] sm:$0xff] %v9404_v55 }
 0x730   :  { %4750 = vmatpush1.bf16.msra.mxu0 %v8810_v27  ;;  %4781 = vmatprep.mubr.bf16.mxu0 %v4664_v19  ;;  %v9362_v27 = vld [vmem:[#allocation10 + $0x428] ss:$24 sps:$4 sm:$0xff]   ;;  %v9410_v19 = vld [vmem:[#allocation10 + $0x518] ss:$24 sps:$4 sm:$0xff]  }
 0x731   :  { %4751 = vmatprep.subr.bf16.mxu0 %v8814_v24  ;;  %4718 = vmatprep.subr.bf16.mxu1 %v9351_v22  ;;  %v9366_v24 = vld [vmem:[#allocation10 + $0x45c] ss:$24 sps:$4 sm:$0xff]   ;;  %10539 = vst [vmem:[#allocation152_spill] sm:$0xff] %v9410_v19 }
 0x733   :  { %4719 = vmatpush1.bf16.msra.mxu1 %v9354_v41 }
 0x734   :  { %4752 = vmatpush1.bf16.msra.mxu0 %v8818_v13  ;;  %4720 = vmatprep.subr.bf16.mxu1 %v9358_v44  ;;  %v9374_v13 = vld [vmem:[#allocation10 + $0x48c] ss:$24 sps:$4 sm:$0xff]  }
 0x735   :  { %4753 = vmatprep.subr.bf16.mxu0 %v8822_v29  ;;  %10526 = vst [vmem:[#allocation147_spill] sm:$0xff] %v9374_v13  ;;  %v9378_v29 = vld [vmem:[#allocation10 + $0x488] ss:$24 sps:$4 sm:$0xff]  }
 0x736   :  { %10527 = vst [vmem:[#allocation134_spill] sm:$0xff] %v9378_v29 }
 0x737   :  { %4721 = vmatpush1.bf16.msra.mxu1 %v9362_v27 }
 0x738   :  { %4754 = vmatpush1.bf16.msra.mxu0 %v8826_v54  ;;  %4722 = vmatprep.subr.bf16.mxu1 %v9366_v24  ;;  %v10528_v54 = vld [vmem:[#allocation27_spill] sm:$0xff] }
 0x739   :  { %4755 = vmatprep.subr.bf16.mxu0 %v8830_v30  ;;  %v10530_v30 = vld [vmem:[#allocation28_spill] sm:$0xff] }
 0x73b   :  { %4723 = vmatpush1.bf16.msra.mxu1 %v9370_v10 }
 0x73c   :  { %4756 = vmatpush1.bf16.msra.mxu0 %v8834_v39  ;;  %4724 = vmatprep.subr.bf16.mxu1 %v9374_v13  ;;  %v9389_v39 = vld [vmem:[#allocation10 + $0x400] ss:$24 sps:$4 sm:$0xff]  }
 0x73d   :  { %4757 = vmatprep.subr.bf16.mxu0 %v8838_v2  ;;  %10532 = vst [vmem:[#allocation155_spill] sm:$0xff] %v9389_v39  ;;  %v9392_v2 = vld [vmem:[#allocation10 + $0x4ec] ss:$24 sps:$4 sm:$0xff]  }
 0x73e   :  { %10533 = vst [vmem:[#allocation138_spill] sm:$0xff] %v9392_v2 }
 0x73f   :  { %4725 = vmatpush1.bf16.msra.mxu1 %v9378_v29 }
 0x740   :  { %4758 = vmatpush1.bf16.msra.mxu0 %v10528_v54  ;;  %4726 = vmatprep.subr.bf16.mxu1 %v9382_v28  ;;  %v9413_v54 = vld [vmem:[#allocation10 + $0x460] ss:$24 sps:$4 sm:$0xff]  }
 0x741   :  { %4759 = vmatprep.subr.bf16.mxu0 %v10530_v30  ;;  %10540 = vst [vmem:[#allocation156_spill] sm:$0xff] %v9413_v54  ;;  %v9416_v30 = vld [vmem:[#allocation10 + $0x54c] ss:$24 sps:$4 sm:$0xff]  }
 0x742   :  { %10541 = vst [vmem:[#allocation26_spill] sm:$0xff] %v9416_v30 }
 0x743   :  { %4727 = vmatpush1.bf16.msra.mxu1 %v9386_v21 }
 0x744   :  { %4760 = vmatpush1.bf16.msra.mxu0 %v9389_v39  ;;  %4728 = vmatprep.subr.bf16.mxu1 %v9392_v2 }
 0x745   :  { %4761 = vmatprep.subr.bf16.mxu0 %v9395_v11  ;;  %v10628_v11 = vld [vmem:[#allocation21_spill] sm:$0xff] }
 0x747   :  { %4729 = vmatpush1.bf16.msra.mxu1 %v9398_v37  ;;  %v9419_v37 = vld [vmem:[#allocation10 + $0x494] ss:$24 sps:$4 sm:$0xff]  }
 0x748   :  { %4762 = vmatpush1.bf16.msra.mxu0 %v9401_v18  ;;  %4730 = vmatprep.subr.bf16.mxu1 %v9404_v55  ;;  %10542 = vst [vmem:[#allocation150_spill] sm:$0xff] %v9419_v37  ;;  %v9422_v55 = vld [vmem:[#allocation10 + $0x548] ss:$24 sps:$4 sm:$0xff]  }
 0x749   :  { %4763 = vmatprep.subr.bf16.mxu0 %v9407_v26  ;;  %10543 = vst [vmem:[#allocation115_spill] sm:$0xff] %v9422_v55  ;;  %v9425_v26 = vld [vmem:[#allocation10 + $0x490] ss:$24 sps:$4 sm:$0xff]  }
 0x74a   :  { %10544 = vst [vmem:[#allocation27_spill] sm:$0xff] %v9425_v26  ;;  %v10627_v18 = vld [vmem:[#allocation20_spill] sm:$0xff] }
 0x74b   :  { %4731 = vmatpush1.bf16.msra.mxu1 %v9410_v19  ;;  %v9428_v19 = vld [vmem:[#allocation10 + $0x57c] ss:$24 sps:$4 sm:$0xff]  }
 0x74c   :  { %4764 = vmatpush1.bf16.msra.mxu0 %v9413_v54  ;;  %4732 = vmatprep.subr.bf16.mxu1 %v9416_v30  ;;  %10545 = vst [vmem:[#allocation28_spill] sm:$0xff] %v9428_v19  ;;  %v9431_v54 = vld [vmem:[#allocation10 + $0x4c4] ss:$24 sps:$4 sm:$0xff]   ;;  %v9434_v30 = vld [vmem:[#allocation10 + $0x578] ss:$24 sps:$4 sm:$0xff]  }
 0x74d   :  { %4765 = vmatprep.subr.bf16.mxu0 %v9419_v37  ;;  %10546 = vst [vmem:[#allocation160_spill] sm:$0xff] %v9431_v54  ;;  %10547 = vst [vmem:[#allocation161_spill] sm:$0xff] %v9434_v30  ;;  %v9437_v37 = vld [vmem:[#allocation10 + $0x4c0] ss:$24 sps:$4 sm:$0xff]  }
 0x74e   :  { %10548 = vst [vmem:[#allocation162_spill] sm:$0xff] %v9437_v37 }
 0x74f   :  { %4733 = vmatpush1.bf16.msra.mxu1 %v9422_v55  ;;  %v9440_v55 = vld [vmem:[#allocation10 + $0x5ac] ss:$24 sps:$4 sm:$0xff]  }
 0x750   :  { %4766 = vmatpush1.bf16.msra.mxu0 %v9425_v26  ;;  %4734 = vmatprep.subr.bf16.mxu1 %v9428_v19  ;;  %10549 = vst [vmem:[#allocation163_spill] sm:$0xff] %v9440_v55  ;;  %v9443_v26 = vld [vmem:[#allocation10 + $0x4f4] ss:$24 sps:$4 sm:$0xff]   ;;  %v9446_v19 = vld [vmem:[#allocation10 + $0x5a8] ss:$24 sps:$4 sm:$0xff]  }
 0x751   :  { %4767 = vmatprep.subr.bf16.mxu0 %v9431_v54  ;;  %10550 = vst [vmem:[#allocation164_spill] sm:$0xff] %v9443_v26  ;;  %10551 = vst [vmem:[#allocation165_spill] sm:$0xff] %v9446_v19  ;;  %v9449_v54 = vld [vmem:[#allocation10 + $0x4f0] ss:$24 sps:$4 sm:$0xff]  }
 0x752   :  { %10552 = vst [vmem:[#allocation166_spill] sm:$0xff] %v9449_v54 }
 0x753   :  { %4735 = vmatpush1.bf16.msra.mxu1 %v9434_v30  ;;  %v9452_v30 = vld [vmem:[#allocation10 + $0x5dc] ss:$24 sps:$4 sm:$0xff]  }
 0x754   :  { %4768 = vmatpush1.bf16.msra.mxu0 %v9437_v37  ;;  %4736 = vmatprep.subr.bf16.mxu1 %v9440_v55  ;;  %10553 = vst [vmem:[#allocation167_spill] sm:$0xff] %v9452_v30  ;;  %v9455_v37 = vld [vmem:[#allocation10 + $0x524] ss:$24 sps:$4 sm:$0xff]   ;;  %v9458_v55 = vld [vmem:[#allocation10 + $0x5d8] ss:$24 sps:$4 sm:$0xff]  }
 0x755   :  { %4769 = vmatprep.subr.bf16.mxu0 %v9443_v26  ;;  %10554 = vst [vmem:[#allocation168_spill] sm:$0xff] %v9455_v37  ;;  %10555 = vst [vmem:[#allocation169_spill] sm:$0xff] %v9458_v55  ;;  %v9461_v26 = vld [vmem:[#allocation10 + $0x520] ss:$24 sps:$4 sm:$0xff]  }
 0x756   :  { %10556 = vst [vmem:[#allocation170_spill] sm:$0xff] %v9461_v26 }
 0x757   :  { %4737 = vmatpush1.bf16.msra.mxu1 %v9446_v19  ;;  %v9465_v19 = vld [vmem:[#allocation10 + $0x554] ss:$24 sps:$4 sm:$0xff]  }
 0x758   :  { %4770 = vmatpush1.bf16.msra.mxu0 %v9449_v54  ;;  %4738 = vmatprep.subr.bf16.mxu1 %v9452_v30  ;;  %10557 = vst [vmem:[#allocation171_spill] sm:$0xff] %v9465_v19  ;;  %v9470_v30 = vld [vmem:[#allocation10 + $0x550] ss:$24 sps:$4 sm:$0xff]  }
 0x759   :  { %4771 = vmatprep.subr.bf16.mxu0 %v9455_v37  ;;  %10558 = vst [vmem:[#allocation172_spill] sm:$0xff] %v9470_v30  ;;  %v10576_v37 = vld [vmem:[#allocation41_spill] sm:$0xff]  ;;  %v10626_v54 = vld [vmem:[#allocation19_spill] sm:$0xff] }
 0x75b   :  { %4739 = vmatpush1.bf16.msra.mxu1 %v9458_v55  ;;  %v9474_v55 = vld [vmem:[#allocation10 + $0x584] ss:$24 sps:$4 sm:$0xff]  }
 0x75c   :  { %4772 = vmatpush1.bf16.msra.mxu0 %v9461_v26  ;;  %4900 = vmatprep.subr.bf16.mxu1 %v8877_v63  ;;  %10559 = vst [vmem:[#allocation173_spill] sm:$0xff] %v9474_v55  ;;  %v9478_v63 = vld [vmem:[#allocation10 + $0x580] ss:$24 sps:$4 sm:$0xff]   ;;  %v10573_v26 = vld [vmem:[#allocation36_spill] sm:$0xff] }
 0x75d   :  { %4773 = vmatprep.subr.bf16.mxu0 %v9465_v19  ;;  %10560 = vst [vmem:[#allocation174_spill] sm:$0xff] %v9478_v63  ;;  %v9482_v19 = vld [vmem:[#allocation10 + $0x5b4] ss:$24 sps:$4 sm:$0xff]  }
 0x75e   :  { %4741 = vmatmul.mubr.bf16.vlgmr.msra.gmra.mrb[56].mxu1 %v9340_v60  ;;  %10561 = vst [vmem:[#allocation175_spill] sm:$0xff] %v9482_v19 }
 0x75f   :  { %4901 = vmatpush1.bf16.msra.mxu1 %v8882_v1  ;;  %v10562_v1 = vld [vmem:[#allocation29_spill] sm:$0xff] }
 0x760   :  { %4774 = vmatpush1.bf16.msra.mxu0 %v9470_v30  ;;  %4902 = vmatprep.subr.bf16.mxu1 %v8886_v58  ;;  %v9486_v30 = vld [vmem:[#allocation10 + $0x5b0] ss:$24 sps:$4 sm:$0xff]   ;;  %v10564_v58 = vld [vmem:[#allocation30_spill] sm:$0xff] }
 0x761   :  { %4775 = vmatprep.subr.bf16.mxu0 %v9474_v55  ;;  %10563 = vst [vmem:[#allocation29_spill] sm:$0xff] %v9486_v30  ;;  %v9490_v55 = vld [vmem:[#allocation10 + $0x5e4] ss:$24 sps:$4 sm:$0xff]  }
 0x762   :  { %10565 = vst [vmem:[#allocation30_spill] sm:$0xff] %v9490_v55 }
 0x763   :  { %4903 = vmatpush1.bf16.msra.mxu1 %v8890_v45  ;;  %v10566_v45 = vld [vmem:[#allocation31_spill] sm:$0xff] }
 0x764   :  { %4776 = vmatpush1.bf16.msra.mxu0 %v9478_v63  ;;  %4904 = vmatprep.subr.bf16.mxu1 %v8894_v53  ;;  %v9494_v63 = vld [vmem:[#allocation10 + $0x5e0] ss:$24 sps:$4 sm:$0xff]  }
 0x765   :  { %4777 = vmatprep.subr.bf16.mxu0 %v9482_v19  ;;  %10567 = vst [vmem:[#allocation31_spill] sm:$0xff] %v9494_v63  ;;  %v10568_v53 = vld [vmem:[#allocation33_spill] sm:$0xff]  ;;  %v10569_v19 = vld [vmem:[#allocation32_spill] sm:$0xff] }
 0x767   :  { %4905 = vmatpush1.bf16.msra.mxu1 %v10562_v1  ;;  %v10570_v1 = vld [vmem:[#allocation35_spill] sm:$0xff] }
 0x768   :  { %4778 = vmatpush1.bf16.msra.mxu0 %v9486_v30  ;;  %4906 = vmatprep.subr.bf16.mxu1 %v10564_v58  ;;  %v10571_v30 = vld [vmem:[#allocation34_spill] sm:$0xff]  ;;  %v10572_v58 = vld [vmem:[#allocation37_spill] sm:$0xff] }
 0x769   :  { %4779 = vmatprep.subr.bf16.mxu0 %v9490_v55  ;;  %v10574_v55 = vld [vmem:[#allocation39_spill] sm:$0xff] }
 0x76b   :  { %4907 = vmatpush1.bf16.msra.mxu1 %v10566_v45  ;;  %v10575_v45 = vld [vmem:[#allocation38_spill] sm:$0xff] }
 0x76c   :  { %4780 = vmatpush1.bf16.msra.mxu0 %v9494_v63  ;;  %4908 = vmatprep.subr.bf16.mxu1 %v10568_v53  ;;  %v10577_v63 = vld [vmem:[#allocation40_spill] sm:$0xff]  ;;  %v10578_v53 = vld [vmem:[#allocation43_spill] sm:$0xff] }
 0x76d   :  { %4941 = vmatprep.subr.bf16.mxu0 %v10569_v19  ;;  %v10579_v19 = vld [vmem:[#allocation42_spill] sm:$0xff] }
 0x76f   :  { %4782 = vmatmul.mubr.bf16.vlgmr.msra.gmra.mrb[56].mxu0 %v9340_v60  ;;  %4909 = vmatpush1.bf16.msra.mxu1 %v10570_v1  ;;  %v10580_v60 = vld [vmem:[#allocation45_spill] sm:$0xff]  ;;  %v10581_v1 = vld [vmem:[#allocation44_spill] sm:$0xff] }
 0x770   :  { %4942 = vmatpush1.bf16.msra.mxu0 %v10571_v30  ;;  %4910 = vmatprep.subr.bf16.mxu1 %v10572_v58  ;;  %v10582_v30 = vld [vmem:[#allocation47_spill] sm:$0xff]  ;;  %v10583_v58 = vld [vmem:[#allocation46_spill] sm:$0xff] }
 0x771   :  { %4943 = vmatprep.subr.bf16.mxu0 %v10573_v26  ;;  %v10584_v26 = vld [vmem:[#allocation49_spill] sm:$0xff] }
 0x773   :  { %4911 = vmatpush1.bf16.msra.mxu1 %v10574_v55  ;;  %v10585_v55 = vld [vmem:[#allocation48_spill] sm:$0xff] }
 0x774   :  { %4944 = vmatpush1.bf16.msra.mxu0 %v10575_v45  ;;  %4912 = vmatprep.subr.bf16.mxu1 %v10576_v37  ;;  %v10586_v45 = vld [vmem:[#allocation128_spill] sm:$0xff]  ;;  %v10587_v37 = vld [vmem:[#allocation127_spill] sm:$0xff] }
 0x775   :  { %4945 = vmatprep.subr.bf16.mxu0 %v10577_v63  ;;  %v10588_v63 = vld [vmem:[#allocation51_spill] sm:$0xff] }
 0x777   :  { %4913 = vmatpush1.bf16.msra.mxu1 %v10578_v53  ;;  %v10589_v53 = vld [vmem:[#allocation50_spill] sm:$0xff] }
 0x778   :  { %4946 = vmatpush1.bf16.msra.mxu0 %v10579_v19  ;;  %4914 = vmatprep.subr.bf16.mxu1 %v10580_v60  ;;  %v10590_v19 = vld [vmem:[#allocation52_spill] sm:$0xff]  ;;  %v10591_v60 = vld [vmem:[#allocation53_spill] sm:$0xff] }
 0x779   :  { %4947 = vmatprep.subr.bf16.mxu0 %v10581_v1  ;;  %v10592_v1 = vld [vmem:[#allocation55_spill] sm:$0xff] }
 0x77b   :  { %4915 = vmatpush1.bf16.msra.mxu1 %v10582_v30  ;;  %v10593_v30 = vld [vmem:[#allocation54_spill] sm:$0xff] }
 0x77c   :  { %4948 = vmatpush1.bf16.msra.mxu0 %v10583_v58  ;;  %4916 = vmatprep.subr.bf16.mxu1 %v10584_v26  ;;  %v10594_v58 = vld [vmem:[#allocation56_spill] sm:$0xff]  ;;  %v10595_v26 = vld [vmem:[#allocation57_spill] sm:$0xff] }
 0x77d   :  { %4949 = vmatprep.subr.bf16.mxu0 %v10585_v55  ;;  %v10596_v55 = vld [vmem:[#allocation59_spill] sm:$0xff] }
 0x77f   :  { %4917 = vmatpush1.bf16.msra.mxu1 %v10586_v45  ;;  %v10597_v45 = vld [vmem:[#allocation58_spill] sm:$0xff] }
 0x780   :  { %4950 = vmatpush1.bf16.msra.mxu0 %v10587_v37  ;;  %4918 = vmatprep.subr.bf16.mxu1 %v10588_v63  ;;  %v10598_v37 = vld [vmem:[#allocation60_spill] sm:$0xff]  ;;  %v10599_v63 = vld [vmem:[#allocation61_spill] sm:$0xff] }
 0x781   :  { %4951 = vmatprep.subr.bf16.mxu0 %v10589_v53  ;;  %v10600_v53 = vld [vmem:[#allocation63_spill] sm:$0xff] }
 0x783   :  { %4919 = vmatpush1.bf16.msra.mxu1 %v10590_v19  ;;  %v10601_v19 = vld [vmem:[#allocation62_spill] sm:$0xff] }
 0x784   :  { %4952 = vmatpush1.bf16.msra.mxu0 %v10591_v60  ;;  %4920 = vmatprep.subr.bf16.mxu1 %v10592_v1  ;;  %v10602_v60 = vld [vmem:[#allocation64_spill] sm:$0xff]  ;;  %v10603_v1 = vld [vmem:[#allocation65_spill] sm:$0xff] }
 0x785   :  { %4953 = vmatprep.subr.bf16.mxu0 %v10593_v30  ;;  %v10604_v30 = vld [vmem:[#allocation67_spill] sm:$0xff] }
 0x787   :  { %4921 = vmatpush1.bf16.msra.mxu1 %v10594_v58  ;;  %v10605_v58 = vld [vmem:[#allocation66_spill] sm:$0xff] }
 0x788   :  { %4954 = vmatpush1.bf16.msra.mxu0 %v10595_v26  ;;  %4922 = vmatprep.subr.bf16.mxu1 %v10596_v55  ;;  %v10606_v26 = vld [vmem:[#allocation68_spill] sm:$0xff]  ;;  %v10607_v55 = vld [vmem:[#allocation69_spill] sm:$0xff] }
 0x789   :  { %4955 = vmatprep.subr.bf16.mxu0 %v10597_v45  ;;  %v10608_v45 = vld [vmem:[#allocation71_spill] sm:$0xff] }
 0x78b   :  { %4923 = vmatpush1.bf16.msra.mxu1 %v10598_v37  ;;  %v10609_v37 = vld [vmem:[#allocation70_spill] sm:$0xff] }
 0x78c   :  { %4956 = vmatpush1.bf16.msra.mxu0 %v10599_v63  ;;  %4924 = vmatprep.subr.bf16.mxu1 %v10600_v53  ;;  %v10610_v63 = vld [vmem:[#allocation72_spill] sm:$0xff]  ;;  %v10611_v53 = vld [vmem:[#allocation73_spill] sm:$0xff] }
 0x78d   :  { %4957 = vmatprep.subr.bf16.mxu0 %v10601_v19  ;;  %v10612_v19 = vld [vmem:[#allocation75_spill] sm:$0xff] }
 0x78f   :  { %4925 = vmatpush1.bf16.msra.mxu1 %v10602_v60  ;;  %v10613_v60 = vld [vmem:[#allocation74_spill] sm:$0xff] }
 0x790   :  { %4958 = vmatpush1.bf16.msra.mxu0 %v10603_v1  ;;  %4926 = vmatprep.subr.bf16.mxu1 %v10604_v30  ;;  %v10614_v1 = vld [vmem:[#allocation76_spill] sm:$0xff]  ;;  %v10615_v30 = vld [vmem:[#allocation77_spill] sm:$0xff] }
 0x791   :  { %4959 = vmatprep.subr.bf16.mxu0 %v10605_v58  ;;  %v10616_v58 = vld [vmem:[#allocation79_spill] sm:$0xff] }
 0x793   :  { %4927 = vmatpush1.bf16.msra.mxu1 %v10606_v26  ;;  %v10617_v26 = vld [vmem:[#allocation78_spill] sm:$0xff] }
 0x794   :  { %4960 = vmatpush1.bf16.msra.mxu0 %v10607_v55  ;;  %4928 = vmatprep.subr.bf16.mxu1 %v10608_v45  ;;  %v10618_v55 = vld [vmem:[#allocation80_spill] sm:$0xff]  ;;  %v10619_v45 = vld [vmem:[#allocation81_spill] sm:$0xff] }
 0x795   :  { %4961 = vmatprep.subr.bf16.mxu0 %v10609_v37  ;;  %v10620_v37 = vld [vmem:[#allocation83_spill] sm:$0xff] }
 0x797   :  { %4929 = vmatpush1.bf16.msra.mxu1 %v10610_v63  ;;  %v10621_v63 = vld [vmem:[#allocation82_spill] sm:$0xff] }
 0x798   :  { %4962 = vmatpush1.bf16.msra.mxu0 %v10611_v53  ;;  %4930 = vmatprep.subr.bf16.mxu1 %v10612_v19  ;;  %v10622_v53 = vld [vmem:[#allocation84_spill] sm:$0xff]  ;;  %v10623_v19 = vld [vmem:[#allocation85_spill] sm:$0xff] }
 0x799   :  { %4963 = vmatprep.subr.bf16.mxu0 %v10613_v60  ;;  %v10624_v60 = vld [vmem:[#allocation87_spill] sm:$0xff] }
 0x79b   :  { %4931 = vmatpush1.bf16.msra.mxu1 %v10614_v1  ;;  %v10625_v1 = vld [vmem:[#allocation86_spill] sm:$0xff] }
 0x79c   :  { %4964 = vmatpush1.bf16.msra.mxu0 %v10615_v30  ;;  %4982 = vmatprep.subr.bf16.mxu1 %v10616_v58 }
 0x79d   :  { %4965 = vmatprep.subr.bf16.mxu0 %v10617_v26 }
 0x7a0   :  { %4966 = vmatpush1.bf16.msra.mxu0 %v10618_v55 }
 0x7a1   :  { %4967 = vmatprep.subr.bf16.mxu0 %v10619_v45 }
 0x7a4   :  { %4968 = vmatpush1.bf16.msra.mxu0 %v10620_v37 }
 0x7a5   :  { %4969 = vmatprep.subr.bf16.mxu0 %v10621_v63 }
 0x7a8   :  { %4970 = vmatpush1.bf16.msra.mxu0 %v10622_v53 }
 0x7a9   :  { %4971 = vmatprep.subr.bf16.mxu0 %v10623_v19 }
 0x7ac   :  { %4972 = vmatpush1.bf16.msra.mxu0 %v10624_v60 }
 0x7ad   :  { %5132 = vmatprep.subr.bf16.mxu0 %v10625_v1 }
 0x7b1   :  { %v4467_v30 = vpop.f32.mrb[48].mxu1  ;;  %v4508_v58 = vpop.f32.mrb[48].mxu0 }
 0x7b2   :  { %v4468_v26 = vadd.f32 %v4467_v30, %v10626_v54  ;;  %v4509_v55 = vadd.f32 %v4508_v58, %v10627_v18  ;;  %v4469_v2 = vpop.f32.mrb[49].mxu1  ;;  %v4510_v45 = vpop.f32.mrb[49].mxu0 }
 0x7b3   :  { %v4470_v37 = vadd.f32 %v4469_v2, %v10628_v11  ;;  %v4511_v63 = vadd.f32 %v4510_v45, %v8623_v16  ;;  %v4471_v21 = vpop.f32.mrb[50].mxu1  ;;  %v4512_v53 = vpop.f32.mrb[50].mxu0 }
 0x7b4   :  { %v4472_v39 = vpop.f32.mrb[51].mxu1  ;;  %v4513_v19 = vpop.f32.mrb[51].mxu0 }
 0x7b5   :  { %v4558_v28 = vcombine.low %v4468_v26, %v4470_v37  ;;  %v4579_v60 = vcombine.low %v4509_v55, %v4511_v63 }
 0x7b7   :  { %v4580_v29 = vrot.slane %v4579_v60, 6  ;;  %v4581_v1 = vrot.slane %v4579_v60, 7  ;;  %v4559_v21 = vrot.slane %v4558_v28, 6  ;;  %v4560_v39 = vrot.slane %v4558_v28, 7 }
 0x7b9   :  { %v4584_v13 = vadd.f32 %v4580_v29, %v10303_v4  ;;  %v4585_v30 = vadd.f32 %v4581_v1, %v10304_v50  ;;  %v4563_v26 = vadd.f32 %v4559_v21, %v8385_v48  ;;  %v4564_v55 = vadd.f32 %v4560_v39, %v8387_v56 }
 0x7ba   :  { %v4615_v29 = vrot.slane %v9102_v57, 7 }
 0x7bb   :  { %v6166_v54 = vmul.f32 -1.442695, %v4584_v13  ;;  %v6167_v58 = vmul.f32 -1.442695, %v4585_v30  ;;  %v4616_v13 = vrot.slane %v9100_v7, 7 }
 0x7bc   :  { %v6164_v53 = vmul.f32 -1.442695, %v4563_v26  ;;  %v6165_v60 = vmul.f32 -1.442695, %v4564_v55 }
 0x7bd   :  { %7087 = vpow2.f32 %v6166_v54 }
 0x7be   :  { %7089 = vpow2.f32 %v6167_v58 }
 0x7c7   :  { %v7088_v18 = vpop.eup %7087 }
 0x7c8   :  { %v7090_v2 = vpop.eup %7089  ;;  %v4592_v11 = vadd.f32 1.0, %v7088_v18 }
 0x7c9   :  { %v4593_v45 = vadd.f32 1.0, %v7090_v2 }
 0x7ca   :  { %7091 = vrcp.f32 %v4592_v11 }
 0x7cb   :  { %7093 = vrcp.f32 %v4593_v45 }
 0x7cc   :  { %7095 = vpow2.f32 %v6164_v53 }
 0x7cd   :  { %7097 = vpow2.f32 %v6165_v60 }
 0x7d4   :  { %v7092_v37 = vpop.eup %7091 }
 0x7d5   :  { %v7094_v63 = vpop.eup %7093  ;;  %v4619_v54 = vmul.f32 %v7092_v37, %v4615_v29 }
 0x7d6   :  { %v4620_v19 = vmul.f32 %v7094_v63, %v4616_v13  ;;  %v7096_v11 = vpop.eup %7095 }
 0x7d7   :  { %v7098_v18 = vpop.eup %7097  ;;  %v4571_v1 = vadd.f32 1.0, %v7096_v11 }
 0x7d8   :  { %v4572_v28 = vadd.f32 1.0, %v7098_v18 }
 0x7d9   :  { %7099 = vrcp.f32 %v4571_v1 }
 0x7da   :  { %7101 = vrcp.f32 %v4572_v28 }
 0x7e3   :  { %v7100_v39 = vpop.eup %7099 }
 0x7e4   :  { %v7102_v29 = vpop.eup %7101 }
 0x7f1   :  { %v4549_v30 = vpop.f32.mrb[52].mxu1 }
 0x7f2   :  { %v4550_v58 = vadd.f32 %v4549_v30, %v8639_v8  ;;  %v4551_v57 = vpop.f32.mrb[53].mxu1 }
 0x7f3   :  { %v4552_v2 = vadd.f32 %v4551_v57, %v8646_v17  ;;  %v4553_v7 = vpop.f32.mrb[54].mxu1 }
 0x7f4   :  { %v4554_v45 = vpop.f32.mrb[55].mxu1  ;;  %v4611_v7 = vsub.f32 1.0, %v7092_v37 }
 0x7f5   :  { %v4600_v21 = vcombine.low %v4550_v58, %v4552_v2 }
 0x7f7   :  { %v4601_v26 = vrot.slane %v4600_v21, 6  ;;  %v4602_v55 = vrot.slane %v4600_v21, 7  ;;  %v4612_v21 = vsub.f32 1.0, %v7094_v63 }
 0x7f9   :  { %v4605_v13 = vmul.f32 %v7100_v39, %v4601_v26  ;;  %v4606_v53 = vmul.f32 %v7102_v29, %v4602_v55 }
 0x7fb   :  { %v4607_v60 = vadd.f32 %v4605_v13, %v8509_v12  ;;  %v4608_v11 = vadd.f32 %v4606_v53, %v8511_v49 }
 0x7fd   :  { %7103 = vtanh.f32 %v4607_v60 }
 0x7fe   :  { %7105 = vtanh.f32 %v4608_v11 }
 0x802   :  { %v4701_v18 = vpop.f32.mrb[52].mxu0 }
 0x803   :  { %v4702_v1 = vadd.f32 %v4701_v18, %v8643_v9  ;;  %v4703_v28 = vpop.f32.mrb[53].mxu0 }
 0x804   :  { %v4704_v30 = vadd.f32 %v4703_v28, %v8650_v52  ;;  %v4705_v57 = vpop.f32.mrb[54].mxu0 }
 0x805   :  { %v4706_v58 = vpop.f32.mrb[55].mxu0 }
 0x806   :  { %v4792_v2 = vcombine.low %v4702_v1, %v4704_v30 }
 0x807   :  { %v7104_v45 = vpop.eup %7103 }
 0x808   :  { %v7106_v39 = vpop.eup %7105  ;;  %v4613_v26 = vmul.f32 %v7104_v45, %v4611_v7 }
 0x809   :  { %v4614_v55 = vmul.f32 %v7106_v39, %v4612_v21 }
 0x80a   :  { %v9572_v29 = vadd.f32 %v4619_v54, %v4613_v26 }
 0x80b   :  { %v9574_v13 = vadd.f32 %v4620_v19, %v4614_v55 }
 0x80c   :  { %v4865_v53 = vrot.slane %v9572_v29, %v10522_v59  ;;  %v4861_v60 = vrot.slane %v9572_v29, %v10523_v33 }
 0x80d   :  { %v4873_v11 = vrot.slane %v9574_v13, %v10522_v59  ;;  %v4869_v37 = vrot.slane %v9574_v13, %v10523_v33  ;;  %v7359_v33 = vld [vmem:[#allocation10 + $0x10] ss:$24 sps:$4 sm:$0xff]  }
 0x80e   :  { %v4879_v63 = vpack.c.bf16 %v4865_v53, %v4865_v53  ;;  %v4878_v18 = vpack.c.bf16 %v4861_v60, %v4861_v60  ;;  %v7360_v53 = vld [vmem:[#allocation10 + $0x300] ss:$24 sps:$4 sm:$0xff]   ;;  %v7361_v60 = vld [vmem:[#allocation10 + $0x334] ss:$24 sps:$4 sm:$0xff]  }
 0x80f   :  { %v4881_v1 = vpack.c.bf16 %v4873_v11, %v4873_v11  ;;  %v4880_v28 = vpack.c.bf16 %v4869_v37, %v4869_v37  ;;  %v4793_v11 = vrot.slane %v4792_v2, 7  ;;  %v4797_v37 = vadd.f32 %v4792_v2, %v8515_v47  ;;  %v10638_v2 = vld [vmem:[#allocation22_spill] sm:$0xff] }
 0x810   :  { %v4887_v54 = vunpack.c.l.b16 %v4879_v63  ;;  %v4886_v30 = vunpack.c.l.b16 %v4878_v18 }
 0x811   :  { %v4889_v19 = vunpack.c.l.b16 %v4881_v1  ;;  %v4888_v57 = vunpack.c.l.b16 %v4880_v28  ;;  %v10639_v1 = vld [vmem:[#allocation24_spill] sm:$0xff] }
 0x812   :  { %v4893_v58 = vrot.slane %v4887_v54, 2  ;;  %v4890_v7 = vrot.slane %v4886_v30, 2  ;;  %v10640_v30 = vld [vmem:[#allocation97_spill] sm:$0xff] }
 0x813   :  { %v4894_v45 = vrot.slane %v4889_v19, 1  ;;  %v4891_v21 = vrot.slane %v4888_v57, 1  ;;  %v10641_v19 = vld [vmem:[#allocation99_spill] sm:$0xff] }
 0x815   :  { %v4895_v39 = vsel %vm933_vm2, %v4894_v45, %v4893_v58  ;;  %v4892_v26 = vsel %vm933_vm2, %v4891_v21, %v4890_v7  ;;  %v10642_v58 = vld [vmem:[#allocation98_spill] sm:$0xff]  ;;  %v10643_v21 = vld [vmem:[#allocation100_spill] sm:$0xff] }
 0x816   :  { %v4897_v59 = vpack.c.b16 %v4895_v39, %v4895_v39  ;;  %v9586_v55 = vpack.c.b16 %v4892_v26, %v4892_v26 }
 0x818   :  { %4932 = vmatprep.mubr.bf16.mxu1 %v4897_v59  ;;  %4973 = vmatprep.mubr.bf16.mxu0 %v4897_v59 }
 0x819   :  { %4933 = vmatmul.mubr.bf16.vlgmr.msra.gmra.mrb[60].mxu1 %v9586_v55  ;;  %4974 = vmatmul.mubr.bf16.vlgmr.msra.gmra.mrb[60].mxu0 %v9586_v55 }
 0x81a   :  { %4983 = vmatpush1.bf16.msra.mxu1 %v7359_v33  ;;  %5014 = vmatprep.mubr.bf16.mxu1 %v4897_v59 }
 0x81b   :  { %4984 = vmatprep.subr.bf16.mxu1 %v9119_v0  ;;  %5133 = vmatpush1.bf16.msra.mxu0 %v7360_v53  ;;  %v4796_v0 = vadd.f32 %v4793_v11, %v8513_v42  ;;  %v10644_v53 = vld [vmem:[#allocation101_spill] sm:$0xff] }
 0x81c   :  { %5134 = vmatprep.subr.bf16.mxu0 %v7361_v60  ;;  %v10645_v60 = vld [vmem:[#allocation157_spill] sm:$0xff] }
 0x81e   :  { %4985 = vmatpush1.bf16.msra.mxu1 %v9124_v51  ;;  %v6169_v51 = vmul.f32 -1.442695, %v4797_v37 }
 0x81f   :  { %4986 = vmatprep.subr.bf16.mxu1 %v9127_v32  ;;  %5135 = vmatpush1.bf16.msra.mxu0 %v9130_v6  ;;  %v6168_v32 = vmul.f32 -1.442695, %v4796_v0  ;;  %v10629_v6 = vld [vmem:[#allocation88_spill] sm:$0xff] }
 0x820   :  { %5136 = vmatprep.subr.bf16.mxu0 %v9133_v25  ;;  %7107 = vpow2.f32 %v6169_v51  ;;  %v10630_v25 = vld [vmem:[#allocation89_spill] sm:$0xff] }
 0x821   :  { %7109 = vpow2.f32 %v6168_v32  ;;  %v7362_v0 = vld [vmem:[#allocation10 + $0x190] ss:$24 sps:$4 sm:$0xff]  }
 0x822   :  { %4987 = vmatpush1.bf16.msra.mxu1 %v9136_v43  ;;  %v10631_v43 = vld [vmem:[#allocation91_spill] sm:$0xff] }
 0x823   :  { %4988 = vmatprep.subr.bf16.mxu1 %v9140_v5  ;;  %5137 = vmatpush1.bf16.msra.mxu0 %v9143_v62  ;;  %v10632_v5 = vld [vmem:[#allocation90_spill] sm:$0xff]  ;;  %v10633_v62 = vld [vmem:[#allocation92_spill] sm:$0xff] }
 0x824   :  { %5138 = vmatprep.subr.bf16.mxu0 %v9147_v15  ;;  %v10634_v15 = vld [vmem:[#allocation93_spill] sm:$0xff] }
 0x826   :  { %4989 = vmatpush1.bf16.msra.mxu1 %v9150_v35  ;;  %v10635_v35 = vld [vmem:[#allocation95_spill] sm:$0xff] }
 0x827   :  { %4990 = vmatprep.subr.bf16.mxu1 %v9153_v36  ;;  %5139 = vmatpush1.bf16.msra.mxu0 %v9156_v34  ;;  %v10636_v36 = vld [vmem:[#allocation94_spill] sm:$0xff] }
 0x828   :  { %5140 = vmatprep.subr.bf16.mxu0 %v9159_v46  ;;  %v10637_v46 = vld [vmem:[#allocation96_spill] sm:$0xff] }
 0x82a   :  { %4991 = vmatpush1.bf16.msra.mxu1 %v10629_v6  ;;  %v7108_v7 = vpop.eup %7107  ;;  %v10646_v6 = vld [vmem:[#allocation103_spill] sm:$0xff] }
 0x82b   :  { %4992 = vmatprep.subr.bf16.mxu1 %v10630_v25  ;;  %5141 = vmatpush1.bf16.msra.mxu0 %v10631_v43  ;;  %v7110_v59 = vpop.eup %7109  ;;  %v4805_v33 = vadd.f32 1.0, %v7108_v7  ;;  %v7363_v25 = vld [vmem:[#allocation10 + $0x480] ss:$24 sps:$4 sm:$0xff]  }
 0x82c   :  { %5142 = vmatprep.subr.bf16.mxu0 %v10632_v5  ;;  %v4804_v51 = vadd.f32 1.0, %v7110_v59  ;;  %v10647_v43 = vld [vmem:[#allocation102_spill] sm:$0xff]  ;;  %v7366_v5 = vld [vmem:[#allocation10 + $0x4b0] ss:$24 sps:$4 sm:$0xff]  }
 0x82d   :  { %v10655_v59 = vld [vmem:[#allocation109_spill] sm:$0xff] }
 0x82e   :  { %4993 = vmatpush1.bf16.msra.mxu1 %v10633_v62  ;;  %v7367_v62 = vld [vmem:[#allocation10 + $0x4e4] ss:$24 sps:$4 sm:$0xff]  }
 0x82f   :  { %4994 = vmatprep.subr.bf16.mxu1 %v10634_v15  ;;  %5143 = vmatpush1.bf16.msra.mxu0 %v10635_v35  ;;  %v10648_v35 = vld [vmem:[#allocation104_spill] sm:$0xff] }
 0x830   :  { %5144 = vmatprep.subr.bf16.mxu0 %v10636_v36  ;;  %v10649_v36 = vld [vmem:[#allocation23_spill] sm:$0xff] }
 0x831   :  { %v4742_v34 = vpop.f32.mrb[56].mxu1 }
 0x832   :  { %4995 = vmatpush1.bf16.msra.mxu1 %v10637_v46  ;;  %v4743_v63 = vadd.f32 %v4742_v34, %v10638_v2  ;;  %v4744_v18 = vpop.f32.mrb[57].mxu1 }
 0x833   :  { %v4745_v28 = vadd.f32 %v4744_v18, %v10639_v1  ;;  %v4746_v54 = vpop.f32.mrb[58].mxu1  ;;  %4996 = vmatprep.subr.bf16.mxu1 %v10640_v30  ;;  %5145 = vmatpush1.bf16.msra.mxu0 %v10641_v19  ;;  %v10651_v18 = vld [vmem:[#allocation106_spill] sm:$0xff]  ;;  %v10653_v19 = vld [vmem:[#allocation107_spill] sm:$0xff] }
 0x834   :  { %v4747_v57 = vpop.f32.mrb[59].mxu1  ;;  %5146 = vmatprep.subr.bf16.mxu0 %v10642_v58 }
 0x835   :  { %v4812_v45 = vcombine.low %v4743_v63, %v4745_v28  ;;  %v10650_v63 = vld [vmem:[#allocation105_spill] sm:$0xff] }
 0x836   :  { %4997 = vmatpush1.bf16.msra.mxu1 %v10643_v21  ;;  %v10652_v28 = vld [vmem:[#allocation25_spill] sm:$0xff] }
 0x837   :  { %v4813_v39 = vrot.slane %v4812_v45, 7  ;;  %v4817_v26 = vadd.f32 %v4812_v45, %v8564_v23  ;;  %4998 = vmatprep.subr.bf16.mxu1 %v9203_v14  ;;  %5147 = vmatpush1.bf16.msra.mxu0 %v9206_v38  ;;  %v7364_v14 = vld [vmem:[#allocation10 + $0x4b4] ss:$24 sps:$4 sm:$0xff]   ;;  %v7365_v38 = vld [vmem:[#allocation10 + $0x1c0] ss:$24 sps:$4 sm:$0xff]  }
 0x838   :  { %5148 = vmatprep.subr.bf16.mxu0 %v10644_v53 }
 0x839   :  { %v4816_v11 = vadd.f32 %v4813_v39, %v10645_v60  ;;  %v6171_v37 = vmul.f32 -1.442695, %v4817_v26  ;;  %v10654_v39 = vld [vmem:[#allocation108_spill] sm:$0xff] }
 0x83a   :  { %4999 = vmatpush1.bf16.msra.mxu1 %v7362_v0  ;;  %v10657_v0 = vld [vmem:[#allocation111_spill] sm:$0xff] }
 0x83b   :  { %v6170_v32 = vmul.f32 -1.442695, %v4816_v11  ;;  %7111 = vpow2.f32 %v6171_v37  ;;  %5000 = vmatprep.subr.bf16.mxu1 %v10646_v6  ;;  %5149 = vmatpush1.bf16.msra.mxu0 %v7363_v25  ;;  %v10658_v6 = vld [vmem:[#allocation159_spill] sm:$0xff] }
 0x83c   :  { %7113 = vrcp.f32 %v4805_v33  ;;  %5150 = vmatprep.subr.bf16.mxu0 %v7364_v14  ;;  %v10656_v33 = vld [vmem:[#allocation110_spill] sm:$0xff]  ;;  %v10659_v14 = vld [vmem:[#allocation112_spill] sm:$0xff] }
 0x83d   :  { %7115 = vpow2.f32 %v6170_v32 }
 0x83e   :  { %5001 = vmatpush1.bf16.msra.mxu1 %v7365_v38  ;;  %7117 = vrcp.f32 %v4804_v51  ;;  %v10660_v38 = vld [vmem:[#allocation113_spill] sm:$0xff] }
 0x83f   :  { %5002 = vmatprep.subr.bf16.mxu1 %v10647_v43  ;;  %5151 = vmatpush1.bf16.msra.mxu0 %v7366_v5  ;;  %v10661_v43 = vld [vmem:[#allocation118_spill] sm:$0xff] }
 0x840   :  { %5152 = vmatprep.subr.bf16.mxu0 %v7367_v62  ;;  %v10662_v5 = vld [vmem:[#allocation158_spill] sm:$0xff] }
 0x842   :  { %v4783_v15 = vpop.f32.mrb[56].mxu0  ;;  %5003 = vmatpush1.bf16.msra.mxu1 %v10648_v35  ;;  %v10664_v35 = vld [vmem:[#allocation121_spill] sm:$0xff] }
 0x843   :  { %v4784_v34 = vadd.f32 %v4783_v15, %v10649_v36  ;;  %v4785_v46 = vpop.f32.mrb[57].mxu0  ;;  %5004 = vmatprep.subr.bf16.mxu1 %v10650_v63  ;;  %5153 = vmatpush1.bf16.msra.mxu0 %v10651_v18  ;;  %v10663_v15 = vld [vmem:[#allocation119_spill] sm:$0xff]  ;;  %v10667_v63 = vld [vmem:[#allocation129_spill] sm:$0xff]  ;;  %v10668_v18 = vld [vmem:[#allocation130_spill] sm:$0xff] }
 0x844   :  { %v4786_v54 = vadd.f32 %v4785_v46, %v10652_v28  ;;  %v4787_v30 = vpop.f32.mrb[58].mxu0  ;;  %5154 = vmatprep.subr.bf16.mxu0 %v10653_v19  ;;  %v10666_v46 = vld [vmem:[#allocation125_spill] sm:$0xff]  ;;  %v10669_v19 = vld [vmem:[#allocation131_spill] sm:$0xff] }
 0x845   :  { %v7112_v57 = vpop.eup %7111  ;;  %v4788_v58 = vpop.f32.mrb[59].mxu0 }
 0x846   :  { %v7114_v7 = vpop.eup %7113  ;;  %v4825_v45 = vadd.f32 1.0, %v7112_v57  ;;  %v4832_v21 = vcombine.low %v4784_v34, %v4786_v54  ;;  %5005 = vmatpush1.bf16.msra.mxu1 %v10654_v39  ;;  %v10665_v34 = vld [vmem:[#allocation123_spill] sm:$0xff]  ;;  %v6173_v54 = vrot.slane %v10668_v18, 9  ;;  %v10670_v57 = vld [vmem:[#allocation133_spill] sm:$0xff] }
 0x847   :  { %v7116_v26 = vpop.eup %7115  ;;  %5006 = vmatprep.subr.bf16.mxu1 %v10655_v59  ;;  %5155 = vmatpush1.bf16.msra.mxu0 %v10656_v33  ;;  %v10671_v58 = vld [vmem:[#allocation135_spill] sm:$0xff]  ;;  %v10673_v59 = vld [vmem:[#allocation120_spill] sm:$0xff] }
 0x848   :  { %v4824_v53 = vadd.f32 1.0, %v7116_v26  ;;  %7119 = vrcp.f32 %v4825_v45  ;;  %v4833_v11 = vrot.slane %v4832_v21, 7  ;;  %v4837_v37 = vmul.f32 %v7114_v7, %v4832_v21  ;;  %5156 = vmatprep.subr.bf16.mxu0 %v10657_v0  ;;  %v7118_v51 = vpop.eup %7117  ;;  %v10672_v45 = vld [vmem:[#allocation143_spill] sm:$0xff]  ;;  %v10675_v0 = vld [vmem:[#allocation122_spill] sm:$0xff] }
 0x849   :  { %v6172_v21 = vrot.slane %v10672_v45, 9 }
 0x84a   :  { %7121 = vrcp.f32 %v4824_v53  ;;  %v4836_v32 = vmul.f32 %v7118_v51, %v4833_v11  ;;  %v4839_v25 = vadd.f32 %v4837_v37, %v10658_v6  ;;  %5007 = vmatpush1.bf16.msra.mxu1 %v10659_v14  ;;  %v10674_v37 = vld [vmem:[#allocation137_spill] sm:$0xff]  ;;  %v10676_v51 = vld [vmem:[#allocation139_spill] sm:$0xff]  ;;  %v10677_v14 = vld [vmem:[#allocation124_spill] sm:$0xff] }
 0x84b   :  { %5008 = vmatprep.subr.bf16.mxu1 %v10660_v38  ;;  %5157 = vmatpush1.bf16.msra.mxu0 %v10661_v43 }
 0x84c   :  { %v4838_v62 = vadd.f32 %v4836_v32, %v10662_v5  ;;  %7123 = vtanh.f32 %v4839_v25  ;;  %5158 = vmatprep.subr.bf16.mxu0 %v10663_v15  ;;  %v10679_v15 = vld [vmem:[#allocation126_spill] sm:$0xff] }
 0x84e   :  { %7125 = vtanh.f32 %v4838_v62  ;;  %5009 = vmatpush1.bf16.msra.mxu1 %v10664_v35  ;;  %v10678_v62 = vld [vmem:[#allocation141_spill] sm:$0xff] }
 0x84f   :  { %5010 = vmatprep.subr.bf16.mxu1 %v10665_v34  ;;  %5159 = vmatpush1.bf16.msra.mxu0 %v10666_v46  ;;  %v10680_v34 = vld [vmem:[#allocation153_spill] sm:$0xff] }
 0x850   :  { %5160 = vmatprep.subr.bf16.mxu0 %v10667_v63  ;;  %v10681_v63 = vld [vmem:[#allocation116_spill] sm:$0xff] }
 0x852   :  { %v7120_v30 = vpop.eup %7119  ;;  %5011 = vmatpush1.bf16.msra.mxu1 %v10669_v19  ;;  %v10683_v19 = vld [vmem:[#allocation132_spill] sm:$0xff] }
 0x853   :  { %5012 = vmatprep.subr.bf16.mxu1 %v10670_v57  ;;  %5161 = vmatpush1.bf16.msra.mxu0 %v10671_v58  ;;  %v4843_v7 = vsub.f32 1.0, %v7120_v30  ;;  %v4853_v39 = vmul.f32 %v7120_v30, %v6173_v54  ;;  %v10682_v30 = vld [vmem:[#allocation145_spill] sm:$0xff] }
 0x854   :  { %v7122_v26 = vpop.eup %7121  ;;  %5162 = vmatprep.subr.bf16.mxu0 %v10673_v59 }
 0x855   :  { %v4842_v33 = vsub.f32 1.0, %v7122_v26  ;;  %v4852_v53 = vmul.f32 %v7122_v26, %v6172_v21 }
 0x856   :  { %v7124_v11 = vpop.eup %7123  ;;  %5013 = vmatpush1.bf16.msra.mxu1 %v10674_v37 }
 0x857   :  { %5173 = vmatprep.subr.bf16.mxu1 %v10675_v0  ;;  %5163 = vmatpush1.bf16.msra.mxu0 %v10676_v51  ;;  %v4845_v32 = vmul.f32 %v7124_v11, %v4843_v7 }
 0x858   :  { %v7126_v25 = vpop.eup %7125  ;;  %5214 = vmatprep.subr.bf16.mxu0 %v10677_v14  ;;  %v10684_v14 = vld [vmem:[#allocation147_spill] sm:$0xff] }
 0x859   :  { %5015 = vmatmul.mubr.bf16.vlgmr.msra.gmra.mrb[64].mxu1 %v9586_v55  ;;  %v4844_v38 = vmul.f32 %v7126_v25, %v4842_v33  ;;  %v9658_v43 = vadd.f32 %v4853_v39, %v4845_v32  ;;  %v7370_v32 = vld [vmem:[#allocation10 + $0x340] ss:$24 sps:$4 sm:$0xff]   ;;  %v7373_v25 = vld [vmem:[#allocation10 + $0x3a4] ss:$24 sps:$4 sm:$0xff]  }
 0x85a   :  { %5174 = vmatpush1.bf16.msra.mxu1 %v10678_v62  ;;  %v10686_v62 = vld [vmem:[#allocation151_spill] sm:$0xff] }
 0x85b   :  { %5175 = vmatprep.subr.bf16.mxu1 %v10679_v15  ;;  %v9662_v35 = vadd.f32 %v4852_v53, %v4844_v38  ;;  %v5107_v46 = vrot.slane %v9658_v43, %v10680_v34  ;;  %v5103_v18 = vrot.slane %v9658_v43, %v10681_v63  ;;  %v10685_v38 = vld [vmem:[#allocation134_spill] sm:$0xff]  ;;  %v10688_v15 = vld [vmem:[#allocation136_spill] sm:$0xff] }
 0x85d   :  { %v5099_v54 = vrot.slane %v9662_v35, %v10680_v34  ;;  %v5095_v55 = vrot.slane %v9662_v35, %v10681_v63  ;;  %v5115_v58 = vpack.c.bf16 %v5107_v46, %v5107_v46  ;;  %v5114_v45 = vpack.c.bf16 %v5103_v18, %v5103_v18  ;;  %v10690_v34 = vld [vmem:[#allocation138_spill] sm:$0xff]  ;;  %v10693_v63 = vld [vmem:[#allocation148_spill] sm:$0xff] }
 0x85e   :  { %5176 = vmatpush1.bf16.msra.mxu1 %v10682_v30  ;;  %v10692_v46 = vld [vmem:[#allocation142_spill] sm:$0xff] }
 0x85f   :  { %5177 = vmatprep.subr.bf16.mxu1 %v10683_v19  ;;  %v5113_v57 = vpack.c.bf16 %v5099_v54, %v5099_v54  ;;  %v5112_v7 = vpack.c.bf16 %v5095_v55, %v5095_v55  ;;  %v5123_v26 = vunpack.c.l.b16 %v5115_v58  ;;  %v5122_v33 = vunpack.c.l.b16 %v5114_v45  ;;  %v10694_v18 = vld [vmem:[#allocation146_spill] sm:$0xff]  ;;  %v10695_v54 = vld [vmem:[#allocation156_spill] sm:$0xff]  ;;  %v10700_v58 = vld [vmem:[#allocation115_spill] sm:$0xff] }
 0x860   :  { %v10696_v55 = vld [vmem:[#allocation152_spill] sm:$0xff]  ;;  %v10697_v30 = vld [vmem:[#allocation150_spill] sm:$0xff] }
 0x861   :  { %v5121_v21 = vunpack.c.l.b16 %v5113_v57  ;;  %v5120_v39 = vunpack.c.l.b16 %v5112_v7  ;;  %v10698_v19 = vld [vmem:[#allocation26_spill] sm:$0xff]  ;;  %v10699_v57 = vld [vmem:[#allocation27_spill] sm:$0xff]  ;;  %v10701_v7 = vld [vmem:[#allocation160_spill] sm:$0xff] }
 0x862   :  { %5178 = vmatpush1.bf16.msra.mxu1 %v9329_v20  ;;  %v7369_v20 = vld [vmem:[#allocation10 + $0x344] ss:$24 sps:$4 sm:$0xff]   ;;  %v10702_v45 = vld [vmem:[#allocation28_spill] sm:$0xff] }
 0x863   :  { %5179 = vmatprep.subr.bf16.mxu1 %v9332_v40  ;;  %v5126_v59 = vrot.slane %v5121_v21, 1  ;;  %v5124_v53 = vrot.slane %v5120_v39, 1  ;;  %v7368_v40 = vld [vmem:[#allocation10 + $0x310] ss:$24 sps:$4 sm:$0xff]   ;;  %v10703_v21 = vld [vmem:[#allocation162_spill] sm:$0xff] }
 0x864   :  { %v10704_v39 = vld [vmem:[#allocation161_spill] sm:$0xff] }
 0x865   :  { %v5127_v11 = vsel %vm933_vm2, %v5123_v26, %v5126_v59  ;;  %v5125_v37 = vsel %vm933_vm2, %v5122_v33, %v5124_v53  ;;  %v10705_v26 = vld [vmem:[#allocation164_spill] sm:$0xff]  ;;  %v10706_v59 = vld [vmem:[#allocation163_spill] sm:$0xff]  ;;  %v10707_v33 = vld [vmem:[#allocation166_spill] sm:$0xff] }
 0x866   :  { %5180 = vmatpush1.bf16.msra.mxu1 %v9335_v31  ;;  %v5129_v0 = vpack.c.b16 %v5127_v11, %v5127_v11  ;;  %v9679_v51 = vpack.c.b16 %v5125_v37, %v5125_v37  ;;  %v7371_v31 = vld [vmem:[#allocation10 + $0x374] ss:$24 sps:$4 sm:$0xff]   ;;  %v10710_v37 = vld [vmem:[#allocation167_spill] sm:$0xff] }
 0x867   :  { %5181 = vmatprep.subr.bf16.mxu1 %v9342_v3  ;;  %v7372_v3 = vld [vmem:[#allocation10 + $0x370] ss:$24 sps:$4 sm:$0xff]  }
 0x868   :  { %5164 = vmatprep.mubr.bf16.mxu0 %v5129_v0  ;;  %5205 = vmatprep.mubr.bf16.mxu1 %v5129_v0  ;;  %v10708_v53 = vld [vmem:[#allocation165_spill] sm:$0xff]  ;;  %v10709_v11 = vld [vmem:[#allocation168_spill] sm:$0xff] }
 0x869   :  { %5165 = vmatmul.mubr.bf16.vlgmr.msra.gmra.mrb[64].mxu0 %v9679_v51 }
 0x86a   :  { %5215 = vmatpush1.bf16.msra.mxu0 %v7368_v40  ;;  %5182 = vmatpush1.bf16.msra.mxu1 %v9346_v61  ;;  %v7374_v61 = vld [vmem:[#allocation10 + $0x3a0] ss:$24 sps:$4 sm:$0xff]  }
 0x86b   :  { %5246 = vmatprep.mubr.bf16.mxu0 %v5129_v0  ;;  %5216 = vmatprep.subr.bf16.mxu0 %v7369_v20  ;;  %v10711_v0 = vld [vmem:[#allocation170_spill] sm:$0xff]  ;;  %v10712_v40 = vld [vmem:[#allocation169_spill] sm:$0xff]  ;;  %v10713_v20 = vld [vmem:[#allocation171_spill] sm:$0xff] }
 0x86c   :  { %5183 = vmatprep.subr.bf16.mxu1 %v9351_v22  ;;  %v7375_v22 = vld [vmem:[#allocation10 + $0x3d4] ss:$24 sps:$4 sm:$0xff]  }
 0x86e   :  { %5217 = vmatpush1.bf16.msra.mxu0 %v7370_v32  ;;  %5184 = vmatpush1.bf16.msra.mxu1 %v9354_v41  ;;  %v7376_v41 = vld [vmem:[#allocation10 + $0x3d0] ss:$24 sps:$4 sm:$0xff]  }
 0x86f   :  { %5218 = vmatprep.subr.bf16.mxu0 %v7371_v31  ;;  %5185 = vmatprep.subr.bf16.mxu1 %v9358_v44  ;;  %v7377_v44 = vld [vmem:[#allocation10 + $0x404] ss:$24 sps:$4 sm:$0xff]   ;;  %v10714_v32 = vld [vmem:[#allocation172_spill] sm:$0xff]  ;;  %v10715_v31 = vld [vmem:[#allocation173_spill] sm:$0xff] }
 0x872   :  { %5219 = vmatpush1.bf16.msra.mxu0 %v7372_v3  ;;  %5186 = vmatpush1.bf16.msra.mxu1 %v9362_v27  ;;  %v10687_v27 = vld [vmem:[#allocation155_spill] sm:$0xff]  ;;  %v10716_v3 = vld [vmem:[#allocation174_spill] sm:$0xff] }
 0x873   :  { %5220 = vmatprep.subr.bf16.mxu0 %v7373_v25  ;;  %5187 = vmatprep.subr.bf16.mxu1 %v9366_v24  ;;  %v10689_v24 = vld [vmem:[#allocation140_spill] sm:$0xff]  ;;  %v10717_v25 = vld [vmem:[#allocation175_spill] sm:$0xff] }
 0x876   :  { %5221 = vmatpush1.bf16.msra.mxu0 %v7374_v61  ;;  %5188 = vmatpush1.bf16.msra.mxu1 %v9370_v10  ;;  %v10691_v10 = vld [vmem:[#allocation144_spill] sm:$0xff]  ;;  %v10718_v61 = vld [vmem:[#allocation29_spill] sm:$0xff] }
 0x877   :  { %5222 = vmatprep.subr.bf16.mxu0 %v7375_v22  ;;  %5189 = vmatprep.subr.bf16.mxu1 %v10684_v14  ;;  %v10719_v22 = vld [vmem:[#allocation30_spill] sm:$0xff]  ;;  %v10720_v14 = vld [vmem:[#allocation31_spill] sm:$0xff] }
 0x87a   :  { %5223 = vmatpush1.bf16.msra.mxu0 %v7376_v41  ;;  %5190 = vmatpush1.bf16.msra.mxu1 %v10685_v38  ;;  %v6971_v41 = vld [vmem:[#allocation11 + $0x40] sm:$0xff]  }
 0x87b   :  { %5224 = vmatprep.subr.bf16.mxu0 %v7377_v44  ;;  %5191 = vmatprep.subr.bf16.mxu1 %v10686_v62  ;;  %v6972_v38 = vld [vmem:[#allocation11] sm:$0xff]   ;;  %v6973_v44 = vld [vmem:[#allocation11 + $0x48] sm:$0xff]  }
 0x87c   :  { %v6974_v62 = vld [vmem:[#allocation11 + $0x8] sm:$0xff]  }
 0x87e   :  { %5225 = vmatpush1.bf16.msra.mxu0 %v10687_v27  ;;  %5192 = vmatpush1.bf16.msra.mxu1 %v10688_v15  ;;  %v6975_v27 = vld [vmem:[#allocation11 + $0x50] sm:$0xff]  }
 0x87f   :  { %5226 = vmatprep.subr.bf16.mxu0 %v10689_v24  ;;  %5193 = vmatprep.subr.bf16.mxu1 %v10690_v34  ;;  %v6976_v15 = vld [vmem:[#allocation11 + $0x10] sm:$0xff]   ;;  %v6977_v24 = vld [vmem:[#allocation11 + $0x58] sm:$0xff]  }
 0x880   :  { %v6978_v34 = vld [vmem:[#allocation11 + $0x18] sm:$0xff]  }
 0x882   :  { %5227 = vmatpush1.bf16.msra.mxu0 %v10691_v10  ;;  %5194 = vmatpush1.bf16.msra.mxu1 %v10692_v46  ;;  %v6979_v10 = vld [vmem:[#allocation11 + $0x60] sm:$0xff]  }
 0x883   :  { %5228 = vmatprep.subr.bf16.mxu0 %v10693_v63  ;;  %5195 = vmatprep.subr.bf16.mxu1 %v10694_v18  ;;  %v6980_v46 = vld [vmem:[#allocation11 + $0x20] sm:$0xff]   ;;  %v6982_v63 = vld [vmem:[#allocation11 + $0x28] sm:$0xff]   ;;  %v6983_v18 = vld [vmem:[#allocation11 + $0x70] sm:$0xff]  }
 0x886   :  { %5229 = vmatpush1.bf16.msra.mxu0 %v10695_v54  ;;  %5196 = vmatpush1.bf16.msra.mxu1 %v10696_v55  ;;  %v6984_v54 = vld [vmem:[#allocation11 + $0x30] sm:$0xff]   ;;  %v6985_v55 = vld [vmem:[#allocation11 + $0x78] sm:$0xff]  }
 0x887   :  { %5230 = vmatprep.subr.bf16.mxu0 %v10697_v30  ;;  %5197 = vmatprep.subr.bf16.mxu1 %v10698_v19  ;;  %v6986_v30 = vld [vmem:[#allocation11 + $0x38] sm:$0xff]  }
 0x88a   :  { %5231 = vmatpush1.bf16.msra.mxu0 %v10699_v57  ;;  %5198 = vmatpush1.bf16.msra.mxu1 %v10700_v58  ;;  %v10721_v58 = vld [vmem:[#allocation19_spill] sm:$0xff] }
 0x88b   :  { %5232 = vmatprep.subr.bf16.mxu0 %v10701_v7  ;;  %5199 = vmatprep.subr.bf16.mxu1 %v10702_v45  ;;  %v10722_v45 = vld [vmem:[#allocation20_spill] sm:$0xff] }
 0x88e   :  { %5233 = vmatpush1.bf16.msra.mxu0 %v10703_v21  ;;  %5200 = vmatpush1.bf16.msra.mxu1 %v10704_v39 }
 0x88f   :  { %5234 = vmatprep.subr.bf16.mxu0 %v10705_v26  ;;  %5201 = vmatprep.subr.bf16.mxu1 %v10706_v59  ;;  %v10723_v59 = vld [vmem:[#allocation21_spill] sm:$0xff] }
 0x892   :  { %5235 = vmatpush1.bf16.msra.mxu0 %v10707_v33  ;;  %5202 = vmatpush1.bf16.msra.mxu1 %v10708_v53 }
 0x893   :  { %5236 = vmatprep.subr.bf16.mxu0 %v10709_v11  ;;  %5203 = vmatprep.subr.bf16.mxu1 %v10710_v37 }
 0x896   :  { %5237 = vmatpush1.bf16.msra.mxu0 %v10711_v0  ;;  %5204 = vmatpush1.bf16.msra.mxu1 %v10712_v40 }
 0x897   :  { %5238 = vmatprep.subr.bf16.mxu0 %v10713_v20 }
 0x899   :  { %5206 = vmatmul.mubr.bf16.vlgmr.msra.gmra.mrb[68].mxu1 %v9679_v51 }
 0x89a   :  { %5239 = vmatpush1.bf16.msra.mxu0 %v10714_v32 }
 0x89b   :  { %5240 = vmatprep.subr.bf16.mxu0 %v10715_v31 }
 0x89e   :  { %5241 = vmatpush1.bf16.msra.mxu0 %v10716_v3 }
 0x89f   :  { %5242 = vmatprep.subr.bf16.mxu0 %v10717_v25 }
 0x8a2   :  { %5243 = vmatpush1.bf16.msra.mxu0 %v10718_v61 }
 0x8a3   :  { %5244 = vmatprep.subr.bf16.mxu0 %v10719_v22 }
 0x8a6   :  { %5245 = vmatpush1.bf16.msra.mxu0 %v10720_v14 }
 0x8a7   :  { %6336 = vmatprep.subr.bf16.mxu0 %v6971_v41  ;;  %v6987_v41 = vld [vmem:[#allocation11 + $0xc0] sm:$0xff]  }
 0x8a8   :  { %6314 = vmatprep.subr.bf16.mxu1 %v6987_v41 }
 0x8a9   :  { %5247 = vmatmul.mubr.bf16.vlgmr.msra.gmra.mrb[68].mxu0 %v9679_v51  ;;  %v6981_v51 = vld [vmem:[#allocation11 + $0x68] sm:$0xff]  }
 0x8aa   :  { %6337 = vmatpush3.bf16.msra.mxu0 %v6972_v38  ;;  %v6988_v38 = vld [vmem:[#allocation11 + $0x80] sm:$0xff]  }
 0x8ab   :  { %6338 = vmatprep.subr.bf16.mxu0 %v6973_v44  ;;  %6315 = vmatpush3.bf16.msra.mxu1 %v6988_v38 }
 0x8ae   :  { %6339 = vmatpush3.bf16.msra.mxu0 %v6974_v62 }
 0x8af   :  { %6340 = vmatprep.subr.bf16.mxu0 %v6975_v27 }
 0x8b2   :  { %6341 = vmatpush3.bf16.msra.mxu0 %v6976_v15  ;;  %v6989_v15 = vld [vmem:[#allocation11 + $0xc8] sm:$0xff]  }
 0x8b3   :  { %6342 = vmatprep.subr.bf16.mxu0 %v6977_v24  ;;  %v6990_v24 = vld [vmem:[#allocation11 + $0x88] sm:$0xff]   ;;  %6316 = vmatprep.subr.bf16.mxu1 %v6989_v15 }
 0x8b4   :  { %6317 = vmatpush3.bf16.msra.mxu1 %v6990_v24 }
 0x8b6   :  { %6343 = vmatpush3.bf16.msra.mxu0 %v6978_v34  ;;  %v6993_v34 = vld [vmem:[#allocation11 + $0xd8] sm:$0xff]  }
 0x8b7   :  { %6344 = vmatprep.subr.bf16.mxu0 %v6979_v10 }
 0x8ba   :  { %6345 = vmatpush3.bf16.msra.mxu0 %v6980_v46 }
 0x8bb   :  { %6346 = vmatprep.subr.bf16.mxu0 %v6981_v51  ;;  %v6994_v51 = vld [vmem:[#allocation11 + $0x98] sm:$0xff]  }
 0x8be   :  { %6347 = vmatpush3.bf16.msra.mxu0 %v6982_v63  ;;  %v6995_v63 = vld [vmem:[#allocation11 + $0xe0] sm:$0xff]  }
 0x8bf   :  { %6348 = vmatprep.subr.bf16.mxu0 %v6983_v18 }
 0x8c2   :  { %6349 = vmatpush3.bf16.msra.mxu0 %v6984_v54 }
 0x8c3   :  { %6350 = vmatprep.subr.bf16.mxu0 %v6985_v55  ;;  %v5082_v55 = vrot.slane %v9572_v29, 7  ;;  %v7001_v29 = vld [vmem:[#allocation11 + $0xf8] sm:$0xff]  }
 0x8c6   :  { %6351 = vmatpush3.bf16.msra.mxu0 %v6986_v30 }
 0x8ec   :  { %v4934_v19 = vpop.f32.mrb[60].mxu1  ;;  %v4975_v57 = vpop.f32.mrb[60].mxu0 }
 0x8ed   :  { %v4935_v7 = vadd.f32 %v4934_v19, %v10721_v58  ;;  %v4976_v21 = vadd.f32 %v4975_v57, %v10722_v45  ;;  %v4936_v39 = vpop.f32.mrb[61].mxu1  ;;  %v4977_v26 = vpop.f32.mrb[61].mxu0  ;;  %v5083_v19 = vrot.slane %v9574_v13, 7  ;;  %v6996_v57 = vld [vmem:[#allocation11 + $0xa0] sm:$0xff]   ;;  %v6997_v45 = vld [vmem:[#allocation11 + $0xe8] sm:$0xff]   ;;  %v7002_v13 = vld [vmem:[#allocation11 + $0xb8] sm:$0xff]  }
 0x8ee   :  { %v4937_v33 = vadd.f32 %v4936_v39, %v10723_v59  ;;  %v4978_v53 = vadd.f32 %v4977_v26, %v8623_v16  ;;  %v4938_v11 = vpop.f32.mrb[62].mxu1  ;;  %v4979_v37 = vpop.f32.mrb[62].mxu0  ;;  %v6998_v59 = vld [vmem:[#allocation11 + $0xa8] sm:$0xff]  }
 0x8ef   :  { %v4939_v0 = vpop.f32.mrb[63].mxu1  ;;  %v4980_v40 = vpop.f32.mrb[63].mxu0 }
 0x8f0   :  { %v5025_v20 = vcombine.low %v4935_v7, %v4937_v33  ;;  %v5046_v32 = vcombine.low %v4976_v21, %v4978_v53 }
 0x8f2   :  { %v5047_v31 = vrot.slane %v5046_v32, 5  ;;  %v5048_v3 = vrot.slane %v5046_v32, 6  ;;  %v5026_v10 = vrot.slane %v5025_v20, 5  ;;  %v5027_v46 = vrot.slane %v5025_v20, 6 }
 0x8f4   :  { %v5051_v25 = vadd.f32 %v5047_v31, %v10303_v4  ;;  %v5052_v61 = vadd.f32 %v5048_v3, %v10304_v50  ;;  %v6991_v4 = vld [vmem:[#allocation11 + $0xd0] sm:$0xff]   ;;  %v5030_v18 = vadd.f32 %v5026_v10, %v8385_v48  ;;  %v5031_v54 = vadd.f32 %v5027_v46, %v8387_v56 }
 0x8f5   :  { %v6992_v50 = vld [vmem:[#allocation11 + $0x90] sm:$0xff]   ;;  %6318 = vmatprep.subr.bf16.mxu1 %v6991_v4 }
 0x8f6   :  { %v6176_v22 = vmul.f32 -1.442695, %v5051_v25  ;;  %v6177_v14 = vmul.f32 -1.442695, %v5052_v61  ;;  %6319 = vmatpush3.bf16.msra.mxu1 %v6992_v50  ;;  %v6174_v21 = vmul.f32 -1.442695, %v5030_v18 }
 0x8f7   :  { %6320 = vmatprep.subr.bf16.mxu1 %v6993_v34  ;;  %v6175_v26 = vmul.f32 -1.442695, %v5031_v54  ;;  %v6999_v48 = vld [vmem:[#allocation11 + $0xf0] sm:$0xff]  }
 0x8f8   :  { %7127 = vpow2.f32 %v6176_v22  ;;  %v7000_v56 = vld [vmem:[#allocation11 + $0xb0] sm:$0xff]  }
 0x8f9   :  { %7129 = vpow2.f32 %v6177_v14 }
 0x8fa   :  { %6321 = vmatpush3.bf16.msra.mxu1 %v6994_v51 }
 0x8fb   :  { %6322 = vmatprep.subr.bf16.mxu1 %v6995_v63 }
 0x8fe   :  { %6323 = vmatpush3.bf16.msra.mxu1 %v6996_v57 }
 0x8ff   :  { %6324 = vmatprep.subr.bf16.mxu1 %v6997_v45 }
 0x902   :  { %v7128_v44 = vpop.eup %7127  ;;  %6325 = vmatpush3.bf16.msra.mxu1 %v6998_v59 }
 0x903   :  { %v7130_v16 = vpop.eup %7129  ;;  %v5059_v62 = vadd.f32 1.0, %v7128_v44  ;;  %6326 = vmatprep.subr.bf16.mxu1 %v6999_v48 }
 0x904   :  { %v5060_v27 = vadd.f32 1.0, %v7130_v16 }
 0x905   :  { %7131 = vrcp.f32 %v5059_v62 }
 0x906   :  { %7133 = vrcp.f32 %v5060_v27  ;;  %6327 = vmatpush3.bf16.msra.mxu1 %v7000_v56 }
 0x907   :  { %7135 = vpow2.f32 %v6174_v21  ;;  %6328 = vmatprep.subr.bf16.mxu1 %v7001_v29 }
 0x908   :  { %7137 = vpow2.f32 %v6175_v26 }
 0x90a   :  { %6329 = vmatpush3.bf16.msra.mxu1 %v7002_v13 }
 0x90f   :  { %v7132_v30 = vpop.eup %7131 }
 0x910   :  { %v7134_v58 = vpop.eup %7133  ;;  %v5086_v7 = vmul.f32 %v7132_v30, %v5082_v55  ;;  %v5078_v34 = vsub.f32 1.0, %v7132_v30 }
 0x911   :  { %v5087_v39 = vmul.f32 %v7134_v58, %v5083_v19  ;;  %v7136_v33 = vpop.eup %7135  ;;  %v5079_v46 = vsub.f32 1.0, %v7134_v58  ;;  %v10725_v19 = vld [vmem:[#allocation117_spill] sm:$0xff] }
 0x912   :  { %v7138_v53 = vpop.eup %7137  ;;  %v5038_v11 = vadd.f32 1.0, %v7136_v33 }
 0x913   :  { %v5039_v37 = vadd.f32 1.0, %v7138_v53 }
 0x914   :  { %7139 = vrcp.f32 %v5038_v11 }
 0x915   :  { %7141 = vrcp.f32 %v5039_v37 }
 0x91e   :  { %v7140_v61 = vpop.eup %7139 }
 0x91f   :  { %v7142_v41 = vpop.eup %7141 }
 0x92c   :  { %v5016_v0 = vpop.f32.mrb[64].mxu1 }
 0x92d   :  { %v5017_v40 = vadd.f32 %v5016_v0, %v8639_v8  ;;  %v5018_v20 = vpop.f32.mrb[65].mxu1 }
 0x92e   :  { %v5019_v32 = vadd.f32 %v5018_v20, %v8646_v17  ;;  %v5020_v31 = vpop.f32.mrb[66].mxu1 }
 0x92f   :  { %v5021_v3 = vpop.f32.mrb[67].mxu1 }
 0x930   :  { %v5067_v25 = vcombine.low %v5017_v40, %v5019_v32 }
 0x932   :  { %v5068_v22 = vrot.slane %v5067_v25, 5  ;;  %v5069_v14 = vrot.slane %v5067_v25, 6 }
 0x934   :  { %v5072_v38 = vmul.f32 %v7140_v61, %v5068_v22  ;;  %v5073_v44 = vmul.f32 %v7142_v41, %v5069_v14 }
 0x936   :  { %v5074_v16 = vadd.f32 %v5072_v38, %v8509_v12  ;;  %v5075_v62 = vadd.f32 %v5073_v44, %v8511_v49  ;;  %v10724_v49 = vld [vmem:[#allocation154_spill] sm:$0xff] }
 0x938   :  { %7143 = vtanh.f32 %v5074_v16 }
 0x939   :  { %7145 = vtanh.f32 %v5075_v62 }
 0x93c   :  { %v5166_v27 = vpop.f32.mrb[64].mxu0 }
 0x93d   :  { %v5167_v8 = vadd.f32 %v5166_v27, %v8643_v9  ;;  %v5168_v15 = vpop.f32.mrb[65].mxu0 }
 0x93e   :  { %v5169_v17 = vadd.f32 %v5168_v15, %v8650_v52  ;;  %v5170_v24 = vpop.f32.mrb[66].mxu0 }
 0x93f   :  { %v5171_v4 = vpop.f32.mrb[67].mxu0 }
 0x940   :  { %v5257_v50 = vcombine.low %v5167_v8, %v5169_v17 }
 0x942   :  { %v7144_v10 = vpop.eup %7143  ;;  %v5258_v0 = vrot.slane %v5257_v50, 1  ;;  %v5261_v40 = vadd.f32 %v5257_v50, %v8513_v42 }
 0x943   :  { %v7146_v51 = vpop.eup %7145  ;;  %v5080_v63 = vmul.f32 %v7144_v10, %v5078_v34 }
 0x944   :  { %v5081_v18 = vmul.f32 %v7146_v51, %v5079_v46  ;;  %v5262_v20 = vadd.f32 %v5258_v0, %v8515_v47  ;;  %v6178_v32 = vmul.f32 -1.442695, %v5261_v40 }
 0x945   :  { %v5088_v12 = vadd.f32 %v5086_v7, %v5080_v63 }
 0x946   :  { %v5089_v54 = vadd.f32 %v5087_v39, %v5081_v18  ;;  %v6179_v31 = vmul.f32 -1.442695, %v5262_v20  ;;  %7147 = vpow2.f32 %v6178_v32 }
 0x947   :  { %v5330_v55 = vrot.slane %v5088_v12, %v10724_v49  ;;  %v5326_v57 = vrot.slane %v5088_v12, %v10725_v19 }
 0x948   :  { %v5338_v9 = vrot.slane %v5089_v54, %v10724_v49  ;;  %v5334_v45 = vrot.slane %v5089_v54, %v10725_v19  ;;  %7149 = vpow2.f32 %v6179_v31 }
 0x949   :  { %v5344_v52 = vpack.c.bf16 %v5330_v55, %v5330_v55  ;;  %v5343_v21 = vpack.c.bf16 %v5326_v57, %v5326_v57 }
 0x94a   :  { %v5346_v26 = vpack.c.bf16 %v5338_v9, %v5338_v9  ;;  %v5345_v59 = vpack.c.bf16 %v5334_v45, %v5334_v45  ;;  %v6183_v9 = vrot.slane %v9658_v43, 9 }
 0x94b   :  { %v5595_v30 = vunpack.c.l.b16 %v5344_v52  ;;  %v5594_v48 = vunpack.c.l.b16 %v5343_v21 }
 0x94c   :  { %v5597_v58 = vunpack.c.l.b16 %v5346_v26  ;;  %v5596_v56 = vunpack.c.l.b16 %v5345_v59 }
 0x94d   :  { %v5601_v29 = vrot.slane %v5595_v30, 3  ;;  %v5598_v13 = vrot.slane %v5594_v48, 3 }
 0x94e   :  { %v5602_v7 = vrot.slane %v5597_v58, 2  ;;  %v5599_v39 = vrot.slane %v5596_v56, 2 }
 0x950   :  { %v5603_v33 = vsel %vm933_vm2, %v5602_v7, %v5601_v29  ;;  %v5600_v53 = vsel %vm933_vm2, %v5599_v39, %v5598_v13  ;;  %v7148_v38 = vpop.eup %7147  ;;  %v10726_v29 = vld [vmem:[#allocation149_spill] sm:$0xff]  ;;  %v10727_v13 = vld [vmem:[#allocation114_spill] sm:$0xff] }
 0x951   :  { %v5605_v11 = vpack.c.b16 %v5603_v33, %v5603_v33  ;;  %v5604_v37 = vpack.c.b16 %v5600_v53, %v5600_v53  ;;  %v5269_v27 = vadd.f32 1.0, %v7148_v38 }
 0x952   :  { %v7150_v16 = vpop.eup %7149 }
 0x953   :  { %5736 = vmatprep.mubr.bf16.mxu0 %v5605_v11  ;;  %v5270_v15 = vadd.f32 1.0, %v7150_v16 }
 0x954   :  { %5737 = vmatmul.mubr.bf16.vlgmr.msra.gmra.mrb[72].mxu0 %v5604_v37 }
 0x96c   :  { %v5207_v3 = vpop.f32.mrb[68].mxu1 }
 0x96d   :  { %v5208_v25 = vadd.f32 %v5207_v3, %v10638_v2  ;;  %v5209_v61 = vpop.f32.mrb[69].mxu1 }
 0x96e   :  { %v5210_v22 = vadd.f32 %v5209_v61, %v10639_v1  ;;  %v5211_v14 = vpop.f32.mrb[70].mxu1 }
 0x96f   :  { %v5212_v41 = vpop.f32.mrb[71].mxu1 }
 0x970   :  { %v5277_v44 = vcombine.low %v5208_v25, %v5210_v22 }
 0x972   :  { %v5278_v62 = vrot.slane %v5277_v44, 1  ;;  %v5281_v42 = vadd.f32 %v5277_v44, %v10645_v60 }
 0x974   :  { %v5282_v47 = vadd.f32 %v5278_v62, %v8564_v23  ;;  %v6180_v8 = vmul.f32 -1.442695, %v5281_v42 }
 0x976   :  { %7151 = vpow2.f32 %v6180_v8  ;;  %v6181_v17 = vmul.f32 -1.442695, %v5282_v47 }
 0x977   :  { %7153 = vrcp.f32 %v5269_v27 }
 0x978   :  { %7155 = vpow2.f32 %v6181_v17 }
 0x979   :  { %7157 = vrcp.f32 %v5270_v15  ;;  %v6216_v15 = vld [vmem:[%s9795_s11] ss:$0 sm:$0xff] }
 0x97c   :  { %v5248_v2 = vpop.f32.mrb[68].mxu0 }
 0x97d   :  { %v5249_v1 = vadd.f32 %v5248_v2, %v10649_v36  ;;  %v5250_v24 = vpop.f32.mrb[69].mxu0 }
 0x97e   :  { %v5251_v4 = vadd.f32 %v5250_v24, %v10652_v28  ;;  %v5252_v50 = vpop.f32.mrb[70].mxu0  ;;  %v6182_v28 = vrot.slane %v9662_v35, 9 }
 0x97f   :  { %v5253_v34 = vpop.f32.mrb[71].mxu0 }
 0x980   :  { %v7152_v10 = vpop.eup %7151  ;;  %v5297_v60 = vcombine.low %v5249_v1, %v5251_v4 }
 0x981   :  { %v7154_v46 = vpop.eup %7153  ;;  %v5289_v51 = vadd.f32 1.0, %v7152_v10 }
 0x982   :  { %v7156_v23 = vpop.eup %7155  ;;  %v5298_v63 = vrot.slane %v5297_v60, 1  ;;  %v5301_v18 = vmul.f32 %v7154_v46, %v5297_v60 }
 0x983   :  { %v7158_v12 = vpop.eup %7157  ;;  %v5290_v54 = vadd.f32 1.0, %v7156_v23  ;;  %7159 = vrcp.f32 %v5289_v51 }
 0x984   :  { %v5302_v49 = vmul.f32 %v7158_v12, %v5298_v63  ;;  %v5303_v55 = vadd.f32 %v5301_v18, %v10662_v5 }
 0x985   :  { %7161 = vrcp.f32 %v5290_v54 }
 0x986   :  { %v5304_v36 = vadd.f32 %v5302_v49, %v10658_v6  ;;  %7163 = vtanh.f32 %v5303_v55 }
 0x988   :  { %7165 = vtanh.f32 %v5304_v36 }
 0x98d   :  { %v7160_v19 = vpop.eup %7159 }
 0x98e   :  { %v5307_v57 = vsub.f32 1.0, %v7160_v19  ;;  %v5317_v45 = vmul.f32 %v7160_v19, %v6182_v28 }
 0x98f   :  { %v7162_v52 = vpop.eup %7161 }
 0x990   :  { %v7164_v21 = vpop.eup %7163  ;;  %v5308_v26 = vsub.f32 1.0, %v7162_v52  ;;  %v5318_v59 = vmul.f32 %v7162_v52, %v6183_v9 }
 0x991   :  { %v5309_v30 = vmul.f32 %v7164_v21, %v5307_v57 }
 0x992   :  { %v7166_v48 = vpop.eup %7165 }
 0x993   :  { %v5310_v58 = vmul.f32 %v7166_v48, %v5308_v26  ;;  %v5319_v5 = vadd.f32 %v5317_v45, %v5309_v30 }
 0x995   :  { %v5320_v56 = vadd.f32 %v5318_v59, %v5310_v58  ;;  %v5388_v6 = vrot.slane %v5319_v5, %v10726_v29  ;;  %v5384_v7 = vrot.slane %v5319_v5, %v10727_v13 }
 0x997   :  { %v5396_v35 = vrot.slane %v5320_v56, %v10726_v29  ;;  %v5392_v39 = vrot.slane %v5320_v56, %v10727_v13  ;;  %v5402_v33 = vpack.c.bf16 %v5388_v6, %v5388_v6  ;;  %v5401_v53 = vpack.c.bf16 %v5384_v7, %v5384_v7 }
 0x999   :  { %v5404_v43 = vpack.c.bf16 %v5396_v35, %v5396_v35  ;;  %v5403_v11 = vpack.c.bf16 %v5392_v39, %v5392_v39  ;;  %v5443_v40 = vunpack.c.l.b16 %v5402_v33  ;;  %v5442_v32 = vunpack.c.l.b16 %v5401_v53 }
 0x99b   :  { %v5445_v37 = vunpack.c.l.b16 %v5404_v43  ;;  %v5444_v0 = vunpack.c.l.b16 %v5403_v11 }
 0x99d   :  { %v5448_v20 = vrot.slane %v5445_v37, 7  ;;  %v5446_v31 = vrot.slane %v5444_v0, 7 }
 0x99f   :  { %v5449_v3 = vsel %vm933_vm2, %v5448_v20, %v5443_v40  ;;  %v5447_v25 = vsel %vm933_vm2, %v5446_v31, %v5442_v32 }
 0x9a0   :  { %v5451_v61 = vpack.c.b16 %v5449_v3, %v5449_v3  ;;  %v5450_v22 = vpack.c.b16 %v5447_v25, %v5447_v25 }
 0x9a2   :  { %5582 = vmatprep.mubr.bf16.mxu1 %v5451_v61 }
 0x9a3   :  { %5583 = vmatmul.mubr.bf16.vlgmr.msra.gmra.mrb[72].mxu1 %v5450_v22 }
 0xa27   :  { %v6352_v14 = vpop.f32.mrb[72].mxu0 }
 0xa28   :  { %v6353_v41 = vpop.f32.mrb[73].mxu0 }
 0xa29   :  { %v6354_v38 = vadd.f32 %v6353_v41, %v6352_v14  ;;  %v6355_v44 = vpop.f32.mrb[74].mxu0 }
 0xa2a   :  { %v6356_v16 = vpop.f32.mrb[75].mxu0 }
 0xa76   :  { %v6330_v62 = vpop.f32.mrb[72].mxu1 }
 0xa77   :  { %v6331_v42 = vpop.f32.mrb[73].mxu1 }
 0xa78   :  { %v6332_v27 = vadd.f32 %v6331_v42, %v6330_v62  ;;  %v6333_v47 = vpop.f32.mrb[74].mxu1 }
 0xa79   :  { %v6334_v8 = vpop.f32.mrb[75].mxu1 }
 0xa7a   :  { %v5739_v17 = vadd.f32 %v6354_v38, %v6332_v27 }
 0xa7c   :  { %v5751_v2 = vadd.f32 %v6216_v15, %v5739_v17 }
 0xa7e   :  { %5752 = vst [vmem:[#allocation13] sm:$0x3] %v5751_v2 }
 0xa7f   :  { %7521 = shalt.err (!%p7518_p10)
}
 0xa80   :  { %s7522_s8 = scalar_lea.hbm %s9796_s12, 32 }
 0xa81   :  { %p7523_p11 = scmp.ne.s32.totalorder %s9796_s12, %s7522_s8  ;;  %p7526_p12 = scmp.lt.u32.totalorder %s7522_s8, %s9796_s12 }
 0xa83   :  { %p7528_p13 = pnand %p7526_p12, %p7523_p11 }
 0xa85   :  { %7531 = shalt.err (!%p7528_p13)
}
 0xa86   :  { %5762 = dma.vmem_to_hbm [thread:$0]  %s5760_s24, 32, %s9796_s12, [#allocation4]  }
 0xa87   :  { %7540 = dma.done.wait [#allocation4], 32  }
 0xa88   :  { %7541 = vsyncadd [#allocation4], 4294967264 }
 0xa89   :  { %5766 = vsyncpa [#allocation3], 1 }
 0xa8a   :  { %5767 = vsyncpa [#allocation6], 1 }
 0xa8b   :  { %5768 = vsyncpa [#allocation9], 1 }
 0xa8c   :  { %5769 = vsyncpa [#allocation12], 1 }
 0xa8d   :  { %5770 = vsyncpa [#allocation4], 1 }

</bundles_post_ra>
